<compile_context>
chip_gen: v7x
topology: tpu7x:2x2x1
jax: 0.10.0
libtpu: 0.0.40
codegen_flags: <defaults>
</compile_context>

<pallas_src>
import functools

import jax
import jax.numpy as jnp
from jax import lax
from jax.experimental import pallas as pl
from jax.experimental.pallas import tpu as pltpu

embedding_size = 128


# ----------------------------------------------------------------------------
# Kernel 1: fused conv3x3 + bias + ReLU + 2x2 max-pool   (one image per grid step)
# ----------------------------------------------------------------------------
def _conv_relu_pool_kernel(x_ref, w_ref, b_ref, o_ref, acc_ref, *, H, W, Cin, Cout):
    # x_ref : (1, H*W, Cin)   bf16  NHWC image, spatial flattened (row stride W)
    # w_ref : (9*Cin, Cout)   bf16  rows ordered (kh, kw, cin), cin fastest
    # b_ref : (1, Cout)       f32
    # o_ref : (1, Hp*Wp, Cout) bf16 pooled NHWC, spatial flattened (row stride Wp)
    # acc_ref: VMEM (M, Cout) f32 scratch, M = (Ho-1)*W + Wo
    Ho, Wo = H - 2, W - 2
    Hp, Wp = Ho // 2, Wo // 2
    M = (Ho - 1) * W + Wo

    # 3x3 conv as 9 shifted flat matmuls (tap (kh,kw) -> row offset kh*W + kw).
    # Columns w >= Wo of the flattened accumulator are wrap-around garbage; the
    # pool below only ever reads the valid (h < Ho, w < Wo) positions.
    acc = jnp.zeros((M, Cout), jnp.float32)
    for kh in range(3):
        for kw in range(3):
            t = kh * 3 + kw
            xs = x_ref[0, pl.ds(kh * W + kw, M), :]        # (M, Cin)   bf16
            ws = w_ref[pl.ds(t * Cin, Cin), :]             # (Cin, Cout) bf16
            acc = acc + jnp.dot(xs, ws, preferred_element_type=jnp.float32)

    acc = jnp.maximum(acc + b_ref[...], 0.0)               # bias + ReLU (f32)
    acc_ref[...] = acc

    # 2x2 max-pool (floor mode, like nn.MaxPool2d(2, 2)) via stride-2 reads of
    # the VMEM accumulator; output written compactly with row stride Wp.
    for p in range(Hp):
        r0 = (2 * p) * W
        r1 = (2 * p + 1) * W
        pooled = jnp.maximum(
            jnp.maximum(acc_ref[pl.ds(r0, Wp, stride=2), :],
                        acc_ref[pl.ds(r0 + 1, Wp, stride=2), :]),
            jnp.maximum(acc_ref[pl.ds(r1, Wp, stride=2), :],
                        acc_ref[pl.ds(r1 + 1, Wp, stride=2), :]),
        )
        o_ref[0, pl.ds(p * Wp, Wp), :] = pooled.astype(o_ref.dtype)


def conv3x3_relu_pool(x_flat, w, b, *, H, W):
    # x_flat: (N, H*W, Cin) bf16 ; w: (9*Cin, Cout) bf16 ; b: (1, Cout) f32
    N, S, Cin = x_flat.shape
    assert S == H * W
    Cout = w.shape[1]
    Ho, Wo = H - 2, W - 2
    Hp, Wp = Ho // 2, Wo // 2
    M = (Ho - 1) * W + Wo

    kernel = functools.partial(_conv_relu_pool_kernel, H=H, W=W, Cin=Cin, Cout=Cout)
    flops = 2 * N * M * 9 * Cin * Cout
    bytes_accessed = int(x_flat.size * 2 + w.size * 2 + b.size * 4
                         + N * Hp * Wp * Cout * 2)

    return pl.pallas_call(
        kernel,
        out_shape=jax.ShapeDtypeStruct((N, Hp * Wp, Cout), jnp.bfloat16),
        grid=(N,),
        in_specs=[
            pl.BlockSpec((1, S, Cin), lambda n: (n, 0, 0)),       # per-image activations
            pl.BlockSpec((9 * Cin, Cout), lambda n: (0, 0)),      # weights: VMEM-resident
            pl.BlockSpec((1, Cout), lambda n: (0, 0)),            # bias:    VMEM-resident
        ],
        out_specs=pl.BlockSpec((1, Hp * Wp, Cout), lambda n: (n, 0, 0)),
        scratch_shapes=[pltpu.VMEM((M, Cout), jnp.float32)],
        compiler_params=pltpu.CompilerParams(
            dimension_semantics=("parallel",),          # megacore on v7x; harmless on v5e/v6e
            vmem_limit_bytes=32 * 1024 * 1024,          # sized for v7x's 64 MiB VMEM
        ),
        cost_estimate=pl.CostEstimate(flops=flops, transcendentals=0,
                                      bytes_accessed=bytes_accessed),
    )(x_flat, w, b)


# ----------------------------------------------------------------------------
# Kernel 2: fused conv3x3 + bias + ReLU + GAP + FC + L2-normalize (head)
# ----------------------------------------------------------------------------
def _head_kernel(x_ref, w_ref, b_ref, wfc_ref, bfc_ref, o_ref, *, H, W, Cin, Cout):
    # x_ref: (1, H*W, Cin) bf16 ; w_ref: (9*Cin, Cout) bf16 ; b_ref: (1, Cout) f32
    # wfc_ref: (Cout, E) bf16 ; bfc_ref: (1, E) f32 ; o_ref: (1, 1, E) f32
    Ho, Wo = H - 2, W - 2
    M = (Ho - 1) * W + Wo

    acc = jnp.zeros((M, Cout), jnp.float32)
    for kh in range(3):
        for kw in range(3):
            t = kh * 3 + kw
            xs = x_ref[0, pl.ds(kh * W + kw, M), :]
            ws = w_ref[pl.ds(t * Cin, Cin), :]
            acc = acc + jnp.dot(xs, ws, preferred_element_type=jnp.float32)
    acc = jnp.maximum(acc + b_ref[...], 0.0)

    # Global average pool over the valid (Ho, Wo) window only.
    g = jnp.zeros((1, Cout), jnp.float32)
    for h in range(Ho):
        g = g + jnp.sum(acc[h * W:h * W + Wo, :], axis=0, keepdims=True)
    g = g * (1.0 / float(Ho * Wo))

    # FC + L2 normalize (F.normalize(p=2, dim=1)); rsqrt uses the EUP slot.
    y = jnp.dot(g.astype(wfc_ref.dtype), wfc_ref[...],
                preferred_element_type=jnp.float32) + bfc_ref[...]
    ss = jnp.sum(y * y, axis=1, keepdims=True)
    o_ref[0] = (y * lax.rsqrt(ss + 1e-24)).astype(o_ref.dtype)


def conv3x3_relu_gap_fc_norm(x_flat, w, b, wfc, bfc, *, H, W):
    N, S, Cin = x_flat.shape
    assert S == H * W
    Cout = w.shape[1]
    E = wfc.shape[1]
    Ho, Wo = H - 2, W - 2
    M = (Ho - 1) * W + Wo

    kernel = functools.partial(_head_kernel, H=H, W=W, Cin=Cin, Cout=Cout)
    flops = N * (2 * M * 9 * Cin * Cout + 2 * Cout * E)
    bytes_accessed = int(x_flat.size * 2 + w.size * 2 + wfc.size * 2
                         + (b.size + bfc.size) * 4 + N * E * 4)

    out = pl.pallas_call(
        kernel,
        out_shape=jax.ShapeDtypeStruct((N, 1, E), jnp.float32),
        grid=(N,),
        in_specs=[
            pl.BlockSpec((1, S, Cin), lambda n: (n, 0, 0)),
            pl.BlockSpec((9 * Cin, Cout), lambda n: (0, 0)),
            pl.BlockSpec((1, Cout), lambda n: (0, 0)),
            pl.BlockSpec((Cout, E), lambda n: (0, 0)),
            pl.BlockSpec((1, E), lambda n: (0, 0)),
        ],
        out_specs=pl.BlockSpec((1, 1, E), lambda n: (n, 0, 0)),
        compiler_params=pltpu.CompilerParams(
            dimension_semantics=("parallel",),
            vmem_limit_bytes=32 * 1024 * 1024,
        ),
        cost_estimate=pl.CostEstimate(flops=flops, transcendentals=N,
                                      bytes_accessed=bytes_accessed),
    )(x_flat, w, b, wfc, bfc)
    return out.reshape(N, E)


# ----------------------------------------------------------------------------
# Parameters (deterministic init).  Conv weights are stored flattened as
# (9*Cin, Cout) in (kh, kw, cin) row order, bf16; biases stay f32.
# conv1's Cout and conv2's Cin are zero-padded 64 -> 128 for lane-dense
# stores/operands; the padded channels are identically zero so the math is
# unchanged.
# ----------------------------------------------------------------------------
def init_params(key, embedding_size=128):
    ks = jax.random.split(key, 8)
    scale = 0.05

    def conv_w(k, cin, cout, cin_pad, cout_pad):
        w = jax.random.normal(k, (3, 3, cin, cout), jnp.float32) * scale
        wp = jnp.zeros((3, 3, cin_pad, cout_pad), jnp.float32)
        wp = wp.at[:, :, :cin, :cout].set(w)
        return wp.reshape(9 * cin_pad, cout_pad).astype(jnp.bfloat16)

    def conv_b(k, cout, cout_pad):
        b = jax.random.normal(k, (1, cout), jnp.float32) * scale
        return jnp.zeros((1, cout_pad), jnp.float32).at[:, :cout].set(b)

    return {
        "w1": conv_w(ks[0], 3, 64, 3, 128),      # Cout padded 64 -> 128 (zero cols)
        "b1": conv_b(ks[1], 64, 128),
        "w2": conv_w(ks[2], 64, 128, 128, 128),  # Cin padded 64 -> 128 (zero rows)
        "b2": conv_b(ks[3], 128, 128),
        "w3": conv_w(ks[4], 128, 256, 128, 256),
        "b3": conv_b(ks[5], 256, 256),
        "wfc": (jax.random.normal(ks[6], (256, embedding_size), jnp.float32)
                * scale).astype(jnp.bfloat16),
        "bfc": jax.random.normal(ks[7], (1, embedding_size), jnp.float32) * scale,
    }


# ----------------------------------------------------------------------------
# Forward pass: 3 pallas_calls total.  Only XLA glue is the NCHW -> flattened
# NHWC layout conversion of the tiny network input.
# ----------------------------------------------------------------------------
def embedding_net_forward(x_nchw, params):
    N, C, H, W = x_nchw.shape
    x = jnp.transpose(x_nchw, (0, 2, 3, 1)).reshape(N, H * W, C).astype(jnp.bfloat16)

    x = conv3x3_relu_pool(x, params["w1"], params["b1"], H=H, W=W)      # conv1+relu+pool
    H1, W1 = (H - 2) // 2, (W - 2) // 2
    x = conv3x3_relu_pool(x, params["w2"], params["b2"], H=H1, W=W1)    # conv2+relu+pool
    H2, W2 = (H1 - 2) // 2, (W1 - 2) // 2
    emb = conv3x3_relu_gap_fc_norm(x, params["w3"], params["b3"],       # conv3+relu+gap+fc+norm
                                   params["wfc"], params["bfc"], H=H2, W=W2)
    return emb                                                          # (N, embedding_size)


if __name__ == "__main__":
    key = jax.random.PRNGKey(0)
    k_x, k_p = jax.random.split(key)
    params = init_params(k_p, embedding_size=embedding_size)

    # 32x32 input -> 30 -> pool 15 -> 13 -> pool 6 -> 4 -> GAP
    x = jax.random.normal(k_x, (2, 3, 32, 32), jnp.float32)

    fwd = jax.jit(embedding_net_forward)
    emb = jax.block_until_ready(fwd(x, params))

    assert emb.shape == (2, embedding_size), emb.shape
    norms = jnp.linalg.norm(emb, axis=1)
    assert bool(jnp.all(jnp.isfinite(emb)))
    assert bool(jnp.allclose(norms, 1.0, atol=1e-3)), norms
    print("KERNEL_OK")
</pallas_src>

<mosaic_0001>
module attributes {stable_mosaic.version = 11 : i64} {
  func.func @_conv_relu_pool_kernel(%arg0: i32, %arg1: memref<1x225x128xbf16, #tpu.memory_space<vmem>>, %arg2: memref<1152x128xbf16, #tpu.memory_space<vmem>>, %arg3: memref<1x128xf32, #tpu.memory_space<vmem>>, %arg4: memref<1x36x128xbf16, #tpu.memory_space<vmem>>, %arg5: memref<193x128xf32, #tpu.memory_space<vmem>>) attributes {dimension_semantics = [#tpu.dimension_semantics<parallel>], iteration_bounds = array<i64: 2>, scalar_prefetch = 0 : i64, scratch_operands = 1 : i64, tpu.core_type = #tpu.core_type<tc>, window_params = [{transform_indices = @transform_0, window_bounds = array<i64: 1, 225, 128>}, {pipeline_mode = #tpu.pipeline_mode<synchronous>, transform_indices = @transform_1, window_bounds = array<i64: 1152, 128>}, {pipeline_mode = #tpu.pipeline_mode<synchronous>, transform_indices = @transform_2, window_bounds = array<i64: 1, 128>}, {transform_indices = @transform_3, window_bounds = array<i64: 1, 36, 128>}]} {
    %cst = arith.constant 0.000000e+00 : f32
    %0 = vector.broadcast %cst : f32 to vector<193x128xf32>
    %c0 = arith.constant 0 : index
    %c0_0 = arith.constant 0 : index
    %c0_1 = arith.constant 0 : index
    %1 = vector.load %arg1[%c0, %c0_0, %c0_1] : memref<1x225x128xbf16, #tpu.memory_space<vmem>>, vector<1x193x128xbf16>
    %2 = vector.shape_cast %1 : vector<1x193x128xbf16> to vector<193x128xbf16>
    %c0_2 = arith.constant 0 : index
    %c0_3 = arith.constant 0 : index
    %3 = vector.load %arg2[%c0_2, %c0_3] : memref<1152x128xbf16, #tpu.memory_space<vmem>>, vector<128x128xbf16>
    %cst_4 = arith.constant dense<0.000000e+00> : vector<193x128xf32>
    %4 = tpu.matmul %2, %3, %cst_4 {dimension_numbers = #tpu.dot_dimension_numbers<[1], [0], [0], [1], [0, 0, 1, 1], [], []>} : vector<193x128xbf16>, vector<128x128xbf16>, vector<193x128xf32> -> vector<193x128xf32>
    %5 = arith.addf %0, %4 : vector<193x128xf32>
    %c0_5 = arith.constant 0 : index
    %c1 = arith.constant 1 : index
    %c0_6 = arith.constant 0 : index
    %6 = vector.load %arg1[%c0_5, %c1, %c0_6] : memref<1x225x128xbf16, #tpu.memory_space<vmem>>, vector<1x193x128xbf16>
    %7 = vector.shape_cast %6 : vector<1x193x128xbf16> to vector<193x128xbf16>
    %c128 = arith.constant 128 : index
    %c0_7 = arith.constant 0 : index
    %8 = vector.load %arg2[%c128, %c0_7] : memref<1152x128xbf16, #tpu.memory_space<vmem>>, vector<128x128xbf16>
    %cst_8 = arith.constant dense<0.000000e+00> : vector<193x128xf32>
    %9 = tpu.matmul %7, %8, %cst_8 {dimension_numbers = #tpu.dot_dimension_numbers<[1], [0], [0], [1], [0, 0, 1, 1], [], []>} : vector<193x128xbf16>, vector<128x128xbf16>, vector<193x128xf32> -> vector<193x128xf32>
    %10 = arith.addf %5, %9 : vector<193x128xf32>
    %c0_9 = arith.constant 0 : index
    %c2 = arith.constant 2 : index
    %c0_10 = arith.constant 0 : index
    %11 = vector.load %arg1[%c0_9, %c2, %c0_10] : memref<1x225x128xbf16, #tpu.memory_space<vmem>>, vector<1x193x128xbf16>
    %12 = vector.shape_cast %11 : vector<1x193x128xbf16> to vector<193x128xbf16>
    %c256 = arith.constant 256 : index
    %c0_11 = arith.constant 0 : index
    %13 = vector.load %arg2[%c256, %c0_11] : memref<1152x128xbf16, #tpu.memory_space<vmem>>, vector<128x128xbf16>
    %cst_12 = arith.constant dense<0.000000e+00> : vector<193x128xf32>
    %14 = tpu.matmul %12, %13, %cst_12 {dimension_numbers = #tpu.dot_dimension_numbers<[1], [0], [0], [1], [0, 0, 1, 1], [], []>} : vector<193x128xbf16>, vector<128x128xbf16>, vector<193x128xf32> -> vector<193x128xf32>
    %15 = arith.addf %10, %14 : vector<193x128xf32>
    %c0_13 = arith.constant 0 : index
    %c15 = arith.constant 15 : index
    %c0_14 = arith.constant 0 : index
    %16 = vector.load %arg1[%c0_13, %c15, %c0_14] : memref<1x225x128xbf16, #tpu.memory_space<vmem>>, vector<1x193x128xbf16>
    %17 = vector.shape_cast %16 : vector<1x193x128xbf16> to vector<193x128xbf16>
    %c384 = arith.constant 384 : index
    %c0_15 = arith.constant 0 : index
    %18 = vector.load %arg2[%c384, %c0_15] : memref<1152x128xbf16, #tpu.memory_space<vmem>>, vector<128x128xbf16>
    %cst_16 = arith.constant dense<0.000000e+00> : vector<193x128xf32>
    %19 = tpu.matmul %17, %18, %cst_16 {dimension_numbers = #tpu.dot_dimension_numbers<[1], [0], [0], [1], [0, 0, 1, 1], [], []>} : vector<193x128xbf16>, vector<128x128xbf16>, vector<193x128xf32> -> vector<193x128xf32>
    %20 = arith.addf %15, %19 : vector<193x128xf32>
    %c0_17 = arith.constant 0 : index
    %c16 = arith.constant 16 : index
    %c0_18 = arith.constant 0 : index
    %21 = vector.load %arg1[%c0_17, %c16, %c0_18] : memref<1x225x128xbf16, #tpu.memory_space<vmem>>, vector<1x193x128xbf16>
    %22 = vector.shape_cast %21 : vector<1x193x128xbf16> to vector<193x128xbf16>
    %c512 = arith.constant 512 : index
    %c0_19 = arith.constant 0 : index
    %23 = vector.load %arg2[%c512, %c0_19] : memref<1152x128xbf16, #tpu.memory_space<vmem>>, vector<128x128xbf16>
    %cst_20 = arith.constant dense<0.000000e+00> : vector<193x128xf32>
    %24 = tpu.matmul %22, %23, %cst_20 {dimension_numbers = #tpu.dot_dimension_numbers<[1], [0], [0], [1], [0, 0, 1, 1], [], []>} : vector<193x128xbf16>, vector<128x128xbf16>, vector<193x128xf32> -> vector<193x128xf32>
    %25 = arith.addf %20, %24 : vector<193x128xf32>
    %c0_21 = arith.constant 0 : index
    %c17 = arith.constant 17 : index
    %c0_22 = arith.constant 0 : index
    %26 = vector.load %arg1[%c0_21, %c17, %c0_22] : memref<1x225x128xbf16, #tpu.memory_space<vmem>>, vector<1x193x128xbf16>
    %27 = vector.shape_cast %26 : vector<1x193x128xbf16> to vector<193x128xbf16>
    %c640 = arith.constant 640 : index
    %c0_23 = arith.constant 0 : index
    %28 = vector.load %arg2[%c640, %c0_23] : memref<1152x128xbf16, #tpu.memory_space<vmem>>, vector<128x128xbf16>
    %cst_24 = arith.constant dense<0.000000e+00> : vector<193x128xf32>
    %29 = tpu.matmul %27, %28, %cst_24 {dimension_numbers = #tpu.dot_dimension_numbers<[1], [0], [0], [1], [0, 0, 1, 1], [], []>} : vector<193x128xbf16>, vector<128x128xbf16>, vector<193x128xf32> -> vector<193x128xf32>
    %30 = arith.addf %25, %29 : vector<193x128xf32>
    %c0_25 = arith.constant 0 : index
    %c30 = arith.constant 30 : index
    %c0_26 = arith.constant 0 : index
    %31 = vector.load %arg1[%c0_25, %c30, %c0_26] : memref<1x225x128xbf16, #tpu.memory_space<vmem>>, vector<1x193x128xbf16>
    %32 = vector.shape_cast %31 : vector<1x193x128xbf16> to vector<193x128xbf16>
    %c768 = arith.constant 768 : index
    %c0_27 = arith.constant 0 : index
    %33 = vector.load %arg2[%c768, %c0_27] : memref<1152x128xbf16, #tpu.memory_space<vmem>>, vector<128x128xbf16>
    %cst_28 = arith.constant dense<0.000000e+00> : vector<193x128xf32>
    %34 = tpu.matmul %32, %33, %cst_28 {dimension_numbers = #tpu.dot_dimension_numbers<[1], [0], [0], [1], [0, 0, 1, 1], [], []>} : vector<193x128xbf16>, vector<128x128xbf16>, vector<193x128xf32> -> vector<193x128xf32>
    %35 = arith.addf %30, %34 : vector<193x128xf32>
    %c0_29 = arith.constant 0 : index
    %c31 = arith.constant 31 : index
    %c0_30 = arith.constant 0 : index
    %36 = vector.load %arg1[%c0_29, %c31, %c0_30] : memref<1x225x128xbf16, #tpu.memory_space<vmem>>, vector<1x193x128xbf16>
    %37 = vector.shape_cast %36 : vector<1x193x128xbf16> to vector<193x128xbf16>
    %c896 = arith.constant 896 : index
    %c0_31 = arith.constant 0 : index
    %38 = vector.load %arg2[%c896, %c0_31] : memref<1152x128xbf16, #tpu.memory_space<vmem>>, vector<128x128xbf16>
    %cst_32 = arith.constant dense<0.000000e+00> : vector<193x128xf32>
    %39 = tpu.matmul %37, %38, %cst_32 {dimension_numbers = #tpu.dot_dimension_numbers<[1], [0], [0], [1], [0, 0, 1, 1], [], []>} : vector<193x128xbf16>, vector<128x128xbf16>, vector<193x128xf32> -> vector<193x128xf32>
    %40 = arith.addf %35, %39 : vector<193x128xf32>
    %c0_33 = arith.constant 0 : index
    %c32 = arith.constant 32 : index
    %c0_34 = arith.constant 0 : index
    %41 = vector.load %arg1[%c0_33, %c32, %c0_34] : memref<1x225x128xbf16, #tpu.memory_space<vmem>>, vector<1x193x128xbf16>
    %42 = vector.shape_cast %41 : vector<1x193x128xbf16> to vector<193x128xbf16>
    %c1024 = arith.constant 1024 : index
    %c0_35 = arith.constant 0 : index
    %43 = vector.load %arg2[%c1024, %c0_35] : memref<1152x128xbf16, #tpu.memory_space<vmem>>, vector<128x128xbf16>
    %cst_36 = arith.constant dense<0.000000e+00> : vector<193x128xf32>
    %44 = tpu.matmul %42, %43, %cst_36 {dimension_numbers = #tpu.dot_dimension_numbers<[1], [0], [0], [1], [0, 0, 1, 1], [], []>} : vector<193x128xbf16>, vector<128x128xbf16>, vector<193x128xf32> -> vector<193x128xf32>
    %45 = arith.addf %40, %44 : vector<193x128xf32>
    %c0_37 = arith.constant 0 : index
    %c0_38 = arith.constant 0 : index
    %46 = vector.load %arg3[%c0_37, %c0_38] : memref<1x128xf32, #tpu.memory_space<vmem>>, vector<1x128xf32>
    %47 = vector.broadcast %46 : vector<1x128xf32> to vector<193x128xf32>
    %48 = arith.addf %45, %47 : vector<193x128xf32>
    %cst_39 = arith.constant 0.000000e+00 : f32
    %49 = vector.broadcast %cst_39 : f32 to vector<193x128xf32>
    %50 = arith.maximumf %48, %49 : vector<193x128xf32>
    %c0_40 = arith.constant 0 : index
    %c0_41 = arith.constant 0 : index
    %51 = vector.load %arg5[%c0_40, %c0_41] : memref<193x128xf32, #tpu.memory_space<vmem>>, vector<193x128xf32>
    tpu.vector_store %arg5[%c0_40, %c0_41], %50 {strides = array<i32>} : memref<193x128xf32, #tpu.memory_space<vmem>>, vector<193x128xf32>,
    %c0_42 = arith.constant 0 : index
    %c0_43 = arith.constant 0 : index
    %52 = tpu.strided_load %arg5[%c0_42, %c0_43] {strides = array<i32: 2, 1>} : memref<193x128xf32, #tpu.memory_space<vmem>>, vector<6x128xf32>
    %c1_44 = arith.constant 1 : index
    %c0_45 = arith.constant 0 : index
    %53 = tpu.strided_load %arg5[%c1_44, %c0_45] {strides = array<i32: 2, 1>} : memref<193x128xf32, #tpu.memory_space<vmem>>, vector<6x128xf32>
    %54 = arith.maximumf %52, %53 : vector<6x128xf32>
    %c15_46 = arith.constant 15 : index
    %c0_47 = arith.constant 0 : index
    %55 = tpu.strided_load %arg5[%c15_46, %c0_47] {strides = array<i32: 2, 1>} : memref<193x128xf32, #tpu.memory_space<vmem>>, vector<6x128xf32>
    %c16_48 = arith.constant 16 : index
    %c0_49 = arith.constant 0 : index
    %56 = tpu.strided_load %arg5[%c16_48, %c0_49] {strides = array<i32: 2, 1>} : memref<193x128xf32, #tpu.memory_space<vmem>>, vector<6x128xf32>
    %57 = arith.maximumf %55, %56 : vector<6x128xf32>
    %58 = arith.maximumf %54, %57 : vector<6x128xf32>
    %59 = arith.truncf %58 : vector<6x128xf32> to vector<6x128xbf16>
    %c0_50 = arith.constant 0 : index
    %c0_51 = arith.constant 0 : index
    %c0_52 = arith.constant 0 : index
    %60 = vector.load %arg4[%c0_50, %c0_51, %c0_52] : memref<1x36x128xbf16, #tpu.memory_space<vmem>>, vector<1x6x128xbf16>
    %61 = vector.shape_cast %60 : vector<1x6x128xbf16> to vector<6x128xbf16>
    %62 = vector.shape_cast %59 : vector<6x128xbf16> to vector<1x6x128xbf16>
    tpu.vector_store %arg4[%c0_50, %c0_51, %c0_52], %62 {strides = array<i32>} : memref<1x36x128xbf16, #tpu.memory_space<vmem>>, vector<1x6x128xbf16>,
    %c30_53 = arith.constant 30 : index
    %c0_54 = arith.constant 0 : index
    %63 = tpu.strided_load %arg5[%c30_53, %c0_54] {strides = array<i32: 2, 1>} : memref<193x128xf32, #tpu.memory_space<vmem>>, vector<6x128xf32>
    %c31_55 = arith.constant 31 : index
    %c0_56 = arith.constant 0 : index
    %64 = tpu.strided_load %arg5[%c31_55, %c0_56] {strides = array<i32: 2, 1>} : memref<193x128xf32, #tpu.memory_space<vmem>>, vector<6x128xf32>
    %65 = arith.maximumf %63, %64 : vector<6x128xf32>
    %c45 = arith.constant 45 : index
    %c0_57 = arith.constant 0 : index
    %66 = tpu.strided_load %arg5[%c45, %c0_57] {strides = array<i32: 2, 1>} : memref<193x128xf32, #tpu.memory_space<vmem>>, vector<6x128xf32>
    %c46 = arith.constant 46 : index
    %c0_58 = arith.constant 0 : index
    %67 = tpu.strided_load %arg5[%c46, %c0_58] {strides = array<i32: 2, 1>} : memref<193x128xf32, #tpu.memory_space<vmem>>, vector<6x128xf32>
    %68 = arith.maximumf %66, %67 : vector<6x128xf32>
    %69 = arith.maximumf %65, %68 : vector<6x128xf32>
    %70 = arith.truncf %69 : vector<6x128xf32> to vector<6x128xbf16>
    %c0_59 = arith.constant 0 : index
    %c6 = arith.constant 6 : index
    %c0_60 = arith.constant 0 : index
    %71 = vector.load %arg4[%c0_59, %c6, %c0_60] : memref<1x36x128xbf16, #tpu.memory_space<vmem>>, vector<1x6x128xbf16>
    %72 = vector.shape_cast %71 : vector<1x6x128xbf16> to vector<6x128xbf16>
    %73 = vector.shape_cast %70 : vector<6x128xbf16> to vector<1x6x128xbf16>
    tpu.vector_store %arg4[%c0_59, %c6, %c0_60], %73 {strides = array<i32>} : memref<1x36x128xbf16, #tpu.memory_space<vmem>>, vector<1x6x128xbf16>,
    %c60 = arith.constant 60 : index
    %c0_61 = arith.constant 0 : index
    %74 = tpu.strided_load %arg5[%c60, %c0_61] {strides = array<i32: 2, 1>} : memref<193x128xf32, #tpu.memory_space<vmem>>, vector<6x128xf32>
    %c61 = arith.constant 61 : index
    %c0_62 = arith.constant 0 : index
    %75 = tpu.strided_load %arg5[%c61, %c0_62] {strides = array<i32: 2, 1>} : memref<193x128xf32, #tpu.memory_space<vmem>>, vector<6x128xf32>
    %76 = arith.maximumf %74, %75 : vector<6x128xf32>
    %c75 = arith.constant 75 : index
    %c0_63 = arith.constant 0 : index
    %77 = tpu.strided_load %arg5[%c75, %c0_63] {strides = array<i32: 2, 1>} : memref<193x128xf32, #tpu.memory_space<vmem>>, vector<6x128xf32>
    %c76 = arith.constant 76 : index
    %c0_64 = arith.constant 0 : index
    %78 = tpu.strided_load %arg5[%c76, %c0_64] {strides = array<i32: 2, 1>} : memref<193x128xf32, #tpu.memory_space<vmem>>, vector<6x128xf32>
    %79 = arith.maximumf %77, %78 : vector<6x128xf32>
    %80 = arith.maximumf %76, %79 : vector<6x128xf32>
    %81 = arith.truncf %80 : vector<6x128xf32> to vector<6x128xbf16>
    %c0_65 = arith.constant 0 : index
    %c12 = arith.constant 12 : index
    %c0_66 = arith.constant 0 : index
    %82 = vector.load %arg4[%c0_65, %c12, %c0_66] : memref<1x36x128xbf16, #tpu.memory_space<vmem>>, vector<1x6x128xbf16>
    %83 = vector.shape_cast %82 : vector<1x6x128xbf16> to vector<6x128xbf16>
    %84 = vector.shape_cast %81 : vector<6x128xbf16> to vector<1x6x128xbf16>
    tpu.vector_store %arg4[%c0_65, %c12, %c0_66], %84 {strides = array<i32>} : memref<1x36x128xbf16, #tpu.memory_space<vmem>>, vector<1x6x128xbf16>,
    %c90 = arith.constant 90 : index
    %c0_67 = arith.constant 0 : index
    %85 = tpu.strided_load %arg5[%c90, %c0_67] {strides = array<i32: 2, 1>} : memref<193x128xf32, #tpu.memory_space<vmem>>, vector<6x128xf32>
    %c91 = arith.constant 91 : index
    %c0_68 = arith.constant 0 : index
    %86 = tpu.strided_load %arg5[%c91, %c0_68] {strides = array<i32: 2, 1>} : memref<193x128xf32, #tpu.memory_space<vmem>>, vector<6x128xf32>
    %87 = arith.maximumf %85, %86 : vector<6x128xf32>
    %c105 = arith.constant 105 : index
    %c0_69 = arith.constant 0 : index
    %88 = tpu.strided_load %arg5[%c105, %c0_69] {strides = array<i32: 2, 1>} : memref<193x128xf32, #tpu.memory_space<vmem>>, vector<6x128xf32>
    %c106 = arith.constant 106 : index
    %c0_70 = arith.constant 0 : index
    %89 = tpu.strided_load %arg5[%c106, %c0_70] {strides = array<i32: 2, 1>} : memref<193x128xf32, #tpu.memory_space<vmem>>, vector<6x128xf32>
    %90 = arith.maximumf %88, %89 : vector<6x128xf32>
    %91 = arith.maximumf %87, %90 : vector<6x128xf32>
    %92 = arith.truncf %91 : vector<6x128xf32> to vector<6x128xbf16>
    %c0_71 = arith.constant 0 : index
    %c18 = arith.constant 18 : index
    %c0_72 = arith.constant 0 : index
    %93 = vector.load %arg4[%c0_71, %c18, %c0_72] : memref<1x36x128xbf16, #tpu.memory_space<vmem>>, vector<1x6x128xbf16>
    %94 = vector.shape_cast %93 : vector<1x6x128xbf16> to vector<6x128xbf16>
    %95 = vector.shape_cast %92 : vector<6x128xbf16> to vector<1x6x128xbf16>
    tpu.vector_store %arg4[%c0_71, %c18, %c0_72], %95 {strides = array<i32>} : memref<1x36x128xbf16, #tpu.memory_space<vmem>>, vector<1x6x128xbf16>,
    %c120 = arith.constant 120 : index
    %c0_73 = arith.constant 0 : index
    %96 = tpu.strided_load %arg5[%c120, %c0_73] {strides = array<i32: 2, 1>} : memref<193x128xf32, #tpu.memory_space<vmem>>, vector<6x128xf32>
    %c121 = arith.constant 121 : index
    %c0_74 = arith.constant 0 : index
    %97 = tpu.strided_load %arg5[%c121, %c0_74] {strides = array<i32: 2, 1>} : memref<193x128xf32, #tpu.memory_space<vmem>>, vector<6x128xf32>
    %98 = arith.maximumf %96, %97 : vector<6x128xf32>
    %c135 = arith.constant 135 : index
    %c0_75 = arith.constant 0 : index
    %99 = tpu.strided_load %arg5[%c135, %c0_75] {strides = array<i32: 2, 1>} : memref<193x128xf32, #tpu.memory_space<vmem>>, vector<6x128xf32>
    %c136 = arith.constant 136 : index
    %c0_76 = arith.constant 0 : index
    %100 = tpu.strided_load %arg5[%c136, %c0_76] {strides = array<i32: 2, 1>} : memref<193x128xf32, #tpu.memory_space<vmem>>, vector<6x128xf32>
    %101 = arith.maximumf %99, %100 : vector<6x128xf32>
    %102 = arith.maximumf %98, %101 : vector<6x128xf32>
    %103 = arith.truncf %102 : vector<6x128xf32> to vector<6x128xbf16>
    %c0_77 = arith.constant 0 : index
    %c24 = arith.constant 24 : index
    %c0_78 = arith.constant 0 : index
    %104 = vector.load %arg4[%c0_77, %c24, %c0_78] : memref<1x36x128xbf16, #tpu.memory_space<vmem>>, vector<1x6x128xbf16>
    %105 = vector.shape_cast %104 : vector<1x6x128xbf16> to vector<6x128xbf16>
    %106 = vector.shape_cast %103 : vector<6x128xbf16> to vector<1x6x128xbf16>
    tpu.vector_store %arg4[%c0_77, %c24, %c0_78], %106 {strides = array<i32>} : memref<1x36x128xbf16, #tpu.memory_space<vmem>>, vector<1x6x128xbf16>,
    %c150 = arith.constant 150 : index
    %c0_79 = arith.constant 0 : index
    %107 = tpu.strided_load %arg5[%c150, %c0_79] {strides = array<i32: 2, 1>} : memref<193x128xf32, #tpu.memory_space<vmem>>, vector<6x128xf32>
    %c151 = arith.constant 151 : index
    %c0_80 = arith.constant 0 : index
    %108 = tpu.strided_load %arg5[%c151, %c0_80] {strides = array<i32: 2, 1>} : memref<193x128xf32, #tpu.memory_space<vmem>>, vector<6x128xf32>
    %109 = arith.maximumf %107, %108 : vector<6x128xf32>
    %c165 = arith.constant 165 : index
    %c0_81 = arith.constant 0 : index
    %110 = tpu.strided_load %arg5[%c165, %c0_81] {strides = array<i32: 2, 1>} : memref<193x128xf32, #tpu.memory_space<vmem>>, vector<6x128xf32>
    %c166 = arith.constant 166 : index
    %c0_82 = arith.constant 0 : index
    %111 = tpu.strided_load %arg5[%c166, %c0_82] {strides = array<i32: 2, 1>} : memref<193x128xf32, #tpu.memory_space<vmem>>, vector<6x128xf32>
    %112 = arith.maximumf %110, %111 : vector<6x128xf32>
    %113 = arith.maximumf %109, %112 : vector<6x128xf32>
    %114 = arith.truncf %113 : vector<6x128xf32> to vector<6x128xbf16>
    %c0_83 = arith.constant 0 : index
    %c30_84 = arith.constant 30 : index
    %c0_85 = arith.constant 0 : index
    %115 = vector.load %arg4[%c0_83, %c30_84, %c0_85] : memref<1x36x128xbf16, #tpu.memory_space<vmem>>, vector<1x6x128xbf16>
    %116 = vector.shape_cast %115 : vector<1x6x128xbf16> to vector<6x128xbf16>
    %117 = vector.shape_cast %114 : vector<6x128xbf16> to vector<1x6x128xbf16>
    tpu.vector_store %arg4[%c0_83, %c30_84, %c0_85], %117 {strides = array<i32>} : memref<1x36x128xbf16, #tpu.memory_space<vmem>>, vector<1x6x128xbf16>,
    return
  }
  func.func @transform_0(%arg0: i32) -> (i32, i32, i32) {
    %c0_i32 = arith.constant 0 : i32
    %c0_i32_0 = arith.constant 0 : i32
    %c0_i32_1 = arith.constant 0 : i32
    return %arg0, %c0_i32, %c0_i32_0 : i32, i32, i32
  }
  func.func @transform_1(%arg0: i32) -> (i32, i32) {
    %c0_i32 = arith.constant 0 : i32
    %c0_i32_0 = arith.constant 0 : i32
    %c0_i32_1 = arith.constant 0 : i32
    return %c0_i32, %c0_i32_0 : i32, i32
  }
  func.func @transform_2(%arg0: i32) -> (i32, i32) {
    %c0_i32 = arith.constant 0 : i32
    %c0_i32_0 = arith.constant 0 : i32
    %c0_i32_1 = arith.constant 0 : i32
    return %c0_i32, %c0_i32_0 : i32, i32
  }
  func.func @transform_3(%arg0: i32) -> (i32, i32, i32) {
    %c0_i32 = arith.constant 0 : i32
    %c0_i32_0 = arith.constant 0 : i32
    %c0_i32_1 = arith.constant 0 : i32
    return %arg0, %c0_i32, %c0_i32_0 : i32, i32, i32
  }
}

module attributes {stable_mosaic.version = 11 : i64} {
  func.func @_conv_relu_pool_kernel(%arg0: i32, %arg1: memref<1x1024x3xbf16, #tpu.memory_space<vmem>>, %arg2: memref<27x128xbf16, #tpu.memory_space<vmem>>, %arg3: memref<1x128xf32, #tpu.memory_space<vmem>>, %arg4: memref<1x225x128xbf16, #tpu.memory_space<vmem>>, %arg5: memref<958x128xf32, #tpu.memory_space<vmem>>) attributes {dimension_semantics = [#tpu.dimension_semantics<parallel>], iteration_bounds = array<i64: 2>, scalar_prefetch = 0 : i64, scratch_operands = 1 : i64, tpu.core_type = #tpu.core_type<tc>, window_params = [{transform_indices = @transform_0, window_bounds = array<i64: 1, 1024, 3>}, {pipeline_mode = #tpu.pipeline_mode<synchronous>, transform_indices = @transform_1, window_bounds = array<i64: 27, 128>}, {pipeline_mode = #tpu.pipeline_mode<synchronous>, transform_indices = @transform_2, window_bounds = array<i64: 1, 128>}, {transform_indices = @transform_3, window_bounds = array<i64: 1, 225, 128>}]} {
    %cst = arith.constant 0.000000e+00 : f32
    %0 = vector.broadcast %cst : f32 to vector<958x128xf32>
    %c0 = arith.constant 0 : index
    %c0_0 = arith.constant 0 : index
    %c0_1 = arith.constant 0 : index
    %1 = vector.load %arg1[%c0, %c0_0, %c0_1] : memref<1x1024x3xbf16, #tpu.memory_space<vmem>>, vector<1x958x3xbf16>
    %2 = vector.shape_cast %1 : vector<1x958x3xbf16> to vector<958x3xbf16>
    %c0_2 = arith.constant 0 : index
    %c0_3 = arith.constant 0 : index
    %3 = vector.load %arg2[%c0_2, %c0_3] : memref<27x128xbf16, #tpu.memory_space<vmem>>, vector<3x128xbf16>
    %cst_4 = arith.constant dense<0.000000e+00> : vector<958x128xf32>
    %4 = tpu.matmul %2, %3, %cst_4 {dimension_numbers = #tpu.dot_dimension_numbers<[1], [0], [0], [1], [0, 0, 1, 1], [], []>} : vector<958x3xbf16>, vector<3x128xbf16>, vector<958x128xf32> -> vector<958x128xf32>
    %5 = arith.addf %0, %4 : vector<958x128xf32>
    %c0_5 = arith.constant 0 : index
    %c1 = arith.constant 1 : index
    %c0_6 = arith.constant 0 : index
    %6 = vector.load %arg1[%c0_5, %c1, %c0_6] : memref<1x1024x3xbf16, #tpu.memory_space<vmem>>, vector<1x958x3xbf16>
    %7 = vector.shape_cast %6 : vector<1x958x3xbf16> to vector<958x3xbf16>
    %c3 = arith.constant 3 : index
    %c0_7 = arith.constant 0 : index
    %8 = vector.load %arg2[%c3, %c0_7] : memref<27x128xbf16, #tpu.memory_space<vmem>>, vector<3x128xbf16>
    %cst_8 = arith.constant dense<0.000000e+00> : vector<958x128xf32>
    %9 = tpu.matmul %7, %8, %cst_8 {dimension_numbers = #tpu.dot_dimension_numbers<[1], [0], [0], [1], [0, 0, 1, 1], [], []>} : vector<958x3xbf16>, vector<3x128xbf16>, vector<958x128xf32> -> vector<958x128xf32>
    %10 = arith.addf %5, %9 : vector<958x128xf32>
    %c0_9 = arith.constant 0 : index
    %c2 = arith.constant 2 : index
    %c0_10 = arith.constant 0 : index
    %11 = vector.load %arg1[%c0_9, %c2, %c0_10] : memref<1x1024x3xbf16, #tpu.memory_space<vmem>>, vector<1x958x3xbf16>
    %12 = vector.shape_cast %11 : vector<1x958x3xbf16> to vector<958x3xbf16>
    %c6 = arith.constant 6 : index
    %c0_11 = arith.constant 0 : index
    %13 = vector.load %arg2[%c6, %c0_11] : memref<27x128xbf16, #tpu.memory_space<vmem>>, vector<3x128xbf16>
    %cst_12 = arith.constant dense<0.000000e+00> : vector<958x128xf32>
    %14 = tpu.matmul %12, %13, %cst_12 {dimension_numbers = #tpu.dot_dimension_numbers<[1], [0], [0], [1], [0, 0, 1, 1], [], []>} : vector<958x3xbf16>, vector<3x128xbf16>, vector<958x128xf32> -> vector<958x128xf32>
    %15 = arith.addf %10, %14 : vector<958x128xf32>
    %c0_13 = arith.constant 0 : index
    %c32 = arith.constant 32 : index
    %c0_14 = arith.constant 0 : index
    %16 = vector.load %arg1[%c0_13, %c32, %c0_14] : memref<1x1024x3xbf16, #tpu.memory_space<vmem>>, vector<1x958x3xbf16>
    %17 = vector.shape_cast %16 : vector<1x958x3xbf16> to vector<958x3xbf16>
    %c9 = arith.constant 9 : index
    %c0_15 = arith.constant 0 : index
    %18 = vector.load %arg2[%c9, %c0_15] : memref<27x128xbf16, #tpu.memory_space<vmem>>, vector<3x128xbf16>
    %cst_16 = arith.constant dense<0.000000e+00> : vector<958x128xf32>
    %19 = tpu.matmul %17, %18, %cst_16 {dimension_numbers = #tpu.dot_dimension_numbers<[1], [0], [0], [1], [0, 0, 1, 1], [], []>} : vector<958x3xbf16>, vector<3x128xbf16>, vector<958x128xf32> -> vector<958x128xf32>
    %20 = arith.addf %15, %19 : vector<958x128xf32>
    %c0_17 = arith.constant 0 : index
    %c33 = arith.constant 33 : index
    %c0_18 = arith.constant 0 : index
    %21 = vector.load %arg1[%c0_17, %c33, %c0_18] : memref<1x1024x3xbf16, #tpu.memory_space<vmem>>, vector<1x958x3xbf16>
    %22 = vector.shape_cast %21 : vector<1x958x3xbf16> to vector<958x3xbf16>
    %c12 = arith.constant 12 : index
    %c0_19 = arith.constant 0 : index
    %23 = vector.load %arg2[%c12, %c0_19] : memref<27x128xbf16, #tpu.memory_space<vmem>>, vector<3x128xbf16>
    %cst_20 = arith.constant dense<0.000000e+00> : vector<958x128xf32>
    %24 = tpu.matmul %22, %23, %cst_20 {dimension_numbers = #tpu.dot_dimension_numbers<[1], [0], [0], [1], [0, 0, 1, 1], [], []>} : vector<958x3xbf16>, vector<3x128xbf16>, vector<958x128xf32> -> vector<958x128xf32>
    %25 = arith.addf %20, %24 : vector<958x128xf32>
    %c0_21 = arith.constant 0 : index
    %c34 = arith.constant 34 : index
    %c0_22 = arith.constant 0 : index
    %26 = vector.load %arg1[%c0_21, %c34, %c0_22] : memref<1x1024x3xbf16, #tpu.memory_space<vmem>>, vector<1x958x3xbf16>
    %27 = vector.shape_cast %26 : vector<1x958x3xbf16> to vector<958x3xbf16>
    %c15 = arith.constant 15 : index
    %c0_23 = arith.constant 0 : index
    %28 = vector.load %arg2[%c15, %c0_23] : memref<27x128xbf16, #tpu.memory_space<vmem>>, vector<3x128xbf16>
    %cst_24 = arith.constant dense<0.000000e+00> : vector<958x128xf32>
    %29 = tpu.matmul %27, %28, %cst_24 {dimension_numbers = #tpu.dot_dimension_numbers<[1], [0], [0], [1], [0, 0, 1, 1], [], []>} : vector<958x3xbf16>, vector<3x128xbf16>, vector<958x128xf32> -> vector<958x128xf32>
    %30 = arith.addf %25, %29 : vector<958x128xf32>
    %c0_25 = arith.constant 0 : index
    %c64 = arith.constant 64 : index
    %c0_26 = arith.constant 0 : index
    %31 = vector.load %arg1[%c0_25, %c64, %c0_26] : memref<1x1024x3xbf16, #tpu.memory_space<vmem>>, vector<1x958x3xbf16>
    %32 = vector.shape_cast %31 : vector<1x958x3xbf16> to vector<958x3xbf16>
    %c18 = arith.constant 18 : index
    %c0_27 = arith.constant 0 : index
    %33 = vector.load %arg2[%c18, %c0_27] : memref<27x128xbf16, #tpu.memory_space<vmem>>, vector<3x128xbf16>
    %cst_28 = arith.constant dense<0.000000e+00> : vector<958x128xf32>
    %34 = tpu.matmul %32, %33, %cst_28 {dimension_numbers = #tpu.dot_dimension_numbers<[1], [0], [0], [1], [0, 0, 1, 1], [], []>} : vector<958x3xbf16>, vector<3x128xbf16>, vector<958x128xf32> -> vector<958x128xf32>
    %35 = arith.addf %30, %34 : vector<958x128xf32>
    %c0_29 = arith.constant 0 : index
    %c65 = arith.constant 65 : index
    %c0_30 = arith.constant 0 : index
    %36 = vector.load %arg1[%c0_29, %c65, %c0_30] : memref<1x1024x3xbf16, #tpu.memory_space<vmem>>, vector<1x958x3xbf16>
    %37 = vector.shape_cast %36 : vector<1x958x3xbf16> to vector<958x3xbf16>
    %c21 = arith.constant 21 : index
    %c0_31 = arith.constant 0 : index
    %38 = vector.load %arg2[%c21, %c0_31] : memref<27x128xbf16, #tpu.memory_space<vmem>>, vector<3x128xbf16>
    %cst_32 = arith.constant dense<0.000000e+00> : vector<958x128xf32>
    %39 = tpu.matmul %37, %38, %cst_32 {dimension_numbers = #tpu.dot_dimension_numbers<[1], [0], [0], [1], [0, 0, 1, 1], [], []>} : vector<958x3xbf16>, vector<3x128xbf16>, vector<958x128xf32> -> vector<958x128xf32>
    %40 = arith.addf %35, %39 : vector<958x128xf32>
    %c0_33 = arith.constant 0 : index
    %c66 = arith.constant 66 : index
    %c0_34 = arith.constant 0 : index
    %41 = vector.load %arg1[%c0_33, %c66, %c0_34] : memref<1x1024x3xbf16, #tpu.memory_space<vmem>>, vector<1x958x3xbf16>
    %42 = vector.shape_cast %41 : vector<1x958x3xbf16> to vector<958x3xbf16>
    %c24 = arith.constant 24 : index
    %c0_35 = arith.constant 0 : index
    %43 = vector.load %arg2[%c24, %c0_35] : memref<27x128xbf16, #tpu.memory_space<vmem>>, vector<3x128xbf16>
    %cst_36 = arith.constant dense<0.000000e+00> : vector<958x128xf32>
    %44 = tpu.matmul %42, %43, %cst_36 {dimension_numbers = #tpu.dot_dimension_numbers<[1], [0], [0], [1], [0, 0, 1, 1], [], []>} : vector<958x3xbf16>, vector<3x128xbf16>, vector<958x128xf32> -> vector<958x128xf32>
    %45 = arith.addf %40, %44 : vector<958x128xf32>
    %c0_37 = arith.constant 0 : index
    %c0_38 = arith.constant 0 : index
    %46 = vector.load %arg3[%c0_37, %c0_38] : memref<1x128xf32, #tpu.memory_space<vmem>>, vector<1x128xf32>
    %47 = vector.broadcast %46 : vector<1x128xf32> to vector<958x128xf32>
    %48 = arith.addf %45, %47 : vector<958x128xf32>
    %cst_39 = arith.constant 0.000000e+00 : f32
    %49 = vector.broadcast %cst_39 : f32 to vector<958x128xf32>
    %50 = arith.maximumf %48, %49 : vector<958x128xf32>
    %c0_40 = arith.constant 0 : index
    %c0_41 = arith.constant 0 : index
    %51 = vector.load %arg5[%c0_40, %c0_41] : memref<958x128xf32, #tpu.memory_space<vmem>>, vector<958x128xf32>
    tpu.vector_store %arg5[%c0_40, %c0_41], %50 {strides = array<i32>} : memref<958x128xf32, #tpu.memory_space<vmem>>, vector<958x128xf32>,
    %c0_42 = arith.constant 0 : index
    %c0_43 = arith.constant 0 : index
    %52 = tpu.strided_load %arg5[%c0_42, %c0_43] {strides = array<i32: 2, 1>} : memref<958x128xf32, #tpu.memory_space<vmem>>, vector<15x128xf32>
    %c1_44 = arith.constant 1 : index
    %c0_45 = arith.constant 0 : index
    %53 = tpu.strided_load %arg5[%c1_44, %c0_45] {strides = array<i32: 2, 1>} : memref<958x128xf32, #tpu.memory_space<vmem>>, vector<15x128xf32>
    %54 = arith.maximumf %52, %53 : vector<15x128xf32>
    %c32_46 = arith.constant 32 : index
    %c0_47 = arith.constant 0 : index
    %55 = tpu.strided_load %arg5[%c32_46, %c0_47] {strides = array<i32: 2, 1>} : memref<958x128xf32, #tpu.memory_space<vmem>>, vector<15x128xf32>
    %c33_48 = arith.constant 33 : index
    %c0_49 = arith.constant 0 : index
    %56 = tpu.strided_load %arg5[%c33_48, %c0_49] {strides = array<i32: 2, 1>} : memref<958x128xf32, #tpu.memory_space<vmem>>, vector<15x128xf32>
    %57 = arith.maximumf %55, %56 : vector<15x128xf32>
    %58 = arith.maximumf %54, %57 : vector<15x128xf32>
    %59 = arith.truncf %58 : vector<15x128xf32> to vector<15x128xbf16>
    %c0_50 = arith.constant 0 : index
    %c0_51 = arith.constant 0 : index
    %c0_52 = arith.constant 0 : index
    %60 = vector.load %arg4[%c0_50, %c0_51, %c0_52] : memref<1x225x128xbf16, #tpu.memory_space<vmem>>, vector<1x15x128xbf16>
    %61 = vector.shape_cast %60 : vector<1x15x128xbf16> to vector<15x128xbf16>
    %62 = vector.shape_cast %59 : vector<15x128xbf16> to vector<1x15x128xbf16>
    tpu.vector_store %arg4[%c0_50, %c0_51, %c0_52], %62 {strides = array<i32>} : memref<1x225x128xbf16, #tpu.memory_space<vmem>>, vector<1x15x128xbf16>,
    %c64_53 = arith.constant 64 : index
    %c0_54 = arith.constant 0 : index
    %63 = tpu.strided_load %arg5[%c64_53, %c0_54] {strides = array<i32: 2, 1>} : memref<958x128xf32, #tpu.memory_space<vmem>>, vector<15x128xf32>
    %c65_55 = arith.constant 65 : index
    %c0_56 = arith.constant 0 : index
    %64 = tpu.strided_load %arg5[%c65_55, %c0_56] {strides = array<i32: 2, 1>} : memref<958x128xf32, #tpu.memory_space<vmem>>, vector<15x128xf32>
    %65 = arith.maximumf %63, %64 : vector<15x128xf32>
    %c96 = arith.constant 96 : index
    %c0_57 = arith.constant 0 : index
    %66 = tpu.strided_load %arg5[%c96, %c0_57] {strides = array<i32: 2, 1>} : memref<958x128xf32, #tpu.memory_space<vmem>>, vector<15x128xf32>
    %c97 = arith.constant 97 : index
    %c0_58 = arith.constant 0 : index
    %67 = tpu.strided_load %arg5[%c97, %c0_58] {strides = array<i32: 2, 1>} : memref<958x128xf32, #tpu.memory_space<vmem>>, vector<15x128xf32>
    %68 = arith.maximumf %66, %67 : vector<15x128xf32>
    %69 = arith.maximumf %65, %68 : vector<15x128xf32>
    %70 = arith.truncf %69 : vector<15x128xf32> to vector<15x128xbf16>
    %c0_59 = arith.constant 0 : index
    %c15_60 = arith.constant 15 : index
    %c0_61 = arith.constant 0 : index
    %71 = vector.load %arg4[%c0_59, %c15_60, %c0_61] : memref<1x225x128xbf16, #tpu.memory_space<vmem>>, vector<1x15x128xbf16>
    %72 = vector.shape_cast %71 : vector<1x15x128xbf16> to vector<15x128xbf16>
    %73 = vector.shape_cast %70 : vector<15x128xbf16> to vector<1x15x128xbf16>
    tpu.vector_store %arg4[%c0_59, %c15_60, %c0_61], %73 {strides = array<i32>} : memref<1x225x128xbf16, #tpu.memory_space<vmem>>, vector<1x15x128xbf16>,
    %c128 = arith.constant 128 : index
    %c0_62 = arith.constant 0 : index
    %74 = tpu.strided_load %arg5[%c128, %c0_62] {strides = array<i32: 2, 1>} : memref<958x128xf32, #tpu.memory_space<vmem>>, vector<15x128xf32>
    %c129 = arith.constant 129 : index
    %c0_63 = arith.constant 0 : index
    %75 = tpu.strided_load %arg5[%c129, %c0_63] {strides = array<i32: 2, 1>} : memref<958x128xf32, #tpu.memory_space<vmem>>, vector<15x128xf32>
    %76 = arith.maximumf %74, %75 : vector<15x128xf32>
    %c160 = arith.constant 160 : index
    %c0_64 = arith.constant 0 : index
    %77 = tpu.strided_load %arg5[%c160, %c0_64] {strides = array<i32: 2, 1>} : memref<958x128xf32, #tpu.memory_space<vmem>>, vector<15x128xf32>
    %c161 = arith.constant 161 : index
    %c0_65 = arith.constant 0 : index
    %78 = tpu.strided_load %arg5[%c161, %c0_65] {strides = array<i32: 2, 1>} : memref<958x128xf32, #tpu.memory_space<vmem>>, vector<15x128xf32>
    %79 = arith.maximumf %77, %78 : vector<15x128xf32>
    %80 = arith.maximumf %76, %79 : vector<15x128xf32>
    %81 = arith.truncf %80 : vector<15x128xf32> to vector<15x128xbf16>
    %c0_66 = arith.constant 0 : index
    %c30 = arith.constant 30 : index
    %c0_67 = arith.constant 0 : index
    %82 = vector.load %arg4[%c0_66, %c30, %c0_67] : memref<1x225x128xbf16, #tpu.memory_space<vmem>>, vector<1x15x128xbf16>
    %83 = vector.shape_cast %82 : vector<1x15x128xbf16> to vector<15x128xbf16>
    %84 = vector.shape_cast %81 : vector<15x128xbf16> to vector<1x15x128xbf16>
    tpu.vector_store %arg4[%c0_66, %c30, %c0_67], %84 {strides = array<i32>} : memref<1x225x128xbf16, #tpu.memory_space<vmem>>, vector<1x15x128xbf16>,
    %c192 = arith.constant 192 : index
    %c0_68 = arith.constant 0 : index
    %85 = tpu.strided_load %arg5[%c192, %c0_68] {strides = array<i32: 2, 1>} : memref<958x128xf32, #tpu.memory_space<vmem>>, vector<15x128xf32>
    %c193 = arith.constant 193 : index
    %c0_69 = arith.constant 0 : index
    %86 = tpu.strided_load %arg5[%c193, %c0_69] {strides = array<i32: 2, 1>} : memref<958x128xf32, #tpu.memory_space<vmem>>, vector<15x128xf32>
    %87 = arith.maximumf %85, %86 : vector<15x128xf32>
    %c224 = arith.constant 224 : index
    %c0_70 = arith.constant 0 : index
    %88 = tpu.strided_load %arg5[%c224, %c0_70] {strides = array<i32: 2, 1>} : memref<958x128xf32, #tpu.memory_space<vmem>>, vector<15x128xf32>
    %c225 = arith.constant 225 : index
    %c0_71 = arith.constant 0 : index
    %89 = tpu.strided_load %arg5[%c225, %c0_71] {strides = array<i32: 2, 1>} : memref<958x128xf32, #tpu.memory_space<vmem>>, vector<15x128xf32>
    %90 = arith.maximumf %88, %89 : vector<15x128xf32>
    %91 = arith.maximumf %87, %90 : vector<15x128xf32>
    %92 = arith.truncf %91 : vector<15x128xf32> to vector<15x128xbf16>
    %c0_72 = arith.constant 0 : index
    %c45 = arith.constant 45 : index
    %c0_73 = arith.constant 0 : index
    %93 = vector.load %arg4[%c0_72, %c45, %c0_73] : memref<1x225x128xbf16, #tpu.memory_space<vmem>>, vector<1x15x128xbf16>
    %94 = vector.shape_cast %93 : vector<1x15x128xbf16> to vector<15x128xbf16>
    %95 = vector.shape_cast %92 : vector<15x128xbf16> to vector<1x15x128xbf16>
    tpu.vector_store %arg4[%c0_72, %c45, %c0_73], %95 {strides = array<i32>} : memref<1x225x128xbf16, #tpu.memory_space<vmem>>, vector<1x15x128xbf16>,
    %c256 = arith.constant 256 : index
    %c0_74 = arith.constant 0 : index
    %96 = tpu.strided_load %arg5[%c256, %c0_74] {strides = array<i32: 2, 1>} : memref<958x128xf32, #tpu.memory_space<vmem>>, vector<15x128xf32>
    %c257 = arith.constant 257 : index
    %c0_75 = arith.constant 0 : index
    %97 = tpu.strided_load %arg5[%c257, %c0_75] {strides = array<i32: 2, 1>} : memref<958x128xf32, #tpu.memory_space<vmem>>, vector<15x128xf32>
    %98 = arith.maximumf %96, %97 : vector<15x128xf32>
    %c288 = arith.constant 288 : index
    %c0_76 = arith.constant 0 : index
    %99 = tpu.strided_load %arg5[%c288, %c0_76] {strides = array<i32: 2, 1>} : memref<958x128xf32, #tpu.memory_space<vmem>>, vector<15x128xf32>
    %c289 = arith.constant 289 : index
    %c0_77 = arith.constant 0 : index
    %100 = tpu.strided_load %arg5[%c289, %c0_77] {strides = array<i32: 2, 1>} : memref<958x128xf32, #tpu.memory_space<vmem>>, vector<15x128xf32>
    %101 = arith.maximumf %99, %100 : vector<15x128xf32>
    %102 = arith.maximumf %98, %101 : vector<15x128xf32>
    %103 = arith.truncf %102 : vector<15x128xf32> to vector<15x128xbf16>
    %c0_78 = arith.constant 0 : index
    %c60 = arith.constant 60 : index
    %c0_79 = arith.constant 0 : index
    %104 = vector.load %arg4[%c0_78, %c60, %c0_79] : memref<1x225x128xbf16, #tpu.memory_space<vmem>>, vector<1x15x128xbf16>
    %105 = vector.shape_cast %104 : vector<1x15x128xbf16> to vector<15x128xbf16>
    %106 = vector.shape_cast %103 : vector<15x128xbf16> to vector<1x15x128xbf16>
    tpu.vector_store %arg4[%c0_78, %c60, %c0_79], %106 {strides = array<i32>} : memref<1x225x128xbf16, #tpu.memory_space<vmem>>, vector<1x15x128xbf16>,
    %c320 = arith.constant 320 : index
    %c0_80 = arith.constant 0 : index
    %107 = tpu.strided_load %arg5[%c320, %c0_80] {strides = array<i32: 2, 1>} : memref<958x128xf32, #tpu.memory_space<vmem>>, vector<15x128xf32>
    %c321 = arith.constant 321 : index
    %c0_81 = arith.constant 0 : index
    %108 = tpu.strided_load %arg5[%c321, %c0_81] {strides = array<i32: 2, 1>} : memref<958x128xf32, #tpu.memory_space<vmem>>, vector<15x128xf32>
    %109 = arith.maximumf %107, %108 : vector<15x128xf32>
    %c352 = arith.constant 352 : index
    %c0_82 = arith.constant 0 : index
    %110 = tpu.strided_load %arg5[%c352, %c0_82] {strides = array<i32: 2, 1>} : memref<958x128xf32, #tpu.memory_space<vmem>>, vector<15x128xf32>
    %c353 = arith.constant 353 : index
    %c0_83 = arith.constant 0 : index
    %111 = tpu.strided_load %arg5[%c353, %c0_83] {strides = array<i32: 2, 1>} : memref<958x128xf32, #tpu.memory_space<vmem>>, vector<15x128xf32>
    %112 = arith.maximumf %110, %111 : vector<15x128xf32>
    %113 = arith.maximumf %109, %112 : vector<15x128xf32>
    %114 = arith.truncf %113 : vector<15x128xf32> to vector<15x128xbf16>
    %c0_84 = arith.constant 0 : index
    %c75 = arith.constant 75 : index
    %c0_85 = arith.constant 0 : index
    %115 = vector.load %arg4[%c0_84, %c75, %c0_85] : memref<1x225x128xbf16, #tpu.memory_space<vmem>>, vector<1x15x128xbf16>
    %116 = vector.shape_cast %115 : vector<1x15x128xbf16> to vector<15x128xbf16>
    %117 = vector.shape_cast %114 : vector<15x128xbf16> to vector<1x15x128xbf16>
    tpu.vector_store %arg4[%c0_84, %c75, %c0_85], %117 {strides = array<i32>} : memref<1x225x128xbf16, #tpu.memory_space<vmem>>, vector<1x15x128xbf16>,
    %c384 = arith.constant 384 : index
    %c0_86 = arith.constant 0 : index
    %118 = tpu.strided_load %arg5[%c384, %c0_86] {strides = array<i32: 2, 1>} : memref<958x128xf32, #tpu.memory_space<vmem>>, vector<15x128xf32>
    %c385 = arith.constant 385 : index
    %c0_87 = arith.constant 0 : index
    %119 = tpu.strided_load %arg5[%c385, %c0_87] {strides = array<i32: 2, 1>} : memref<958x128xf32, #tpu.memory_space<vmem>>, vector<15x128xf32>
    %120 = arith.maximumf %118, %119 : vector<15x128xf32>
    %c416 = arith.constant 416 : index
    %c0_88 = arith.constant 0 : index
    %121 = tpu.strided_load %arg5[%c416, %c0_88] {strides = array<i32: 2, 1>} : memref<958x128xf32, #tpu.memory_space<vmem>>, vector<15x128xf32>
    %c417 = arith.constant 417 : index
    %c0_89 = arith.constant 0 : index
    %122 = tpu.strided_load %arg5[%c417, %c0_89] {strides = array<i32: 2, 1>} : memref<958x128xf32, #tpu.memory_space<vmem>>, vector<15x128xf32>
    %123 = arith.maximumf %121, %122 : vector<15x128xf32>
    %124 = arith.maximumf %120, %123 : vector<15x128xf32>
    %125 = arith.truncf %124 : vector<15x128xf32> to vector<15x128xbf16>
    %c0_90 = arith.constant 0 : index
    %c90 = arith.constant 90 : index
    %c0_91 = arith.constant 0 : index
    %126 = vector.load %arg4[%c0_90, %c90, %c0_91] : memref<1x225x128xbf16, #tpu.memory_space<vmem>>, vector<1x15x128xbf16>
    %127 = vector.shape_cast %126 : vector<1x15x128xbf16> to vector<15x128xbf16>
    %128 = vector.shape_cast %125 : vector<15x128xbf16> to vector<1x15x128xbf16>
    tpu.vector_store %arg4[%c0_90, %c90, %c0_91], %128 {strides = array<i32>} : memref<1x225x128xbf16, #tpu.memory_space<vmem>>, vector<1x15x128xbf16>,
    %c448 = arith.constant 448 : index
    %c0_92 = arith.constant 0 : index
    %129 = tpu.strided_load %arg5[%c448, %c0_92] {strides = array<i32: 2, 1>} : memref<958x128xf32, #tpu.memory_space<vmem>>, vector<15x128xf32>
    %c449 = arith.constant 449 : index
    %c0_93 = arith.constant 0 : index
    %130 = tpu.strided_load %arg5[%c449, %c0_93] {strides = array<i32: 2, 1>} : memref<958x128xf32, #tpu.memory_space<vmem>>, vector<15x128xf32>
    %131 = arith.maximumf %129, %130 : vector<15x128xf32>
    %c480 = arith.constant 480 : index
    %c0_94 = arith.constant 0 : index
    %132 = tpu.strided_load %arg5[%c480, %c0_94] {strides = array<i32: 2, 1>} : memref<958x128xf32, #tpu.memory_space<vmem>>, vector<15x128xf32>
    %c481 = arith.constant 481 : index
    %c0_95 = arith.constant 0 : index
    %133 = tpu.strided_load %arg5[%c481, %c0_95] {strides = array<i32: 2, 1>} : memref<958x128xf32, #tpu.memory_space<vmem>>, vector<15x128xf32>
    %134 = arith.maximumf %132, %133 : vector<15x128xf32>
    %135 = arith.maximumf %131, %134 : vector<15x128xf32>
    %136 = arith.truncf %135 : vector<15x128xf32> to vector<15x128xbf16>
    %c0_96 = arith.constant 0 : index
    %c105 = arith.constant 105 : index
    %c0_97 = arith.constant 0 : index
    %137 = vector.load %arg4[%c0_96, %c105, %c0_97] : memref<1x225x128xbf16, #tpu.memory_space<vmem>>, vector<1x15x128xbf16>
    %138 = vector.shape_cast %137 : vector<1x15x128xbf16> to vector<15x128xbf16>
    %139 = vector.shape_cast %136 : vector<15x128xbf16> to vector<1x15x128xbf16>
    tpu.vector_store %arg4[%c0_96, %c105, %c0_97], %139 {strides = array<i32>} : memref<1x225x128xbf16, #tpu.memory_space<vmem>>, vector<1x15x128xbf16>,
    %c512 = arith.constant 512 : index
    %c0_98 = arith.constant 0 : index
    %140 = tpu.strided_load %arg5[%c512, %c0_98] {strides = array<i32: 2, 1>} : memref<958x128xf32, #tpu.memory_space<vmem>>, vector<15x128xf32>
    %c513 = arith.constant 513 : index
    %c0_99 = arith.constant 0 : index
    %141 = tpu.strided_load %arg5[%c513, %c0_99] {strides = array<i32: 2, 1>} : memref<958x128xf32, #tpu.memory_space<vmem>>, vector<15x128xf32>
    %142 = arith.maximumf %140, %141 : vector<15x128xf32>
    %c544 = arith.constant 544 : index
    %c0_100 = arith.constant 0 : index
    %143 = tpu.strided_load %arg5[%c544, %c0_100] {strides = array<i32: 2, 1>} : memref<958x128xf32, #tpu.memory_space<vmem>>, vector<15x128xf32>
    %c545 = arith.constant 545 : index
    %c0_101 = arith.constant 0 : index
    %144 = tpu.strided_load %arg5[%c545, %c0_101] {strides = array<i32: 2, 1>} : memref<958x128xf32, #tpu.memory_space<vmem>>, vector<15x128xf32>
    %145 = arith.maximumf %143, %144 : vector<15x128xf32>
    %146 = arith.maximumf %142, %145 : vector<15x128xf32>
    %147 = arith.truncf %146 : vector<15x128xf32> to vector<15x128xbf16>
    %c0_102 = arith.constant 0 : index
    %c120 = arith.constant 120 : index
    %c0_103 = arith.constant 0 : index
    %148 = vector.load %arg4[%c0_102, %c120, %c0_103] : memref<1x225x128xbf16, #tpu.memory_space<vmem>>, vector<1x15x128xbf16>
    %149 = vector.shape_cast %148 : vector<1x15x128xbf16> to vector<15x128xbf16>
    %150 = vector.shape_cast %147 : vector<15x128xbf16> to vector<1x15x128xbf16>
    tpu.vector_store %arg4[%c0_102, %c120, %c0_103], %150 {strides = array<i32>} : memref<1x225x128xbf16, #tpu.memory_space<vmem>>, vector<1x15x128xbf16>,
    %c576 = arith.constant 576 : index
    %c0_104 = arith.constant 0 : index
    %151 = tpu.strided_load %arg5[%c576, %c0_104] {strides = array<i32: 2, 1>} : memref<958x128xf32, #tpu.memory_space<vmem>>, vector<15x128xf32>
    %c577 = arith.constant 577 : index
    %c0_105 = arith.constant 0 : index
    %152 = tpu.strided_load %arg5[%c577, %c0_105] {strides = array<i32: 2, 1>} : memref<958x128xf32, #tpu.memory_space<vmem>>, vector<15x128xf32>
    %153 = arith.maximumf %151, %152 : vector<15x128xf32>
    %c608 = arith.constant 608 : index
    %c0_106 = arith.constant 0 : index
    %154 = tpu.strided_load %arg5[%c608, %c0_106] {strides = array<i32: 2, 1>} : memref<958x128xf32, #tpu.memory_space<vmem>>, vector<15x128xf32>
    %c609 = arith.constant 609 : index
    %c0_107 = arith.constant 0 : index
    %155 = tpu.strided_load %arg5[%c609, %c0_107] {strides = array<i32: 2, 1>} : memref<958x128xf32, #tpu.memory_space<vmem>>, vector<15x128xf32>
    %156 = arith.maximumf %154, %155 : vector<15x128xf32>
    %157 = arith.maximumf %153, %156 : vector<15x128xf32>
    %158 = arith.truncf %157 : vector<15x128xf32> to vector<15x128xbf16>
    %c0_108 = arith.constant 0 : index
    %c135 = arith.constant 135 : index
    %c0_109 = arith.constant 0 : index
    %159 = vector.load %arg4[%c0_108, %c135, %c0_109] : memref<1x225x128xbf16, #tpu.memory_space<vmem>>, vector<1x15x128xbf16>
    %160 = vector.shape_cast %159 : vector<1x15x128xbf16> to vector<15x128xbf16>
    %161 = vector.shape_cast %158 : vector<15x128xbf16> to vector<1x15x128xbf16>
    tpu.vector_store %arg4[%c0_108, %c135, %c0_109], %161 {strides = array<i32>} : memref<1x225x128xbf16, #tpu.memory_space<vmem>>, vector<1x15x128xbf16>,
    %c640 = arith.constant 640 : index
    %c0_110 = arith.constant 0 : index
    %162 = tpu.strided_load %arg5[%c640, %c0_110] {strides = array<i32: 2, 1>} : memref<958x128xf32, #tpu.memory_space<vmem>>, vector<15x128xf32>
    %c641 = arith.constant 641 : index
    %c0_111 = arith.constant 0 : index
    %163 = tpu.strided_load %arg5[%c641, %c0_111] {strides = array<i32: 2, 1>} : memref<958x128xf32, #tpu.memory_space<vmem>>, vector<15x128xf32>
    %164 = arith.maximumf %162, %163 : vector<15x128xf32>
    %c672 = arith.constant 672 : index
    %c0_112 = arith.constant 0 : index
    %165 = tpu.strided_load %arg5[%c672, %c0_112] {strides = array<i32: 2, 1>} : memref<958x128xf32, #tpu.memory_space<vmem>>, vector<15x128xf32>
    %c673 = arith.constant 673 : index
    %c0_113 = arith.constant 0 : index
    %166 = tpu.strided_load %arg5[%c673, %c0_113] {strides = array<i32: 2, 1>} : memref<958x128xf32, #tpu.memory_space<vmem>>, vector<15x128xf32>
    %167 = arith.maximumf %165, %166 : vector<15x128xf32>
    %168 = arith.maximumf %164, %167 : vector<15x128xf32>
    %169 = arith.truncf %168 : vector<15x128xf32> to vector<15x128xbf16>
    %c0_114 = arith.constant 0 : index
    %c150 = arith.constant 150 : index
    %c0_115 = arith.constant 0 : index
    %170 = vector.load %arg4[%c0_114, %c150, %c0_115] : memref<1x225x128xbf16, #tpu.memory_space<vmem>>, vector<1x15x128xbf16>
    %171 = vector.shape_cast %170 : vector<1x15x128xbf16> to vector<15x128xbf16>
    %172 = vector.shape_cast %169 : vector<15x128xbf16> to vector<1x15x128xbf16>
    tpu.vector_store %arg4[%c0_114, %c150, %c0_115], %172 {strides = array<i32>} : memref<1x225x128xbf16, #tpu.memory_space<vmem>>, vector<1x15x128xbf16>,
    %c704 = arith.constant 704 : index
    %c0_116 = arith.constant 0 : index
    %173 = tpu.strided_load %arg5[%c704, %c0_116] {strides = array<i32: 2, 1>} : memref<958x128xf32, #tpu.memory_space<vmem>>, vector<15x128xf32>
    %c705 = arith.constant 705 : index
    %c0_117 = arith.constant 0 : index
    %174 = tpu.strided_load %arg5[%c705, %c0_117] {strides = array<i32: 2, 1>} : memref<958x128xf32, #tpu.memory_space<vmem>>, vector<15x128xf32>
    %175 = arith.maximumf %173, %174 : vector<15x128xf32>
    %c736 = arith.constant 736 : index
    %c0_118 = arith.constant 0 : index
    %176 = tpu.strided_load %arg5[%c736, %c0_118] {strides = array<i32: 2, 1>} : memref<958x128xf32, #tpu.memory_space<vmem>>, vector<15x128xf32>
    %c737 = arith.constant 737 : index
    %c0_119 = arith.constant 0 : index
    %177 = tpu.strided_load %arg5[%c737, %c0_119] {strides = array<i32: 2, 1>} : memref<958x128xf32, #tpu.memory_space<vmem>>, vector<15x128xf32>
    %178 = arith.maximumf %176, %177 : vector<15x128xf32>
    %179 = arith.maximumf %175, %178 : vector<15x128xf32>
    %180 = arith.truncf %179 : vector<15x128xf32> to vector<15x128xbf16>
    %c0_120 = arith.constant 0 : index
    %c165 = arith.constant 165 : index
    %c0_121 = arith.constant 0 : index
    %181 = vector.load %arg4[%c0_120, %c165, %c0_121] : memref<1x225x128xbf16, #tpu.memory_space<vmem>>, vector<1x15x128xbf16>
    %182 = vector.shape_cast %181 : vector<1x15x128xbf16> to vector<15x128xbf16>
    %183 = vector.shape_cast %180 : vector<15x128xbf16> to vector<1x15x128xbf16>
    tpu.vector_store %arg4[%c0_120, %c165, %c0_121], %183 {strides = array<i32>} : memref<1x225x128xbf16, #tpu.memory_space<vmem>>, vector<1x15x128xbf16>,
    %c768 = arith.constant 768 : index
    %c0_122 = arith.constant 0 : index
    %184 = tpu.strided_load %arg5[%c768, %c0_122] {strides = array<i32: 2, 1>} : memref<958x128xf32, #tpu.memory_space<vmem>>, vector<15x128xf32>
    %c769 = arith.constant 769 : index
    %c0_123 = arith.constant 0 : index
    %185 = tpu.strided_load %arg5[%c769, %c0_123] {strides = array<i32: 2, 1>} : memref<958x128xf32, #tpu.memory_space<vmem>>, vector<15x128xf32>
    %186 = arith.maximumf %184, %185 : vector<15x128xf32>
    %c800 = arith.constant 800 : index
    %c0_124 = arith.constant 0 : index
    %187 = tpu.strided_load %arg5[%c800, %c0_124] {strides = array<i32: 2, 1>} : memref<958x128xf32, #tpu.memory_space<vmem>>, vector<15x128xf32>
    %c801 = arith.constant 801 : index
    %c0_125 = arith.constant 0 : index
    %188 = tpu.strided_load %arg5[%c801, %c0_125] {strides = array<i32: 2, 1>} : memref<958x128xf32, #tpu.memory_space<vmem>>, vector<15x128xf32>
    %189 = arith.maximumf %187, %188 : vector<15x128xf32>
    %190 = arith.maximumf %186, %189 : vector<15x128xf32>
    %191 = arith.truncf %190 : vector<15x128xf32> to vector<15x128xbf16>
    %c0_126 = arith.constant 0 : index
    %c180 = arith.constant 180 : index
    %c0_127 = arith.constant 0 : index
    %192 = vector.load %arg4[%c0_126, %c180, %c0_127] : memref<1x225x128xbf16, #tpu.memory_space<vmem>>, vector<1x15x128xbf16>
    %193 = vector.shape_cast %192 : vector<1x15x128xbf16> to vector<15x128xbf16>
    %194 = vector.shape_cast %191 : vector<15x128xbf16> to vector<1x15x128xbf16>
    tpu.vector_store %arg4[%c0_126, %c180, %c0_127], %194 {strides = array<i32>} : memref<1x225x128xbf16, #tpu.memory_space<vmem>>, vector<1x15x128xbf16>,
    %c832 = arith.constant 832 : index
    %c0_128 = arith.constant 0 : index
    %195 = tpu.strided_load %arg5[%c832, %c0_128] {strides = array<i32: 2, 1>} : memref<958x128xf32, #tpu.memory_space<vmem>>, vector<15x128xf32>
    %c833 = arith.constant 833 : index
    %c0_129 = arith.constant 0 : index
    %196 = tpu.strided_load %arg5[%c833, %c0_129] {strides = array<i32: 2, 1>} : memref<958x128xf32, #tpu.memory_space<vmem>>, vector<15x128xf32>
    %197 = arith.maximumf %195, %196 : vector<15x128xf32>
    %c864 = arith.constant 864 : index
    %c0_130 = arith.constant 0 : index
    %198 = tpu.strided_load %arg5[%c864, %c0_130] {strides = array<i32: 2, 1>} : memref<958x128xf32, #tpu.memory_space<vmem>>, vector<15x128xf32>
    %c865 = arith.constant 865 : index
    %c0_131 = arith.constant 0 : index
    %199 = tpu.strided_load %arg5[%c865, %c0_131] {strides = array<i32: 2, 1>} : memref<958x128xf32, #tpu.memory_space<vmem>>, vector<15x128xf32>
    %200 = arith.maximumf %198, %199 : vector<15x128xf32>
    %201 = arith.maximumf %197, %200 : vector<15x128xf32>
    %202 = arith.truncf %201 : vector<15x128xf32> to vector<15x128xbf16>
    %c0_132 = arith.constant 0 : index
    %c195 = arith.constant 195 : index
    %c0_133 = arith.constant 0 : index
    %203 = vector.load %arg4[%c0_132, %c195, %c0_133] : memref<1x225x128xbf16, #tpu.memory_space<vmem>>, vector<1x15x128xbf16>
    %204 = vector.shape_cast %203 : vector<1x15x128xbf16> to vector<15x128xbf16>
    %205 = vector.shape_cast %202 : vector<15x128xbf16> to vector<1x15x128xbf16>
    tpu.vector_store %arg4[%c0_132, %c195, %c0_133], %205 {strides = array<i32>} : memref<1x225x128xbf16, #tpu.memory_space<vmem>>, vector<1x15x128xbf16>,
    %c896 = arith.constant 896 : index
    %c0_134 = arith.constant 0 : index
    %206 = tpu.strided_load %arg5[%c896, %c0_134] {strides = array<i32: 2, 1>} : memref<958x128xf32, #tpu.memory_space<vmem>>, vector<15x128xf32>
    %c897 = arith.constant 897 : index
    %c0_135 = arith.constant 0 : index
    %207 = tpu.strided_load %arg5[%c897, %c0_135] {strides = array<i32: 2, 1>} : memref<958x128xf32, #tpu.memory_space<vmem>>, vector<15x128xf32>
    %208 = arith.maximumf %206, %207 : vector<15x128xf32>
    %c928 = arith.constant 928 : index
    %c0_136 = arith.constant 0 : index
    %209 = tpu.strided_load %arg5[%c928, %c0_136] {strides = array<i32: 2, 1>} : memref<958x128xf32, #tpu.memory_space<vmem>>, vector<15x128xf32>
    %c929 = arith.constant 929 : index
    %c0_137 = arith.constant 0 : index
    %210 = tpu.strided_load %arg5[%c929, %c0_137] {strides = array<i32: 2, 1>} : memref<958x128xf32, #tpu.memory_space<vmem>>, vector<15x128xf32>
    %211 = arith.maximumf %209, %210 : vector<15x128xf32>
    %212 = arith.maximumf %208, %211 : vector<15x128xf32>
    %213 = arith.truncf %212 : vector<15x128xf32> to vector<15x128xbf16>
    %c0_138 = arith.constant 0 : index
    %c210 = arith.constant 210 : index
    %c0_139 = arith.constant 0 : index
    %214 = vector.load %arg4[%c0_138, %c210, %c0_139] : memref<1x225x128xbf16, #tpu.memory_space<vmem>>, vector<1x15x128xbf16>
    %215 = vector.shape_cast %214 : vector<1x15x128xbf16> to vector<15x128xbf16>
    %216 = vector.shape_cast %213 : vector<15x128xbf16> to vector<1x15x128xbf16>
    tpu.vector_store %arg4[%c0_138, %c210, %c0_139], %216 {strides = array<i32>} : memref<1x225x128xbf16, #tpu.memory_space<vmem>>, vector<1x15x128xbf16>,
    return
  }
  func.func @transform_0(%arg0: i32) -> (i32, i32, i32) {
    %c0_i32 = arith.constant 0 : i32
    %c0_i32_0 = arith.constant 0 : i32
    %c0_i32_1 = arith.constant 0 : i32
    return %arg0, %c0_i32, %c0_i32_0 : i32, i32, i32
  }
  func.func @transform_1(%arg0: i32) -> (i32, i32) {
    %c0_i32 = arith.constant 0 : i32
    %c0_i32_0 = arith.constant 0 : i32
    %c0_i32_1 = arith.constant 0 : i32
    return %c0_i32, %c0_i32_0 : i32, i32
  }
  func.func @transform_2(%arg0: i32) -> (i32, i32) {
    %c0_i32 = arith.constant 0 : i32
    %c0_i32_0 = arith.constant 0 : i32
    %c0_i32_1 = arith.constant 0 : i32
    return %c0_i32, %c0_i32_0 : i32, i32
  }
  func.func @transform_3(%arg0: i32) -> (i32, i32, i32) {
    %c0_i32 = arith.constant 0 : i32
    %c0_i32_0 = arith.constant 0 : i32
    %c0_i32_1 = arith.constant 0 : i32
    return %arg0, %c0_i32, %c0_i32_0 : i32, i32, i32
  }
}

module attributes {stable_mosaic.version = 11 : i64} {
  func.func @_head_kernel(%arg0: i32, %arg1: memref<1x36x128xbf16, #tpu.memory_space<vmem>>, %arg2: memref<1152x256xbf16, #tpu.memory_space<vmem>>, %arg3: memref<1x256xf32, #tpu.memory_space<vmem>>, %arg4: memref<256x128xbf16, #tpu.memory_space<vmem>>, %arg5: memref<1x128xf32, #tpu.memory_space<vmem>>, %arg6: memref<1x1x128xf32, #tpu.memory_space<vmem>>) attributes {dimension_semantics = [#tpu.dimension_semantics<parallel>], iteration_bounds = array<i64: 2>, scalar_prefetch = 0 : i64, scratch_operands = 0 : i64, tpu.core_type = #tpu.core_type<tc>, window_params = [{transform_indices = @transform_0, window_bounds = array<i64: 1, 36, 128>}, {pipeline_mode = #tpu.pipeline_mode<synchronous>, transform_indices = @transform_1, window_bounds = array<i64: 1152, 256>}, {pipeline_mode = #tpu.pipeline_mode<synchronous>, transform_indices = @transform_2, window_bounds = array<i64: 1, 256>}, {pipeline_mode = #tpu.pipeline_mode<synchronous>, transform_indices = @transform_3, window_bounds = array<i64: 256, 128>}, {pipeline_mode = #tpu.pipeline_mode<synchronous>, transform_indices = @transform_4, window_bounds = array<i64: 1, 128>}, {transform_indices = @transform_5, window_bounds = array<i64: 1, 1, 128>}]} {
    %cst = arith.constant 0.000000e+00 : f32
    %0 = vector.broadcast %cst : f32 to vector<22x256xf32>
    %c0 = arith.constant 0 : index
    %c0_0 = arith.constant 0 : index
    %c0_1 = arith.constant 0 : index
    %1 = vector.load %arg1[%c0, %c0_0, %c0_1] : memref<1x36x128xbf16, #tpu.memory_space<vmem>>, vector<1x22x128xbf16>
    %2 = vector.shape_cast %1 : vector<1x22x128xbf16> to vector<22x128xbf16>
    %c0_2 = arith.constant 0 : index
    %c0_3 = arith.constant 0 : index
    %3 = vector.load %arg2[%c0_2, %c0_3] : memref<1152x256xbf16, #tpu.memory_space<vmem>>, vector<128x256xbf16>
    %cst_4 = arith.constant dense<0.000000e+00> : vector<22x256xf32>
    %4 = tpu.matmul %2, %3, %cst_4 {dimension_numbers = #tpu.dot_dimension_numbers<[1], [0], [0], [1], [0, 0, 1, 1], [], []>} : vector<22x128xbf16>, vector<128x256xbf16>, vector<22x256xf32> -> vector<22x256xf32>
    %5 = arith.addf %0, %4 : vector<22x256xf32>
    %c0_5 = arith.constant 0 : index
    %c1 = arith.constant 1 : index
    %c0_6 = arith.constant 0 : index
    %6 = vector.load %arg1[%c0_5, %c1, %c0_6] : memref<1x36x128xbf16, #tpu.memory_space<vmem>>, vector<1x22x128xbf16>
    %7 = vector.shape_cast %6 : vector<1x22x128xbf16> to vector<22x128xbf16>
    %c128 = arith.constant 128 : index
    %c0_7 = arith.constant 0 : index
    %8 = vector.load %arg2[%c128, %c0_7] : memref<1152x256xbf16, #tpu.memory_space<vmem>>, vector<128x256xbf16>
    %cst_8 = arith.constant dense<0.000000e+00> : vector<22x256xf32>
    %9 = tpu.matmul %7, %8, %cst_8 {dimension_numbers = #tpu.dot_dimension_numbers<[1], [0], [0], [1], [0, 0, 1, 1], [], []>} : vector<22x128xbf16>, vector<128x256xbf16>, vector<22x256xf32> -> vector<22x256xf32>
    %10 = arith.addf %5, %9 : vector<22x256xf32>
    %c0_9 = arith.constant 0 : index
    %c2 = arith.constant 2 : index
    %c0_10 = arith.constant 0 : index
    %11 = vector.load %arg1[%c0_9, %c2, %c0_10] : memref<1x36x128xbf16, #tpu.memory_space<vmem>>, vector<1x22x128xbf16>
    %12 = vector.shape_cast %11 : vector<1x22x128xbf16> to vector<22x128xbf16>
    %c256 = arith.constant 256 : index
    %c0_11 = arith.constant 0 : index
    %13 = vector.load %arg2[%c256, %c0_11] : memref<1152x256xbf16, #tpu.memory_space<vmem>>, vector<128x256xbf16>
    %cst_12 = arith.constant dense<0.000000e+00> : vector<22x256xf32>
    %14 = tpu.matmul %12, %13, %cst_12 {dimension_numbers = #tpu.dot_dimension_numbers<[1], [0], [0], [1], [0, 0, 1, 1], [], []>} : vector<22x128xbf16>, vector<128x256xbf16>, vector<22x256xf32> -> vector<22x256xf32>
    %15 = arith.addf %10, %14 : vector<22x256xf32>
    %c0_13 = arith.constant 0 : index
    %c6 = arith.constant 6 : index
    %c0_14 = arith.constant 0 : index
    %16 = vector.load %arg1[%c0_13, %c6, %c0_14] : memref<1x36x128xbf16, #tpu.memory_space<vmem>>, vector<1x22x128xbf16>
    %17 = vector.shape_cast %16 : vector<1x22x128xbf16> to vector<22x128xbf16>
    %c384 = arith.constant 384 : index
    %c0_15 = arith.constant 0 : index
    %18 = vector.load %arg2[%c384, %c0_15] : memref<1152x256xbf16, #tpu.memory_space<vmem>>, vector<128x256xbf16>
    %cst_16 = arith.constant dense<0.000000e+00> : vector<22x256xf32>
    %19 = tpu.matmul %17, %18, %cst_16 {dimension_numbers = #tpu.dot_dimension_numbers<[1], [0], [0], [1], [0, 0, 1, 1], [], []>} : vector<22x128xbf16>, vector<128x256xbf16>, vector<22x256xf32> -> vector<22x256xf32>
    %20 = arith.addf %15, %19 : vector<22x256xf32>
    %c0_17 = arith.constant 0 : index
    %c7 = arith.constant 7 : index
    %c0_18 = arith.constant 0 : index
    %21 = vector.load %arg1[%c0_17, %c7, %c0_18] : memref<1x36x128xbf16, #tpu.memory_space<vmem>>, vector<1x22x128xbf16>
    %22 = vector.shape_cast %21 : vector<1x22x128xbf16> to vector<22x128xbf16>
    %c512 = arith.constant 512 : index
    %c0_19 = arith.constant 0 : index
    %23 = vector.load %arg2[%c512, %c0_19] : memref<1152x256xbf16, #tpu.memory_space<vmem>>, vector<128x256xbf16>
    %cst_20 = arith.constant dense<0.000000e+00> : vector<22x256xf32>
    %24 = tpu.matmul %22, %23, %cst_20 {dimension_numbers = #tpu.dot_dimension_numbers<[1], [0], [0], [1], [0, 0, 1, 1], [], []>} : vector<22x128xbf16>, vector<128x256xbf16>, vector<22x256xf32> -> vector<22x256xf32>
    %25 = arith.addf %20, %24 : vector<22x256xf32>
    %c0_21 = arith.constant 0 : index
    %c8 = arith.constant 8 : index
    %c0_22 = arith.constant 0 : index
    %26 = vector.load %arg1[%c0_21, %c8, %c0_22] : memref<1x36x128xbf16, #tpu.memory_space<vmem>>, vector<1x22x128xbf16>
    %27 = vector.shape_cast %26 : vector<1x22x128xbf16> to vector<22x128xbf16>
    %c640 = arith.constant 640 : index
    %c0_23 = arith.constant 0 : index
    %28 = vector.load %arg2[%c640, %c0_23] : memref<1152x256xbf16, #tpu.memory_space<vmem>>, vector<128x256xbf16>
    %cst_24 = arith.constant dense<0.000000e+00> : vector<22x256xf32>
    %29 = tpu.matmul %27, %28, %cst_24 {dimension_numbers = #tpu.dot_dimension_numbers<[1], [0], [0], [1], [0, 0, 1, 1], [], []>} : vector<22x128xbf16>, vector<128x256xbf16>, vector<22x256xf32> -> vector<22x256xf32>
    %30 = arith.addf %25, %29 : vector<22x256xf32>
    %c0_25 = arith.constant 0 : index
    %c12 = arith.constant 12 : index
    %c0_26 = arith.constant 0 : index
    %31 = vector.load %arg1[%c0_25, %c12, %c0_26] : memref<1x36x128xbf16, #tpu.memory_space<vmem>>, vector<1x22x128xbf16>
    %32 = vector.shape_cast %31 : vector<1x22x128xbf16> to vector<22x128xbf16>
    %c768 = arith.constant 768 : index
    %c0_27 = arith.constant 0 : index
    %33 = vector.load %arg2[%c768, %c0_27] : memref<1152x256xbf16, #tpu.memory_space<vmem>>, vector<128x256xbf16>
    %cst_28 = arith.constant dense<0.000000e+00> : vector<22x256xf32>
    %34 = tpu.matmul %32, %33, %cst_28 {dimension_numbers = #tpu.dot_dimension_numbers<[1], [0], [0], [1], [0, 0, 1, 1], [], []>} : vector<22x128xbf16>, vector<128x256xbf16>, vector<22x256xf32> -> vector<22x256xf32>
    %35 = arith.addf %30, %34 : vector<22x256xf32>
    %c0_29 = arith.constant 0 : index
    %c13 = arith.constant 13 : index
    %c0_30 = arith.constant 0 : index
    %36 = vector.load %arg1[%c0_29, %c13, %c0_30] : memref<1x36x128xbf16, #tpu.memory_space<vmem>>, vector<1x22x128xbf16>
    %37 = vector.shape_cast %36 : vector<1x22x128xbf16> to vector<22x128xbf16>
    %c896 = arith.constant 896 : index
    %c0_31 = arith.constant 0 : index
    %38 = vector.load %arg2[%c896, %c0_31] : memref<1152x256xbf16, #tpu.memory_space<vmem>>, vector<128x256xbf16>
    %cst_32 = arith.constant dense<0.000000e+00> : vector<22x256xf32>
    %39 = tpu.matmul %37, %38, %cst_32 {dimension_numbers = #tpu.dot_dimension_numbers<[1], [0], [0], [1], [0, 0, 1, 1], [], []>} : vector<22x128xbf16>, vector<128x256xbf16>, vector<22x256xf32> -> vector<22x256xf32>
    %40 = arith.addf %35, %39 : vector<22x256xf32>
    %c0_33 = arith.constant 0 : index
    %c14 = arith.constant 14 : index
    %c0_34 = arith.constant 0 : index
    %41 = vector.load %arg1[%c0_33, %c14, %c0_34] : memref<1x36x128xbf16, #tpu.memory_space<vmem>>, vector<1x22x128xbf16>
    %42 = vector.shape_cast %41 : vector<1x22x128xbf16> to vector<22x128xbf16>
    %c1024 = arith.constant 1024 : index
    %c0_35 = arith.constant 0 : index
    %43 = vector.load %arg2[%c1024, %c0_35] : memref<1152x256xbf16, #tpu.memory_space<vmem>>, vector<128x256xbf16>
    %cst_36 = arith.constant dense<0.000000e+00> : vector<22x256xf32>
    %44 = tpu.matmul %42, %43, %cst_36 {dimension_numbers = #tpu.dot_dimension_numbers<[1], [0], [0], [1], [0, 0, 1, 1], [], []>} : vector<22x128xbf16>, vector<128x256xbf16>, vector<22x256xf32> -> vector<22x256xf32>
    %45 = arith.addf %40, %44 : vector<22x256xf32>
    %c0_37 = arith.constant 0 : index
    %c0_38 = arith.constant 0 : index
    %46 = vector.load %arg3[%c0_37, %c0_38] : memref<1x256xf32, #tpu.memory_space<vmem>>, vector<1x256xf32>
    %47 = vector.broadcast %46 : vector<1x256xf32> to vector<22x256xf32>
    %48 = arith.addf %45, %47 : vector<22x256xf32>
    %cst_39 = arith.constant 0.000000e+00 : f32
    %49 = vector.broadcast %cst_39 : f32 to vector<22x256xf32>
    %50 = arith.maximumf %48, %49 : vector<22x256xf32>
    %cst_40 = arith.constant 0.000000e+00 : f32
    %51 = vector.broadcast %cst_40 : f32 to vector<1x256xf32>
    %52 = vector.extract_strided_slice %50 {offsets = [0, 0], sizes = [4, 256], strides = [1, 1]} : vector<22x256xf32> to vector<4x256xf32>
    %cst_41 = arith.constant dense<0.000000e+00> : vector<256xf32>
    %53 = vector.multi_reduction <add>, %52, %cst_41 [0] : vector<4x256xf32> to vector<256xf32>
    %54 = vector.shape_cast %53 : vector<256xf32> to vector<1x256xf32>
    %55 = arith.addf %51, %54 : vector<1x256xf32>
    %56 = vector.extract_strided_slice %50 {offsets = [6, 0], sizes = [4, 256], strides = [1, 1]} : vector<22x256xf32> to vector<4x256xf32>
    %cst_42 = arith.constant dense<0.000000e+00> : vector<256xf32>
    %57 = vector.multi_reduction <add>, %56, %cst_42 [0] : vector<4x256xf32> to vector<256xf32>
    %58 = vector.shape_cast %57 : vector<256xf32> to vector<1x256xf32>
    %59 = arith.addf %55, %58 : vector<1x256xf32>
    %60 = vector.extract_strided_slice %50 {offsets = [12, 0], sizes = [4, 256], strides = [1, 1]} : vector<22x256xf32> to vector<4x256xf32>
    %cst_43 = arith.constant dense<0.000000e+00> : vector<256xf32>
    %61 = vector.multi_reduction <add>, %60, %cst_43 [0] : vector<4x256xf32> to vector<256xf32>
    %62 = vector.shape_cast %61 : vector<256xf32> to vector<1x256xf32>
    %63 = arith.addf %59, %62 : vector<1x256xf32>
    %64 = vector.extract_strided_slice %50 {offsets = [18, 0], sizes = [4, 256], strides = [1, 1]} : vector<22x256xf32> to vector<4x256xf32>
    %cst_44 = arith.constant dense<0.000000e+00> : vector<256xf32>
    %65 = vector.multi_reduction <add>, %64, %cst_44 [0] : vector<4x256xf32> to vector<256xf32>
    %66 = vector.shape_cast %65 : vector<256xf32> to vector<1x256xf32>
    %67 = arith.addf %63, %66 : vector<1x256xf32>
    %cst_45 = arith.constant 6.250000e-02 : f32
    %68 = vector.broadcast %cst_45 : f32 to vector<1x256xf32>
    %69 = arith.mulf %67, %68 : vector<1x256xf32>
    %70 = arith.truncf %69 : vector<1x256xf32> to vector<1x256xbf16>
    %c0_46 = arith.constant 0 : index
    %c0_47 = arith.constant 0 : index
    %71 = vector.load %arg4[%c0_46, %c0_47] : memref<256x128xbf16, #tpu.memory_space<vmem>>, vector<256x128xbf16>
    %cst_48 = arith.constant dense<0.000000e+00> : vector<1x128xf32>
    %72 = tpu.matmul %70, %71, %cst_48 {dimension_numbers = #tpu.dot_dimension_numbers<[1], [0], [0], [1], [0, 0, 1, 1], [], []>} : vector<1x256xbf16>, vector<256x128xbf16>, vector<1x128xf32> -> vector<1x128xf32>
    %c0_49 = arith.constant 0 : index
    %c0_50 = arith.constant 0 : index
    %73 = vector.load %arg5[%c0_49, %c0_50] : memref<1x128xf32, #tpu.memory_space<vmem>>, vector<1x128xf32>
    %74 = arith.addf %72, %73 : vector<1x128xf32>
    %75 = arith.mulf %74, %74 : vector<1x128xf32>
    %cst_51 = arith.constant dense<0.000000e+00> : vector<1xf32>
    %76 = vector.multi_reduction <add>, %75, %cst_51 [1] : vector<1x128xf32> to vector<1xf32>
    %77 = vector.shape_cast %76 : vector<1xf32> to vector<1x1xf32>
    %cst_52 = arith.constant 1.000000e-24 : f32
    %78 = vector.broadcast %cst_52 : f32 to vector<1x1xf32>
    %79 = arith.addf %77, %78 : vector<1x1xf32>
    %80 = math.rsqrt %79 : vector<1x1xf32>
    %81 = vector.broadcast %80 : vector<1x1xf32> to vector<1x128xf32>
    %82 = arith.mulf %74, %81 : vector<1x128xf32>
    %c0_53 = arith.constant 0 : index
    %c0_54 = arith.constant 0 : index
    %c0_55 = arith.constant 0 : index
    %83 = vector.load %arg6[%c0_53, %c0_54, %c0_55] : memref<1x1x128xf32, #tpu.memory_space<vmem>>, vector<1x1x128xf32>
    %84 = vector.shape_cast %83 : vector<1x1x128xf32> to vector<1x128xf32>
    %85 = vector.shape_cast %82 : vector<1x128xf32> to vector<1x1x128xf32>
    tpu.vector_store %arg6[%c0_53, %c0_54, %c0_55], %85 {strides = array<i32>} : memref<1x1x128xf32, #tpu.memory_space<vmem>>, vector<1x1x128xf32>,
    return
  }
  func.func @transform_0(%arg0: i32) -> (i32, i32, i32) {
    %c0_i32 = arith.constant 0 : i32
    %c0_i32_0 = arith.constant 0 : i32
    %c0_i32_1 = arith.constant 0 : i32
    return %arg0, %c0_i32, %c0_i32_0 : i32, i32, i32
  }
  func.func @transform_1(%arg0: i32) -> (i32, i32) {
    %c0_i32 = arith.constant 0 : i32
    %c0_i32_0 = arith.constant 0 : i32
    %c0_i32_1 = arith.constant 0 : i32
    return %c0_i32, %c0_i32_0 : i32, i32
  }
  func.func @transform_2(%arg0: i32) -> (i32, i32) {
    %c0_i32 = arith.constant 0 : i32
    %c0_i32_0 = arith.constant 0 : i32
    %c0_i32_1 = arith.constant 0 : i32
    return %c0_i32, %c0_i32_0 : i32, i32
  }
  func.func @transform_3(%arg0: i32) -> (i32, i32) {
    %c0_i32 = arith.constant 0 : i32
    %c0_i32_0 = arith.constant 0 : i32
    %c0_i32_1 = arith.constant 0 : i32
    return %c0_i32, %c0_i32_0 : i32, i32
  }
  func.func @transform_4(%arg0: i32) -> (i32, i32) {
    %c0_i32 = arith.constant 0 : i32
    %c0_i32_0 = arith.constant 0 : i32
    %c0_i32_1 = arith.constant 0 : i32
    return %c0_i32, %c0_i32_0 : i32, i32
  }
  func.func @transform_5(%arg0: i32) -> (i32, i32, i32) {
    %c0_i32 = arith.constant 0 : i32
    %c0_i32_0 = arith.constant 0 : i32
    %c0_i32_1 = arith.constant 0 : i32
    return %arg0, %c0_i32, %c0_i32_0 : i32, i32, i32
  }
}

</mosaic_0001>

<bundles_post_ra>
// kernel: embedding_net_forward.5
= control target key start
LH: loop header
LB: loop body
LE: loop exit
PB: predicated region body
PF: predicated region fallthrough
CT: control target
= control target key end

     0   :  { %10 = vsyncpa [#allocation3], 0  ;;  %s3413_s0 = inlined_call_operand.vmem [shape: bf16[2,36,128], index: 0, kind: input, shape index: {}]   ;;  %s3414_s1 = inlined_call_operand.vmem [shape: bf16[1152,256], index: 1, kind: input, shape index: {}]   ;;  %s3415_s2 = inlined_call_operand.vmem [shape: f32[1,256], index: 2, kind: input, shape index: {}]   ;;  %s3416_s3 = inlined_call_operand.vmem [shape: bf16[256,128], index: 3, kind: input, shape index: {}]   ;;  %s3417_s4 = inlined_call_operand.vmem [shape: f32[1,128], index: 4, kind: input, shape index: {}]   ;;  %s3418_s5 = inlined_call_operand.hbm [shape: f32[2,1,128], index: 5, kind: output, shape index: {}]  }
   0x1   :  { %12 = vsyncpa [#allocation3 + $0x1], 0  ;;  %s2715_s18 = smov 0   ;;  %s2717_s19 = smov 0  }
   0x2   :  { %s2719_s20 = smov 0   ;;  %s2721_s21 = smov 0  }
   0x3 LB: > { %s2736_s22 = sadd.s32 4294967295, %s2681_s21   ;;  %s2096_s23 = sadd.s32 4294967294, %s2681_s21   ;;  %s2681_s21 = sphi %s2721_s21, %s3424_s21   ;;  %s2677_s20 = sphi %s2719_s20, %s3423_s20   ;;  %s2673_s19 = sphi %s2717_s19, %s3422_s19   ;;  %s2669_s18 = sphi %s2715_s18, %s3421_s18  }
   0x4   : > { %s2740_s24 = sadd.s32 1, %s2681_s21   ;;  %s135_s25 = sadd.s32 1, %s2677_s20 }
   0x5   : > { %s132_s26 = ssub.s32 %s2681_s21, %s2740_s24  ;;  %p145_p0 = scmp.ne.s32.totalorder %s2677_s20, %s2673_s19 }
   0x6   : > { %p133_p1 = scmp.eq.s32.totalorder %s132_s26, 0  ;;  %p146_p2 = scmp.eq.s32.totalorder %s2736_s22, 1 }
   0x7   : > { %p151_p3 = scmp.ne.s32.totalorder %s2673_s19, %s2669_s18  ;;  %p152_p4 = scmp.eq.s32.totalorder %s2096_s23, 1 }
   0x8   : > { %s2751_s27 = scalar_select %p133_p1, %s2677_s20, %s135_s25  }
   0x9   : > { %p2753_p5 = por %p146_p2, %p145_p0  ;;  %p2757_p6 = por %p152_p4, %p151_p3 }
   0xa   : > { %p2099_p7 = scmp.ge.s32.totalorder %s2681_s21, 1  ;;  %p190_p8 = scmp.lt.s32.totalorder %s2681_s21, 3 }
   0xc   : > { %p191_p9 = pnand %p2099_p7, %p190_p8 }
   0xd   : > { %v2372_v0 = vld [vmem:[%s3414_s1 + $0x84] ss:$8 sps:$4 sm:$0xff] (!%p191_p9)   ;;  %v2683_v2 = vmov (!%p191_p9), 0   ;;  %v2376_v3 = vld [vmem:[%s3414_s1 + $0x80] ss:$8 sps:$4 sm:$0xff] (!%p191_p9)   ;;  %p217_p10 = scmp.lt.s32.totalorder (!%p191_p9), %s2736_s22, 1 }
   0xe   : > { %194 = sbr.rel (%p191_p9) target bundleno = 818 (0x332), region = 40  ;;  %v2374_v1 = vld [vmem:[%s3414_s1 + $0x204] ss:$8 sps:$4 sm:$0xff] (!%p191_p9)   ;;  %397 = vmatprep.mubr.bf16.mxu1 (!%p191_p9), %v2683_v2  ;;  %1040 = vmatprep.mubr.bf16.mxu0 (!%p191_p9), %v2683_v2  ;;  %v2377_v4 = vld [vmem:[%s3414_s1 + $0x200] ss:$8 sps:$4 sm:$0xff] (!%p191_p9)   ;;  %vm572_vm2 = vcmask (!%p191_p9), 1046528  }
   0xf   : > { %365 = vmatprep.subr.bf16.mxu1 (!%p191_p9), %v2372_v0  ;;  %1008 = vmatprep.subr.bf16.mxu0 (!%p191_p9), %v2374_v1  ;;  %v2378_v5 = vld [vmem:[%s3414_s1 + $0x94] ss:$8 sps:$4 sm:$0xff] (!%p191_p9)   ;;  %v2382_v7 = vld [vmem:[%s3414_s1 + $0x90] ss:$8 sps:$4 sm:$0xff] (!%p191_p9)   ;;  %v2384_v9 = vld [vmem:[%s3414_s1 + $0xa4] ss:$8 sps:$4 sm:$0xff] (!%p191_p9)  }
  0x10   : > { %366 = vmatpush1.bf16.msra.mxu1 (!%p191_p9), %v2376_v3  ;;  %1009 = vmatpush1.bf16.msra.mxu0 (!%p191_p9), %v2377_v4  ;;  %v2380_v6 = vld [vmem:[%s3414_s1 + $0x214] ss:$8 sps:$4 sm:$0xff] (!%p191_p9)   ;;  %v2383_v8 = vld [vmem:[%s3414_s1 + $0x210] ss:$8 sps:$4 sm:$0xff] (!%p191_p9)   ;;  %v2386_v10 = vld [vmem:[%s3414_s1 + $0x224] ss:$8 sps:$4 sm:$0xff] (!%p191_p9)  }
  0x11   : > { %367 = vmatprep.subr.bf16.mxu1 (!%p191_p9), %v2378_v5  ;;  %1010 = vmatprep.subr.bf16.mxu0 (!%p191_p9), %v2380_v6  ;;  %v2388_v11 = vld [vmem:[%s3414_s1 + $0xa0] ss:$8 sps:$4 sm:$0xff] (!%p191_p9)   ;;  %v2390_v13 = vld [vmem:[%s3414_s1 + $0xb4] ss:$8 sps:$4 sm:$0xff] (!%p191_p9)   ;;  %v2394_v15 = vld [vmem:[%s3414_s1 + $0xb0] ss:$8 sps:$4 sm:$0xff] (!%p191_p9)  }
  0x12   : > { %v2389_v12 = vld [vmem:[%s3414_s1 + $0x220] ss:$8 sps:$4 sm:$0xff] (!%p191_p9)   ;;  %v2392_v14 = vld [vmem:[%s3414_s1 + $0x234] ss:$8 sps:$4 sm:$0xff] (!%p191_p9)   ;;  %v2395_v16 = vld [vmem:[%s3414_s1 + $0x230] ss:$8 sps:$4 sm:$0xff] (!%p191_p9)  }
  0x13   : > { %v2396_v17 = vld [vmem:[%s3414_s1 + $0xc4] ss:$8 sps:$4 sm:$0xff] (!%p191_p9)   ;;  %v2400_v19 = vld [vmem:[%s3414_s1 + $0xc0] ss:$8 sps:$4 sm:$0xff] (!%p191_p9)   ;;  %v2402_v21 = vld [vmem:[%s3414_s1 + $0xd4] ss:$8 sps:$4 sm:$0xff] (!%p191_p9)  }
  0x14   : > { %368 = vmatpush1.bf16.msra.mxu1 (!%p191_p9), %v2382_v7  ;;  %1011 = vmatpush1.bf16.msra.mxu0 (!%p191_p9), %v2383_v8  ;;  %v2398_v18 = vld [vmem:[%s3414_s1 + $0x244] ss:$8 sps:$4 sm:$0xff] (!%p191_p9)   ;;  %v2401_v20 = vld [vmem:[%s3414_s1 + $0x240] ss:$8 sps:$4 sm:$0xff] (!%p191_p9)   ;;  %v2404_v22 = vld [vmem:[%s3414_s1 + $0x254] ss:$8 sps:$4 sm:$0xff] (!%p191_p9)  }
  0x15   : > { %369 = vmatprep.subr.bf16.mxu1 %v2384_v9  ;;  %1012 = vmatprep.subr.bf16.mxu0 %v2386_v10  ;;  %s218_s9 = scalar_select %p217_p10, %s2736_s22, 1  ;;  %v2406_v23 = vld [vmem:[%s3414_s1 + $0xd0] ss:$8 sps:$4 sm:$0xff]   ;;  %v2408_v25 = vld [vmem:[%s3414_s1 + $0xe4] ss:$8 sps:$4 sm:$0xff]   ;;  %vm1252_vm3 = vcmask 1045504  }
  0x16   : > { %v2407_v24 = vld [vmem:[%s3414_s1 + $0x250] ss:$8 sps:$4 sm:$0xff]   ;;  %v2410_v26 = vld [vmem:[%s3414_s1 + $0x264] ss:$8 sps:$4 sm:$0xff]   ;;  %v2412_v27 = vld [vmem:[%s3414_s1 + $0xe0] ss:$8 sps:$4 sm:$0xff]  }
  0x17   : > { %s2331_s23 = smul.u32 20, %s218_s9  ;;  %v2413_v28 = vld [vmem:[%s3414_s1 + $0x260] ss:$8 sps:$4 sm:$0xff]   ;;  %v2414_v29 = vld [vmem:[%s3414_s1 + $0xf4] ss:$8 sps:$4 sm:$0xff]   ;;  %vm745_vm4 = vcmask 1044480  }
  0x18   : > { %370 = vmatpush1.bf16.msra.mxu1 %v2388_v11  ;;  %1013 = vmatpush1.bf16.msra.mxu0 %v2389_v12  ;;  %v2416_v30 = vld [vmem:[%s3414_s1 + $0x274] ss:$8 sps:$4 sm:$0xff]   ;;  %v2418_v37 = vld [vmem:[%s3414_s1 + $0xf0] ss:$8 sps:$4 sm:$0xff]   ;;  %v2422_v46 = vld [vmem:[%s3414_s1 + $0x4] ss:$8 sps:$4 sm:$0xff]  }
  0x19   : > { %371 = vmatprep.subr.bf16.mxu1 %v2390_v13  ;;  %1014 = vmatprep.subr.bf16.mxu0 %v2392_v14  ;;  %s2848_s13 = scalar_lea.vmem %s3413_s0, %s2331_s23  ;;  %v2419_v41 = vld [vmem:[%s3414_s1 + $0x270] ss:$8 sps:$4 sm:$0xff]   ;;  %v2425_v49 = vld [vmem:[%s3414_s1 + $0x284] ss:$8 sps:$4 sm:$0xff]   ;;  %vm267_vm0 = vsmask.f32 7424 }
  0x1a   : > { %v223_v31 = vld [vmem:[%s2848_s13] sm:$0xf]  ;;  %v2864_v32 = vld [vmem:[%s2848_s13 + $0x4] sm:$0xf]  ;;  %v2870_v34 = vld [vmem:[%s2848_s13 + $0x8] ss:$0 sps:$4 sm:$0xff]  }
  0x1b   : > { %v2867_v33 = vcombine.low %v223_v31, %v2864_v32  ;;  %v715_v35 = vld [vmem:[%s2848_s13] sm:$0x8]  ;;  %v2874_v36 = vld [vmem:[%s2848_s13 + $0x4] sm:$0xf]  ;;  %v2880_v38 = vld [vmem:[%s2848_s13 + $0x8] sm:$0xf] }
  0x1c   : > { %372 = vmatpush1.bf16.msra.mxu1 %v2394_v15  ;;  %1015 = vmatpush1.bf16.msra.mxu0 %v2395_v16  ;;  %v2883_v39 = vcombine.low %v715_v35, %v2874_v36  ;;  %v2886_v40 = vld [vmem:[%s2848_s13 + $0xc] sm:$0x7]  ;;  %v276_v44 = vshll.u32 %v2870_v34, 16  ;;  %v2420_v56 = vld [vmem:[%s3414_s1] ss:$8 sps:$4 sm:$0xff]   ;;  %v280_v5 = vshrl.u32 %v2870_v34, 16 }
  0x1d   : > { %373 = vmatprep.subr.bf16.mxu1 %v2396_v17  ;;  %1016 = vmatprep.subr.bf16.mxu0 %v2398_v18  ;;  %v269_v42 = vshrl.u32 %v2867_v33, 16  ;;  %v271_v43 = vshll.u32 %v2867_v33, 16  ;;  %v2171_v45 = vcombine.low %v2880_v38, %v2886_v40  ;;  %v2423_v60 = vld [vmem:[%s3414_s1 + $0x280] ss:$8 sps:$4 sm:$0xff]   ;;  %vm908_vm1 = vsmask.f32 4352 }
  0x1e   : > { %v910_v47 = vshrl.u32 %v2883_v39, 16  ;;  %v913_v48 = vshll.u32 %v2883_v39, 16  ;;  %v278_v51 = vrot.slane %v276_v44, 1  ;;  %v2432_v0 = vld [vmem:[%s3414_s1 + $0x14] ss:$8 sps:$4 sm:$0xff]   ;;  %vm1758_vm6 = vcmask 1043456  }
  0x1f   : > { %v273_v50 = vrot.slane %v271_v43, 1  ;;  %v918_v52 = vshrl.u32 %v2171_v45, 16  ;;  %v921_v53 = vshll.u32 %v2171_v45, 16  ;;  %v2435_v1 = vld [vmem:[%s3414_s1 + $0x294] ss:$8 sps:$4 sm:$0xff]   ;;  %vm1779_vm7 = vcmask 1041408  }
  0x20   : > { %374 = vmatpush1.bf16.msra.mxu1 %v2400_v19  ;;  %1017 = vmatpush1.bf16.msra.mxu0 %v2401_v20  ;;  %v912_v54 = vrot.slane %v910_v47, 3  ;;  %v915_v55 = vrot.slane %v913_v48, 4  ;;  %v2430_v4 = vld [vmem:[%s3414_s1 + $0x10] ss:$8 sps:$4 sm:$0xff]   ;;  %v2438_v7 = vld [vmem:[%s3414_s1 + $0x24] ss:$8 sps:$4 sm:$0xff]   ;;  %v282_v10 = vor.u32 %v280_v5, %v278_v51 }
  0x21   : > { %375 = vmatprep.subr.bf16.mxu1 %v2402_v21  ;;  %1018 = vmatprep.subr.bf16.mxu0 %v2404_v22  ;;  %v274_v57 = vor.u32 %v273_v50, %v269_v42  ;;  %v920_v58 = vrot.slane %v918_v52, 3  ;;  %v923_v59 = vrot.slane %v921_v53, 4  ;;  %v2433_v6 = vld [vmem:[%s3414_s1 + $0x290] ss:$8 sps:$4 sm:$0xff]   ;;  %v2441_v8 = vld [vmem:[%s3414_s1 + $0x2a4] ss:$8 sps:$4 sm:$0xff]   ;;  %v2188_v42 = vcombine.low %v2874_v36, %v2880_v38 }
  0x22   : > { %v916_v61 = vor.u32 %v915_v55, %v912_v54  ;;  %v2436_v9 = vld [vmem:[%s3414_s1 + $0x20] ss:$8 sps:$4 sm:$0xff]   ;;  %v2444_v12 = vld [vmem:[%s3414_s1 + $0x34] ss:$8 sps:$4 sm:$0xff]   ;;  %v2442_v14 = vld [vmem:[%s3414_s1 + $0x30] ss:$8 sps:$4 sm:$0xff]  }
  0x23   : > { %v279_v62 = vsel %vm267_vm0, %v274_v57, %v278_v51  ;;  %v924_v63 = vor.u32 %v923_v59, %v920_v58  ;;  %v2439_v11 = vld [vmem:[%s3414_s1 + $0x2a0] ss:$8 sps:$4 sm:$0xff]   ;;  %v2447_v13 = vld [vmem:[%s3414_s1 + $0x2b4] ss:$8 sps:$4 sm:$0xff]   ;;  %v2445_v15 = vld [vmem:[%s3414_s1 + $0x2b0] ss:$8 sps:$4 sm:$0xff]  }
  0x24   : > { %376 = vmatpush1.bf16.msra.mxu1 %v2406_v23  ;;  %1019 = vmatpush1.bf16.msra.mxu0 %v2407_v24  ;;  %v2450_v16 = vld [vmem:[%s3414_s1 + $0x44] ss:$8 sps:$4 sm:$0xff]   ;;  %v2448_v18 = vld [vmem:[%s3414_s1 + $0x40] ss:$8 sps:$4 sm:$0xff]   ;;  %v2456_v20 = vld [vmem:[%s3414_s1 + $0x54] ss:$8 sps:$4 sm:$0xff]  }
  0x25   : > { %377 = vmatprep.subr.bf16.mxu1 %v2408_v25  ;;  %1020 = vmatprep.subr.bf16.mxu0 %v2410_v26  ;;  %v925_v3 = vsel %vm908_vm1, %v916_v61, %v924_v63  ;;  %v2453_v17 = vld [vmem:[%s3414_s1 + $0x2c4] ss:$8 sps:$4 sm:$0xff]   ;;  %v2451_v19 = vld [vmem:[%s3414_s1 + $0x2c0] ss:$8 sps:$4 sm:$0xff]   ;;  %v2459_v21 = vld [vmem:[%s3414_s1 + $0x2d4] ss:$8 sps:$4 sm:$0xff]  }
  0x26   : > { %v2454_v22 = vld [vmem:[%s3414_s1 + $0x50] ss:$8 sps:$4 sm:$0xff]   ;;  %v2462_v24 = vld [vmem:[%s3414_s1 + $0x64] ss:$8 sps:$4 sm:$0xff]   ;;  %v2460_v26 = vld [vmem:[%s3414_s1 + $0x60] ss:$8 sps:$4 sm:$0xff]  }
  0x27   : > { %v2457_v23 = vld [vmem:[%s3414_s1 + $0x2d0] ss:$8 sps:$4 sm:$0xff]   ;;  %v2465_v25 = vld [vmem:[%s3414_s1 + $0x2e4] ss:$8 sps:$4 sm:$0xff]   ;;  %v2475_v43 = vld [vmem:[%s3414_s1 + $0x300] ss:$8 sps:$4 sm:$0xff]  }
  0x28   : > { %378 = vmatpush1.bf16.msra.mxu1 %v2412_v27  ;;  %1021 = vmatpush1.bf16.msra.mxu0 %v2413_v28  ;;  %v2463_v27 = vld [vmem:[%s3414_s1 + $0x2e0] ss:$8 sps:$4 sm:$0xff]   ;;  %v2468_v28 = vld [vmem:[%s3414_s1 + $0x74] ss:$8 sps:$4 sm:$0xff]   ;;  %v2469_v31 = vld [vmem:[%s3414_s1 + $0x2f0] ss:$8 sps:$4 sm:$0xff]  }
  0x29   : > { %379 = vmatprep.subr.bf16.mxu1 %v2414_v29  ;;  %1022 = vmatprep.subr.bf16.mxu0 %v2416_v30  ;;  %v2471_v29 = vld [vmem:[%s3414_s1 + $0x2f4] ss:$8 sps:$4 sm:$0xff]   ;;  %v2466_v30 = vld [vmem:[%s3414_s1 + $0x70] ss:$8 sps:$4 sm:$0xff]   ;;  %v2474_v35 = vld [vmem:[%s3414_s1 + $0x104] ss:$8 sps:$4 sm:$0xff]  }
  0x2a   : > { %v2481_v44 = vld [vmem:[%s3414_s1 + $0x114] ss:$8 sps:$4 sm:$0xff]   ;;  %v2479_v36 = vld [vmem:[%s3414_s1 + $0x110] ss:$8 sps:$4 sm:$0xff]   ;;  %v552_v47 = vld [vmem:[%s2848_s13] sm:$0xe] }
  0x2b   : > { %v2484_v45 = vld [vmem:[%s3414_s1 + $0x314] ss:$8 sps:$4 sm:$0xff]   ;;  %v2487_v48 = vld [vmem:[%s3414_s1 + $0x124] ss:$8 sps:$4 sm:$0xff]   ;;  %v2485_v53 = vld [vmem:[%s3414_s1 + $0x120] ss:$8 sps:$4 sm:$0xff]  }
  0x2c   : > { %380 = vmatpush1.bf16.msra.mxu1 %v2418_v37  ;;  %1023 = vmatpush1.bf16.msra.mxu0 %v2419_v41  ;;  %v2477_v37 = vld [vmem:[%s3414_s1 + $0x304] ss:$8 sps:$4 sm:$0xff]   ;;  %v2472_v41 = vld [vmem:[%s3414_s1 + $0x100] ss:$8 sps:$4 sm:$0xff]   ;;  %v2493_v55 = vld [vmem:[%s3414_s1 + $0x134] ss:$8 sps:$4 sm:$0xff]  }
  0x2d   : > { %501 = vmatprep.subr.bf16.mxu1 %v2422_v46  ;;  %1165 = vmatprep.subr.bf16.mxu0 %v2425_v49  ;;  %v2482_v46 = vld [vmem:[%s3414_s1 + $0x310] ss:$8 sps:$4 sm:$0xff]   ;;  %v2136_v49 = vcombine.low %v552_v47, %v2864_v32  ;;  %v2490_v50 = vld [vmem:[%s3414_s1 + $0x324] ss:$8 sps:$4 sm:$0xff]   ;;  %v2189_v32 = vcombine.low %v2886_v40, %v2886_v40  ;;  %v2488_v54 = vld [vmem:[%s3414_s1 + $0x320] ss:$8 sps:$4 sm:$0xff]  }
  0x2e   : > { %v2497_v51 = vld [vmem:[%s2848_s13 + $0x8] ss:$0 sps:$4 sm:$0x77]   ;;  %v2496_v57 = vld [vmem:[%s3414_s1 + $0x334] ss:$8 sps:$4 sm:$0xff]   ;;  %vm2020_vm8 = vcmask 1040384  }
  0x2f   : > { %398 = vmatmul.mubr.bf16.vlgmr.msra.gmra.mrb[0].mxu1 %v279_v62  ;;  %1041 = vmatmul.mubr.bf16.vlgmr.msra.gmra.mrb[0].mxu0 %v925_v3  ;;  %v573_v52 = vrot.slane %v2136_v49, 1  ;;  %v2491_v40 = vld [vmem:[%s3414_s1 + $0x130] ss:$8 sps:$4 sm:$0xff]   ;;  %v2500_v59 = vld [vmem:[%s3414_s1 + $0x144] ss:$8 sps:$4 sm:$0xff]   ;;  %s215_s12 = sand.u32 1, %s2673_s19  }
  0x30   : > { %502 = vmatpush1.bf16.msra.mxu1 %v2420_v56  ;;  %1166 = vmatpush1.bf16.msra.mxu0 %v2423_v60  ;;  %v2494_v58 = vld [vmem:[%s3414_s1 + $0x330] ss:$8 sps:$4 sm:$0xff]   ;;  %v2503_v60 = vld [vmem:[%s3414_s1 + $0x344] ss:$8 sps:$4 sm:$0xff]   ;;  %v2498_v61 = vld [vmem:[%s3414_s1 + $0x140] ss:$8 sps:$4 sm:$0xff]  }
  0x31   : > { %503 = vmatprep.subr.bf16.mxu1 %v2432_v0  ;;  %1167 = vmatprep.subr.bf16.mxu0 %v2435_v1  ;;  %v2501_v62 = vld [vmem:[%s3414_s1 + $0x340] ss:$8 sps:$4 sm:$0xff]   ;;  %v2504_v0 = vld [vmem:[%s3414_s1 + $0x150] ss:$8 sps:$4 sm:$0xff]   ;;  %v2509_v1 = vld [vmem:[%s3414_s1 + $0x354] ss:$8 sps:$4 sm:$0xff]  }
  0x32   : > { %1050 = vmatprep.mubr.bf16.mxu0 %v2683_v2  ;;  %407 = vmatprep.mubr.bf16.mxu1 %v2683_v2  ;;  %v2507_v3 = vld [vmem:[%s3414_s1 + $0x350] ss:$8 sps:$4 sm:$0xff]   ;;  %v2516_v5 = vld [vmem:[%s3414_s1 + $0x364] ss:$8 sps:$4 sm:$0xff]   ;;  %v2559_v47 = vld [vmem:[%s3414_s1 + $0x1d4] ss:$8 sps:$4 sm:$0xff]  }
  0x33   : > { %v2562_v49 = vld [vmem:[%s3414_s1 + $0x3d4] ss:$8 sps:$4 sm:$0xff]   ;;  %vm1415_vm5 = vsmask.f32 5376  ;;  %s2274_s14 = sshll.u32 %s2736_s22, 4  ;;  %s216_s15 = scalar_lea.vmem [#allocation2], %s215_s12 }
  0x34   : > { %504 = vmatpush1.bf16.msra.mxu1 %v2430_v4  ;;  %1168 = vmatpush1.bf16.msra.mxu0 %v2433_v6  ;;  %v2513_v4 = vld [vmem:[%s3414_s1 + $0x164] ss:$8 sps:$4 sm:$0xff]   ;;  %s2041_s16 = sshll.u32 %s216_s15, 4  ;;  %s3371_s26 = scalar_lea.hbm %s3418_s5, %s2274_s14  ;;  %s3373_s16 = int_to_ptr.vmem [resolvable:$true] %s2041_s16 }
  0x35   : > { %505 = vmatprep.subr.bf16.mxu1 %v2438_v7  ;;  %1169 = vmatprep.subr.bf16.mxu0 %v2441_v8  ;;  %v1222_v6 = vld [vmem:[%s2848_s13 + $0x4] sm:$0xc]  ;;  %v3096_v7 = vld [vmem:[%s2848_s13 + $0x8] sm:$0xf]  ;;  %v3099_v8 = vld [vmem:[%s2848_s13 + $0xc] sm:$0xf] }
  0x36   : > { %s2029_s23 = scalar_lea.sflag [#allocation3], %s215_s12  ;;  %s2619_s30 = scalar_lea.vmem %s3373_s16, 16 }
  0x37   : > { %408 = vmatmul.mubr.bf16.gmra.mrb[4].mxu1 %v282_v10  ;;  %1051 = vmatmul.mubr.bf16.gmra.mrb[4].mxu0 %v924_v63  ;;  %v2506_v63 = vld [vmem:[%s3414_s1 + $0x154] ss:$8 sps:$4 sm:$0xff]   ;;  %v2511_v10 = vld [vmem:[%s3414_s1 + $0x160] ss:$8 sps:$4 sm:$0xff]   ;;  %p2620_p11 = scmp.ne.s32.totalorder %s3373_s16, %s2619_s30  ;;  %s2684_s22 = smov [#allocation2]  }
  0x38   : > { %506 = vmatpush1.bf16.msra.mxu1 %v2436_v9  ;;  %1170 = vmatpush1.bf16.msra.mxu0 %v2439_v11  ;;  %v1225_v9 = vld [vmem:[%s2848_s13 + $0x10] sm:$0x1]  ;;  %v2514_v11 = vld [vmem:[%s3414_s1 + $0x360] ss:$8 sps:$4 sm:$0xff]   ;;  %s2623_s6 = sshll.u32 %s2684_s22, 4  ;;  %s2624_s6 = int_to_ptr.vmem [resolvable:$false] %s2623_s6 }
  0x39   : > { %507 = vmatprep.subr.bf16.mxu1 %v2444_v12  ;;  %1171 = vmatprep.subr.bf16.mxu0 %v2447_v13  ;;  %v2519_v12 = vld [vmem:[%s3414_s1 + $0x174] ss:$8 sps:$4 sm:$0xff]   ;;  %v3112_v13 = vcombine.low %v1222_v6, %v3096_v7  ;;  %p2621_p12 = pnand %p2620_p11, %p2753_p5  ;;  %s2625_s7 = scalar_lea.vmem %s2624_s6, 32 }
  0x3a   : > { %533 = vmatprep.mubr.bf16.mxu1 %v2683_v2  ;;  %1197 = vmatprep.mubr.bf16.mxu0 %v2683_v2  ;;  %p2626_p0 = scmp.lt.s32.totalorder %s3373_s16, %s2624_s6  ;;  %p2627_p1 = scmp.lt.s32.totalorder %s2625_s7, %s2619_s30 }
  0x3b   : > { %p2622_p13 = pneg %p2621_p12 }
  0x3c   : > { %508 = vmatpush1.bf16.msra.mxu1 %v2442_v14  ;;  %1172 = vmatpush1.bf16.msra.mxu0 %v2445_v15  ;;  %v2207_v14 = vcombine.low %v3099_v8, %v1225_v9  ;;  %v2522_v15 = vld [vmem:[%s3414_s1 + $0x374] ss:$8 sps:$4 sm:$0xff]   ;;  %p2628_p2 = por %p2627_p1, %p2626_p0 }
  0x3d   : > { %509 = vmatprep.subr.bf16.mxu1 %v2450_v16  ;;  %1173 = vmatprep.subr.bf16.mxu0 %v2453_v17  ;;  %v2517_v16 = vld [vmem:[%s3414_s1 + $0x170] ss:$8 sps:$4 sm:$0xff]  }
  0x3e   : > { %v2520_v17 = vld [vmem:[%s3414_s1 + $0x370] ss:$8 sps:$4 sm:$0xff]   ;;  %p2629_p3 = pnand %p2628_p2, %p2622_p13 }
  0x40   : > { %510 = vmatpush1.bf16.msra.mxu1 %v2448_v18  ;;  %1174 = vmatpush1.bf16.msra.mxu0 %v2451_v19  ;;  %v2526_v18 = vld [vmem:[%s3414_s1 + $0x184] ss:$8 sps:$4 sm:$0xff]   ;;  %v1253_v19 = vrot.slane %v3112_v13, 2 }
  0x41   : > { %511 = vmatprep.subr.bf16.mxu1 %v2456_v20  ;;  %1175 = vmatprep.subr.bf16.mxu0 %v2459_v21  ;;  %v1254_v20 = vrot.slane %v2207_v14, 2  ;;  %v2529_v21 = vld [vmem:[%s3414_s1 + $0x384] ss:$8 sps:$4 sm:$0xff]   ;;  %v2582_v14 = vld [vmem:[%s3414_s1 + $0x420] ss:$8 sps:$4 sm:$0xff]  }
  0x44   : > { %512 = vmatpush1.bf16.msra.mxu1 %v2454_v22  ;;  %1176 = vmatpush1.bf16.msra.mxu0 %v2457_v23  ;;  %v2524_v22 = vld [vmem:[%s3414_s1 + $0x180] ss:$8 sps:$4 sm:$0xff]  }
  0x45   : > { %513 = vmatprep.subr.bf16.mxu1 %v2462_v24  ;;  %1177 = vmatprep.subr.bf16.mxu0 %v2465_v25  ;;  %v2527_v23 = vld [vmem:[%s3414_s1 + $0x380] ss:$8 sps:$4 sm:$0xff]   ;;  %v1255_v24 = vsel %vm1252_vm3, %v1253_v19, %v1254_v20  ;;  %v2535_v25 = vld [vmem:[%s3414_s1 + $0x194] ss:$8 sps:$4 sm:$0xff]  }
  0x46   : > { %v2593_v19 = vld [vmem:[%s3414_s1 + $0x454] ss:$8 sps:$4 sm:$0xff]  }
  0x48   : > { %514 = vmatpush1.bf16.msra.mxu1 %v2460_v26  ;;  %1178 = vmatpush1.bf16.msra.mxu0 %v2463_v27  ;;  %v2538_v26 = vld [vmem:[%s3414_s1 + $0x394] ss:$8 sps:$4 sm:$0xff]   ;;  %v2533_v27 = vld [vmem:[%s3414_s1 + $0x190] ss:$8 sps:$4 sm:$0xff]  }
  0x49   : > { %515 = vmatprep.subr.bf16.mxu1 %v2468_v28  ;;  %1179 = vmatprep.subr.bf16.mxu0 %v2471_v29  ;;  %v2536_v28 = vld [vmem:[%s3414_s1 + $0x390] ss:$8 sps:$4 sm:$0xff]   ;;  %v2541_v29 = vld [vmem:[%s3414_s1 + $0x1a4] ss:$8 sps:$4 sm:$0xff]  }
  0x4c   : > { %516 = vmatpush1.bf16.msra.mxu1 %v2466_v30  ;;  %1180 = vmatpush1.bf16.msra.mxu0 %v2469_v31  ;;  %v2539_v30 = vld [vmem:[%s3414_s1 + $0x1a0] ss:$8 sps:$4 sm:$0xff]   ;;  %v2544_v31 = vld [vmem:[%s3414_s1 + $0x3a4] ss:$8 sps:$4 sm:$0xff]  }
  0x4d   : > { %658 = vmatprep.subr.bf16.mxu1 %v2474_v35  ;;  %1338 = vmatprep.subr.bf16.mxu0 %v2477_v37  ;;  %v2542_v35 = vld [vmem:[%s3414_s1 + $0x3a0] ss:$8 sps:$4 sm:$0xff]   ;;  %v2547_v37 = vld [vmem:[%s3414_s1 + $0x1b4] ss:$8 sps:$4 sm:$0xff]  }
  0x4f   : > { %534 = vmatmul.mubr.bf16.vlgmr.msra.gmra.mrb[0].mxu1 %v2867_v33  ;;  %1198 = vmatmul.mubr.bf16.vlgmr.msra.gmra.mrb[0].mxu0 %v2188_v42  ;;  %v574_v33 = vrot.slane %v2870_v34, 1  ;;  %v2550_v42 = vld [vmem:[%s3414_s1 + $0x3b4] ss:$8 sps:$4 sm:$0xff]   ;;  %v2551_v34 = vld [vmem:[%s3414_s1 + $0x1c0] ss:$8 sps:$4 sm:$0xff]  }
  0x50   : > { %659 = vmatpush1.bf16.msra.mxu1 %v2472_v41  ;;  %1339 = vmatpush1.bf16.msra.mxu0 %v2475_v43  ;;  %v2545_v41 = vld [vmem:[%s3414_s1 + $0x1b0] ss:$8 sps:$4 sm:$0xff]  }
  0x51   : > { %660 = vmatprep.subr.bf16.mxu1 %v2481_v44  ;;  %1340 = vmatprep.subr.bf16.mxu0 %v2484_v45  ;;  %v3051_v56 = vsel %vm572_vm2, %v573_v52, %v574_v33  ;;  %v1395_v43 = vld [vmem:[%s2848_s13 + $0x10] sm:$0x3]  ;;  %v2553_v45 = vld [vmem:[%s3414_s1 + $0x1c4] ss:$8 sps:$4 sm:$0xff]  }
  0x52   : > { %543 = vmatprep.mubr.bf16.mxu1 %v2683_v2  ;;  %1207 = vmatprep.mubr.bf16.mxu0 %v2683_v2  ;;  %v2548_v44 = vld [vmem:[%s3414_s1 + $0x3b0] ss:$8 sps:$4 sm:$0xff]  }
  0x54   : > { %661 = vmatpush1.bf16.msra.mxu1 %v2479_v36  ;;  %1341 = vmatpush1.bf16.msra.mxu0 %v2482_v46  ;;  %v2556_v36 = vld [vmem:[%s3414_s1 + $0x3c4] ss:$8 sps:$4 sm:$0xff]   ;;  %v2554_v46 = vld [vmem:[%s3414_s1 + $0x3c0] ss:$8 sps:$4 sm:$0xff]  }
  0x55   : > { %662 = vmatprep.subr.bf16.mxu1 %v2487_v48  ;;  %1342 = vmatprep.subr.bf16.mxu0 %v2490_v50  ;;  %v3197_v48 = vcombine.low %v3099_v8, %v1395_v43  ;;  %v1417_v50 = vshrl.u32 %v3112_v13, 16  ;;  %v2578_v8 = vld [vmem:[%s3414_s1 + $0x404] ss:$8 sps:$4 sm:$0xff]  }
  0x57   : > { %544 = vmatmul.mubr.bf16.gmra.mrb[8].mxu1 %v2497_v51  ;;  %1208 = vmatmul.mubr.bf16.gmra.mrb[8].mxu0 %v2189_v32  ;;  %v1420_v51 = vshll.u32 %v3112_v13, 16  ;;  %v1425_v52 = vshrl.u32 %v3197_v48, 16  ;;  %v2560_v32 = vld [vmem:[%s3414_s1 + $0x3d0] ss:$8 sps:$4 sm:$0xff]   ;;  %v2584_v13 = vld [vmem:[%s3414_s1 + $0x424] ss:$8 sps:$4 sm:$0xff]  }
  0x58   : > { %663 = vmatpush1.bf16.msra.mxu1 %v2485_v53  ;;  %1343 = vmatpush1.bf16.msra.mxu0 %v2488_v54  ;;  %v1428_v53 = vshll.u32 %v3197_v48, 16  ;;  %v2565_v54 = vld [vmem:[%s3414_s1 + $0x1e4] ss:$8 sps:$4 sm:$0xff]  }
  0x59   : > { %664 = vmatprep.subr.bf16.mxu1 %v2493_v55  ;;  %1344 = vmatprep.subr.bf16.mxu0 %v2496_v57  ;;  %v718_v55 = vld [vmem:[%s2848_s13 + $0xc] sm:$0x3]  ;;  %v2563_v57 = vld [vmem:[%s3414_s1 + $0x1e0] ss:$8 sps:$4 sm:$0xff]  }
  0x5a   : > { %690 = vmatprep.mubr.bf16.mxu1 %v2683_v2  ;;  %1370 = vmatprep.mubr.bf16.mxu0 %v2683_v2 }
  0x5c   : > { %665 = vmatpush1.bf16.msra.mxu1 %v2491_v40  ;;  %1345 = vmatpush1.bf16.msra.mxu0 %v2494_v58  ;;  %v2154_v40 = vcombine.low %v2880_v38, %v718_v55  ;;  %v1419_v58 = vrot.slane %v1417_v50, 2  ;;  %v2569_v38 = vld [vmem:[%s3414_s1 + $0x1f0] ss:$8 sps:$4 sm:$0xff]   ;;  %v2611_v50 = vld [vmem:[%s3416_s3 + $0x68] sm:$0xff]  }
  0x5d   : > { %666 = vmatprep.subr.bf16.mxu1 %v2500_v59  ;;  %1346 = vmatprep.subr.bf16.mxu0 %v2503_v60  ;;  %v1422_v59 = vrot.slane %v1420_v51, 3  ;;  %v2566_v60 = vld [vmem:[%s3414_s1 + $0x3e0] ss:$8 sps:$4 sm:$0xff]  }
  0x5e   : > { %v2612_v51 = vld [vmem:[%s3416_s3 + $0x28] sm:$0xff]  }
  0x60   : > { %667 = vmatpush1.bf16.msra.mxu1 %v2498_v61  ;;  %1347 = vmatpush1.bf16.msra.mxu0 %v2501_v62  ;;  %v2571_v61 = vld [vmem:[%s3414_s1 + $0x1f4] ss:$8 sps:$4 sm:$0xff]   ;;  %v1427_v62 = vrot.slane %v1425_v52, 2 }
  0x61   : > { %668 = vmatprep.subr.bf16.mxu1 %v2506_v63  ;;  %1348 = vmatprep.subr.bf16.mxu0 %v2509_v1  ;;  %v1430_v63 = vrot.slane %v1428_v53, 3  ;;  %v746_v1 = vrot.slane %v2883_v39, 3  ;;  %v2576_v39 = vld [vmem:[%s3414_s1 + $0x400] ss:$8 sps:$4 sm:$0xff]   ;;  %v2613_v52 = vld [vmem:[%s3416_s3 + $0x70] sm:$0xff]  }
  0x62   : > { %v2614_v53 = vld [vmem:[%s3416_s3 + $0x30] sm:$0xff]  }
  0x63   : > { %v1431_v6 = vor.u32 %v1430_v63, %v1427_v62 }
  0x64   : > { %669 = vmatpush1.bf16.msra.mxu1 %v2504_v0  ;;  %1349 = vmatpush1.bf16.msra.mxu0 %v2507_v3  ;;  %v2574_v0 = vld [vmem:[%s3414_s1 + $0x3f4] ss:$8 sps:$4 sm:$0xff]   ;;  %v747_v3 = vrot.slane %v2154_v40, 3 }
  0x65   : > { %670 = vmatprep.subr.bf16.mxu1 %v2513_v4  ;;  %1350 = vmatprep.subr.bf16.mxu0 %v2516_v5  ;;  %v2572_v4 = vld [vmem:[%s3414_s1 + $0x3f0] ss:$8 sps:$4 sm:$0xff]   ;;  %v1423_v5 = vor.u32 %v1422_v59, %v1419_v58 }
  0x66   : > { %v748_v9 = vsel %vm745_vm4, %v746_v1, %v747_v3 }
  0x68   : > { %671 = vmatpush1.bf16.msra.mxu1 %v2511_v10  ;;  %1351 = vmatpush1.bf16.msra.mxu0 %v2514_v11  ;;  %v1432_v10 = vsel %vm1415_vm5, %v1423_v5, %v1431_v6  ;;  %v2581_v11 = vld [vmem:[%s3414_s1 + $0x414] ss:$8 sps:$4 sm:$0xff]  }
  0x69   : > { %672 = vmatprep.subr.bf16.mxu1 %v2519_v12  ;;  %1352 = vmatprep.subr.bf16.mxu0 %v2522_v15  ;;  %v2579_v12 = vld [vmem:[%s3414_s1 + $0x410] ss:$8 sps:$4 sm:$0xff]   ;;  %v2587_v15 = vld [vmem:[%s3414_s1 + $0x434] ss:$8 sps:$4 sm:$0xff]  }
  0x6c   : > { %673 = vmatpush1.bf16.msra.mxu1 %v2517_v16  ;;  %1353 = vmatpush1.bf16.msra.mxu0 %v2520_v17  ;;  %v2585_v16 = vld [vmem:[%s3414_s1 + $0x430] ss:$8 sps:$4 sm:$0xff]   ;;  %v2590_v17 = vld [vmem:[%s3414_s1 + $0x444] ss:$8 sps:$4 sm:$0xff]  }
  0x6d   : > { %831 = vmatprep.subr.bf16.mxu1 %v2526_v18  ;;  %1515 = vmatprep.subr.bf16.mxu0 %v2529_v21  ;;  %v2588_v18 = vld [vmem:[%s3414_s1 + $0x440] ss:$8 sps:$4 sm:$0xff]   ;;  %v2596_v21 = vld [vmem:[%s3414_s1 + $0x464] ss:$8 sps:$4 sm:$0xff]  }
  0x6f   : > { %691 = vmatmul.mubr.bf16.vlgmr.msra.gmra.mrb[0].mxu1 %v3051_v56  ;;  %1371 = vmatmul.mubr.bf16.vlgmr.msra.gmra.mrb[0].mxu0 %v1255_v24  ;;  %v2568_v56 = vld [vmem:[%s3414_s1 + $0x3e4] ss:$8 sps:$4 sm:$0xff]  }
  0x70   : > { %832 = vmatpush1.bf16.msra.mxu1 %v2524_v22  ;;  %1516 = vmatpush1.bf16.msra.mxu0 %v2527_v23  ;;  %v1572_v22 = vld [vmem:[%s2848_s13 + $0x4] sm:$0x8]  ;;  %v2594_v23 = vld [vmem:[%s3414_s1 + $0x460] ss:$8 sps:$4 sm:$0xff]  }
  0x71   : > { %833 = vmatprep.subr.bf16.mxu1 %v2535_v25  ;;  %1517 = vmatprep.subr.bf16.mxu0 %v2538_v26  ;;  %v2241_v24 = vcombine.low %v1572_v22, %v3096_v7  ;;  %v2599_v25 = vld [vmem:[%s3414_s1 + $0x474] ss:$8 sps:$4 sm:$0xff]   ;;  %v2597_v26 = vld [vmem:[%s3414_s1 + $0x470] ss:$8 sps:$4 sm:$0xff]   ;;  %v2601_v7 = vld [vmem:[%s3416_s3 + $0x40] sm:$0xff]  }
  0x72   : > { %700 = vmatprep.mubr.bf16.mxu1 %v2683_v2  ;;  %1380 = vmatprep.mubr.bf16.mxu0 %v2683_v2 }
  0x74   : > { %834 = vmatpush1.bf16.msra.mxu1 %v2533_v27  ;;  %1518 = vmatpush1.bf16.msra.mxu0 %v2536_v28  ;;  %v1592_v27 = vrot.slane %v2241_v24, 3  ;;  %v1593_v28 = vrot.slane %v3197_v48, 3  ;;  %v2608_v48 = vld [vmem:[%s3416_s3 + $0x18] sm:$0xff]  }
  0x75   : > { %835 = vmatprep.subr.bf16.mxu1 %v2541_v29  ;;  %1519 = vmatprep.subr.bf16.mxu0 %v2544_v31 }
  0x76   : > { %v1594_v29 = vsel %vm745_vm4, %v1592_v27, %v1593_v28 }
  0x77   : > { %701 = vmatmul.mubr.bf16.gmra.mrb[12].mxu1 %v574_v33  ;;  %1381 = vmatmul.mubr.bf16.gmra.mrb[12].mxu0 %v1254_v20  ;;  %v2557_v33 = vld [vmem:[%s3414_s1 + $0x1d0] ss:$8 sps:$4 sm:$0xff]  }
  0x78   : > { %836 = vmatpush1.bf16.msra.mxu1 %v2539_v30  ;;  %1520 = vmatpush1.bf16.msra.mxu0 %v2542_v35  ;;  %v2591_v20 = vld [vmem:[%s3414_s1 + $0x450] ss:$8 sps:$4 sm:$0xff]   ;;  %v2602_v30 = vld [vmem:[%s3416_s3] sm:$0xff]  }
  0x79   : > { %837 = vmatprep.subr.bf16.mxu1 %v2547_v37  ;;  %1521 = vmatprep.subr.bf16.mxu0 %v2550_v42 }
  0x7a   : > { %863 = vmatprep.mubr.bf16.mxu1 %v2683_v2  ;;  %1547 = vmatprep.mubr.bf16.mxu0 %v2683_v2 }
  0x7c   : > { %838 = vmatpush1.bf16.msra.mxu1 %v2545_v41  ;;  %1522 = vmatpush1.bf16.msra.mxu0 %v2548_v44 }
  0x7d   : > { %839 = vmatprep.subr.bf16.mxu1 %v2553_v45  ;;  %1523 = vmatprep.subr.bf16.mxu0 %v2556_v36  ;;  %v2603_v45 = vld [vmem:[%s3416_s3 + $0x48] sm:$0xff]  }
  0x7e   : > { %v2604_v36 = vld [vmem:[%s3416_s3 + $0x8] sm:$0xff]  }
  0x80   : > { %840 = vmatpush1.bf16.msra.mxu1 %v2551_v34  ;;  %1524 = vmatpush1.bf16.msra.mxu0 %v2554_v46  ;;  %v2605_v34 = vld [vmem:[%s3416_s3 + $0x50] sm:$0xff]  }
  0x81   : > { %841 = vmatprep.subr.bf16.mxu1 %v2559_v47  ;;  %1525 = vmatprep.subr.bf16.mxu0 %v2562_v49  ;;  %v2606_v46 = vld [vmem:[%s3416_s3 + $0x10] sm:$0xff]   ;;  %v2607_v47 = vld [vmem:[%s3416_s3 + $0x58] sm:$0xff]   ;;  %v2609_v49 = vld [vmem:[%s3416_s3 + $0x60] sm:$0xff]  }
  0x84   : > { %842 = vmatpush1.bf16.msra.mxu1 %v2557_v33  ;;  %1526 = vmatpush1.bf16.msra.mxu0 %v2560_v32  ;;  %v2610_v33 = vld [vmem:[%s3416_s3 + $0x20] sm:$0xff]   ;;  %v2615_v32 = vld [vmem:[%s3416_s3 + $0x78] sm:$0xff]  }
  0x85   : > { %843 = vmatprep.subr.bf16.mxu1 %v2565_v54  ;;  %1527 = vmatprep.subr.bf16.mxu0 %v2568_v56  ;;  %v2616_v54 = vld [vmem:[%s3416_s3 + $0x38] sm:$0xff]  }
  0x88   : > { %844 = vmatpush1.bf16.msra.mxu1 %v2563_v57  ;;  %1528 = vmatpush1.bf16.msra.mxu0 %v2566_v60 }
  0x89   : > { %845 = vmatprep.subr.bf16.mxu1 %v2571_v61  ;;  %1529 = vmatprep.subr.bf16.mxu0 %v2574_v0 }
  0x8c   : > { %846 = vmatpush1.bf16.msra.mxu1 %v2569_v38  ;;  %1530 = vmatpush1.bf16.msra.mxu0 %v2572_v4 }
  0x8d   : > { %1677 = vmatprep.subr.bf16.mxu0 %v2578_v8  ;;  %2277 = vmatprep.subr.bf16.mxu1 %v2601_v7 }
  0x8f   : > { %864 = vmatmul.mubr.bf16.vlgmr.msra.gmra.mrb[0].mxu1 %v748_v9  ;;  %1548 = vmatmul.mubr.bf16.vlgmr.msra.gmra.mrb[0].mxu0 %v1432_v10 }
  0x90   : > { %873 = vmatprep.mubr.bf16.mxu1 %v2683_v2  ;;  %1678 = vmatpush1.bf16.msra.mxu0 %v2576_v39 }
  0x91   : > { %1557 = vmatprep.mubr.bf16.mxu0 %v2683_v2  ;;  %1679 = vmatprep.subr.bf16.mxu0 %v2581_v11 }
  0x92   : > { %2278 = vmatpush3.bf16.msra.mxu1 %v2602_v30 }
  0x93   : > { %2279 = vmatprep.subr.bf16.mxu1 %v2603_v45 }
  0x94   : > { %1680 = vmatpush1.bf16.msra.mxu0 %v2579_v12 }
  0x95   : > { %1681 = vmatprep.subr.bf16.mxu0 %v2584_v13 }
  0x96   : > { %2280 = vmatpush3.bf16.msra.mxu1 %v2604_v36 }
  0x97   : > { %874 = vmatmul.mubr.bf16.gmra.mrb[16].mxu1 %v747_v3  ;;  %1558 = vmatmul.mubr.bf16.gmra.mrb[16].mxu0 %v1431_v6 }
  0x98   : > { %1682 = vmatpush1.bf16.msra.mxu0 %v2582_v14  ;;  %1709 = vmatprep.mubr.bf16.mxu0 %v2683_v2 }
  0x99   : > { %1683 = vmatprep.subr.bf16.mxu0 %v2587_v15  ;;  %2281 = vmatprep.subr.bf16.mxu1 %v2605_v34 }
  0x9a   : > { %2282 = vmatpush3.bf16.msra.mxu1 %v2606_v46 }
  0x9b   : > { %2283 = vmatprep.subr.bf16.mxu1 %v2607_v47 }
  0x9c   : > { %1684 = vmatpush1.bf16.msra.mxu0 %v2585_v16 }
  0x9d   : > { %1685 = vmatprep.subr.bf16.mxu0 %v2590_v17 }
  0x9e   : > { %2284 = vmatpush3.bf16.msra.mxu1 %v2608_v48 }
  0x9f   : > { %2285 = vmatprep.subr.bf16.mxu1 %v2609_v49 }
  0xa0   : > { %1686 = vmatpush1.bf16.msra.mxu0 %v2588_v18 }
  0xa1   : > { %1687 = vmatprep.subr.bf16.mxu0 %v2593_v19 }
  0xa2   : > { %2286 = vmatpush3.bf16.msra.mxu1 %v2610_v33 }
  0xa3   : > { %2287 = vmatprep.subr.bf16.mxu1 %v2611_v50 }
  0xa4   : > { %1688 = vmatpush1.bf16.msra.mxu0 %v2591_v20 }
  0xa5   : > { %1689 = vmatprep.subr.bf16.mxu0 %v2596_v21 }
  0xa6   : > { %2288 = vmatpush3.bf16.msra.mxu1 %v2612_v51 }
  0xa7   : > { %2289 = vmatprep.subr.bf16.mxu1 %v2613_v52 }
  0xa8   : > { %1690 = vmatpush1.bf16.msra.mxu0 %v2594_v23 }
  0xa9   : > { %1691 = vmatprep.subr.bf16.mxu0 %v2599_v25 }
  0xaa   : > { %2290 = vmatpush3.bf16.msra.mxu1 %v2614_v53 }
  0xab   : > { %2291 = vmatprep.subr.bf16.mxu1 %v2615_v32 }
  0xac   : > { %1692 = vmatpush1.bf16.msra.mxu0 %v2597_v26 }
  0xae   : > { %2292 = vmatpush3.bf16.msra.mxu1 %v2616_v54 }
  0xaf   : > { %1710 = vmatmul.mubr.bf16.vlgmr.msra.gmra.mrb[0].mxu0 %v1594_v29 }
  0xb0   : > { %1719 = vmatprep.mubr.bf16.mxu0 %v2683_v2 }
  0xb7   : > { %1720 = vmatmul.mubr.bf16.gmra.mrb[20].mxu0 %v1593_v28 }
 0x10a   : > { %v409_v31 = vpop.f32.mrb[4].mxu1  ;;  %v3302_v35 = vpop.f32.mrb[4].mxu0 }
 0x10b   : > { %v411_v37 = vpop.f32.mrb[5].mxu1  ;;  %v3304_v41 = vpop.f32.mrb[5].mxu0 }
 0x10c   : > { %v413_v42 = vpop.f32.mrb[6].mxu1  ;;  %v1056_v43 = vpop.f32.mrb[6].mxu0 }
 0x10d   : > { %v414_v2 = vpop.f32.mrb[7].mxu1  ;;  %v1057_v44 = vpop.f32.mrb[7].mxu0  ;;  %v1734_v43 = vld [vmem:[%s3415_s2] sm:$0x3] }
 0x12a   : > { %v545_v55 = vpop.f32.mrb[8].mxu1  ;;  %v1209_v40 = vpop.f32.mrb[8].mxu0 }
 0x12b   : > { %v546_v56 = vadd.f32 %v545_v55, %v409_v31  ;;  %v547_v57 = vpop.f32.mrb[9].mxu1  ;;  %v1211_v59 = vpop.f32.mrb[9].mxu0  ;;  %v1736_v31 = vlaneseq }
 0x12c   : > { %v548_v58 = vadd.f32 %v547_v57, %v411_v37  ;;  %v549_v60 = vpop.f32.mrb[10].mxu1  ;;  %v1213_v61 = vpop.f32.mrb[10].mxu0 }
 0x12d   : > { %v550_v62 = vpop.f32.mrb[11].mxu1  ;;  %v1214_v63 = vpop.f32.mrb[11].mxu0  ;;  %v1737_v37 = vshrl.u32 %v1736_v31, 7 }
 0x12f   : > { %v1738_v42 = vsub.s32 0, %v1737_v37  ;;  %v1742_v2 = vsub.s32 1, %v1737_v37 }
 0x131   : > { %v1743_v45 = vrot.slane %v1734_v43, %v1742_v2 }
 0x14a   : > { %v702_v0 = vpop.f32.mrb[12].mxu1  ;;  %v1382_v3 = vpop.f32.mrb[12].mxu0 }
 0x14b   : > { %v713_v38 = vadd.f32 %v702_v0, %v546_v56  ;;  %v704_v1 = vpop.f32.mrb[13].mxu1  ;;  %v1384_v5 = vpop.f32.mrb[13].mxu0 }
 0x14c   : > { %v714_v4 = vadd.f32 %v704_v1, %v548_v58  ;;  %v706_v6 = vpop.f32.mrb[14].mxu1  ;;  %v1386_v8 = vpop.f32.mrb[14].mxu0 }
 0x14d   : > { %v707_v9 = vpop.f32.mrb[15].mxu1  ;;  %v1387_v39 = vpop.f32.mrb[15].mxu0 }
 0x162   : > { %v865_v10 = vpop.f32.mrb[0].mxu1 }
 0x163   : > { %v867_v11 = vpop.f32.mrb[1].mxu1 }
 0x164   : > { %v869_v12 = vpop.f32.mrb[2].mxu1 }
 0x165   : > { %v871_v13 = vpop.f32.mrb[3].mxu1 }
 0x16a   : > { %v875_v14 = vpop.f32.mrb[16].mxu1  ;;  %v1559_v17 = vpop.f32.mrb[16].mxu0 }
 0x16b   : > { %v886_v15 = vadd.f32 %v875_v14, %v713_v38  ;;  %v877_v16 = vpop.f32.mrb[17].mxu1  ;;  %v1561_v19 = vpop.f32.mrb[17].mxu0 }
 0x16c   : > { %v887_v18 = vadd.f32 %v877_v16, %v714_v4  ;;  %v879_v20 = vpop.f32.mrb[18].mxu1  ;;  %v1563_v22 = vpop.f32.mrb[18].mxu0 }
 0x16d   : > { %v1063_v21 = vadd.f32 %v3302_v35, %v886_v15  ;;  %v880_v23 = vpop.f32.mrb[19].mxu1  ;;  %v1564_v25 = vpop.f32.mrb[19].mxu0  ;;  %v1739_v35 = vrot.slane %v1734_v43, %v1738_v42 }
 0x16e   : > { %v1064_v24 = vadd.f32 %v3304_v41, %v887_v18 }
 0x16f   : > { %v1220_v26 = vadd.f32 %v1209_v40, %v1063_v21 }
 0x170   : > { %v1221_v27 = vadd.f32 %v1211_v59, %v1064_v24 }
 0x171   : > { %v1393_v28 = vadd.f32 %v1382_v3, %v1220_v26 }
 0x172   : > { %v1394_v29 = vadd.f32 %v1384_v5, %v1221_v27 }
 0x173   : > { %v1570_v7 = vadd.f32 %v1559_v17, %v1393_v28 }
 0x174   : > { %v1571_v30 = vadd.f32 %v1561_v19, %v1394_v29 }
 0x182   : > { %v1711_v44 = vpop.f32.mrb[0].mxu0 }
 0x183   : > { %v2299_v36 = vadd.f32 %v1711_v44, %v865_v10  ;;  %v1713_v41 = vpop.f32.mrb[1].mxu0 }
 0x184   : > { %v2300_v34 = vadd.f32 %v1713_v41, %v867_v11  ;;  %v1715_v46 = vpop.f32.mrb[2].mxu0 }
 0x185   : > { %v1746_v47 = vadd.f32 %v2299_v36, %v1739_v35  ;;  %v2301_v48 = vadd.f32 %v1715_v46, %v869_v12  ;;  %v1717_v49 = vpop.f32.mrb[3].mxu0 }
 0x186   : > { %v1747_v33 = vadd.f32 %v2300_v34, %v1743_v45  ;;  %v2302_v50 = vadd.f32 %v1717_v49, %v871_v13 }
 0x187   : > { %v1752_v51 = vmax.f32 %v1746_v47, 0.0  ;;  %v1748_v52 = vadd.f32 %v2301_v48, %v1739_v35 }
 0x188   : > { %v1753_v53 = vmax.f32 %v1747_v33, 0.0  ;;  %v1749_v32 = vadd.f32 %v2302_v50, %v1743_v45 }
 0x189   : > { %v1759_v54 = vsel %vm1758_vm6, %v1752_v51, 0.0  ;;  %v1780_v55 = vrot.slane %v1752_v51, 6  ;;  %v1754_v56 = vmax.f32 %v1748_v52, 0.0 }
 0x18a   : > { %v1760_v57 = vrot.slane %v1759_v54, 4  ;;  %v1766_v40 = vsel %vm1758_vm6, %v1753_v53, 0.0  ;;  %v1783_v58 = vrot.slane %v1753_v53, 6  ;;  %v1755_v59 = vmax.f32 %v1749_v32, 0.0  ;;  %v1721_v60 = vpop.f32.mrb[20].mxu0 }
 0x18b   : > { %v1767_v61 = vrot.slane %v1766_v40, 4  ;;  %v1781_v62 = vrot.slane %v1754_v56, 6  ;;  %v1804_v63 = vrot.slane %v1754_v56, 4  ;;  %v1732_v0 = vadd.f32 %v1721_v60, %v1570_v7  ;;  %v1723_v38 = vpop.f32.mrb[21].mxu0 }
 0x18c   : > { %v1761_v1 = vadd.f32 %v1760_v57, %v1759_v54  ;;  %v1784_v3 = vrot.slane %v1755_v59, 6  ;;  %v1805_v4 = vrot.slane %v1755_v59, 4  ;;  %v1733_v5 = vadd.f32 %v1723_v38, %v1571_v30  ;;  %v1725_v6 = vpop.f32.mrb[22].mxu0 }
 0x18d   : > { %v1768_v8 = vadd.f32 %v1767_v61, %v1766_v40  ;;  %v1782_v9 = vsel %vm1779_vm7, %v1780_v55, %v1781_v62  ;;  %v1808_v39 = vsel %vm1758_vm6, %v1804_v63, 0.0  ;;  %v1750_v10 = vadd.f32 %v1739_v35, %v1732_v0  ;;  %v1726_v11 = vpop.f32.mrb[23].mxu0 }
 0x18e   : > { %v1762_v12 = vrot.slane %v1761_v1, 2  ;;  %v1788_v13 = vsel %vm1758_vm6, %v1782_v9, 0.0  ;;  %v1809_v14 = vrot.slane %v1808_v39, 4  ;;  %v1785_v15 = vsel %vm1779_vm7, %v1783_v58, %v1784_v3 }
 0x18f   : > { %v1769_v16 = vrot.slane %v1768_v8, 2  ;;  %v1789_v17 = vrot.slane %v1788_v13, 4  ;;  %v1795_v18 = vsel %vm1758_vm6, %v1785_v15, 0.0  ;;  %v1815_v19 = vsel %vm1758_vm6, %v1805_v4, 0.0 }
 0x190   : > { %v1810_v20 = vadd.f32 %v1809_v14, %v1808_v39  ;;  %v1796_v21 = vrot.slane %v1795_v18, 4  ;;  %v1816_v22 = vrot.slane %v1815_v19, 4  ;;  %v1763_v23 = vadd.f32 %v1762_v12, %v1761_v1  ;;  %v1882_v14 = vld [vmem:[%s3417_s4] sm:$0x1] }
 0x191   : > { %v1790_v24 = vadd.f32 %v1789_v17, %v1788_v13  ;;  %v1756_v25 = vmax.f32 %v1750_v10, 0.0  ;;  %v1751_v26 = vadd.f32 %v1743_v45, %v1733_v5  ;;  %v1770_v27 = vadd.f32 %v1769_v16, %v1768_v8 }
 0x192   : > { %v1811_v28 = vrot.slane %v1810_v20, 2  ;;  %v1797_v29 = vadd.f32 %v1796_v21, %v1795_v18  ;;  %v1817_v7 = vadd.f32 %v1816_v22, %v1815_v19  ;;  %v1764_v35 = vrot.slane %v1763_v23, 1 }
 0x193   : > { %v1791_v30 = vrot.slane %v1790_v24, 2  ;;  %v1826_v31 = vrot.slane %v1756_v25, 2  ;;  %v1757_v37 = vmax.f32 %v1751_v26, 0.0  ;;  %v1771_v34 = vrot.slane %v1770_v27, 1 }
 0x194   : > { %v1812_v42 = vadd.f32 %v1811_v28, %v1810_v20  ;;  %v1798_v43 = vrot.slane %v1797_v29, 2  ;;  %v1818_v2 = vrot.slane %v1817_v7, 2  ;;  %v1765_v53 = vadd.f32 %v1764_v35, %v1763_v23 }
 0x195   : > { %v1792_v44 = vadd.f32 %v1791_v30, %v1790_v24  ;;  %v1830_v36 = vsel %vm1758_vm6, %v1826_v31, 0.0  ;;  %v1827_v41 = vrot.slane %v1757_v37, 2  ;;  %v1772_v55 = vadd.f32 %v1771_v34, %v1770_v27 }
 0x196   : > { %v1819_v46 = vadd.f32 %v1818_v2, %v1817_v7  ;;  %v1831_v47 = vrot.slane %v1830_v36, 4  ;;  %v1799_v48 = vadd.f32 %v1798_v43, %v1797_v29  ;;  %v1813_v49 = vrot.slane %v1812_v42, 1 }
 0x197   : > { %v1793_v45 = vrot.slane %v1792_v44, 1  ;;  %v1837_v33 = vsel %vm1758_vm6, %v1827_v41, 0.0 }
 0x198   : > { %v1832_v50 = vadd.f32 %v1831_v47, %v1830_v36  ;;  %v1838_v51 = vrot.slane %v1837_v33, 4  ;;  %v1800_v52 = vrot.slane %v1799_v48, 1  ;;  %v1820_v54 = vrot.slane %v1819_v46, 1 }
 0x199   : > { %v1794_v32 = vadd.f32 %v1793_v45, %v1792_v44  ;;  %v1814_v59 = vadd.f32 %v1813_v49, %v1812_v42 }
 0x19a   : > { %v1833_v56 = vrot.slane %v1832_v50, 2  ;;  %v1839_v57 = vadd.f32 %v1838_v51, %v1837_v33  ;;  %v1801_v40 = vadd.f32 %v1800_v52, %v1799_v48  ;;  %v1821_v63 = vadd.f32 %v1820_v54, %v1819_v46 }
 0x19b   : > { %v1802_v58 = vadd.f32 %v1794_v32, %v1765_v53 }
 0x19c   : > { %v1834_v60 = vadd.f32 %v1833_v56, %v1832_v50  ;;  %v1840_v61 = vrot.slane %v1839_v57, 2  ;;  %v1803_v62 = vadd.f32 %v1801_v40, %v1772_v55 }
 0x19d   : > { %v1822_v0 = vadd.f32 %v1814_v59, %v1802_v58 }
 0x19e   : > { %v1835_v38 = vrot.slane %v1834_v60, 1  ;;  %v1841_v1 = vadd.f32 %v1840_v61, %v1839_v57  ;;  %v1823_v3 = vadd.f32 %v1821_v63, %v1803_v62 }
 0x1a0   : > { %v1836_v4 = vadd.f32 %v1835_v38, %v1834_v60  ;;  %v1842_v5 = vrot.slane %v1841_v1, 1 }
 0x1a2   : > { %v1844_v6 = vadd.f32 %v1836_v4, %v1822_v0  ;;  %v1843_v8 = vadd.f32 %v1842_v5, %v1841_v1 }
 0x1a4   : > { %v1845_v9 = vadd.f32 %v1843_v8, %v1823_v3  ;;  %v1846_v39 = vmul.f32 0.0625, %v1844_v6 }
 0x1a6   : > { %v1847_v10 = vmul.f32 0.0625, %v1845_v9  ;;  %v1848_v12 = vpack.c.bf16 %v1846_v39, %v1846_v39 }
 0x1a8   : > { %v1849_v11 = vpack.c.bf16 %v1847_v10, %v1847_v10 }
 0x1aa   : > { %2011 = vmatprep.mubr.bf16.mxu1 %v1849_v11 }
 0x1ab   : > { %2012 = vmatmul.mubr.bf16.vlgmr.msra.gmra.mrb[20].mxu1 %v1848_v12 }
 0x27e   : > { %v2293_v13 = vpop.f32.mrb[20].mxu1 }
 0x27f   : > { %v2294_v15 = vpop.f32.mrb[21].mxu1 }
 0x280   : > { %v2295_v16 = vadd.f32 %v2294_v15, %v2293_v13  ;;  %v2296_v17 = vpop.f32.mrb[22].mxu1 }
 0x281   : > { %v2297_v18 = vpop.f32.mrb[23].mxu1 }
 0x282   : > { %v2014_v19 = vadd.f32 %v2295_v16, %v1882_v14 }
 0x284   : > { %v2019_v20 = vmul.f32 %v2014_v19, %v2014_v19 }
 0x286   : > { %v2021_v21 = vsel %vm2020_vm8, %v2019_v20, 0.0 }
 0x287   : > { %2022 = vadd.xlane.f32.xlu0 %v2021_v21 }
 0x314   : > { %v2023_v22 = vpop.xlane.xlu0 %2022 }
 0x315   : > { %v2024_v23 = vadd.f32 1e-24, %v2023_v22 }
 0x317   : > { %2617 = vrsqrt.f32 %v2024_v23 }
 0x321   : > { %v2618_v24 = vpop.eup %2617 }
 0x322   : > { %v2026_v25 = vmul.f32 %v2618_v24, %v2014_v19 }
 0x324   : > { %2027 = vst [vmem:[%s216_s15] sm:$0x1] %v2026_v25 }
 0x325   : > { %2632 = shalt.err (!%p2629_p3)
}
 0x326   : > { %s2633_s8 = scalar_lea.hbm %s3371_s26, 16  ;;  %s2637_s11 = scalar_lea.hbm %s3418_s5, 32 }
 0x327   : > { %p2634_p4 = scmp.ne.s32.totalorder %s3371_s26, %s2633_s8  ;;  %p2638_p9 = scmp.lt.u32.totalorder %s3371_s26, %s3418_s5 }
 0x328   : > { %p2639_p10 = scmp.lt.u32.totalorder %s2637_s11, %s2633_s8  ;;  %p2641_p12 = scmp.lt.u32.totalorder %s2633_s8, %s3371_s26 }
 0x329   : > { %p2635_p7 = pnand %p2634_p4, %p2753_p5 }
 0x32a   : > { %p2640_p11 = por %p2639_p10, %p2638_p9 }
 0x32b   : > { %p2636_p8 = pneg %p2635_p7 }
 0x32c   : > { %p2642_p13 = por %p2641_p12, %p2640_p11 }
 0x32e   : > { %p2643_p0 = pnand %p2642_p13, %p2636_p8 }
 0x330   : > { %2646 = shalt.err (!%p2643_p0)
}
 0x331   : > { %2332 = dma.vmem_to_hbm [thread:$0]  (%p2753_p5), %s3373_s16, 16, %s3371_s26, %s2029_s23  }
 0x332 PF: > { %p2338_p1 = scmp.ge.s32.totalorder %s2681_s21, 2  ;;  %s2053_s14 = sand.u32 1, %s2669_s18  }
 0x333   : > { %s2054_s15 = scalar_lea.sflag [#allocation3], %s2053_s14 }
 0x334   : > { %p2335_p2 = pnand %p2338_p1, %p2757_p6 }
 0x336   : > { %2664 = dma.done.wait (!%p2335_p2), %s2054_s15, 16  }
 0x337   : > { %2666 = vsyncadd (!%p2335_p2), %s2054_s15, 4294967280  ;;  %p15_p3 = scmp.ge.s32.totalorder %s2740_s24, 4   ;;  %s3421_s18 = smov %s2673_s19 }
 0x338   : > { %s3422_s19 = smov %s2677_s20  ;;  %s3423_s20 = smov %s2751_s27 }
 0x339   : > { %s3424_s21 = smov %s2740_s24  ;;  %17 = sbr.rel (!%p15_p3) target bundleno = 3 (0x3), region = 75 }
 0x340   :  { %2058 = vsyncpa [#allocation3], 1 }
 0x341   :  { %2060 = vsyncpa [#allocation3 + $0x1], 1 }

// kernel: embedding_net_forward.4
= control target key start
LH: loop header
LB: loop body
LE: loop exit
PB: predicated region body
PF: predicated region fallthrough
CT: control target
= control target key end

     0   :  { %s4600_s12 = smov 0   ;;  %s5856_s0 = inlined_call_operand.vmem [shape: bf16[2,225,128], index: 0, kind: input, shape index: {}]   ;;  %s5857_s1 = inlined_call_operand.vmem [shape: bf16[1152,128], index: 1, kind: input, shape index: {}]   ;;  %s5858_s2 = inlined_call_operand.vmem [shape: f32[1,128], index: 2, kind: input, shape index: {}]   ;;  %s5859_s3 = inlined_call_operand.vmem [shape: bf16[2,36,128], index: 3, kind: output, shape index: {}]  }
   0x1 LB: > { %s3445_s13 = sadd.s32 4294967295, %s4576_s12   ;;  %p3449_p0 = scmp.ge.s32.totalorder %s4576_s12, 1  ;;  %s4576_s12 = sphi %s4600_s12, %s13_s12  }
   0x2   : > { %p137_p1 = scmp.lt.s32.totalorder %s4576_s12, 3 }
   0x4   : > { %p138_p2 = pnand %p3449_p0, %p137_p1 }
   0x5   : > { %v4431_v0 = vld [vmem:[%s5857_s1 + $0x40] sm:$0xff] (!%p138_p2)   ;;  %v4578_v1 = vmov (!%p138_p2), 0.0   ;;  %v4432_v2 = vld [vmem:[%s5857_s1 + $0x48] sm:$0xff] (!%p138_p2)   ;;  %p161_p3 = scmp.lt.s32.totalorder (!%p138_p2), %s3445_s13, 1  ;;  %vm4579_vm0 = vmmov (!%p138_p2), 0   ;;  %v4433_v3 = vld [vmem:[%s5857_s1 + $0x50] sm:$0xff] (!%p138_p2)  }
   0x6   : > { %141 = sbr.rel (%p138_p2) target bundleno = 731 (0x2db), region = 32  ;;  %3791 = vmatprep.subr.bf16.mxu0 (!%p138_p2), %v4578_v1  ;;  %4403 = vmatprep.subr.bf16.mxu1 (!%p138_p2), %v4578_v1  ;;  %v4434_v4 = vld [vmem:[%s5857_s1 + $0x58] sm:$0xff] (!%p138_p2)   ;;  %v4435_v8 = vld [vmem:[%s5857_s1 + $0x60] sm:$0xff] (!%p138_p2)   ;;  %v4436_v11 = vld [vmem:[%s5857_s1 + $0x68] sm:$0xff] (!%p138_p2)   ;;  %vm292_vm1 = vsmask.f32 (!%p138_p2), 7424 }
   0x7   : > { %3792 = vmatpush3.bf16.msra.mxu0 (!%p138_p2), %v4431_v0  ;;  %4411 = vmatpush3.bf16.msra.mxu1 (!%p138_p2), %v4431_v0  ;;  %v4437_v15 = vld [vmem:[%s5857_s1 + $0x70] sm:$0xff] (!%p138_p2)   ;;  %v4438_v22 = vld [vmem:[%s5857_s1 + $0x78] sm:$0xff] (!%p138_p2)   ;;  %v4443_v29 = vld [vmem:[%s5857_s1 + $0x80] sm:$0xff] (!%p138_p2)   ;;  %vm813_vm2 = vcmask (!%p138_p2), 1046528   ;;  %vm1165_vm3 = vsmask.f32 (!%p138_p2), 4352 }
   0x8   : > { %3793 = vmatprep.subr.bf16.mxu0 (!%p138_p2), %v4578_v1  ;;  %4404 = vmatprep.subr.bf16.mxu1 (!%p138_p2), %v4578_v1  ;;  %v4444_v36 = vld [vmem:[%s5857_s1] sm:$0xff] (!%p138_p2)   ;;  %v4447_v38 = vld [vmem:[%s5857_s1 + $0x88] sm:$0xff] (!%p138_p2)   ;;  %v4449_v45 = vld [vmem:[%s5857_s1 + $0x90] sm:$0xff] (!%p138_p2)   ;;  %vm2274_vm4 = vcmask (!%p138_p2), 1044480  }
   0x9   : > { %3807 = vmatprep.mubr.msk.bf16.mxu0 (!%p138_p2), %vm4579_vm0, %v4578_v1  ;;  %3835 = vmatprep.mubr.msk.bf16.mxu1 (!%p138_p2), %vm4579_vm0, %v4578_v1  ;;  %v4448_v44 = vld [vmem:[%s5857_s1 + $0x8] sm:$0xff] (!%p138_p2)   ;;  %v4452_v52 = vld [vmem:[%s5857_s1 + $0x10] sm:$0xff] (!%p138_p2)   ;;  %v4453_v54 = vld [vmem:[%s5857_s1 + $0x98] sm:$0xff] (!%p138_p2)  }
   0xa   : > { %v4456_v60 = vld [vmem:[%s5857_s1 + $0x18] sm:$0xff] (!%p138_p2)  }
   0xb   : > { %3794 = vmatpush3.bf16.msra.mxu0 (!%p138_p2), %v4432_v2  ;;  %4412 = vmatpush3.bf16.msra.mxu1 (!%p138_p2), %v4432_v2 }
   0xc   : > { %3795 = vmatprep.subr.bf16.mxu0 (!%p138_p2), %v4578_v1  ;;  %4405 = vmatprep.subr.bf16.mxu1 (!%p138_p2), %v4578_v1 }
   0xd   : > { %s5861_s13 = smov (!%p161_p3, %s3445_s13), 1 }
   0xe   : > { %s4419_s20 = smul.u32 116, %s5861_s13 }
   0xf   : > { %3796 = vmatpush3.bf16.msra.mxu0 %v4433_v3  ;;  %4413 = vmatpush3.bf16.msra.mxu1 %v4433_v3  ;;  %s4420_s18 = smul.u32 20, %s5861_s13 }
  0x10   : > { %s4633_s23 = scalar_lea.vmem %s5856_s0, %s4419_s20  ;;  %3797 = vmatprep.subr.bf16.mxu0 %v4578_v1  ;;  %4406 = vmatprep.subr.bf16.mxu1 %v4578_v1 }
  0x11   : > { %v172_v5 = vld [vmem:[%s4633_s23] sm:$0xf]  ;;  %v4640_v6 = vld [vmem:[%s4633_s23 + $0x4] sm:$0xf]  ;;  %v4651_v9 = vld [vmem:[%s4633_s23 + $0x38] sm:$0xff]   ;;  %s5811_s13 = scalar_lea.vmem %s5859_s3, %s4420_s18 }
  0x12   : > { %v4645_v7 = vcombine.low %v172_v5, %v4640_v6  ;;  %v4656_v10 = vld [vmem:[%s4633_s23 + $0x8] sm:$0xff]   ;;  %v4663_v13 = vld [vmem:[%s4633_s23 + $0x40] sm:$0xff]   ;;  %v349_v14 = vshll.u32 %v4651_v9, 16  ;;  %v353_v19 = vshrl.u32 %v4651_v9, 16  ;;  %v4683_v23 = vld [vmem:[%s4633_s23 + $0x10] sm:$0xff]  }
  0x13   : > { %3798 = vmatpush3.bf16.msra.mxu0 %v4434_v4  ;;  %4414 = vmatpush3.bf16.msra.mxu1 %v4434_v4  ;;  %v301_v17 = vshll.u32 %v4656_v10, 16  ;;  %v357_v21 = vshll.u32 %v4663_v13, 16  ;;  %v4686_v24 = vld [vmem:[%s4633_s23 + $0x48] sm:$0xff]   ;;  %v305_v30 = vshrl.u32 %v4656_v10, 16  ;;  %v309_v31 = vshll.u32 %v4683_v23, 16  ;;  %v4709_v39 = vld [vmem:[%s4633_s23 + $0x18] sm:$0xff]  }
  0x14   : > { %3799 = vmatprep.subr.bf16.mxu0 %v4578_v1  ;;  %4407 = vmatprep.subr.bf16.mxu1 %v4578_v1  ;;  %v296_v12 = vshll.u32 %v4645_v7, 16  ;;  %v294_v16 = vshrl.u32 %v4645_v7, 16  ;;  %v4674_v20 = vrot.slane %v349_v14, 1  ;;  %v361_v32 = vshrl.u32 %v4663_v13, 16  ;;  %v4714_v43 = vld [vmem:[%s4633_s23 + $0x50] sm:$0xff]   ;;  %v4741_v55 = vld [vmem:[%s4633_s23 + $0x20] sm:$0xff]  }
  0x15   : > { %v303_v26 = vrot.slane %v301_v17, 1  ;;  %v359_v28 = vrot.slane %v357_v21, 1  ;;  %v365_v33 = vshll.u32 %v4686_v24, 16  ;;  %v311_v37 = vrot.slane %v309_v31, 1  ;;  %v4748_v59 = vld [vmem:[%s4633_s23 + $0x58] sm:$0xff]   ;;  %v4457_v4 = vld [vmem:[%s5857_s1 + $0xa0] sm:$0xff]  }
  0x16   : > { %v298_v18 = vrot.slane %v296_v12, 1  ;;  %v355_v27 = vor.u32 %v353_v19, %v4674_v20  ;;  %v313_v46 = vshrl.u32 %v4683_v23, 16  ;;  %v317_v47 = vshll.u32 %v4709_v39, 16  ;;  %v4458_v5 = vld [vmem:[%s5857_s1 + $0x20] sm:$0xff]   ;;  %v4773_v12 = vld [vmem:[%s4633_s23 + $0x28] sm:$0xff]  }
  0x17   : > { %3800 = vmatpush3.bf16.msra.mxu0 %v4435_v8  ;;  %4415 = vmatpush3.bf16.msra.mxu1 %v4435_v8  ;;  %v307_v40 = vor.u32 %v305_v30, %v303_v26  ;;  %v363_v41 = vor.u32 %v361_v32, %v359_v28  ;;  %v367_v42 = vrot.slane %v365_v33, 1  ;;  %v369_v50 = vshrl.u32 %v4686_v24, 16  ;;  %v4770_v8 = vld [vmem:[%s4633_s23 + $0x60] ss:$0 sps:$4 sm:$0x11]   ;;  %v4461_v17 = vld [vmem:[%s5857_s1 + $0xa8] sm:$0xff]  }
  0x18   : > { %3801 = vmatprep.subr.bf16.mxu0 %v4578_v1  ;;  %4408 = vmatprep.subr.bf16.mxu1 %v4578_v1  ;;  %v299_v25 = vor.u32 %v298_v18, %v294_v16  ;;  %v360_v35 = vsel %vm292_vm1, %v355_v27, %v359_v28  ;;  %v373_v51 = vshll.u32 %v4714_v43, 16  ;;  %v319_v53 = vrot.slane %v317_v47, 1  ;;  %v4462_v18 = vld [vmem:[%s5857_s1 + $0x28] sm:$0xff]   ;;  %v4464_v28 = vld [vmem:[%s5857_s1 + $0x30] sm:$0xff]  }
  0x19   : > { %v312_v48 = vsel %vm292_vm1, %v307_v40, %v311_v37  ;;  %v368_v49 = vsel %vm292_vm1, %v363_v41, %v367_v42  ;;  %v315_v56 = vor.u32 %v313_v46, %v311_v37  ;;  %v371_v57 = vor.u32 %v369_v50, %v367_v42 }
  0x1a   : > { %v304_v34 = vsel %vm292_vm1, %v299_v25, %v303_v26  ;;  %v375_v58 = vrot.slane %v373_v51, 1  ;;  %v321_v61 = vshrl.u32 %v4709_v39, 16  ;;  %v325_v62 = vshll.u32 %v4741_v55, 16 }
  0x1b   : > { %3802 = vmatpush3.bf16.msra.mxu0 %v4436_v11  ;;  %4416 = vmatpush3.bf16.msra.mxu1 %v4436_v11  ;;  %v377_v63 = vshrl.u32 %v4714_v43, 16  ;;  %v320_v0 = vsel %vm292_vm1, %v315_v56, %v319_v53  ;;  %v381_v3 = vshll.u32 %v4748_v59, 16  ;;  %v329_v19 = vshrl.u32 %v4741_v55, 16  ;;  %v4473_v56 = vld [vmem:[%s5857_s1 + $0xd0] sm:$0xff]  }
  0x1c   : > { %3803 = vmatprep.subr.bf16.mxu0 %v4578_v1  ;;  %4409 = vmatprep.subr.bf16.mxu1 %v4578_v1  ;;  %v376_v2 = vsel %vm292_vm1, %v371_v57, %v375_v58  ;;  %v327_v11 = vrot.slane %v325_v62, 1  ;;  %v323_v14 = vor.u32 %v321_v61, %v319_v53  ;;  %v333_v21 = vshll.u32 %v4773_v12, 16  ;;  %v4474_v61 = vld [vmem:[%s5857_s1 + $0x110] sm:$0xff]   ;;  %v4477_v62 = vld [vmem:[%s5857_s1 + $0xe0] sm:$0xff]  }
  0x1d   : > { %v383_v16 = vrot.slane %v381_v3, 1  ;;  %v385_v26 = vshrl.u32 %v4748_v59, 16  ;;  %v389_v27 = vshll.u32 %v4770_v8, 16  ;;  %v337_v40 = vshrl.u32 %v4773_v12, 16  ;;  %v4478_v3 = vld [vmem:[%s5857_s1 + $0x120] sm:$0xff]  }
  0x1e   : > { %v331_v30 = vor.u32 %v329_v19, %v327_v11  ;;  %v335_v31 = vrot.slane %v333_v21, 1  ;;  %v815_v53 = vrot.slane %v4656_v10, 1  ;;  %v817_v57 = vrot.slane %v4683_v23, 1 }
  0x1f   : > { %3804 = vmatpush3.bf16.msra.mxu0 %v4437_v15  ;;  %4417 = vmatpush3.bf16.msra.mxu1 %v4437_v15  ;;  %v379_v15 = vor.u32 %v377_v63, %v375_v58  ;;  %v387_v32 = vor.u32 %v385_v26, %v383_v16  ;;  %v391_v33 = vrot.slane %v389_v27, 1  ;;  %v4472_v58 = vld [vmem:[%s5857_s1 + $0x108] sm:$0xff]   ;;  %v819_v63 = vrot.slane %v4709_v39, 1 }
  0x20   : > { %3805 = vmatprep.subr.bf16.mxu0 %v4578_v1  ;;  %4410 = vmatprep.subr.bf16.mxu1 %v4578_v1  ;;  %v336_v37 = vsel %vm292_vm1, %v331_v30, %v335_v31  ;;  %v339_v42 = vor.u32 %v337_v40, %v335_v31  ;;  %v4487_v31 = vld [vmem:[%s4633_s23 + $0xc] sm:$0xff]  }
  0x21   : > { %v384_v25 = vsel %vm292_vm1, %v379_v15, %v383_v16  ;;  %v4482_v15 = vld [vmem:[%s5857_s1 + $0x130] sm:$0xff]   ;;  %v823_v16 = vrot.slane %v4773_v12, 1 }
  0x23   : > { %3806 = vmatpush3.bf16.msra.mxu0 %v4438_v22  ;;  %4418 = vmatpush3.bf16.msra.mxu1 %v4438_v22  ;;  %v328_v22 = vsel %vm292_vm1, %v323_v14, %v327_v11  ;;  %v4480_v11 = vld [vmem:[%s5857_s1 + $0x128] sm:$0xff]  }
  0x24   : > { %3927 = vmatprep.subr.bf16.mxu0 %v4578_v1  ;;  %3859 = vmatprep.subr.bf16.mxu1 %v4578_v1 }
  0x26   : > { %3808 = vmatmul.mubr.bf16.vlgmr.msra.gmra.mrb[0].mxu0 %v304_v34  ;;  %3836 = vmatmul.mubr.bf16.vlgmr.msra.gmra.mrb[0].mxu1 %v360_v35  ;;  %v4806_v34 = vld [vmem:[%s4633_s23 + $0x30] sm:$0xff]   ;;  %v4466_v35 = vld [vmem:[%s5857_s1 + $0x38] sm:$0xff]  }
  0x27   : > { %3928 = vmatpush3.bf16.msra.mxu0 %v4443_v29  ;;  %3811 = vmatprep.mubr.msk.bf16.mxu0 %vm4579_vm0, %v4578_v1  ;;  %v4465_v29 = vld [vmem:[%s5857_s1 + $0xb0] sm:$0xff]   ;;  %v341_v41 = vshll.u32 %v4806_v34, 16  ;;  %v345_v46 = vshrl.u32 %v4806_v34, 16 }
  0x28   : > { %3839 = vmatprep.mubr.msk.bf16.mxu1 %vm4579_vm0, %v4578_v1  ;;  %3860 = vmatpush3.bf16.msra.mxu1 %v4444_v36  ;;  %v4467_v36 = vld [vmem:[%s5857_s1 + $0xb8] sm:$0xff]  }
  0x29   : > { %3929 = vmatprep.subr.bf16.mxu0 %v4578_v1  ;;  %3861 = vmatprep.subr.bf16.mxu1 %v4578_v1 }
  0x2b   : > { %3930 = vmatpush3.bf16.msra.mxu0 %v4447_v38  ;;  %v392_v38 = vsel %vm292_vm1, %v387_v32, %v391_v33  ;;  %v4982_v32 = vld [vmem:[%s4633_s23 + $0x18] sm:$0xff]  }
  0x2c   : > { %3862 = vmatpush3.bf16.msra.mxu1 %v4448_v44  ;;  %3931 = vmatprep.subr.bf16.mxu0 %v4578_v1  ;;  %v343_v44 = vrot.slane %v341_v41, 1  ;;  %v1862_v33 = vshll.u32 %v4982_v32, 16  ;;  %v1866_v41 = vshrl.u32 %v4982_v32, 16 }
  0x2d   : > { %3863 = vmatprep.subr.bf16.mxu1 %v4578_v1 }
  0x2e   : > { %3812 = vmatmul.mubr.bf16.gmra.mrb[4].mxu0 %v312_v48  ;;  %3840 = vmatmul.mubr.bf16.gmra.mrb[4].mxu1 %v368_v49  ;;  %v344_v47 = vsel %vm292_vm1, %v339_v42, %v343_v44  ;;  %v347_v48 = vor.u32 %v345_v46, %v343_v44  ;;  %v789_v49 = vld [vmem:[%s4633_s23] sm:$0xe]  ;;  %v4993_v40 = vrot.slane %v1862_v33, 1  ;;  %v4489_v46 = vld [vmem:[%s4633_s23 + $0x14] sm:$0xff]  }
  0x2f   : > { %3815 = vmatprep.mubr.msk.bf16.mxu0 %vm4579_vm0, %v4578_v1  ;;  %3843 = vmatprep.mubr.msk.bf16.mxu1 %vm4579_vm0, %v4578_v1  ;;  %v3481_v51 = vcombine.low %v789_v49, %v4640_v6  ;;  %v4471_v6 = vld [vmem:[%s5857_s1 + $0xc8] sm:$0xff]  }
  0x30   : > { %3932 = vmatpush3.bf16.msra.mxu0 %v4449_v45  ;;  %3864 = vmatpush3.bf16.msra.mxu1 %v4452_v52  ;;  %v393_v45 = vshrl.u32 %v4770_v8, 16  ;;  %v352_v50 = vsel %vm292_vm1, %v347_v48, %v4674_v20  ;;  %v4468_v52 = vld [vmem:[%s5857_s1 + $0xc0] sm:$0xff]   ;;  %v1868_v49 = vor.u32 %v1866_v41, %v4993_v40 }
  0x31   : > { %3933 = vmatprep.subr.bf16.mxu0 %v4578_v1  ;;  %3865 = vmatprep.subr.bf16.mxu1 %v4578_v1  ;;  %v4470_v20 = vld [vmem:[%s5857_s1 + $0x100] sm:$0xff]  }
  0x34   : > { %3934 = vmatpush3.bf16.msra.mxu0 %v4453_v54  ;;  %3866 = vmatpush3.bf16.msra.mxu1 %v4456_v60  ;;  %v814_v54 = vrot.slane %v3481_v51, 1  ;;  %v818_v60 = vsel %vm813_vm2, %v815_v53, %v817_v57 }
  0x35   : > { %3935 = vmatprep.subr.bf16.mxu0 %v4578_v1  ;;  %3867 = vmatprep.subr.bf16.mxu1 %v4578_v1 }
  0x36   : > { %3816 = vmatmul.mubr.bf16.gmra.mrb[8].mxu0 %v320_v0  ;;  %3844 = vmatmul.mubr.bf16.gmra.mrb[8].mxu1 %v376_v2  ;;  %v4476_v0 = vld [vmem:[%s5857_s1 + $0x118] sm:$0xff]   ;;  %v820_v2 = vsel %vm813_vm2, %v817_v57, %v819_v63 }
  0x37   : > { %3819 = vmatprep.mubr.msk.bf16.mxu0 %vm4579_vm0, %v4578_v1  ;;  %3847 = vmatprep.mubr.msk.bf16.mxu1 %vm4579_vm0, %v4578_v1  ;;  %v4492_v57 = vld [vmem:[%s4633_s23 + $0x1c] sm:$0xff]  }
  0x38   : > { %3936 = vmatpush3.bf16.msra.mxu0 %v4457_v4  ;;  %3868 = vmatpush3.bf16.msra.mxu1 %v4458_v5  ;;  %v4481_v4 = vld [vmem:[%s5857_s1 + $0xf0] sm:$0xff]   ;;  %v821_v5 = vrot.slane %v4741_v55, 1 }
  0x39   : > { %3937 = vmatprep.subr.bf16.mxu0 %v4578_v1  ;;  %3869 = vmatprep.subr.bf16.mxu1 %v4578_v1 }
  0x3a   : > { %v822_v14 = vsel %vm813_vm2, %v819_v63, %v821_v5 }
  0x3c   : > { %3938 = vmatpush3.bf16.msra.mxu0 %v4461_v17  ;;  %3870 = vmatpush3.bf16.msra.mxu1 %v4462_v18  ;;  %v4485_v17 = vld [vmem:[%s5857_s1 + $0x138] sm:$0xff]   ;;  %v825_v18 = vrot.slane %v4806_v34, 1 }
  0x3d   : > { %3871 = vmatprep.subr.bf16.mxu1 %v4578_v1  ;;  %3939 = vmatprep.subr.bf16.mxu0 %v4578_v1 }
  0x3e   : > { %3820 = vmatmul.mubr.bf16.gmra.mrb[12].mxu0 %v328_v22  ;;  %3848 = vmatmul.mubr.bf16.gmra.mrb[12].mxu1 %v384_v25  ;;  %v826_v19 = vsel %vm813_vm2, %v823_v16, %v825_v18  ;;  %v829_v22 = vrot.slane %v4663_v13, 1 }
  0x3f   : > { %3823 = vmatprep.mubr.msk.bf16.mxu0 %vm4579_vm0, %v4578_v1  ;;  %3851 = vmatprep.mubr.msk.bf16.mxu1 %vm4579_vm0, %v4578_v1 }
  0x40   : > { %3872 = vmatpush3.bf16.msra.mxu1 %v4464_v28  ;;  %3940 = vmatpush3.bf16.msra.mxu0 %v4465_v29  ;;  %v4483_v28 = vld [vmem:[%s4633_s23 + $0x60] ss:$0 sps:$4 sm:$0x33]   ;;  %v4486_v29 = vld [vmem:[%s4633_s23 + $0x4] sm:$0xf8]  }
  0x41   : > { %3873 = vmatprep.subr.bf16.mxu1 %v4578_v1  ;;  %3941 = vmatprep.subr.bf16.mxu0 %v4578_v1 }
  0x44   : > { %3874 = vmatpush3.bf16.msra.mxu1 %v4466_v35  ;;  %3942 = vmatpush3.bf16.msra.mxu0 %v4467_v36  ;;  %v1170_v35 = vshll.u32 %v4486_v29, 16  ;;  %v1175_v36 = vshrl.u32 %v4487_v31, 16 }
  0x45   : > { %3995 = vmatprep.subr.bf16.mxu1 %v4578_v1  ;;  %4063 = vmatprep.subr.bf16.mxu0 %v4578_v1 }
  0x46   : > { %3824 = vmatmul.mubr.bf16.gmra.mrb[16].mxu0 %v336_v37  ;;  %3852 = vmatmul.mubr.bf16.gmra.mrb[16].mxu1 %v392_v38  ;;  %v1178_v37 = vshll.u32 %v4487_v31, 16  ;;  %v4991_v38 = vld [vmem:[%s4633_s23 + $0x20] sm:$0xff]   ;;  %v4498_v31 = vld [vmem:[%s4633_s23 + $0x2c] sm:$0xff]  }
  0x47   : > { %3827 = vmatprep.mubr.msk.bf16.mxu0 %vm4579_vm0, %v4578_v1  ;;  %3855 = vmatprep.mubr.msk.bf16.mxu1 %vm4579_vm0, %v4578_v1 }
  0x48   : > { %v1180_v48 = vrot.slane %v1178_v37, 4  ;;  %v4510_v37 = vld [vmem:[%s5857_s1 + $0x160] sm:$0xff]  }
  0x4e   : > { %3828 = vmatmul.mubr.bf16.gmra.mrb[20].mxu0 %v344_v47  ;;  %3856 = vmatmul.mubr.bf16.gmra.mrb[20].mxu1 %v393_v45  ;;  %v1172_v45 = vrot.slane %v1170_v35, 4  ;;  %v1177_v47 = vrot.slane %v1175_v36, 3  ;;  %v4501_v36 = vld [vmem:[%s5857_s1 + $0x190] sm:$0xff]  }
  0x4f   : > { %3831 = vmatprep.mubr.msk.bf16.mxu0 %vm4579_vm0, %v4578_v1  ;;  %3875 = vmatprep.mubr.msk.bf16.mxu1 %vm4579_vm0, %v4578_v1 }
  0x56   : > { %3832 = vmatmul.mubr.bf16.gmra.mrb[24].mxu0 %v352_v50  ;;  %3876 = vmatmul.mubr.bf16.vlgmr.msra.gmra.mrb[24].mxu1 %v4645_v7  ;;  %v816_v7 = vsel %vm813_vm2, %v814_v54, %v815_v53  ;;  %v1181_v54 = vor.u32 %v1180_v48, %v1177_v47  ;;  %v4516_v47 = vld [vmem:[%s5857_s1 + $0x168] sm:$0xff]  }
  0x57   : > { %3879 = vmatprep.mubr.msk.bf16.mxu1 %vm4579_vm0, %v4578_v1  ;;  %3943 = vmatprep.mubr.msk.bf16.mxu0 %vm4579_vm0, %v4578_v1 }
  0x58   : > { %3996 = vmatpush3.bf16.msra.mxu1 %v4468_v52  ;;  %v1184_v52 = vshrl.u32 %v4489_v46, 16 }
  0x59   : > { %3997 = vmatprep.subr.bf16.mxu1 %v4578_v1 }
  0x5c   : > { %3998 = vmatpush3.bf16.msra.mxu1 %v4471_v6  ;;  %v1187_v6 = vshll.u32 %v4489_v46, 16  ;;  %v4507_v46 = vld [vmem:[%s5857_s1 + $0x198] sm:$0xff]  }
  0x5d   : > { %3999 = vmatprep.subr.bf16.mxu1 %v4578_v1 }
  0x5e   : > { %3880 = vmatmul.mubr.bf16.gmra.mrb[28].mxu1 %v4656_v10  ;;  %3944 = vmatmul.mubr.bf16.vlgmr.msra.gmra.mrb[28].mxu0 %v816_v7  ;;  %v4475_v10 = vld [vmem:[%s5857_s1 + $0xd8] sm:$0xff]   ;;  %v1874_v7 = vshrl.u32 %v4991_v38, 16 }
  0x5f   : > { %4064 = vmatpush3.bf16.msra.mxu0 %v4470_v20  ;;  %3883 = vmatprep.mubr.msk.bf16.mxu1 %vm4579_vm0, %v4578_v1  ;;  %v5009_v20 = vld [vmem:[%s4633_s23 + $0x28] sm:$0xff]  }
  0x60   : > { %3947 = vmatprep.mubr.msk.bf16.mxu0 %vm4579_vm0, %v4578_v1  ;;  %4065 = vmatprep.subr.bf16.mxu0 %v4578_v1 }
  0x61   : > { %4000 = vmatpush3.bf16.msra.mxu1 %v4473_v56  ;;  %v1878_v56 = vshll.u32 %v5009_v20, 16 }
  0x62   : > { %4001 = vmatprep.subr.bf16.mxu1 %v4578_v1 }
  0x63   : > { %4066 = vmatpush3.bf16.msra.mxu0 %v4472_v58 }
  0x64   : > { %4067 = vmatprep.subr.bf16.mxu0 %v4578_v1 }
  0x65   : > { %4002 = vmatpush3.bf16.msra.mxu1 %v4475_v10  ;;  %v1189_v10 = vrot.slane %v1187_v6, 4 }
  0x66   : > { %3884 = vmatmul.mubr.bf16.gmra.mrb[32].mxu1 %v4683_v23  ;;  %3948 = vmatmul.mubr.bf16.gmra.mrb[32].mxu0 %v818_v60  ;;  %v4479_v23 = vld [vmem:[%s5857_s1 + $0xe8] sm:$0xff]  }
  0x67   : > { %3887 = vmatprep.mubr.msk.bf16.mxu1 %vm4579_vm0, %v4578_v1  ;;  %3951 = vmatprep.mubr.msk.bf16.mxu0 %vm4579_vm0, %v4578_v1 }
  0x68   : > { %4068 = vmatpush3.bf16.msra.mxu0 %v4474_v61  ;;  %4003 = vmatprep.subr.bf16.mxu1 %v4578_v1  ;;  %v1880_v61 = vrot.slane %v1878_v56, 1  ;;  %v4511_v56 = vld [vmem:[%s5857_s1 + $0x1a0] sm:$0xff]  }
  0x69   : > { %4069 = vmatprep.subr.bf16.mxu0 %v4578_v1  ;;  %4004 = vmatpush3.bf16.msra.mxu1 %v4477_v62  ;;  %v4488_v62 = vld [vmem:[%s5857_s1 + $0x140] sm:$0xff]  }
  0x6a   : > { %4005 = vmatprep.subr.bf16.mxu1 %v4578_v1 }
  0x6c   : > { %4070 = vmatpush3.bf16.msra.mxu0 %v4476_v0  ;;  %v1193_v0 = vshrl.u32 %v4492_v57, 16 }
  0x6d   : > { %4071 = vmatprep.subr.bf16.mxu0 %v4578_v1  ;;  %4006 = vmatpush3.bf16.msra.mxu1 %v4479_v23  ;;  %v1196_v23 = vshll.u32 %v4492_v57, 16 }
  0x6e   : > { %3888 = vmatmul.mubr.bf16.gmra.mrb[36].mxu1 %v4709_v39  ;;  %3952 = vmatmul.mubr.bf16.gmra.mrb[36].mxu0 %v820_v2  ;;  %v4484_v39 = vld [vmem:[%s5857_s1 + $0xf8] sm:$0xff]  }
  0x6f   : > { %3891 = vmatprep.mubr.msk.bf16.mxu1 %vm4579_vm0, %v4578_v1  ;;  %3955 = vmatprep.mubr.msk.bf16.mxu0 %vm4579_vm0, %v4578_v1 }
  0x70   : > { %4072 = vmatpush3.bf16.msra.mxu0 %v4478_v3  ;;  %4007 = vmatprep.subr.bf16.mxu1 %v4578_v1  ;;  %v5026_v3 = vld [vmem:[%s4633_s23 + $0x30] sm:$0xff]  }
  0x71   : > { %4073 = vmatprep.subr.bf16.mxu0 %v4578_v1  ;;  %4008 = vmatpush3.bf16.msra.mxu1 %v4481_v4  ;;  %v4494_v4 = vld [vmem:[%s5857_s1 + $0x148] sm:$0xff]  }
  0x72   : > { %4009 = vmatprep.subr.bf16.mxu1 %v4578_v1 }
  0x74   : > { %4074 = vmatpush3.bf16.msra.mxu0 %v4480_v11  ;;  %v1886_v11 = vshll.u32 %v5026_v3, 16 }
  0x75   : > { %4075 = vmatprep.subr.bf16.mxu0 %v4578_v1  ;;  %4010 = vmatpush3.bf16.msra.mxu1 %v4484_v39  ;;  %v5035_v39 = vld [vmem:[%s4633_s23 + $0x8] sm:$0xff]  }
  0x76   : > { %3892 = vmatmul.mubr.bf16.gmra.mrb[40].mxu1 %v4741_v55  ;;  %3956 = vmatmul.mubr.bf16.gmra.mrb[40].mxu0 %v822_v14  ;;  %v824_v55 = vsel %vm813_vm2, %v821_v5, %v823_v16  ;;  %v1882_v5 = vshrl.u32 %v5009_v20, 16  ;;  %v1195_v14 = vrot.slane %v1193_v0, 3 }
  0x77   : > { %3895 = vmatprep.mubr.msk.bf16.mxu1 %vm4579_vm0, %v4578_v1  ;;  %3959 = vmatprep.mubr.msk.bf16.mxu0 %vm4579_vm0, %v4578_v1 }
  0x78   : > { %4076 = vmatpush3.bf16.msra.mxu0 %v4482_v15  ;;  %4131 = vmatprep.subr.bf16.mxu1 %v4578_v1  ;;  %v1198_v15 = vrot.slane %v1196_v23, 4 }
  0x79   : > { %4077 = vmatprep.subr.bf16.mxu0 %v4578_v1 }
  0x7c   : > { %4078 = vmatpush3.bf16.msra.mxu0 %v4485_v17  ;;  %v4491_v17 = vld [vmem:[%s5857_s1 + $0x180] sm:$0xff]  }
  0x7d   : > { %4199 = vmatprep.subr.bf16.mxu0 %v4578_v1 }
  0x7e   : > { %3896 = vmatmul.mubr.bf16.gmra.mrb[44].mxu1 %v4773_v12  ;;  %3960 = vmatmul.mubr.bf16.gmra.mrb[44].mxu0 %v824_v55  ;;  %v827_v12 = vrot.slane %v4651_v9, 1  ;;  %v4496_v55 = vld [vmem:[%s4633_s23 + $0x24] sm:$0xff]  }
  0x7f   : > { %3899 = vmatprep.mubr.msk.bf16.mxu1 %vm4579_vm0, %v4578_v1  ;;  %3963 = vmatprep.mubr.msk.bf16.mxu0 %vm4579_vm0, %v4578_v1 }
  0x80   : > { %v828_v21 = vsel %vm813_vm2, %v825_v18, %v827_v12  ;;  %v830_v25 = vsel %vm813_vm2, %v827_v12, %v829_v22  ;;  %v1884_v18 = vor.u32 %v1882_v5, %v1880_v61  ;;  %v4500_v12 = vld [vmem:[%s5857_s1 + $0x150] sm:$0xff]  }
  0x86   : > { %3900 = vmatmul.mubr.bf16.gmra.mrb[48].mxu1 %v4806_v34  ;;  %3964 = vmatmul.mubr.bf16.gmra.mrb[48].mxu0 %v826_v19  ;;  %v1167_v34 = vshrl.u32 %v4486_v29, 16  ;;  %v1888_v19 = vrot.slane %v1886_v11, 1 }
  0x87   : > { %3903 = vmatprep.mubr.msk.bf16.mxu1 %vm4579_vm0, %v4578_v1  ;;  %3967 = vmatprep.mubr.msk.bf16.mxu0 %vm4579_vm0, %v4578_v1 }
  0x88   : > { %v1169_v44 = vrot.slane %v1167_v34, 3 }
  0x8a   : > { %v1173_v53 = vor.u32 %v1172_v45, %v1169_v44  ;;  %v5088_v45 = vld [vmem:[%s4633_s23 + $0x40] sm:$0xff]  }
  0x8b   : > { %v1906_v0 = vshrl.u32 %v5088_v45, 16 }
  0x8c   : > { %v1182_v58 = vsel %vm1165_vm3, %v1173_v53, %v1181_v54 }
  0x8e   : > { %3904 = vmatmul.mubr.bf16.gmra.mrb[52].mxu1 %v4651_v9  ;;  %3968 = vmatmul.mubr.bf16.gmra.mrb[52].mxu0 %v828_v21  ;;  %v831_v9 = vrot.slane %v4686_v24, 1  ;;  %v5047_v21 = vsel %vm292_vm1, %v1884_v18, %v1888_v19 }
  0x8f   : > { %3907 = vmatprep.mubr.msk.bf16.mxu1 %vm4579_vm0, %v4578_v1  ;;  %3971 = vmatprep.mubr.msk.bf16.mxu0 %vm4579_vm0, %v4578_v1 }
  0x90   : > { %v832_v26 = vsel %vm813_vm2, %v829_v22, %v831_v9  ;;  %v1199_v22 = vor.u32 %v1198_v15, %v1195_v14 }
  0x96   : > { %3908 = vmatmul.mubr.bf16.gmra.mrb[56].mxu1 %v4663_v13  ;;  %3972 = vmatmul.mubr.bf16.gmra.mrb[56].mxu0 %v830_v25  ;;  %v833_v13 = vrot.slane %v4714_v43, 1  ;;  %v4495_v25 = vld [vmem:[%s5857_s1 + $0x188] sm:$0xff]  }
  0x97   : > { %3911 = vmatprep.mubr.msk.bf16.mxu1 %vm4579_vm0, %v4578_v1  ;;  %3975 = vmatprep.mubr.msk.bf16.mxu0 %vm4579_vm0, %v4578_v1 }
  0x98   : > { %v834_v27 = vsel %vm813_vm2, %v831_v9, %v833_v13  ;;  %v1202_v9 = vshrl.u32 %v4496_v55, 16 }
  0x9a   : > { %v1204_v33 = vrot.slane %v1202_v9, 3 }
  0x9e   : > { %3912 = vmatmul.mubr.bf16.gmra.mrb[60].mxu1 %v4686_v24  ;;  %3976 = vmatmul.mubr.bf16.gmra.mrb[60].mxu0 %v832_v26  ;;  %v835_v24 = vrot.slane %v4748_v59, 1  ;;  %v1205_v26 = vshll.u32 %v4496_v55, 16 }
  0x9f   : > { %3915 = vmatprep.mubr.msk.bf16.mxu1 %vm4579_vm0, %v4578_v1  ;;  %3979 = vmatprep.mubr.msk.bf16.mxu0 %vm4579_vm0, %v4578_v1 }
  0xa0   : > { %v836_v30 = vsel %vm813_vm2, %v833_v13, %v835_v24  ;;  %v5056_v13 = vld [vmem:[%s4633_s23 + $0x38] sm:$0xff]  }
  0xa1   : > { %v1898_v48 = vshrl.u32 %v5056_v13, 16 }
  0xa6   : > { %3916 = vmatmul.mubr.bf16.gmra.mrb[64].mxu1 %v4714_v43  ;;  %3980 = vmatmul.mubr.bf16.gmra.mrb[64].mxu0 %v834_v27  ;;  %v837_v43 = vrot.slane %v4483_v28, 1  ;;  %v4504_v27 = vld [vmem:[%s5857_s1 + $0x158] sm:$0xff]   ;;  %v1894_v28 = vshll.u32 %v5056_v13, 16 }
  0xa7   : > { %3919 = vmatprep.mubr.msk.bf16.mxu1 %vm4579_vm0, %v4578_v1  ;;  %3983 = vmatprep.mubr.msk.bf16.mxu0 %vm4579_vm0, %v4578_v1 }
  0xa8   : > { %v838_v42 = vsel %vm813_vm2, %v835_v24, %v837_v43  ;;  %v1890_v24 = vshrl.u32 %v5026_v3, 16  ;;  %v1896_v35 = vrot.slane %v1894_v28, 1 }
  0xaa   : > { %v1892_v34 = vor.u32 %v1890_v24, %v1888_v19  ;;  %v1900_v6 = vor.u32 %v1898_v48, %v1896_v35  ;;  %v4508_v24 = vld [vmem:[%s4633_s23 + $0x44] sm:$0xff]  }
  0xac   : > { %v5080_v41 = vsel %vm292_vm1, %v1892_v34, %v1896_v35  ;;  %v1241_v34 = vshll.u32 %v4508_v24, 16  ;;  %v5168_v35 = vld [vmem:[%s4633_s23 + $0x58] sm:$0xff]  }
  0xae   : > { %3920 = vmatmul.mubr.bf16.gmra.mrb[68].mxu1 %v4748_v59  ;;  %3984 = vmatmul.mubr.bf16.gmra.mrb[68].mxu0 %v836_v30  ;;  %v1870_v59 = vshll.u32 %v4991_v38, 16  ;;  %v5068_v30 = vld [vmem:[%s4633_s23 + $0x10] sm:$0xff]  }
  0xaf   : > { %3923 = vmatprep.mubr.msk.bf16.mxu1 %vm4579_vm0, %v4578_v1  ;;  %3987 = vmatprep.mubr.msk.bf16.mxu0 %vm4579_vm0, %v4578_v1 }
  0xb0   : > { %v1872_v50 = vrot.slane %v1870_v59, 1  ;;  %v1211_v59 = vshrl.u32 %v4498_v31, 16 }
  0xb2   : > { %v5001_v51 = vsel %vm292_vm1, %v1868_v49, %v1872_v50  ;;  %v1876_v60 = vor.u32 %v1874_v7, %v1872_v50  ;;  %v1902_v49 = vshll.u32 %v5088_v45, 16  ;;  %v1213_v50 = vrot.slane %v1211_v59, 3 }
  0xb4   : > { %v5019_v63 = vsel %vm292_vm1, %v1876_v60, %v1880_v61  ;;  %v1904_v7 = vrot.slane %v1902_v49, 1  ;;  %v5119_v61 = vld [vmem:[%s4633_s23 + $0x48] sm:$0xff]  }
  0xb5   : > { %v1910_v23 = vshll.u32 %v5119_v61, 16 }
  0xb6   : > { %3924 = vmatmul.mubr.bf16.gmra.mrb[72].mxu1 %v4770_v8  ;;  %3988 = vmatmul.mubr.bf16.gmra.mrb[72].mxu0 %v838_v42  ;;  %v1186_v8 = vrot.slane %v1184_v52, 3  ;;  %v1214_v42 = vshll.u32 %v4498_v31, 16  ;;  %v5111_v57 = vsel %vm292_vm1, %v1900_v6, %v1904_v7  ;;  %v1908_v14 = vor.u32 %v1906_v0, %v1904_v7 }
  0xb7   : > { %3991 = vmatprep.mubr.msk.bf16.mxu0 %vm4579_vm0, %v4578_v1  ;;  %4011 = vmatprep.mubr.msk.bf16.mxu1 %vm4579_vm0, %v4578_v1  ;;  %v1912_v15 = vrot.slane %v1910_v23, 1  ;;  %v5198_v23 = vld [vmem:[%s4633_s23 + $0x68] ss:$0 sps:$4 sm:$0x11]  }
  0xb8   : > { %v1190_v2 = vor.u32 %v1189_v10, %v1186_v8  ;;  %v1216_v52 = vrot.slane %v1214_v42, 4  ;;  %v4520_v8 = vld [vmem:[%s5857_s1 + $0x170] sm:$0xff]  }
  0xb9   : > { %v4512_v42 = vld [vmem:[%s4633_s23 + $0x4c] sm:$0xff]  }
  0xba   : > { %v1191_v16 = vsel %vm1165_vm3, %v1181_v54, %v1190_v2  ;;  %v1200_v29 = vsel %vm1165_vm3, %v1190_v2, %v1199_v22  ;;  %v4502_v54 = vld [vmem:[%s4633_s23 + $0x34] sm:$0xff]   ;;  %v1247_v49 = vshrl.u32 %v4512_v42, 16 }
  0xbb   : > { %v1220_v10 = vshrl.u32 %v4502_v54, 16  ;;  %v1223_v60 = vshll.u32 %v4502_v54, 16  ;;  %v1930_v54 = vshrl.u32 %v5168_v35, 16 }
  0xbc   : > { %v1249_v7 = vrot.slane %v1247_v49, 3 }
  0xbd   : > { %v1222_v5 = vrot.slane %v1220_v10, 3  ;;  %v1225_v11 = vrot.slane %v1223_v60, 4 }
  0xbe   : > { %3992 = vmatmul.mubr.bf16.gmra.mrb[76].mxu0 %v837_v43  ;;  %4012 = vmatmul.mubr.bf16.vlgmr.msra.gmra.mrb[76].mxu1 %v1182_v58  ;;  %v1207_v43 = vrot.slane %v1205_v26, 4  ;;  %v1217_v58 = vor.u32 %v1216_v52, %v1213_v50  ;;  %v1250_v50 = vshll.u32 %v4512_v42, 16 }
  0xbf   : > { %4015 = vmatprep.mubr.msk.bf16.mxu1 %vm4579_vm0, %v4578_v1  ;;  %4079 = vmatprep.mubr.msk.bf16.mxu0 %vm4579_vm0, %v4578_v1  ;;  %v1226_v19 = vor.u32 %v1225_v11, %v1222_v5 }
  0xc0   : > { %4132 = vmatpush3.bf16.msra.mxu1 %v4488_v62  ;;  %v1208_v44 = vor.u32 %v1207_v43, %v1204_v33  ;;  %v4517_v62 = vld [vmem:[%s5857_s1 + $0x1a8] sm:$0xff]   ;;  %v1238_v43 = vshrl.u32 %v4508_v24, 16 }
  0xc1   : > { %4133 = vmatprep.subr.bf16.mxu1 %v4578_v1 }
  0xc2   : > { %v1209_v53 = vsel %vm1165_vm3, %v1199_v22, %v1208_v44  ;;  %v1218_v2 = vsel %vm1165_vm3, %v1208_v44, %v1217_v58  ;;  %v4526_v22 = vld [vmem:[%s5857_s1 + $0x1b8] sm:$0xff]   ;;  %v1243_v44 = vrot.slane %v1241_v34, 4 }
  0xc4   : > { %4134 = vmatpush3.bf16.msra.mxu1 %v4494_v4  ;;  %v4505_v4 = vld [vmem:[%s4633_s23 + $0x3c] sm:$0xff]  }
  0xc5   : > { %4135 = vmatprep.subr.bf16.mxu1 %v4578_v1  ;;  %v1229_v55 = vshrl.u32 %v4505_v4, 16  ;;  %v1232_v18 = vshll.u32 %v4505_v4, 16 }
  0xc6   : > { %4016 = vmatmul.mubr.bf16.gmra.mrb[80].mxu1 %v1191_v16  ;;  %4080 = vmatmul.mubr.bf16.vlgmr.msra.gmra.mrb[80].mxu0 %v5035_v39  ;;  %v4521_v16 = vld [vmem:[%s5857_s1 + $0x1b0] sm:$0xff]  }
  0xc7   : > { %4200 = vmatpush3.bf16.msra.mxu0 %v4491_v17  ;;  %4019 = vmatprep.mubr.msk.bf16.mxu1 %vm4579_vm0, %v4578_v1  ;;  %v5139_v17 = vsel %vm292_vm1, %v1908_v14, %v1912_v15  ;;  %v1231_v9 = vrot.slane %v1229_v55, 3  ;;  %v1234_v26 = vrot.slane %v1232_v18, 4 }
  0xc8   : > { %4083 = vmatprep.mubr.msk.bf16.mxu0 %vm4579_vm0, %v4578_v1  ;;  %4201 = vmatprep.subr.bf16.mxu0 %v4578_v1 }
  0xc9   : > { %4136 = vmatpush3.bf16.msra.mxu1 %v4500_v12  ;;  %v5147_v12 = vld [vmem:[%s4633_s23 + $0x50] sm:$0xff]   ;;  %v1235_v33 = vor.u32 %v1234_v26, %v1231_v9 }
  0xca   : > { %4137 = vmatprep.subr.bf16.mxu1 %v4578_v1 }
  0xcb   : > { %4202 = vmatpush3.bf16.msra.mxu0 %v4495_v25  ;;  %v1918_v25 = vshll.u32 %v5147_v12, 16  ;;  %v1236_v59 = vsel %vm1165_vm3, %v1226_v19, %v1235_v33 }
  0xcc   : > { %4203 = vmatprep.subr.bf16.mxu0 %v4578_v1 }
  0xcd   : > { %4138 = vmatpush3.bf16.msra.mxu1 %v4504_v27  ;;  %v1227_v27 = vsel %vm1165_vm3, %v1217_v58, %v1226_v19 }
  0xce   : > { %4020 = vmatmul.mubr.bf16.gmra.mrb[84].mxu1 %v1200_v29  ;;  %4084 = vmatmul.mubr.bf16.gmra.mrb[84].mxu0 %v5068_v30  ;;  %v1920_v29 = vrot.slane %v1918_v25, 1 }
  0xcf   : > { %4023 = vmatprep.mubr.msk.bf16.mxu1 %vm4579_vm0, %v4578_v1  ;;  %4087 = vmatprep.mubr.msk.bf16.mxu0 %vm4579_vm0, %v4578_v1 }
  0xd0   : > { %4204 = vmatpush3.bf16.msra.mxu0 %v4501_v36  ;;  %4139 = vmatprep.subr.bf16.mxu1 %v4578_v1  ;;  %v1922_v36 = vshrl.u32 %v5147_v12, 16 }
  0xd1   : > { %4205 = vmatprep.subr.bf16.mxu0 %v4578_v1  ;;  %4140 = vmatpush3.bf16.msra.mxu1 %v4510_v37  ;;  %v1926_v37 = vshll.u32 %v5168_v35, 16 }
  0xd2   : > { %4141 = vmatprep.subr.bf16.mxu1 %v4578_v1 }
  0xd4   : > { %4206 = vmatpush3.bf16.msra.mxu0 %v4507_v46  ;;  %v1924_v46 = vor.u32 %v1922_v36, %v1920_v29 }
  0xd5   : > { %4207 = vmatprep.subr.bf16.mxu0 %v4578_v1  ;;  %4142 = vmatpush3.bf16.msra.mxu1 %v4516_v47  ;;  %v1928_v47 = vrot.slane %v1926_v37, 1 }
  0xd6   : > { %4024 = vmatmul.mubr.bf16.gmra.mrb[88].mxu1 %v1209_v53  ;;  %4088 = vmatmul.mubr.bf16.gmra.mrb[88].mxu0 %v4982_v32  ;;  %v4525_v32 = vld [vmem:[%s5857_s1 + $0x178] sm:$0xff]   ;;  %v5183_v53 = vld [vmem:[%s4633_s23 + $0x60] sm:$0xff]  }
  0xd7   : > { %4027 = vmatprep.mubr.msk.bf16.mxu1 %vm4579_vm0, %v4578_v1  ;;  %4091 = vmatprep.mubr.msk.bf16.mxu0 %vm4579_vm0, %v4578_v1  ;;  %v5175_v48 = vsel %vm292_vm1, %v1924_v46, %v1928_v47  ;;  %v1934_v6 = vshll.u32 %v5183_v53, 16  ;;  %v1932_v58 = vor.u32 %v1930_v54, %v1928_v47  ;;  %v1938_v5 = vshrl.u32 %v5183_v53, 16 }
  0xd8   : > { %4208 = vmatpush3.bf16.msra.mxu0 %v4511_v56  ;;  %4143 = vmatprep.subr.bf16.mxu1 %v4578_v1  ;;  %v1252_v56 = vrot.slane %v1250_v50, 4 }
  0xd9   : > { %4209 = vmatprep.subr.bf16.mxu0 %v4578_v1  ;;  %4144 = vmatpush3.bf16.msra.mxu1 %v4520_v8  ;;  %v4514_v8 = vld [vmem:[%s4633_s23 + $0x54] sm:$0xff]   ;;  %v1936_v10 = vrot.slane %v1934_v6, 1 }
  0xda   : > { %4145 = vmatprep.subr.bf16.mxu1 %v4578_v1  ;;  %v1259_v0 = vshll.u32 %v4514_v8, 16 }
  0xdb   : > { %v5190_v60 = vsel %vm292_vm1, %v1932_v58, %v1936_v10 }
  0xdc   : > { %4210 = vmatpush3.bf16.msra.mxu0 %v4517_v62  ;;  %v1253_v62 = vor.u32 %v1252_v56, %v1249_v7  ;;  %v1261_v19 = vrot.slane %v1259_v0, 4 }
  0xdd   : > { %4211 = vmatprep.subr.bf16.mxu0 %v4578_v1  ;;  %4146 = vmatpush3.bf16.msra.mxu1 %v4525_v32  ;;  %v1256_v32 = vshrl.u32 %v4514_v8, 16 }
  0xde   : > { %4028 = vmatmul.mubr.bf16.gmra.mrb[92].mxu1 %v1218_v2  ;;  %4092 = vmatmul.mubr.bf16.gmra.mrb[92].mxu0 %v4991_v38  ;;  %v1914_v38 = vshrl.u32 %v5119_v61, 16 }
  0xdf   : > { %4031 = vmatprep.mubr.msk.bf16.mxu1 %vm4579_vm0, %v4578_v1  ;;  %4095 = vmatprep.mubr.msk.bf16.mxu0 %vm4579_vm0, %v4578_v1  ;;  %v1258_v18 = vrot.slane %v1256_v32, 3 }
  0xe0   : > { %4212 = vmatpush3.bf16.msra.mxu0 %v4521_v16  ;;  %4267 = vmatprep.subr.bf16.mxu1 %v4578_v1  ;;  %v1916_v28 = vor.u32 %v1914_v38, %v1912_v15  ;;  %v1940_v38 = vor.u32 %v1938_v5, %v1936_v10 }
  0xe1   : > { %4213 = vmatprep.subr.bf16.mxu0 %v4578_v1  ;;  %v1262_v24 = vor.u32 %v1261_v19, %v1258_v18 }
  0xe2   : > { %v5160_v31 = vsel %vm292_vm1, %v1916_v28, %v1920_v29 }
  0xe4   : > { %4214 = vmatpush3.bf16.msra.mxu0 %v4526_v22  ;;  %v4518_v22 = vld [vmem:[%s4633_s23 + $0x5c] sm:$0xff]  }
  0xe5   : > { %4335 = vmatprep.subr.bf16.mxu0 %v4578_v1  ;;  %v1265_v28 = vshrl.u32 %v4518_v22, 16  ;;  %v1268_v29 = vshll.u32 %v4518_v22, 16 }
  0xe6   : > { %4032 = vmatmul.mubr.bf16.gmra.mrb[96].mxu1 %v1227_v27  ;;  %4096 = vmatmul.mubr.bf16.gmra.mrb[96].mxu0 %v5009_v20  ;;  %v1240_v20 = vrot.slane %v1238_v43, 3 }
  0xe7   : > { %4035 = vmatprep.mubr.msk.bf16.mxu1 %vm4579_vm0, %v4578_v1  ;;  %4099 = vmatprep.mubr.msk.bf16.mxu0 %vm4579_vm0, %v4578_v1  ;;  %v1267_v42 = vrot.slane %v1265_v28, 3  ;;  %v1854_v28 = vshll.u32 %v5068_v30, 16 }
  0xe8   : > { %v1244_v52 = vor.u32 %v1243_v44, %v1240_v20  ;;  %v1270_v20 = vrot.slane %v1268_v29, 4  ;;  %v4522_v44 = vld [vmem:[%s4633_s23 + $0x64] ss:$0 sps:$4 sm:$0xff]  }
  0xe9   : > { %v1274_v50 = vshrl.u32 %v4522_v44, 16 }
  0xea   : > { %v1254_v15 = vsel %vm1165_vm3, %v1244_v52, %v1253_v62  ;;  %v1271_v49 = vor.u32 %v1270_v20, %v1267_v42  ;;  %v1856_v20 = vrot.slane %v1854_v28, 1 }
  0xeb   : > { %v1276_v58 = vrot.slane %v1274_v50, 3 }
  0xec   : > { %v1272_v8 = vsel %vm1165_vm3, %v1262_v24, %v1271_v49 }
  0xee   : > { %4036 = vmatmul.mubr.bf16.gmra.mrb[100].mxu1 %v1236_v59  ;;  %4100 = vmatmul.mubr.bf16.gmra.mrb[100].mxu0 %v5026_v3  ;;  %v1245_v3 = vsel %vm1165_vm3, %v1235_v33, %v1244_v52  ;;  %v1263_v59 = vsel %vm1165_vm3, %v1253_v62, %v1262_v24  ;;  %v1277_v52 = vshll.u32 %v4522_v44, 16 }
  0xef   : > { %4039 = vmatprep.mubr.msk.bf16.mxu1 %vm4579_vm0, %v4578_v1  ;;  %4103 = vmatprep.mubr.msk.bf16.mxu0 %vm4579_vm0, %v4578_v1 }
  0xf0   : > { %v1279_v10 = vrot.slane %v1277_v52, 4 }
  0xf2   : > { %v1280_v0 = vor.u32 %v1279_v10, %v1276_v58 }
  0xf4   : > { %v1281_v18 = vsel %vm1165_vm3, %v1271_v49, %v1280_v0 }
  0xf6   : > { %4040 = vmatmul.mubr.bf16.gmra.mrb[104].mxu1 %v1245_v3  ;;  %4104 = vmatmul.mubr.bf16.gmra.mrb[104].mxu0 %v5056_v13  ;;  %v1942_v13 = vshll.u32 %v5198_v23, 16 }
  0xf7   : > { %4043 = vmatprep.mubr.msk.bf16.mxu1 %vm4579_vm0, %v4578_v1  ;;  %4107 = vmatprep.mubr.msk.bf16.mxu0 %vm4579_vm0, %v4578_v1 }
  0xf8   : > { %v1944_v25 = vrot.slane %v1942_v13, 1 }
  0xf9   : > { %v5200_v2 = vpop.f32.mrb[0].mxu0  ;;  %v5202_v4 = vpop.f32.mrb[0].mxu1 }
  0xfa   : > { %v3809_v11 = vpop.f32.mrb[1].mxu0  ;;  %v3837_v14 = vpop.f32.mrb[1].mxu1  ;;  %v5213_v27 = vsel %vm292_vm1, %v1940_v38, %v1944_v25  ;;  %v1849_v38 = vshll.u32 %v5035_v39, 16 }
  0xfb   : > { %v5207_v16 = vpop.f32.mrb[2].mxu0  ;;  %v5209_v55 = vpop.f32.mrb[2].mxu1 }
  0xfc   : > { %v3810_v9 = vpop.f32.mrb[3].mxu0  ;;  %v3838_v26 = vpop.f32.mrb[3].mxu1 }
  0xfe   : > { %4044 = vmatmul.mubr.bf16.gmra.mrb[108].mxu1 %v1254_v15  ;;  %4108 = vmatmul.mubr.bf16.gmra.mrb[108].mxu0 %v5088_v45 }
  0xff   : > { %4047 = vmatprep.mubr.msk.bf16.mxu1 %vm4579_vm0, %v4578_v1  ;;  %4111 = vmatprep.mubr.msk.bf16.mxu0 %vm4579_vm0, %v4578_v1 }
 0x101   : > { %v5220_v33 = vpop.f32.mrb[4].mxu0  ;;  %v5222_v43 = vpop.f32.mrb[4].mxu1 }
 0x102   : > { %v3813_v34 = vpop.f32.mrb[5].mxu0  ;;  %v3841_v36 = vpop.f32.mrb[5].mxu1 }
 0x103   : > { %v5224_v37 = vpop.f32.mrb[6].mxu0  ;;  %v5227_v45 = vpop.f32.mrb[6].mxu1  ;;  %v1851_v36 = vrot.slane %v1849_v38, 1 }
 0x104   : > { %v3814_v46 = vpop.f32.mrb[7].mxu0  ;;  %v3842_v47 = vpop.f32.mrb[7].mxu1 }
 0x106   : > { %4048 = vmatmul.mubr.bf16.gmra.mrb[112].mxu1 %v1263_v59  ;;  %4112 = vmatmul.mubr.bf16.gmra.mrb[112].mxu0 %v5119_v61 }
 0x107   : > { %4051 = vmatprep.mubr.msk.bf16.mxu1 %vm4579_vm0, %v4578_v1  ;;  %4115 = vmatprep.mubr.msk.bf16.mxu0 %vm4579_vm0, %v4578_v1 }
 0x109   : > { %v5235_v54 = vpop.f32.mrb[8].mxu0  ;;  %v5237_v6 = vpop.f32.mrb[8].mxu1 }
 0x10a   : > { %v3817_v7 = vpop.f32.mrb[9].mxu0  ;;  %v3845_v56 = vpop.f32.mrb[9].mxu1 }
 0x10b   : > { %v5239_v3 = vpop.f32.mrb[10].mxu0  ;;  %v5242_v61 = vpop.f32.mrb[10].mxu1  ;;  %v5284_v56 = vld [vmem:[%s4633_s23 + $0xc] sm:$0xf8]  }
 0x10c   : > { %v3818_v62 = vpop.f32.mrb[11].mxu0  ;;  %v3846_v32 = vpop.f32.mrb[11].mxu1 }
 0x10d   : > { %v4528_v62 = vld [vmem:[%s5857_s1 + $0x1c0] sm:$0xff]   ;;  %v2275_v32 = vrot.slane %v5284_v56, 3 }
 0x10e   : > { %4052 = vmatmul.mubr.bf16.gmra.mrb[116].mxu1 %v1272_v8  ;;  %4116 = vmatmul.mubr.bf16.gmra.mrb[116].mxu0 %v5147_v12  ;;  %v5287_v8 = vld [vmem:[%s4633_s23 + $0x14] sm:$0xff]  }
 0x10f   : > { %4055 = vmatprep.mubr.msk.bf16.mxu1 %vm4579_vm0, %v4578_v1  ;;  %4119 = vmatprep.mubr.msk.bf16.mxu0 %vm4579_vm0, %v4578_v1  ;;  %v2276_v0 = vrot.slane %v5287_v8, 3 }
 0x111   : > { %v5249_v5 = vpop.f32.mrb[12].mxu0  ;;  %v5251_v13 = vpop.f32.mrb[12].mxu1 }
 0x112   : > { %v3821_v11 = vpop.f32.mrb[13].mxu0  ;;  %v3849_v14 = vpop.f32.mrb[13].mxu1 }
 0x113   : > { %v5253_v15 = vpop.f32.mrb[14].mxu0  ;;  %v5256_v19 = vpop.f32.mrb[14].mxu1  ;;  %v4533_v11 = vld [vmem:[%s5857_s1 + $0x1c8] sm:$0xff]  }
 0x114   : > { %v3822_v12 = vpop.f32.mrb[15].mxu0  ;;  %v3850_v22 = vpop.f32.mrb[15].mxu1 }
 0x116   : > { %4056 = vmatmul.mubr.bf16.gmra.mrb[120].mxu1 %v1281_v18  ;;  %4120 = vmatmul.mubr.bf16.gmra.mrb[120].mxu0 %v5168_v35  ;;  %v1847_v35 = vshrl.u32 %v5035_v39, 16 }
 0x117   : > { %4059 = vmatprep.mubr.msk.bf16.mxu1 %vm4579_vm0, %v4578_v1  ;;  %4123 = vmatprep.mubr.msk.bf16.mxu0 %vm4579_vm0, %v4578_v1 }
 0x118   : > { %v1852_v44 = vor.u32 %v1851_v36, %v1847_v35  ;;  %v4531_v35 = vld [vmem:[%s5857_s1 + $0x200] sm:$0xff]  }
 0x119   : > { %v5264_v25 = vpop.f32.mrb[16].mxu0  ;;  %v5266_v9 = vpop.f32.mrb[16].mxu1  ;;  %v5315_v36 = vld [vmem:[%s4633_s23 + $0x1c] sm:$0xff]  }
 0x11a   : > { %v3825_v26 = vpop.f32.mrb[17].mxu0  ;;  %v3853_v24 = vpop.f32.mrb[17].mxu1  ;;  %v1857_v52 = vsel %vm292_vm1, %v1852_v44, %v1856_v20 }
 0x11b   : > { %v5269_v29 = vpop.f32.mrb[18].mxu0  ;;  %v581_v34 = vpop.f32.mrb[18].mxu1 }
 0x11c   : > { %v3826_v59 = vpop.f32.mrb[19].mxu0  ;;  %v3854_v42 = vpop.f32.mrb[19].mxu1  ;;  %v2277_v34 = vsel %vm2274_vm4, %v2275_v32, %v2276_v0 }
 0x11e   : > { %4060 = vmatmul.mubr.bf16.gmra.mrb[124].mxu1 %v1276_v58  ;;  %4124 = vmatmul.mubr.bf16.gmra.mrb[124].mxu0 %v5183_v53  ;;  %v1858_v53 = vshrl.u32 %v5068_v30, 16 }
 0x11f   : > { %4127 = vmatprep.mubr.msk.bf16.mxu0 %vm4579_vm0, %v4578_v1  ;;  %4147 = vmatprep.mubr.msk.bf16.mxu1 %vm4579_vm0, %v4578_v1 }
 0x120   : > { %v1860_v30 = vor.u32 %v1858_v53, %v1856_v20  ;;  %v4537_v20 = vld [vmem:[%s5857_s1 + $0x1d0] sm:$0xff]  }
 0x121   : > { %v5277_v46 = vpop.f32.mrb[20].mxu0  ;;  %v586_v47 = vpop.f32.mrb[20].mxu1 }
 0x122   : > { %v3829_v39 = vpop.f32.mrb[21].mxu0  ;;  %v3857_v49 = vpop.f32.mrb[21].mxu1  ;;  %v1865_v28 = vsel %vm292_vm1, %v1860_v30, %v4993_v40  ;;  %v2278_v40 = vrot.slane %v5315_v36, 3  ;;  %v5340_v30 = vld [vmem:[%s4633_s23 + $0x24] sm:$0xff]  }
 0x123   : > { %v5279_v50 = vpop.f32.mrb[22].mxu0  ;;  %v589_v7 = vpop.f32.mrb[22].mxu1  ;;  %v4540_v39 = vld [vmem:[%s5857_s1 + $0x1d8] sm:$0xff]  }
 0x124   : > { %v3830_v58 = vpop.f32.mrb[23].mxu0  ;;  %v3858_v10 = vpop.f32.mrb[23].mxu1 }
 0x126   : > { %4128 = vmatmul.mubr.bf16.gmra.mrb[128].mxu0 %v5198_v23  ;;  %4148 = vmatmul.mubr.bf16.vlgmr.msra.gmra.mrb[128].mxu1 %v1857_v52 }
 0x127   : > { %4151 = vmatprep.mubr.msk.bf16.mxu1 %vm4579_vm0, %v4578_v1  ;;  %4215 = vmatprep.mubr.msk.bf16.mxu0 %vm4579_vm0, %v4578_v1 }
 0x128   : > { %4268 = vmatpush3.bf16.msra.mxu1 %v4528_v62  ;;  %v2279_v62 = vsel %vm2274_vm4, %v2276_v0, %v2278_v40  ;;  %v4544_v0 = vld [vmem:[%s5857_s1 + $0x1e0] sm:$0xff]  }
 0x129   : > { %v5302_v14 = vpop.f32.mrb[24].mxu0  ;;  %v687_v18 = vpop.f32.mrb[24].mxu1  ;;  %4269 = vmatprep.subr.bf16.mxu1 %v4578_v1 }
 0x12a   : > { %v688_v12 = vadd.f32 %v687_v18, %v5200_v2  ;;  %v3833_v22 = vpop.f32.mrb[25].mxu0  ;;  %v3877_v38 = vpop.f32.mrb[25].mxu1 }
 0x12b   : > { %v5306_v26 = vpop.f32.mrb[26].mxu0  ;;  %v690_v24 = vpop.f32.mrb[26].mxu1 }
 0x12c   : > { %v691_v59 = vadd.f32 %v690_v24, %v5207_v16  ;;  %v3834_v42 = vpop.f32.mrb[27].mxu0  ;;  %v3878_v2 = vpop.f32.mrb[27].mxu1  ;;  %4270 = vmatpush3.bf16.msra.mxu1 %v4533_v11  ;;  %v4534_v16 = vld [vmem:[%s5857_s1 + $0x208] sm:$0xff]  }
 0x12d   : > { %4271 = vmatprep.subr.bf16.mxu1 %v4578_v1 }
 0x12e   : > { %4152 = vmatmul.mubr.bf16.gmra.mrb[132].mxu1 %v1865_v28  ;;  %4216 = vmatmul.mubr.bf16.vlgmr.msra.gmra.mrb[132].mxu0 %v2277_v34 }
 0x12f   : > { %4336 = vmatpush3.bf16.msra.mxu0 %v4531_v35  ;;  %4155 = vmatprep.mubr.msk.bf16.mxu1 %vm4579_vm0, %v4578_v1 }
 0x130   : > { %4219 = vmatprep.mubr.msk.bf16.mxu0 %vm4579_vm0, %v4578_v1  ;;  %4337 = vmatprep.subr.bf16.mxu0 %v4578_v1 }
 0x131   : > { %v695_v44 = vpop.f32.mrb[28].mxu1  ;;  %v934_v47 = vpop.f32.mrb[28].mxu0  ;;  %4272 = vmatpush3.bf16.msra.mxu1 %v4537_v20 }
 0x132   : > { %v696_v49 = vadd.f32 %v695_v44, %v5220_v33  ;;  %v5335_v52 = vadd.f32 %v934_v47, %v688_v12  ;;  %v3881_v7 = vpop.f32.mrb[29].mxu1  ;;  %v3945_v53 = vpop.f32.mrb[29].mxu0  ;;  %4273 = vmatprep.subr.bf16.mxu1 %v4578_v1  ;;  %v4538_v33 = vld [vmem:[%s5857_s1 + $0x210] sm:$0xff]   ;;  %v4542_v12 = vld [vmem:[%s5857_s1 + $0x218] sm:$0xff]  }
 0x133   : > { %v698_v58 = vpop.f32.mrb[30].mxu1  ;;  %v937_v10 = vpop.f32.mrb[30].mxu0  ;;  %4338 = vmatpush3.bf16.msra.mxu0 %v4534_v16  ;;  %v5372_v16 = vld [vmem:[%s4633_s23 + $0x2c] sm:$0xff]  }
 0x134   : > { %v699_v32 = vadd.f32 %v698_v58, %v5224_v37  ;;  %v5343_v11 = vadd.f32 %v937_v10, %v691_v59  ;;  %v3946_v18 = vpop.f32.mrb[31].mxu0  ;;  %v3882_v22 = vpop.f32.mrb[31].mxu1  ;;  %4339 = vmatprep.subr.bf16.mxu0 %v4578_v1  ;;  %v2280_v37 = vrot.slane %v5340_v30, 3 }
 0x135   : > { %4274 = vmatpush3.bf16.msra.mxu1 %v4540_v39 }
 0x136   : > { %4156 = vmatmul.mubr.bf16.gmra.mrb[136].mxu1 %v5001_v51  ;;  %4220 = vmatmul.mubr.bf16.gmra.mrb[136].mxu0 %v2279_v62  ;;  %v4548_v51 = vld [vmem:[%s5857_s1 + $0x1e8] sm:$0xff]   ;;  %v2281_v20 = vsel %vm2274_vm4, %v2278_v40, %v2280_v37  ;;  %v4551_v40 = vld [vmem:[%s5857_s1 + $0x1f0] sm:$0xff]  }
 0x137   : > { %4159 = vmatprep.mubr.msk.bf16.mxu1 %vm4579_vm0, %v4578_v1  ;;  %4223 = vmatprep.mubr.msk.bf16.mxu0 %vm4579_vm0, %v4578_v1 }
 0x138   : > { %4340 = vmatpush3.bf16.msra.mxu0 %v4538_v33  ;;  %4275 = vmatprep.subr.bf16.mxu1 %v4578_v1 }
 0x139   : > { %v703_v38 = vpop.f32.mrb[32].mxu1  ;;  %v942_v24 = vpop.f32.mrb[32].mxu0  ;;  %4341 = vmatprep.subr.bf16.mxu0 %v4578_v1  ;;  %4276 = vmatpush3.bf16.msra.mxu1 %v4544_v0 }
 0x13a   : > { %v704_v28 = vadd.f32 %v703_v38, %v5235_v54  ;;  %v5367_v34 = vadd.f32 %v942_v24, %v696_v49  ;;  %v3885_v35 = vpop.f32.mrb[33].mxu1  ;;  %v3949_v59 = vpop.f32.mrb[33].mxu0  ;;  %4277 = vmatprep.subr.bf16.mxu1 %v4578_v1  ;;  %v4545_v54 = vld [vmem:[%s5857_s1 + $0x220] sm:$0xff]   ;;  %v4549_v49 = vld [vmem:[%s5857_s1 + $0x228] sm:$0xff]  }
 0x13b   : > { %v706_v42 = vpop.f32.mrb[34].mxu1  ;;  %v945_v2 = vpop.f32.mrb[34].mxu0 }
 0x13c   : > { %v707_v44 = vadd.f32 %v706_v42, %v5239_v3  ;;  %v5375_v47 = vadd.f32 %v945_v2, %v699_v32  ;;  %v3950_v39 = vpop.f32.mrb[35].mxu0  ;;  %v3886_v7 = vpop.f32.mrb[35].mxu1  ;;  %4342 = vmatpush3.bf16.msra.mxu0 %v4542_v12  ;;  %v2282_v3 = vrot.slane %v5372_v16, 3  ;;  %v5404_v12 = vld [vmem:[%s4633_s23 + $0x34] sm:$0xff]  }
 0x13d   : > { %4343 = vmatprep.subr.bf16.mxu0 %v4578_v1  ;;  %4278 = vmatpush3.bf16.msra.mxu1 %v4548_v51 }
 0x13e   : > { %4160 = vmatmul.mubr.bf16.gmra.mrb[140].mxu1 %v5019_v63  ;;  %4224 = vmatmul.mubr.bf16.gmra.mrb[140].mxu0 %v2281_v20  ;;  %v4555_v63 = vld [vmem:[%s5857_s1 + $0x1f8] sm:$0xff]   ;;  %v2283_v0 = vsel %vm2274_vm4, %v2280_v37, %v2282_v3 }
 0x13f   : > { %4163 = vmatprep.mubr.msk.bf16.mxu1 %vm4579_vm0, %v4578_v1  ;;  %4227 = vmatprep.mubr.msk.bf16.mxu0 %vm4579_vm0, %v4578_v1  ;;  %v4556_v37 = vld [vmem:[%s5857_s1 + $0x238] sm:$0xff]  }
 0x140   : > { %4344 = vmatpush3.bf16.msra.mxu0 %v4545_v54  ;;  %4279 = vmatprep.subr.bf16.mxu1 %v4578_v1  ;;  %v5428_v54 = vld [vmem:[%s4633_s23 + $0x3c] sm:$0xff]  }
 0x141   : > { %v711_v53 = vpop.f32.mrb[36].mxu1  ;;  %v950_v58 = vpop.f32.mrb[36].mxu0  ;;  %4345 = vmatprep.subr.bf16.mxu0 %v4578_v1  ;;  %4280 = vmatpush3.bf16.msra.mxu1 %v4551_v40 }
 0x142   : > { %v712_v10 = vadd.f32 %v711_v53, %v5249_v5  ;;  %v5399_v62 = vadd.f32 %v950_v58, %v704_v28  ;;  %v3889_v32 = vpop.f32.mrb[37].mxu1  ;;  %v3953_v18 = vpop.f32.mrb[37].mxu0  ;;  %4281 = vmatprep.subr.bf16.mxu1 %v4578_v1  ;;  %v4552_v5 = vld [vmem:[%s5857_s1 + $0x230] sm:$0xff]  }
 0x143   : > { %v714_v22 = vpop.f32.mrb[38].mxu1  ;;  %v953_v33 = vpop.f32.mrb[38].mxu0 }
 0x144   : > { %v715_v38 = vadd.f32 %v714_v22, %v5253_v15  ;;  %v5407_v24 = vadd.f32 %v953_v33, %v707_v44  ;;  %v3954_v51 = vpop.f32.mrb[39].mxu0  ;;  %v3890_v35 = vpop.f32.mrb[39].mxu1  ;;  %4346 = vmatpush3.bf16.msra.mxu0 %v4549_v49  ;;  %v2284_v15 = vrot.slane %v5404_v12, 3 }
 0x145   : > { %4347 = vmatprep.subr.bf16.mxu0 %v4578_v1  ;;  %4282 = vmatpush3.bf16.msra.mxu1 %v4555_v63 }
 0x146   : > { %4164 = vmatmul.mubr.bf16.gmra.mrb[144].mxu1 %v5047_v21  ;;  %4228 = vmatmul.mubr.bf16.gmra.mrb[144].mxu0 %v2283_v0  ;;  %v2285_v7 = vsel %vm2274_vm4, %v2282_v3, %v2284_v15  ;;  %v5444_v0 = vld [vmem:[%s4633_s23 + $0x44] sm:$0xff]  }
 0x147   : > { %4167 = vmatprep.mubr.msk.bf16.mxu1 %vm4579_vm0, %v4578_v1  ;;  %4231 = vmatprep.mubr.msk.bf16.mxu0 %vm4579_vm0, %v4578_v1 }
 0x148   : > { %4348 = vmatpush3.bf16.msra.mxu0 %v4552_v5 }
 0x149   : > { %v719_v28 = vpop.f32.mrb[40].mxu1  ;;  %v958_v59 = vpop.f32.mrb[40].mxu0  ;;  %4349 = vmatprep.subr.bf16.mxu0 %v4578_v1 }
 0x14a   : > { %v720_v21 = vadd.f32 %v719_v28, %v5264_v25  ;;  %v5424_v42 = vadd.f32 %v958_v59, %v712_v10  ;;  %v3893_v2 = vpop.f32.mrb[41].mxu1  ;;  %v3957_v20 = vpop.f32.mrb[41].mxu0  ;;  %v2286_v25 = vrot.slane %v5428_v54, 3 }
 0x14b   : > { %v722_v44 = vpop.f32.mrb[42].mxu1  ;;  %v961_v39 = vpop.f32.mrb[42].mxu0 }
 0x14c   : > { %v723_v40 = vadd.f32 %v722_v44, %v5269_v29  ;;  %v5431_v49 = vadd.f32 %v961_v39, %v715_v38  ;;  %v3958_v53 = vpop.f32.mrb[43].mxu0  ;;  %v3894_v58 = vpop.f32.mrb[43].mxu1  ;;  %4350 = vmatpush3.bf16.msra.mxu0 %v4556_v37  ;;  %v5460_v44 = vld [vmem:[%s4633_s23 + $0x4c] sm:$0xff]  }
 0x14e   : > { %4168 = vmatmul.mubr.bf16.gmra.mrb[148].mxu1 %v5080_v41  ;;  %4232 = vmatmul.mubr.bf16.gmra.mrb[148].mxu0 %v2285_v7  ;;  %v2287_v41 = vsel %vm2274_vm4, %v2284_v15, %v2286_v25 }
 0x14f   : > { %4171 = vmatprep.mubr.msk.bf16.mxu1 %vm4579_vm0, %v4578_v1  ;;  %4235 = vmatprep.mubr.msk.bf16.mxu0 %vm4579_vm0, %v4578_v1 }
 0x151   : > { %v727_v3 = vpop.f32.mrb[44].mxu1  ;;  %v966_v63 = vpop.f32.mrb[44].mxu0 }
 0x152   : > { %v728_v29 = vadd.f32 %v727_v3, %v5277_v46  ;;  %v5440_v10 = vadd.f32 %v966_v63, %v720_v21  ;;  %v3897_v32 = vpop.f32.mrb[45].mxu1  ;;  %v3961_v18 = vpop.f32.mrb[45].mxu0  ;;  %v2288_v46 = vrot.slane %v5444_v0, 3 }
 0x153   : > { %v730_v22 = vpop.f32.mrb[46].mxu1  ;;  %v969_v33 = vpop.f32.mrb[46].mxu0 }
 0x154   : > { %v731_v38 = vadd.f32 %v730_v22, %v5279_v50  ;;  %v5447_v51 = vadd.f32 %v969_v33, %v723_v40  ;;  %v3962_v35 = vpop.f32.mrb[47].mxu0  ;;  %v3898_v5 = vpop.f32.mrb[47].mxu1  ;;  %v5476_v22 = vld [vmem:[%s4633_s23 + $0x54] sm:$0xff]  }
 0x156   : > { %4172 = vmatmul.mubr.bf16.gmra.mrb[152].mxu1 %v5111_v57  ;;  %4236 = vmatmul.mubr.bf16.gmra.mrb[152].mxu0 %v2287_v41  ;;  %v2289_v57 = vsel %vm2274_vm4, %v2286_v25, %v2288_v46 }
 0x157   : > { %4175 = vmatprep.mubr.msk.bf16.mxu1 %vm4579_vm0, %v4578_v1  ;;  %4239 = vmatprep.mubr.msk.bf16.mxu0 %vm4579_vm0, %v4578_v1 }
 0x159   : > { %v735_v15 = vpop.f32.mrb[48].mxu1  ;;  %v974_v37 = vpop.f32.mrb[48].mxu0 }
 0x15a   : > { %v736_v50 = vadd.f32 %v735_v15, %v5302_v14  ;;  %v5456_v28 = vadd.f32 %v974_v37, %v728_v29  ;;  %v3901_v59 = vpop.f32.mrb[49].mxu1  ;;  %v3965_v21 = vpop.f32.mrb[49].mxu0  ;;  %v2290_v14 = vrot.slane %v5460_v44, 3 }
 0x15b   : > { %v738_v2 = vpop.f32.mrb[50].mxu1  ;;  %v977_v20 = vpop.f32.mrb[50].mxu0 }
 0x15c   : > { %v739_v39 = vadd.f32 %v738_v2, %v5306_v26  ;;  %v5463_v7 = vadd.f32 %v977_v20, %v731_v38  ;;  %v3966_v40 = vpop.f32.mrb[51].mxu0  ;;  %v3902_v53 = vpop.f32.mrb[51].mxu1  ;;  %v5492_v2 = vld [vmem:[%s4633_s23 + $0x5c] sm:$0xff]  }
 0x15e   : > { %4176 = vmatmul.mubr.bf16.gmra.mrb[156].mxu1 %v5139_v17  ;;  %4240 = vmatmul.mubr.bf16.gmra.mrb[156].mxu0 %v2289_v57  ;;  %v2291_v17 = vsel %vm2274_vm4, %v2288_v46, %v2290_v14 }
 0x15f   : > { %4179 = vmatprep.mubr.msk.bf16.mxu1 %vm4579_vm0, %v4578_v1  ;;  %4243 = vmatprep.mubr.msk.bf16.mxu0 %vm4579_vm0, %v4578_v1 }
 0x161   : > { %v743_v58 = vpop.f32.mrb[52].mxu1  ;;  %v982_v25 = vpop.f32.mrb[52].mxu0 }
 0x162   : > { %v744_v26 = vadd.f32 %v743_v58, %v5202_v4  ;;  %v5472_v3 = vadd.f32 %v982_v25, %v736_v50  ;;  %v3905_v63 = vpop.f32.mrb[53].mxu1  ;;  %v3969_v29 = vpop.f32.mrb[53].mxu0  ;;  %v2292_v4 = vrot.slane %v5476_v22, 3 }
 0x163   : > { %v746_v32 = vpop.f32.mrb[54].mxu1  ;;  %v985_v18 = vpop.f32.mrb[54].mxu0 }
 0x164   : > { %v747_v33 = vadd.f32 %v746_v32, %v5209_v55  ;;  %v5479_v41 = vadd.f32 %v985_v18, %v739_v39  ;;  %v3970_v38 = vpop.f32.mrb[55].mxu0  ;;  %v3906_v35 = vpop.f32.mrb[55].mxu1  ;;  %v5508_v32 = vld [vmem:[%s4633_s23 + $0x64] sm:$0xff]  }
 0x166   : > { %4180 = vmatmul.mubr.bf16.gmra.mrb[160].mxu1 %v5160_v31  ;;  %4244 = vmatmul.mubr.bf16.gmra.mrb[160].mxu0 %v2291_v17  ;;  %v2293_v31 = vsel %vm2274_vm4, %v2290_v14, %v2292_v4 }
 0x167   : > { %4183 = vmatprep.mubr.msk.bf16.mxu1 %vm4579_vm0, %v4578_v1  ;;  %4247 = vmatprep.mubr.msk.bf16.mxu0 %vm4579_vm0, %v4578_v1 }
 0x169   : > { %v751_v5 = vpop.f32.mrb[56].mxu1  ;;  %v990_v46 = vpop.f32.mrb[56].mxu0 }
 0x16a   : > { %v752_v55 = vadd.f32 %v751_v5, %v5222_v43  ;;  %v5488_v15 = vadd.f32 %v990_v46, %v744_v26  ;;  %v3909_v37 = vpop.f32.mrb[57].mxu1  ;;  %v3973_v50 = vpop.f32.mrb[57].mxu0  ;;  %v2294_v43 = vrot.slane %v5492_v2, 3 }
 0x16b   : > { %v754_v59 = vpop.f32.mrb[58].mxu1  ;;  %v993_v21 = vpop.f32.mrb[58].mxu0  ;;  %v5523_v37 = vld [vmem:[%s4633_s23 + $0x6c] ss:$0 sps:$4 sm:$0xff]  }
 0x16c   : > { %v755_v20 = vadd.f32 %v754_v59, %v5227_v45  ;;  %v5495_v57 = vadd.f32 %v993_v21, %v747_v33  ;;  %v3974_v39 = vpop.f32.mrb[59].mxu0  ;;  %v3910_v40 = vpop.f32.mrb[59].mxu1 }
 0x16d   : > { %v2539_v40 = vshrl.u32 %v5284_v56, 16 }
 0x16e   : > { %4184 = vmatmul.mubr.bf16.gmra.mrb[164].mxu1 %v5175_v48  ;;  %4248 = vmatmul.mubr.bf16.gmra.mrb[164].mxu0 %v2293_v31  ;;  %v2295_v48 = vsel %vm2274_vm4, %v2292_v4, %v2294_v43 }
 0x16f   : > { %4187 = vmatprep.mubr.msk.bf16.mxu1 %vm4579_vm0, %v4578_v1  ;;  %4251 = vmatprep.mubr.msk.bf16.mxu0 %vm4579_vm0, %v4578_v1 }
 0x171   : > { %v759_v53 = vpop.f32.mrb[60].mxu1  ;;  %v998_v14 = vpop.f32.mrb[60].mxu0 }
 0x172   : > { %v760_v45 = vadd.f32 %v759_v53, %v5237_v6  ;;  %v5504_v58 = vadd.f32 %v998_v14, %v752_v55  ;;  %v3913_v25 = vpop.f32.mrb[61].mxu1  ;;  %v3977_v26 = vpop.f32.mrb[61].mxu0  ;;  %v2296_v6 = vrot.slane %v5508_v32, 3  ;;  %v2550_v53 = vshll.u32 %v5287_v8, 16 }
 0x173   : > { %v762_v63 = vpop.f32.mrb[62].mxu1  ;;  %v1001_v29 = vpop.f32.mrb[62].mxu0 }
 0x174   : > { %v763_v18 = vadd.f32 %v762_v63, %v5242_v61  ;;  %v5511_v17 = vadd.f32 %v1001_v29, %v755_v20  ;;  %v3978_v33 = vpop.f32.mrb[63].mxu0  ;;  %v3914_v38 = vpop.f32.mrb[63].mxu1  ;;  %v2297_v59 = vsel %vm2274_vm4, %v2294_v43, %v2296_v6  ;;  %v2542_v43 = vshll.u32 %v5284_v56, 16 }
 0x175   : > { %v1946_v29 = vshrl.u32 %v5198_v23, 16  ;;  %v2541_v38 = vrot.slane %v2539_v40, 3 }
 0x176   : > { %4188 = vmatmul.mubr.bf16.gmra.mrb[168].mxu1 %v5190_v60  ;;  %4252 = vmatmul.mubr.bf16.gmra.mrb[168].mxu0 %v2295_v48  ;;  %v2544_v56 = vrot.slane %v2542_v43, 4 }
 0x177   : > { %4191 = vmatprep.mubr.msk.bf16.mxu1 %vm4579_vm0, %v4578_v1  ;;  %4255 = vmatprep.mubr.msk.bf16.mxu0 %vm4579_vm0, %v4578_v1 }
 0x178   : > { %v2545_v23 = vor.u32 %v2544_v56, %v2541_v38  ;;  %v4557_v38 = vld [vmem:[%s4633_s23 + $0x10] sm:$0xff]  }
 0x179   : > { %v767_v35 = vpop.f32.mrb[64].mxu1  ;;  %v1006_v4 = vpop.f32.mrb[64].mxu0 }
 0x17a   : > { %v768_v5 = vadd.f32 %v767_v35, %v5251_v13  ;;  %v5520_v61 = vadd.f32 %v1006_v4, %v760_v45  ;;  %v3917_v46 = vpop.f32.mrb[65].mxu1  ;;  %v3981_v55 = vpop.f32.mrb[65].mxu0  ;;  %v2298_v13 = vrot.slane %v5523_v37, 3  ;;  %v2552_v4 = vrot.slane %v2550_v53, 4 }
 0x17b   : > { %v770_v60 = vpop.f32.mrb[66].mxu1  ;;  %v1009_v50 = vpop.f32.mrb[66].mxu0 }
 0x17c   : > { %v771_v21 = vadd.f32 %v770_v60, %v5256_v19  ;;  %v5527_v31 = vadd.f32 %v1009_v50, %v763_v18  ;;  %v3982_v20 = vpop.f32.mrb[67].mxu0  ;;  %v3918_v39 = vpop.f32.mrb[67].mxu1  ;;  %v2547_v19 = vshrl.u32 %v5287_v8, 16  ;;  %v2299_v48 = vsel %vm2274_vm4, %v2296_v6, %v2298_v13 }
 0x17d   : > { %v2556_v6 = vshrl.u32 %v5315_v36, 16 }
 0x17e   : > { %4192 = vmatmul.mubr.bf16.gmra.mrb[172].mxu1 %v5213_v27  ;;  %4256 = vmatmul.mubr.bf16.gmra.mrb[172].mxu0 %v2297_v59  ;;  %v2549_v35 = vrot.slane %v2547_v19, 3 }
 0x17f   : > { %4195 = vmatprep.mubr.msk.bf16.mxu1 %vm4579_vm0, %v4578_v1  ;;  %4259 = vmatprep.mubr.msk.bf16.mxu0 %vm4579_vm0, %v4578_v1  ;;  %v2558_v19 = vrot.slane %v2556_v6, 3 }
 0x181   : > { %v775_v14 = vpop.f32.mrb[68].mxu1  ;;  %v1014_v45 = vpop.f32.mrb[68].mxu0 }
 0x182   : > { %v776_v27 = vadd.f32 %v775_v14, %v5266_v9  ;;  %v5540_v25 = vadd.f32 %v1014_v45, %v768_v5  ;;  %v3921_v26 = vpop.f32.mrb[69].mxu1  ;;  %v3985_v63 = vpop.f32.mrb[69].mxu0  ;;  %v2553_v9 = vor.u32 %v2552_v4, %v2549_v35  ;;  %v2559_v5 = vshll.u32 %v5315_v36, 16 }
 0x183   : > { %v778_v18 = vpop.f32.mrb[70].mxu1  ;;  %v1017_v33 = vpop.f32.mrb[70].mxu0  ;;  %v2568_v26 = vshll.u32 %v5340_v30, 16 }
 0x184   : > { %v5544_v46 = vadd.f32 %v1017_v33, %v771_v21  ;;  %v3986_v8 = vpop.f32.mrb[71].mxu0  ;;  %v3922_v55 = vpop.f32.mrb[71].mxu1  ;;  %v2554_v40 = vsel %vm1165_vm3, %v2545_v23, %v2553_v9  ;;  %v2561_v53 = vrot.slane %v2559_v5, 4 }
 0x185   : > { %v2570_v8 = vrot.slane %v2568_v26, 4 }
 0x186   : > { %4196 = vmatmul.mubr.bf16.gmra.mrb[176].mxu1 %v1946_v29  ;;  %4260 = vmatmul.mubr.bf16.gmra.mrb[176].mxu0 %v2299_v48  ;;  %v2562_v36 = vor.u32 %v2561_v53, %v2558_v19 }
 0x187   : > { %4263 = vmatprep.mubr.msk.bf16.mxu0 %vm4579_vm0, %v4578_v1  ;;  %4283 = vmatprep.mubr.msk.bf16.mxu1 %vm4579_vm0, %v4578_v1 }
 0x188   : > { %v2563_v35 = vsel %vm1165_vm3, %v2553_v9, %v2562_v36  ;;  %v2577_v9 = vshll.u32 %v5372_v16, 16 }
 0x189   : > { %v783_v60 = vpop.f32.mrb[72].mxu1  ;;  %v1022_v50 = vpop.f32.mrb[72].mxu0 }
 0x18a   : > { %v5552_v59 = vadd.f32 %v1022_v50, %v776_v27  ;;  %v3989_v21 = vpop.f32.mrb[73].mxu0  ;;  %v3925_v20 = vpop.f32.mrb[73].mxu1  ;;  %v2565_v27 = vshrl.u32 %v5340_v30, 16  ;;  %v2574_v30 = vshrl.u32 %v5372_v16, 16 }
 0x18b   : > { %v1025_v39 = vpop.f32.mrb[74].mxu0  ;;  %v786_v43 = vpop.f32.mrb[74].mxu1 }
 0x18c   : > { %v3990_v14 = vpop.f32.mrb[75].mxu0  ;;  %v3926_v45 = vpop.f32.mrb[75].mxu1  ;;  %v2567_v4 = vrot.slane %v2565_v27, 3  ;;  %v4558_v39 = vld [vmem:[%s4633_s23 + $0x18] sm:$0xff]   ;;  %v2576_v53 = vrot.slane %v2574_v30, 3 }
 0x18d   : > { %v2579_v14 = vrot.slane %v2577_v9, 4  ;;  %v2595_v9 = vshll.u32 %v5428_v54, 16 }
 0x18e   : > { %4264 = vmatmul.mubr.bf16.gmra.mrb[180].mxu0 %v2298_v13  ;;  %4284 = vmatmul.mubr.bf16.vlgmr.msra.gmra.mrb[180].mxu1 %v2554_v40 }
 0x18f   : > { %4287 = vmatprep.mubr.msk.bf16.mxu1 %vm4579_vm0, %v4578_v1  ;;  %4351 = vmatprep.mubr.msk.bf16.mxu0 %vm4579_vm0, %v4578_v1 }
 0x191   : > { %v1030_v63 = vpop.f32.mrb[76].mxu0  ;;  %v1377_v29 = vpop.f32.mrb[76].mxu1 }
 0x192   : > { %v1479_v48 = vadd.f32 %v1377_v29, %v5335_v52  ;;  %v3993_v18 = vpop.f32.mrb[77].mxu0  ;;  %v4013_v33 = vpop.f32.mrb[77].mxu1  ;;  %v2571_v52 = vor.u32 %v2570_v8, %v2567_v4  ;;  %v2586_v63 = vshll.u32 %v5404_v12, 16 }
 0x193   : > { %v1033_v13 = vpop.f32.mrb[78].mxu0  ;;  %v1380_v56 = vpop.f32.mrb[78].mxu1 }
 0x194   : > { %v1480_v55 = vadd.f32 %v1380_v56, %v5343_v11  ;;  %v3994_v23 = vpop.f32.mrb[79].mxu0  ;;  %v4014_v6 = vpop.f32.mrb[79].mxu1  ;;  %v2572_v19 = vsel %vm1165_vm3, %v2562_v36, %v2571_v52  ;;  %v2583_v36 = vshrl.u32 %v5404_v12, 16  ;;  %v4559_v13 = vld [vmem:[%s4633_s23 + $0x20] sm:$0xff]  }
 0x196   : > { %4288 = vmatmul.mubr.bf16.gmra.mrb[184].mxu1 %v2563_v35  ;;  %4352 = vmatmul.mubr.bf16.vlgmr.msra.gmra.mrb[184].mxu0 %v4557_v38  ;;  %v2585_v8 = vrot.slane %v2583_v36, 3  ;;  %v2604_v36 = vshll.u32 %v5444_v0, 16 }
 0x197   : > { %4291 = vmatprep.mubr.msk.bf16.mxu1 %vm4579_vm0, %v4578_v1  ;;  %4355 = vmatprep.mubr.msk.bf16.mxu0 %vm4579_vm0, %v4578_v1 }
 0x199   : > { %v1385_v5 = vpop.f32.mrb[80].mxu1  ;;  %v1703_v60 = vpop.f32.mrb[80].mxu0 }
 0x19a   : > { %v1481_v11 = vadd.f32 %v1385_v5, %v5367_v34  ;;  %v5572_v50 = vadd.f32 %v1703_v60, %v1479_v48  ;;  %v4017_v21 = vpop.f32.mrb[81].mxu1  ;;  %v4081_v20 = vpop.f32.mrb[81].mxu0  ;;  %v2580_v34 = vor.u32 %v2579_v14, %v2576_v53  ;;  %v2597_v14 = vrot.slane %v2595_v9, 4 }
 0x19b   : > { %v1388_v40 = vpop.f32.mrb[82].mxu1  ;;  %v1706_v43 = vpop.f32.mrb[82].mxu0 }
 0x19c   : > { %v1482_v45 = vadd.f32 %v1388_v40, %v5375_v47  ;;  %v5577_v27 = vadd.f32 %v1706_v43, %v1480_v55  ;;  %v4082_v16 = vpop.f32.mrb[83].mxu0  ;;  %v4018_v26 = vpop.f32.mrb[83].mxu1  ;;  %v2581_v4 = vsel %vm1165_vm3, %v2571_v52, %v2580_v34  ;;  %v2588_v55 = vrot.slane %v2586_v63, 4 }
 0x19d   : > { %v2592_v52 = vshrl.u32 %v5428_v54, 16 }
 0x19e   : > { %4292 = vmatmul.mubr.bf16.gmra.mrb[188].mxu1 %v2572_v19  ;;  %4356 = vmatmul.mubr.bf16.gmra.mrb[188].mxu0 %v4558_v39  ;;  %v4560_v39 = vld [vmem:[%s4633_s23 + $0x28] sm:$0xff]  }
 0x19f   : > { %4295 = vmatprep.mubr.msk.bf16.mxu1 %vm4579_vm0, %v4578_v1  ;;  %4359 = vmatprep.mubr.msk.bf16.mxu0 %vm4579_vm0, %v4578_v1  ;;  %v2594_v53 = vrot.slane %v2592_v52, 3 }
 0x1a1   : > { %v1393_v29 = vpop.f32.mrb[84].mxu1  ;;  %v1711_v47 = vpop.f32.mrb[84].mxu0 }
 0x1a2   : > { %v1483_v48 = vadd.f32 %v1393_v29, %v5399_v62  ;;  %v5586_v18 = vadd.f32 %v1711_v47, %v1481_v11  ;;  %v4021_v33 = vpop.f32.mrb[85].mxu1  ;;  %v4085_v38 = vpop.f32.mrb[85].mxu0  ;;  %v2589_v62 = vor.u32 %v2588_v55, %v2585_v8  ;;  %v2606_v8 = vrot.slane %v2604_v36, 4 }
 0x1a3   : > { %v1396_v56 = vpop.f32.mrb[86].mxu1  ;;  %v1714_v35 = vpop.f32.mrb[86].mxu0  ;;  %v4561_v38 = vld [vmem:[%s4633_s23 + $0x30] sm:$0xff]  }
 0x1a4   : > { %v1484_v23 = vadd.f32 %v1396_v56, %v5407_v24  ;;  %v5591_v6 = vadd.f32 %v1714_v35, %v1482_v45  ;;  %v4086_v12 = vpop.f32.mrb[87].mxu0  ;;  %v4022_v30 = vpop.f32.mrb[87].mxu1  ;;  %v2590_v19 = vsel %vm1165_vm3, %v2580_v34, %v2589_v62  ;;  %v2601_v34 = vshrl.u32 %v5444_v0, 16 }
 0x1a5   : > { %v2610_v30 = vshrl.u32 %v5460_v44, 16 }
 0x1a6   : > { %4296 = vmatmul.mubr.bf16.gmra.mrb[192].mxu1 %v2581_v4  ;;  %4360 = vmatmul.mubr.bf16.gmra.mrb[192].mxu0 %v4559_v13  ;;  %v2603_v4 = vrot.slane %v2601_v34, 3 }
 0x1a7   : > { %4299 = vmatprep.mubr.msk.bf16.mxu1 %vm4579_vm0, %v4578_v1  ;;  %4363 = vmatprep.mubr.msk.bf16.mxu0 %vm4579_vm0, %v4578_v1 }
 0x1a9   : > { %v1401_v5 = vpop.f32.mrb[88].mxu1  ;;  %v1719_v24 = vpop.f32.mrb[88].mxu0 }
 0x1aa   : > { %v1485_v60 = vadd.f32 %v1401_v5, %v5424_v42  ;;  %v5600_v11 = vadd.f32 %v1719_v24, %v1483_v48  ;;  %v4025_v21 = vpop.f32.mrb[89].mxu1  ;;  %v4089_v20 = vpop.f32.mrb[89].mxu0  ;;  %v2598_v42 = vor.u32 %v2597_v14, %v2594_v53 }
 0x1ab   : > { %v1404_v40 = vpop.f32.mrb[90].mxu1  ;;  %v1722_v43 = vpop.f32.mrb[90].mxu0  ;;  %v4562_v21 = vld [vmem:[%s4633_s23 + $0x38] sm:$0xff]  }
 0x1ac   : > { %v1486_v45 = vadd.f32 %v1404_v40, %v5431_v49  ;;  %v5605_v16 = vadd.f32 %v1722_v43, %v1484_v23  ;;  %v4090_v54 = vpop.f32.mrb[91].mxu0  ;;  %v4026_v26 = vpop.f32.mrb[91].mxu1  ;;  %v2599_v35 = vsel %vm1165_vm3, %v2589_v62, %v2598_v42  ;;  %v2613_v62 = vshll.u32 %v5460_v44, 16 }
 0x1ad   : > { %v2612_v43 = vrot.slane %v2610_v30, 3  ;;  %v2619_v54 = vshrl.u32 %v5476_v22, 16  ;;  %v2622_v26 = vshll.u32 %v5476_v22, 16 }
 0x1ae   : > { %4300 = vmatmul.mubr.bf16.gmra.mrb[196].mxu1 %v2590_v19  ;;  %4364 = vmatmul.mubr.bf16.gmra.mrb[196].mxu0 %v4560_v39  ;;  %v2615_v19 = vrot.slane %v2613_v62, 4 }
 0x1af   : > { %4303 = vmatprep.mubr.msk.bf16.mxu1 %vm4579_vm0, %v4578_v1  ;;  %4367 = vmatprep.mubr.msk.bf16.mxu0 %vm4579_vm0, %v4578_v1 }
 0x1b1   : > { %v1409_v63 = vpop.f32.mrb[92].mxu1  ;;  %v1727_v49 = vpop.f32.mrb[92].mxu0 }
 0x1b2   : > { %v1487_v29 = vadd.f32 %v1409_v63, %v5440_v10  ;;  %v5614_v47 = vadd.f32 %v1727_v49, %v1485_v60  ;;  %v4029_v48 = vpop.f32.mrb[93].mxu1  ;;  %v4093_v33 = vpop.f32.mrb[93].mxu0  ;;  %v2607_v10 = vor.u32 %v2606_v8, %v2603_v4 }
 0x1b3   : > { %v1412_v13 = vpop.f32.mrb[94].mxu1  ;;  %v1730_v56 = vpop.f32.mrb[94].mxu0 }
 0x1b4   : > { %v1488_v55 = vadd.f32 %v1412_v13, %v5447_v51  ;;  %v5619_v23 = vadd.f32 %v1730_v56, %v1486_v45  ;;  %v4094_v0 = vpop.f32.mrb[95].mxu0  ;;  %v4030_v12 = vpop.f32.mrb[95].mxu1  ;;  %v2608_v40 = vsel %vm1165_vm3, %v2598_v42, %v2607_v10  ;;  %v2621_v13 = vrot.slane %v2619_v54, 3 }
 0x1b5   : > { %v2624_v56 = vrot.slane %v2622_v26, 4  ;;  %v2631_v0 = vshll.u32 %v5492_v2, 16 }
 0x1b6   : > { %4304 = vmatmul.mubr.bf16.gmra.mrb[200].mxu1 %v2599_v35  ;;  %4368 = vmatmul.mubr.bf16.gmra.mrb[200].mxu0 %v4561_v38 }
 0x1b7   : > { %4307 = vmatprep.mubr.msk.bf16.mxu1 %vm4579_vm0, %v4578_v1  ;;  %4371 = vmatprep.mubr.msk.bf16.mxu0 %vm4579_vm0, %v4578_v1 }
 0x1b9   : > { %v1417_v52 = vpop.f32.mrb[96].mxu1  ;;  %v1735_v51 = vpop.f32.mrb[96].mxu0 }
 0x1ba   : > { %v1489_v9 = vadd.f32 %v1417_v52, %v5456_v28  ;;  %v5628_v5 = vadd.f32 %v1735_v51, %v1487_v29  ;;  %v4033_v24 = vpop.f32.mrb[97].mxu1  ;;  %v4097_v60 = vpop.f32.mrb[97].mxu0  ;;  %v2616_v28 = vor.u32 %v2615_v19, %v2612_v43  ;;  %v4563_v29 = vld [vmem:[%s4633_s23 + $0x40] sm:$0xff]   ;;  %v4564_v51 = vld [vmem:[%s4633_s23 + $0x48] sm:$0xff]   ;;  %v2637_v19 = vshrl.u32 %v5508_v32, 16 }
 0x1bb   : > { %v1420_v20 = vpop.f32.mrb[98].mxu1  ;;  %v1738_v39 = vpop.f32.mrb[98].mxu0 }
 0x1bc   : > { %v1490_v53 = vadd.f32 %v1420_v20, %v5463_v7  ;;  %v5633_v14 = vadd.f32 %v1738_v39, %v1488_v55  ;;  %v4098_v44 = vpop.f32.mrb[99].mxu0  ;;  %v4034_v45 = vpop.f32.mrb[99].mxu1  ;;  %v2617_v38 = vsel %vm1165_vm3, %v2607_v10, %v2616_v28  ;;  %v2628_v55 = vshrl.u32 %v5492_v2, 16 }
 0x1bd   : > { %v2633_v20 = vrot.slane %v2631_v0, 4  ;;  %v4566_v0 = vld [vmem:[%s4633_s23 + $0x58] sm:$0xff]  }
 0x1be   : > { %4308 = vmatmul.mubr.bf16.gmra.mrb[204].mxu1 %v2608_v40  ;;  %4372 = vmatmul.mubr.bf16.gmra.mrb[204].mxu0 %v4562_v21  ;;  %v2630_v21 = vrot.slane %v2628_v55, 3 }
 0x1bf   : > { %4311 = vmatprep.mubr.msk.bf16.mxu1 %vm4579_vm0, %v4578_v1  ;;  %4375 = vmatprep.mubr.msk.bf16.mxu0 %vm4579_vm0, %v4578_v1 }
 0x1c1   : > { %v1425_v42 = vpop.f32.mrb[100].mxu1  ;;  %v1743_v7 = vpop.f32.mrb[100].mxu0 }
 0x1c2   : > { %v1491_v34 = vadd.f32 %v1425_v42, %v5472_v3  ;;  %v5642_v36 = vadd.f32 %v1743_v7, %v1489_v9  ;;  %v4037_v63 = vpop.f32.mrb[101].mxu1  ;;  %v4101_v49 = vpop.f32.mrb[101].mxu0  ;;  %v2625_v3 = vor.u32 %v2624_v56, %v2621_v13  ;;  %v4565_v42 = vld [vmem:[%s4633_s23 + $0x50] sm:$0xff]   ;;  %v2646_v13 = vshrl.u32 %v5523_v37, 16 }
 0x1c3   : > { %v1428_v48 = vpop.f32.mrb[102].mxu1  ;;  %v1746_v33 = vpop.f32.mrb[102].mxu0  ;;  %v2639_v49 = vrot.slane %v2637_v19, 3  ;;  %v2649_v56 = vshll.u32 %v5523_v37, 16 }
 0x1c4   : > { %v1492_v35 = vadd.f32 %v1428_v48, %v5479_v41  ;;  %v5647_v4 = vadd.f32 %v1746_v33, %v1490_v53  ;;  %v4102_v22 = vpop.f32.mrb[103].mxu0  ;;  %v4038_v8 = vpop.f32.mrb[103].mxu1  ;;  %v2626_v60 = vsel %vm1165_vm3, %v2616_v28, %v2625_v3  ;;  %v2640_v53 = vshll.u32 %v5508_v32, 16 }
 0x1c6   : > { %4312 = vmatmul.mubr.bf16.gmra.mrb[208].mxu1 %v2617_v38  ;;  %4376 = vmatmul.mubr.bf16.gmra.mrb[208].mxu0 %v4563_v29  ;;  %v2642_v29 = vrot.slane %v2640_v53, 4 }
 0x1c7   : > { %4315 = vmatprep.mubr.msk.bf16.mxu1 %vm4579_vm0, %v4578_v1  ;;  %4379 = vmatprep.mubr.msk.bf16.mxu0 %vm4579_vm0, %v4578_v1 }
 0x1c9   : > { %v1433_v12 = vpop.f32.mrb[104].mxu1  ;;  %v1751_v41 = vpop.f32.mrb[104].mxu0 }
 0x1ca   : > { %v1493_v10 = vadd.f32 %v1433_v12, %v5488_v15  ;;  %v5656_v30 = vadd.f32 %v1751_v41, %v1491_v34  ;;  %v4041_v62 = vpop.f32.mrb[105].mxu1  ;;  %v4105_v52 = vpop.f32.mrb[105].mxu0  ;;  %v2634_v15 = vor.u32 %v2633_v20, %v2630_v21 }
 0x1cb   : > { %v1436_v9 = vpop.f32.mrb[106].mxu1  ;;  %v1754_v24 = vpop.f32.mrb[106].mxu0  ;;  %v2648_v62 = vrot.slane %v2646_v13, 3  ;;  %v2651_v52 = vrot.slane %v2649_v56, 4 }
 0x1cc   : > { %v1494_v39 = vadd.f32 %v1436_v9, %v5495_v57  ;;  %v5661_v40 = vadd.f32 %v1754_v24, %v1492_v35  ;;  %v4106_v2 = vpop.f32.mrb[107].mxu0  ;;  %v4042_v43 = vpop.f32.mrb[107].mxu1  ;;  %v2635_v63 = vsel %vm1165_vm3, %v2625_v3, %v2634_v15 }
 0x1cd   : > { %v4567_v43 = vld [vmem:[%s4633_s23 + $0x60] sm:$0xff]  }
 0x1ce   : > { %4316 = vmatmul.mubr.bf16.gmra.mrb[212].mxu1 %v2626_v60  ;;  %4380 = vmatmul.mubr.bf16.gmra.mrb[212].mxu0 %v4564_v51 }
 0x1cf   : > { %4319 = vmatprep.mubr.msk.bf16.mxu1 %vm4579_vm0, %v4578_v1  ;;  %4383 = vmatprep.mubr.msk.bf16.mxu0 %vm4579_vm0, %v4578_v1 }
 0x1d1   : > { %v1441_v44 = vpop.f32.mrb[108].mxu1  ;;  %v1759_v57 = vpop.f32.mrb[108].mxu0 }
 0x1d2   : > { %v1495_v45 = vadd.f32 %v1441_v44, %v5504_v58  ;;  %v5670_v28 = vadd.f32 %v1759_v57, %v1493_v10  ;;  %v4045_v54 = vpop.f32.mrb[109].mxu1  ;;  %v4109_v26 = vpop.f32.mrb[109].mxu0  ;;  %v2643_v58 = vor.u32 %v2642_v29, %v2639_v49 }
 0x1d3   : > { %v1444_v7 = vpop.f32.mrb[110].mxu1  ;;  %v1762_v34 = vpop.f32.mrb[110].mxu0 }
 0x1d4   : > { %v1496_v48 = vadd.f32 %v1444_v7, %v5511_v17  ;;  %v5675_v33 = vadd.f32 %v1762_v34, %v1494_v39  ;;  %v4110_v32 = vpop.f32.mrb[111].mxu0  ;;  %v4046_v38 = vpop.f32.mrb[111].mxu1  ;;  %v2644_v10 = vsel %vm1165_vm3, %v2634_v15, %v2643_v58 }
 0x1d6   : > { %4320 = vmatmul.mubr.bf16.gmra.mrb[216].mxu1 %v2635_v63  ;;  %4384 = vmatmul.mubr.bf16.gmra.mrb[216].mxu0 %v4565_v42  ;;  %v4568_v63 = vld [vmem:[%s4633_s23 + $0x68] sm:$0xff]  }
 0x1d7   : > { %4323 = vmatprep.mubr.msk.bf16.mxu1 %vm4579_vm0, %v4578_v1  ;;  %4387 = vmatprep.mubr.msk.bf16.mxu0 %vm4579_vm0, %v4578_v1 }
 0x1d9   : > { %v1449_v35 = vpop.f32.mrb[112].mxu1  ;;  %v1767_v17 = vpop.f32.mrb[112].mxu0 }
 0x1da   : > { %v1497_v22 = vadd.f32 %v1449_v35, %v5520_v61  ;;  %v5684_v8 = vadd.f32 %v1767_v17, %v1495_v45  ;;  %v4049_v3 = vpop.f32.mrb[113].mxu1  ;;  %v4113_v55 = vpop.f32.mrb[113].mxu0  ;;  %v2652_v61 = vor.u32 %v2651_v52, %v2648_v62  ;;  %v4569_v17 = vld [vmem:[%s4633_s23 + $0x70] ss:$0 sps:$4 sm:$0x11]  }
 0x1db   : > { %v1452_v12 = vpop.f32.mrb[114].mxu1  ;;  %v1770_v41 = vpop.f32.mrb[114].mxu0 }
 0x1dc   : > { %v1498_v51 = vadd.f32 %v1452_v12, %v5527_v31  ;;  %v5689_v9 = vadd.f32 %v1770_v41, %v1496_v48  ;;  %v4114_v37 = vpop.f32.mrb[115].mxu0  ;;  %v4050_v24 = vpop.f32.mrb[115].mxu1  ;;  %v2653_v53 = vsel %vm1165_vm3, %v2643_v58, %v2652_v61 }
 0x1de   : > { %4324 = vmatmul.mubr.bf16.gmra.mrb[220].mxu1 %v2644_v10  ;;  %4388 = vmatmul.mubr.bf16.gmra.mrb[220].mxu0 %v4566_v0 }
 0x1df   : > { %4327 = vmatprep.mubr.msk.bf16.mxu1 %vm4579_vm0, %v4578_v1  ;;  %4391 = vmatprep.mubr.msk.bf16.mxu0 %vm4579_vm0, %v4578_v1 }
 0x1e1   : > { %v1457_v60 = vpop.f32.mrb[116].mxu1  ;;  %v1775_v21 = vpop.f32.mrb[116].mxu0 }
 0x1e2   : > { %v1499_v20 = vadd.f32 %v1457_v60, %v5540_v25  ;;  %v5696_v39 = vadd.f32 %v1775_v21, %v1497_v22  ;;  %v4053_v31 = vpop.f32.mrb[117].mxu1  ;;  %v4117_v2 = vpop.f32.mrb[117].mxu0 }
 0x1e3   : > { %v1460_v15 = vpop.f32.mrb[118].mxu1  ;;  %v1778_v19 = vpop.f32.mrb[118].mxu0 }
 0x1e4   : > { %v1500_v44 = vadd.f32 %v1460_v15, %v5544_v46  ;;  %v5701_v57 = vadd.f32 %v1778_v19, %v1498_v51  ;;  %v4118_v45 = vpop.f32.mrb[119].mxu0  ;;  %v4054_v54 = vpop.f32.mrb[119].mxu1 }
 0x1e6   : > { %4328 = vmatmul.mubr.bf16.gmra.mrb[224].mxu1 %v2653_v53  ;;  %4392 = vmatmul.mubr.bf16.gmra.mrb[224].mxu0 %v4567_v43 }
 0x1e7   : > { %4331 = vmatprep.mubr.msk.bf16.mxu1 %vm4579_vm0, %v4578_v1  ;;  %4395 = vmatprep.mubr.msk.bf16.mxu0 %vm4579_vm0, %v4578_v1 }
 0x1e9   : > { %v1465_v25 = vpop.f32.mrb[120].mxu1  ;;  %v1783_v26 = vpop.f32.mrb[120].mxu0 }
 0x1ea   : > { %v1501_v42 = vadd.f32 %v1465_v25, %v5552_v59  ;;  %v5708_v7 = vadd.f32 %v1783_v26, %v1499_v20  ;;  %v4057_v34 = vpop.f32.mrb[121].mxu1  ;;  %v4121_v46 = vpop.f32.mrb[121].mxu0 }
 0x1eb   : > { %v1468_v49 = vpop.f32.mrb[122].mxu1  ;;  %v1786_v29 = vpop.f32.mrb[122].mxu0 }
 0x1ec   : > { %v5711_v48 = vadd.f32 %v1786_v29, %v1500_v44  ;;  %v4122_v32 = vpop.f32.mrb[123].mxu0  ;;  %v4058_v38 = vpop.f32.mrb[123].mxu1 }
 0x1ee   : > { %4332 = vmatmul.mubr.bf16.gmra.mrb[228].mxu1 %v2648_v62  ;;  %4396 = vmatmul.mubr.bf16.gmra.mrb[228].mxu0 %v4568_v63 }
 0x1ef   : > { %4399 = vmatprep.mubr.msk.bf16.mxu0 %vm4579_vm0, %v4578_v1 }
 0x1f1   : > { %v1473_v58 = vpop.f32.mrb[124].mxu1  ;;  %v1791_v13 = vpop.f32.mrb[124].mxu0 }
 0x1f2   : > { %v5715_v59 = vadd.f32 %v1791_v13, %v1501_v42  ;;  %v4125_v56 = vpop.f32.mrb[125].mxu0  ;;  %v4061_v35 = vpop.f32.mrb[125].mxu1 }
 0x1f3   : > { %v1794_v22 = vpop.f32.mrb[126].mxu0  ;;  %v1476_v3 = vpop.f32.mrb[126].mxu1 }
 0x1f4   : > { %v4126_v55 = vpop.f32.mrb[127].mxu0  ;;  %v4062_v0 = vpop.f32.mrb[127].mxu1 }
 0x1f6   : > { %4400 = vmatmul.mubr.bf16.gmra.mrb[232].mxu0 %v4569_v17 }
 0x1f9   : > { %v1799_v12 = vpop.f32.mrb[128].mxu0  ;;  %v2043_v41 = vpop.f32.mrb[128].mxu1 }
 0x1fa   : > { %v2145_v10 = vadd.f32 %v2043_v41, %v5572_v50  ;;  %v4129_v62 = vpop.f32.mrb[129].mxu0  ;;  %v4149_v52 = vpop.f32.mrb[129].mxu1 }
 0x1fb   : > { %v1802_v51 = vpop.f32.mrb[130].mxu0  ;;  %v2046_v1 = vpop.f32.mrb[130].mxu1 }
 0x1fc   : > { %v2146_v37 = vadd.f32 %v2046_v1, %v5577_v27  ;;  %v4130_v24 = vpop.f32.mrb[131].mxu0  ;;  %v4150_v61 = vpop.f32.mrb[131].mxu1 }
 0x201   : > { %v2051_v60 = vpop.f32.mrb[132].mxu1  ;;  %v2395_v21 = vpop.f32.mrb[132].mxu0 }
 0x202   : > { %v2147_v20 = vadd.f32 %v2051_v60, %v5586_v18  ;;  %v5721_v31 = vadd.f32 %v2395_v21, %v2145_v10  ;;  %v4153_v2 = vpop.f32.mrb[133].mxu1  ;;  %v4217_v43 = vpop.f32.mrb[133].mxu0 }
 0x203   : > { %v2054_v15 = vpop.f32.mrb[134].mxu1  ;;  %v2398_v19 = vpop.f32.mrb[134].mxu0 }
 0x204   : > { %v2148_v50 = vadd.f32 %v2054_v15, %v5591_v6  ;;  %v5724_v53 = vadd.f32 %v2398_v19, %v2146_v37  ;;  %v4218_v44 = vpop.f32.mrb[135].mxu0  ;;  %v4154_v45 = vpop.f32.mrb[135].mxu1 }
 0x209   : > { %v2059_v54 = vpop.f32.mrb[136].mxu1  ;;  %v2403_v27 = vpop.f32.mrb[136].mxu0 }
 0x20a   : > { %v2149_v25 = vadd.f32 %v2059_v54, %v5600_v11  ;;  %v5727_v26 = vadd.f32 %v2403_v27, %v2147_v20  ;;  %v4157_v42 = vpop.f32.mrb[137].mxu1  ;;  %v4221_v18 = vpop.f32.mrb[137].mxu0 }
 0x20b   : > { %v2062_v34 = vpop.f32.mrb[138].mxu1  ;;  %v2406_v46 = vpop.f32.mrb[138].mxu0 }
 0x20c   : > { %v2150_v63 = vadd.f32 %v2062_v34, %v5605_v16  ;;  %v5730_v49 = vadd.f32 %v2406_v46, %v2148_v50  ;;  %v4222_v29 = vpop.f32.mrb[139].mxu0  ;;  %v4158_v6 = vpop.f32.mrb[139].mxu1 }
 0x211   : > { %v2067_v32 = vpop.f32.mrb[140].mxu1  ;;  %v2411_v38 = vpop.f32.mrb[140].mxu0 }
 0x212   : > { %v2151_v58 = vadd.f32 %v2067_v32, %v5614_v47  ;;  %v5733_v13 = vadd.f32 %v2411_v38, %v2149_v25  ;;  %v4161_v56 = vpop.f32.mrb[141].mxu1  ;;  %v4225_v11 = vpop.f32.mrb[141].mxu0 }
 0x213   : > { %v2070_v35 = vpop.f32.mrb[142].mxu1  ;;  %v2414_v17 = vpop.f32.mrb[142].mxu0 }
 0x214   : > { %v2152_v22 = vadd.f32 %v2070_v35, %v5619_v23  ;;  %v5736_v3 = vadd.f32 %v2414_v17, %v2150_v63  ;;  %v4226_v55 = vpop.f32.mrb[143].mxu0  ;;  %v4162_v16 = vpop.f32.mrb[143].mxu1 }
 0x219   : > { %v2075_v0 = vpop.f32.mrb[144].mxu1  ;;  %v2419_v12 = vpop.f32.mrb[144].mxu0 }
 0x21a   : > { %v2153_v41 = vadd.f32 %v2075_v0, %v5628_v5  ;;  %v5739_v10 = vadd.f32 %v2419_v12, %v2151_v58  ;;  %v4165_v62 = vpop.f32.mrb[145].mxu1  ;;  %v4229_v47 = vpop.f32.mrb[145].mxu0 }
 0x21b   : > { %v2078_v52 = vpop.f32.mrb[146].mxu1  ;;  %v2422_v51 = vpop.f32.mrb[146].mxu0 }
 0x21c   : > { %v2154_v1 = vadd.f32 %v2078_v52, %v5633_v14  ;;  %v5742_v37 = vadd.f32 %v2422_v51, %v2152_v22  ;;  %v4230_v24 = vpop.f32.mrb[147].mxu0  ;;  %v4166_v23 = vpop.f32.mrb[147].mxu1 }
 0x221   : > { %v2083_v61 = vpop.f32.mrb[148].mxu1  ;;  %v2427_v60 = vpop.f32.mrb[148].mxu0 }
 0x222   : > { %v2155_v21 = vadd.f32 %v2083_v61, %v5642_v36  ;;  %v5745_v20 = vadd.f32 %v2427_v60, %v2153_v41  ;;  %v4169_v2 = vpop.f32.mrb[149].mxu1  ;;  %v4233_v5 = vpop.f32.mrb[149].mxu0 }
 0x223   : > { %v2086_v43 = vpop.f32.mrb[150].mxu1  ;;  %v2430_v15 = vpop.f32.mrb[150].mxu0 }
 0x224   : > { %v2156_v19 = vadd.f32 %v2086_v43, %v5647_v4  ;;  %v5748_v50 = vadd.f32 %v2430_v15, %v2154_v1  ;;  %v4234_v44 = vpop.f32.mrb[151].mxu0  ;;  %v4170_v14 = vpop.f32.mrb[151].mxu1 }
 0x229   : > { %v2091_v45 = vpop.f32.mrb[152].mxu1  ;;  %v2435_v54 = vpop.f32.mrb[152].mxu0 }
 0x22a   : > { %v2157_v27 = vadd.f32 %v2091_v45, %v5656_v30  ;;  %v5751_v25 = vadd.f32 %v2435_v54, %v2155_v21  ;;  %v4173_v42 = vpop.f32.mrb[153].mxu1  ;;  %v4237_v36 = vpop.f32.mrb[153].mxu0 }
 0x22b   : > { %v2094_v18 = vpop.f32.mrb[154].mxu1  ;;  %v2438_v34 = vpop.f32.mrb[154].mxu0 }
 0x22c   : > { %v2158_v46 = vadd.f32 %v2094_v18, %v5661_v40  ;;  %v5754_v63 = vadd.f32 %v2438_v34, %v2156_v19  ;;  %v4238_v29 = vpop.f32.mrb[155].mxu0  ;;  %v4174_v4 = vpop.f32.mrb[155].mxu1 }
 0x231   : > { %v2099_v6 = vpop.f32.mrb[156].mxu1  ;;  %v2443_v32 = vpop.f32.mrb[156].mxu0 }
 0x232   : > { %v2159_v38 = vadd.f32 %v2099_v6, %v5670_v28  ;;  %v5757_v58 = vadd.f32 %v2443_v32, %v2157_v27  ;;  %v4177_v56 = vpop.f32.mrb[157].mxu1  ;;  %v4241_v30 = vpop.f32.mrb[157].mxu0 }
 0x233   : > { %v2102_v11 = vpop.f32.mrb[158].mxu1  ;;  %v2446_v35 = vpop.f32.mrb[158].mxu0 }
 0x234   : > { %v2160_v17 = vadd.f32 %v2102_v11, %v5675_v33  ;;  %v5760_v22 = vadd.f32 %v2446_v35, %v2158_v46  ;;  %v4242_v55 = vpop.f32.mrb[159].mxu0  ;;  %v4178_v40 = vpop.f32.mrb[159].mxu1 }
 0x239   : > { %v2107_v16 = vpop.f32.mrb[160].mxu1  ;;  %v2451_v0 = vpop.f32.mrb[160].mxu0 }
 0x23a   : > { %v2161_v12 = vadd.f32 %v2107_v16, %v5684_v8  ;;  %v5763_v41 = vadd.f32 %v2451_v0, %v2159_v38  ;;  %v4181_v62 = vpop.f32.mrb[161].mxu1  ;;  %v4245_v28 = vpop.f32.mrb[161].mxu0 }
 0x23b   : > { %v2110_v47 = vpop.f32.mrb[162].mxu1  ;;  %v2454_v52 = vpop.f32.mrb[162].mxu0 }
 0x23c   : > { %v2162_v51 = vadd.f32 %v2110_v47, %v5689_v9  ;;  %v5766_v1 = vadd.f32 %v2454_v52, %v2160_v17  ;;  %v4246_v24 = vpop.f32.mrb[163].mxu0  ;;  %v4182_v33 = vpop.f32.mrb[163].mxu1 }
 0x241   : > { %v2115_v23 = vpop.f32.mrb[164].mxu1  ;;  %v2459_v61 = vpop.f32.mrb[164].mxu0 }
 0x242   : > { %v2163_v60 = vadd.f32 %v2115_v23, %v5696_v39  ;;  %v5769_v21 = vadd.f32 %v2459_v61, %v2161_v12  ;;  %v4185_v2 = vpop.f32.mrb[165].mxu1  ;;  %v4249_v8 = vpop.f32.mrb[165].mxu0 }
 0x243   : > { %v2118_v5 = vpop.f32.mrb[166].mxu1  ;;  %v2462_v43 = vpop.f32.mrb[166].mxu0 }
 0x244   : > { %v2164_v15 = vadd.f32 %v2118_v5, %v5701_v57  ;;  %v5772_v19 = vadd.f32 %v2462_v43, %v2162_v51  ;;  %v4250_v44 = vpop.f32.mrb[167].mxu0  ;;  %v4186_v9 = vpop.f32.mrb[167].mxu1 }
 0x245   : > { %v5792_v44 = vld [vmem:[%s5858_s2] ss:$0 sm:$0xff] }
 0x249   : > { %v2123_v14 = vpop.f32.mrb[168].mxu1  ;;  %v2467_v45 = vpop.f32.mrb[168].mxu0 }
 0x24a   : > { %v2165_v54 = vadd.f32 %v2123_v14, %v5708_v7  ;;  %v5775_v27 = vadd.f32 %v2467_v45, %v2163_v60  ;;  %v4189_v42 = vpop.f32.mrb[169].mxu1  ;;  %v4253_v39 = vpop.f32.mrb[169].mxu0 }
 0x24b   : > { %v2126_v36 = vpop.f32.mrb[170].mxu1  ;;  %v2470_v18 = vpop.f32.mrb[170].mxu0 }
 0x24c   : > { %v2166_v34 = vadd.f32 %v2126_v36, %v5711_v48  ;;  %v5778_v46 = vadd.f32 %v2470_v18, %v2164_v15  ;;  %v4254_v29 = vpop.f32.mrb[171].mxu0  ;;  %v4190_v57 = vpop.f32.mrb[171].mxu1 }
 0x251   : > { %v2131_v4 = vpop.f32.mrb[172].mxu1  ;;  %v2475_v6 = vpop.f32.mrb[172].mxu0 }
 0x252   : > { %v2167_v32 = vadd.f32 %v2131_v4, %v5715_v59  ;;  %v5781_v38 = vadd.f32 %v2475_v6, %v2165_v54  ;;  %v4193_v56 = vpop.f32.mrb[173].mxu1  ;;  %v4257_v7 = vpop.f32.mrb[173].mxu0 }
 0x253   : > { %v2134_v30 = vpop.f32.mrb[174].mxu1  ;;  %v2478_v11 = vpop.f32.mrb[174].mxu0 }
 0x254   : > { %v5783_v35 = vadd.f32 %v2478_v11, %v2166_v34  ;;  %v4258_v17 = vpop.f32.mrb[175].mxu0  ;;  %v4194_v55 = vpop.f32.mrb[175].mxu1 }
 0x259   : > { %v2139_v40 = vpop.f32.mrb[176].mxu1  ;;  %v2483_v48 = vpop.f32.mrb[176].mxu0 }
 0x25a   : > { %v5785_v16 = vadd.f32 %v2483_v48, %v2167_v32  ;;  %v4261_v0 = vpop.f32.mrb[177].mxu0  ;;  %v4197_v12 = vpop.f32.mrb[177].mxu1 }
 0x25b   : > { %v2486_v62 = vpop.f32.mrb[178].mxu0  ;;  %v2142_v28 = vpop.f32.mrb[178].mxu1 }
 0x25c   : > { %v4262_v47 = vpop.f32.mrb[179].mxu0  ;;  %v4198_v59 = vpop.f32.mrb[179].mxu1 }
 0x261   : > { %v2491_v52 = vpop.f32.mrb[180].mxu0  ;;  %v2749_v51 = vpop.f32.mrb[180].mxu1 }
 0x262   : > { %v2851_v24 = vadd.f32 %v2749_v51, %v5721_v31  ;;  %v4265_v33 = vpop.f32.mrb[181].mxu0  ;;  %v4285_v23 = vpop.f32.mrb[181].mxu1 }
 0x263   : > { %v2494_v61 = vpop.f32.mrb[182].mxu0  ;;  %v2752_v60 = vpop.f32.mrb[182].mxu1 }
 0x264   : > { %v2852_v2 = vadd.f32 %v2752_v60, %v5724_v53  ;;  %v4266_v8 = vpop.f32.mrb[183].mxu0  ;;  %v4286_v5 = vpop.f32.mrb[183].mxu1 }
 0x269   : > { %v2757_v43 = vpop.f32.mrb[184].mxu1  ;;  %v3075_v15 = vpop.f32.mrb[184].mxu0 }
 0x26a   : > { %v2853_v9 = vadd.f32 %v2757_v43, %v5727_v26  ;;  %v3177_v14 = vadd.f32 %v3075_v15, %v2851_v24  ;;  %v4289_v45 = vpop.f32.mrb[185].mxu1  ;;  %v4353_v31 = vpop.f32.mrb[185].mxu0 }
 0x26b   : > { %v2760_v54 = vpop.f32.mrb[186].mxu1  ;;  %v3078_v42 = vpop.f32.mrb[186].mxu0 }
 0x26c   : > { %v3209_v39 = vadd.f32 %v5792_v44, %v3177_v14  ;;  %v2854_v53 = vadd.f32 %v2760_v54, %v5730_v49  ;;  %v3178_v36 = vadd.f32 %v3078_v42, %v2852_v2  ;;  %v4354_v18 = vpop.f32.mrb[187].mxu0  ;;  %v4290_v34 = vpop.f32.mrb[187].mxu1 }
 0x26e   : > { %v3234_v29 = vmax.f32 %v3209_v39, 0.0  ;;  %v3210_v57 = vadd.f32 %v5792_v44, %v3178_v36 }
 0x270   : > { %3259 = vst [vmem:[#allocation2] sm:$0xff] %v3234_v29  ;;  %v3235_v4 = vmax.f32 %v3210_v57, 0.0 }
 0x271   : > { %v2765_v6 = vpop.f32.mrb[188].mxu1  ;;  %v3083_v32 = vpop.f32.mrb[188].mxu0 }
 0x272   : > { %3260 = vst [vmem:[#allocation2 + $0x8] sm:$0xff] %v3235_v4  ;;  %v2855_v26 = vadd.f32 %v2765_v6, %v5733_v13  ;;  %v3179_v56 = vadd.f32 %v3083_v32, %v2853_v9  ;;  %v4293_v7 = vpop.f32.mrb[189].mxu1  ;;  %v4357_v30 = vpop.f32.mrb[189].mxu0 }
 0x273   : > { %v2768_v11 = vpop.f32.mrb[190].mxu1  ;;  %v3086_v17 = vpop.f32.mrb[190].mxu0 }
 0x274   : > { %v3211_v49 = vadd.f32 %v5792_v44, %v3179_v56  ;;  %v2856_v55 = vadd.f32 %v2768_v11, %v5736_v3  ;;  %v3180_v40 = vadd.f32 %v3086_v17, %v2854_v53  ;;  %v4358_v48 = vpop.f32.mrb[191].mxu0  ;;  %v4294_v0 = vpop.f32.mrb[191].mxu1 }
 0x276   : > { %v3236_v12 = vmax.f32 %v3211_v49, 0.0  ;;  %v3212_v62 = vadd.f32 %v5792_v44, %v3180_v40 }
 0x278   : > { %3261 = vst [vmem:[#allocation2 + $0x10] sm:$0xff] %v3236_v12  ;;  %v3237_v28 = vmax.f32 %v3212_v62, 0.0 }
 0x279   : > { %v2773_v47 = vpop.f32.mrb[192].mxu1  ;;  %v3091_v13 = vpop.f32.mrb[192].mxu0  ;;  %v3284_v5 = vld [vmem:[#allocation2] ss:$2 sm:$0x3f] }
 0x27a   : > { %3262 = vst [vmem:[#allocation2 + $0x18] sm:$0xff] %v3237_v28  ;;  %v2857_v59 = vadd.f32 %v2773_v47, %v5739_v10  ;;  %v3181_v52 = vadd.f32 %v3091_v13, %v2855_v26  ;;  %v4297_v51 = vpop.f32.mrb[193].mxu1  ;;  %v4361_v24 = vpop.f32.mrb[193].mxu0  ;;  %v3286_v43 = vld [vmem:[#allocation2 + $0x1] ss:$2 sm:$0x3f] }
 0x27b   : > { %v2776_v33 = vpop.f32.mrb[194].mxu1  ;;  %v3094_v23 = vpop.f32.mrb[194].mxu0  ;;  %v3287_v45 = vmax.f32 %v3284_v5, %v3286_v43 }
 0x27c   : > { %v3213_v3 = vadd.f32 %v5792_v44, %v3181_v52  ;;  %v2858_v61 = vadd.f32 %v2776_v33, %v5742_v37  ;;  %v3182_v60 = vadd.f32 %v3094_v23, %v2856_v55  ;;  %v4362_v2 = vpop.f32.mrb[195].mxu0  ;;  %v4298_v8 = vpop.f32.mrb[195].mxu1 }
 0x27e   : > { %v3238_v15 = vmax.f32 %v3213_v3, 0.0  ;;  %v3214_v9 = vadd.f32 %v5792_v44, %v3182_v60 }
 0x280   : > { %3263 = vst [vmem:[#allocation2 + $0x20] sm:$0xff] %v3238_v15  ;;  %v3239_v54 = vmax.f32 %v3214_v9, 0.0 }
 0x281   : > { %v3289_v14 = vld [vmem:[#allocation2 + $0xf] ss:$2 sm:$0x3f]  ;;  %v3291_v10 = vld [vmem:[#allocation2 + $0x10] ss:$2 sm:$0x3f] }
 0x282   : > { %v3292_v31 = vmax.f32 %v3289_v14, %v3291_v10  ;;  %v2781_v42 = vpop.f32.mrb[196].mxu1  ;;  %v3099_v39 = vpop.f32.mrb[196].mxu0  ;;  %3264 = vst [vmem:[#allocation2 + $0x28] sm:$0xff] %v3239_v54 }
 0x283   : > { %v2859_v53 = vadd.f32 %v2781_v42, %v5745_v20  ;;  %v3183_v37 = vadd.f32 %v3099_v39, %v2857_v59  ;;  %v4301_v36 = vpop.f32.mrb[197].mxu1  ;;  %v4365_v18 = vpop.f32.mrb[197].mxu0 }
 0x284   : > { %v3293_v34 = vmax.f32 %v3287_v45, %v3292_v31  ;;  %v2784_v29 = vpop.f32.mrb[198].mxu1  ;;  %v3102_v57 = vpop.f32.mrb[198].mxu0 }
 0x285   : > { %v3215_v4 = vadd.f32 %v5792_v44, %v3183_v37  ;;  %v2860_v6 = vadd.f32 %v2784_v29, %v5748_v50  ;;  %v3184_v32 = vadd.f32 %v3102_v57, %v2858_v61  ;;  %v4366_v26 = vpop.f32.mrb[199].mxu0  ;;  %v4302_v20 = vpop.f32.mrb[199].mxu1 }
 0x286   : > { %v3294_v56 = vpack.c.bf16 %v3293_v34, %v3293_v34 }
 0x287   : > { %v3240_v7 = vmax.f32 %v3215_v4, 0.0  ;;  %v3216_v30 = vadd.f32 %v5792_v44, %v3184_v32 }
 0x288   : > { %3295 = vst [vmem:[%s5811_s13] sm:$0x7] %v3294_v56 }
 0x289   : > { %3265 = vst [vmem:[#allocation2 + $0x30] sm:$0xff] %v3240_v7  ;;  %v3241_v11 = vmax.f32 %v3216_v30, 0.0  ;;  %v2789_v17 = vpop.f32.mrb[200].mxu1  ;;  %v3107_v49 = vpop.f32.mrb[200].mxu0 }
 0x28a   : > { %v2861_v55 = vadd.f32 %v2789_v17, %v5751_v25  ;;  %v3185_v40 = vadd.f32 %v3107_v49, %v2859_v53  ;;  %v4305_v48 = vpop.f32.mrb[201].mxu1  ;;  %v4369_v0 = vpop.f32.mrb[201].mxu0  ;;  %v3297_v24 = vld [vmem:[#allocation2 + $0x1e] ss:$2 sm:$0x3f] }
 0x28b   : > { %3266 = vst [vmem:[#allocation2 + $0x38] sm:$0xff] %v3241_v11  ;;  %v2792_v12 = vpop.f32.mrb[202].mxu1  ;;  %v3110_v62 = vpop.f32.mrb[202].mxu0  ;;  %v3299_v33 = vld [vmem:[#allocation2 + $0x1f] ss:$2 sm:$0x3f] }
 0x28c   : > { %v3217_v50 = vadd.f32 %v5792_v44, %v3185_v40  ;;  %v2862_v28 = vadd.f32 %v2792_v12, %v5754_v63  ;;  %v3186_v47 = vadd.f32 %v3110_v62, %v2860_v6  ;;  %v4370_v13 = vpop.f32.mrb[203].mxu0  ;;  %v4306_v59 = vpop.f32.mrb[203].mxu1  ;;  %v3300_v63 = vmax.f32 %v3297_v24, %v3299_v33 }
 0x28e   : > { %v3242_v52 = vmax.f32 %v3217_v50, 0.0  ;;  %v3218_v51 = vadd.f32 %v5792_v44, %v3186_v47 }
 0x290   : > { %3267 = vst [vmem:[#allocation2 + $0x40] sm:$0xff] %v3242_v52  ;;  %v3302_v25 = vld [vmem:[#allocation2 + $0x2d] ss:$2 sm:$0x3f]  ;;  %v3243_v23 = vmax.f32 %v3218_v51, 0.0 }
 0x291   : > { %v2797_v3 = vpop.f32.mrb[204].mxu1  ;;  %v3115_v61 = vpop.f32.mrb[204].mxu0 }
 0x292   : > { %v3304_v60 = vld [vmem:[#allocation2 + $0x2e] ss:$2 sm:$0x3f]  ;;  %v2863_v2 = vadd.f32 %v2797_v3, %v5757_v58  ;;  %v3187_v8 = vadd.f32 %v3115_v61, %v2861_v55  ;;  %v4309_v5 = vpop.f32.mrb[205].mxu1  ;;  %v4373_v43 = vpop.f32.mrb[205].mxu0  ;;  %3268 = vst [vmem:[#allocation2 + $0x48] sm:$0xff] %v3243_v23 }
 0x293   : > { %v3305_v15 = vmax.f32 %v3302_v25, %v3304_v60  ;;  %v2800_v9 = vpop.f32.mrb[206].mxu1  ;;  %v3118_v14 = vpop.f32.mrb[206].mxu0 }
 0x294   : > { %v3219_v10 = vadd.f32 %v5792_v44, %v3187_v8  ;;  %v2864_v45 = vadd.f32 %v2800_v9, %v5760_v22  ;;  %v3188_v31 = vadd.f32 %v3118_v14, %v2862_v28  ;;  %v4374_v54 = vpop.f32.mrb[207].mxu0  ;;  %v4310_v42 = vpop.f32.mrb[207].mxu1 }
 0x295   : > { %v3306_v39 = vmax.f32 %v3300_v63, %v3305_v15 }
 0x296   : > { %v3244_v53 = vmax.f32 %v3219_v10, 0.0  ;;  %v3220_v58 = vadd.f32 %v5792_v44, %v3188_v31 }
 0x297   : > { %v3598_v37 = vpack.c.bf16 %v3306_v39, %v3306_v39  ;;  %v3318_v49 = vld [vmem:[#allocation2 + $0x3c] ss:$2 sm:$0x3f]  ;;  %v3320_v55 = vld [vmem:[#allocation2 + $0x3d] ss:$2 sm:$0x3f] }
 0x298   : > { %3269 = vst [vmem:[#allocation2 + $0x50] sm:$0xff] %v3244_v53  ;;  %v3245_v36 = vmax.f32 %v3220_v58, 0.0  ;;  %v3321_v50 = vmax.f32 %v3318_v49, %v3320_v55 }
 0x299   : > { %v3311_v18 = vrot.slane %v3598_v37, 5  ;;  %v2805_v34 = vpop.f32.mrb[208].mxu1  ;;  %v3123_v29 = vpop.f32.mrb[208].mxu0 }
 0x29a   : > { %3270 = vst [vmem:[#allocation2 + $0x58] sm:$0xff] %v3245_v36  ;;  %v2865_v57 = vadd.f32 %v2805_v34, %v5763_v41  ;;  %v3189_v4 = vadd.f32 %v3123_v29, %v2863_v2  ;;  %v4313_v22 = vpop.f32.mrb[209].mxu1  ;;  %v4377_v6 = vpop.f32.mrb[209].mxu0 }
 0x29b   : > { %v3312_v32 = vrot.slane %v3311_v18, 4  ;;  %3315 = vst [vmem:[%s5811_s13] sm:$0x8] %v3311_v18  ;;  %v2808_v26 = vpop.f32.mrb[210].mxu1  ;;  %v3126_v20 = vpop.f32.mrb[210].mxu0 }
 0x29c   : > { %v3221_v56 = vadd.f32 %v5792_v44, %v3189_v4  ;;  %v2866_v7 = vadd.f32 %v2808_v26, %v5766_v1  ;;  %v3190_v30 = vadd.f32 %v3126_v20, %v2864_v45  ;;  %v4378_v11 = vpop.f32.mrb[211].mxu0  ;;  %v4314_v17 = vpop.f32.mrb[211].mxu1 }
 0x29d   : > { %3316 = vst [vmem:[%s5811_s13 + $0x4] sm:$0x3] %v3312_v32 }
 0x29e   : > { %v3246_v40 = vmax.f32 %v3221_v56, 0.0  ;;  %v3222_v41 = vadd.f32 %v5792_v44, %v3190_v30 }
 0x29f   : > { %v3323_v48 = vld [vmem:[#allocation2 + $0x4b] ss:$2 sm:$0x3f]  ;;  %v3325_v0 = vld [vmem:[#allocation2 + $0x4c] ss:$2 sm:$0x3f] }
 0x2a0   : > { %v3326_v12 = vmax.f32 %v3323_v48, %v3325_v0  ;;  %3271 = vst [vmem:[#allocation2 + $0x60] sm:$0xff] %v3246_v40  ;;  %v3247_v62 = vmax.f32 %v3222_v41, 0.0 }
 0x2a1   : > { %v2813_v28 = vpop.f32.mrb[212].mxu1  ;;  %v3131_v47 = vpop.f32.mrb[212].mxu0 }
 0x2a2   : > { %v3327_v13 = vmax.f32 %v3321_v50, %v3326_v12  ;;  %3272 = vst [vmem:[#allocation2 + $0x68] sm:$0xff] %v3247_v62  ;;  %v2867_v1 = vadd.f32 %v2813_v28, %v5769_v21  ;;  %v3191_v59 = vadd.f32 %v3131_v47, %v2865_v57  ;;  %v4317_v52 = vpop.f32.mrb[213].mxu1  ;;  %v4381_v51 = vpop.f32.mrb[213].mxu0 }
 0x2a3   : > { %v2816_v24 = vpop.f32.mrb[214].mxu1  ;;  %v3134_v33 = vpop.f32.mrb[214].mxu0 }
 0x2a4   : > { %v3599_v25 = vpack.c.bf16 %v3327_v13, %v3327_v13  ;;  %v3223_v23 = vadd.f32 %v5792_v44, %v3191_v59  ;;  %v2868_v3 = vadd.f32 %v2816_v24, %v5772_v19  ;;  %v3192_v61 = vadd.f32 %v3134_v33, %v2866_v7  ;;  %v4382_v60 = vpop.f32.mrb[215].mxu0  ;;  %v4318_v2 = vpop.f32.mrb[215].mxu1 }
 0x2a6   : > { %v3332_v8 = vrot.slane %v3599_v25, 6  ;;  %v3248_v5 = vmax.f32 %v3223_v23, 0.0  ;;  %v3224_v43 = vadd.f32 %v5792_v44, %v3192_v61 }
 0x2a7   : > { %v3339_v36 = vld [vmem:[#allocation2 + $0x5a] ss:$2 sm:$0x3f]  ;;  %v3341_v18 = vld [vmem:[#allocation2 + $0x5b] ss:$2 sm:$0x3f] }
 0x2a8   : > { %v3333_v21 = vrot.slane %v3332_v8, 4  ;;  %3336 = vst [vmem:[%s5811_s13 + $0x4] sm:$0xc] %v3332_v8  ;;  %3273 = vst [vmem:[#allocation2 + $0x70] sm:$0xff] %v3248_v5  ;;  %v3249_v63 = vmax.f32 %v3224_v43, 0.0 }
 0x2a9   : > { %v2821_v15 = vpop.f32.mrb[216].mxu1  ;;  %v3139_v9 = vpop.f32.mrb[216].mxu0 }
 0x2aa   : > { %3337 = vst [vmem:[%s5811_s13 + $0x8] sm:$0x1] %v3333_v21  ;;  %3274 = vst [vmem:[#allocation2 + $0x78] sm:$0xff] %v3249_v63  ;;  %v2869_v14 = vadd.f32 %v2821_v15, %v5775_v27  ;;  %v3193_v10 = vadd.f32 %v3139_v9, %v2867_v1  ;;  %v4321_v45 = vpop.f32.mrb[217].mxu1  ;;  %v4385_v19 = vpop.f32.mrb[217].mxu0  ;;  %v3342_v27 = vmax.f32 %v3339_v36, %v3341_v18 }
 0x2ab   : > { %v2824_v31 = vpop.f32.mrb[218].mxu1  ;;  %v3142_v54 = vpop.f32.mrb[218].mxu0 }
 0x2ac   : > { %v3225_v42 = vadd.f32 %v5792_v44, %v3193_v10  ;;  %v2870_v39 = vadd.f32 %v2824_v31, %v5778_v46  ;;  %v3194_v53 = vadd.f32 %v3142_v54, %v2868_v3  ;;  %v4386_v58 = vpop.f32.mrb[219].mxu0  ;;  %v4322_v37 = vpop.f32.mrb[219].mxu1 }
 0x2ae   : > { %v3250_v34 = vmax.f32 %v3225_v42, 0.0  ;;  %v3226_v29 = vadd.f32 %v5792_v44, %v3194_v53 }
 0x2af   : > { %v3344_v57 = vld [vmem:[#allocation2 + $0x69] ss:$2 sm:$0x3f]  ;;  %v3346_v4 = vld [vmem:[#allocation2 + $0x6a] ss:$2 sm:$0x3f] }
 0x2b0   : > { %v3347_v22 = vmax.f32 %v3344_v57, %v3346_v4  ;;  %3275 = vst [vmem:[#allocation2 + $0x80] sm:$0xff] %v3250_v34  ;;  %v3251_v6 = vmax.f32 %v3226_v29, 0.0 }
 0x2b1   : > { %v2829_v32 = vpop.f32.mrb[220].mxu1  ;;  %v3147_v26 = vpop.f32.mrb[220].mxu0 }
 0x2b2   : > { %v3348_v20 = vmax.f32 %v3342_v27, %v3347_v22  ;;  %3276 = vst [vmem:[#allocation2 + $0x88] sm:$0xff] %v3251_v6  ;;  %v2871_v46 = vadd.f32 %v2829_v32, %v5781_v38  ;;  %v3195_v56 = vadd.f32 %v3147_v26, %v2869_v14  ;;  %v4325_v7 = vpop.f32.mrb[221].mxu1  ;;  %v4389_v30 = vpop.f32.mrb[221].mxu0 }
 0x2b3   : > { %v2832_v11 = vpop.f32.mrb[222].mxu1  ;;  %v3150_v17 = vpop.f32.mrb[222].mxu0 }
 0x2b4   : > { %v3600_v49 = vpack.c.bf16 %v3348_v20, %v3348_v20  ;;  %v3227_v55 = vadd.f32 %v5792_v44, %v3195_v56  ;;  %v2872_v40 = vadd.f32 %v2832_v11, %v5783_v35  ;;  %v3196_v41 = vadd.f32 %v3150_v17, %v2870_v39  ;;  %v4390_v48 = vpop.f32.mrb[223].mxu0  ;;  %v4326_v0 = vpop.f32.mrb[223].mxu1 }
 0x2b6   : > { %v3353_v50 = vrot.slane %v3600_v49, 7  ;;  %v3252_v12 = vmax.f32 %v3227_v55, 0.0  ;;  %v3228_v62 = vadd.f32 %v5792_v44, %v3196_v41 }
 0x2b7   : > { %v3357_v3 = vld [vmem:[#allocation2 + $0x78] ss:$2 sm:$0x3f]  ;;  %v3359_v61 = vld [vmem:[#allocation2 + $0x79] ss:$2 sm:$0x3f] }
 0x2b8   : > { %3355 = vst [vmem:[%s5811_s13 + $0x8] sm:$0xe] %v3353_v50  ;;  %3277 = vst [vmem:[#allocation2 + $0x90] sm:$0xff] %v3252_v12  ;;  %v3253_v38 = vmax.f32 %v3228_v62, 0.0  ;;  %v3360_v43 = vmax.f32 %v3357_v3, %v3359_v61 }
 0x2b9   : > { %v2837_v28 = vpop.f32.mrb[224].mxu1  ;;  %v3155_v47 = vpop.f32.mrb[224].mxu0 }
 0x2ba   : > { %3278 = vst [vmem:[#allocation2 + $0x98] sm:$0xff] %v3253_v38  ;;  %v2873_v13 = vadd.f32 %v2837_v28, %v5785_v16  ;;  %v3197_v1 = vadd.f32 %v3155_v47, %v2871_v46  ;;  %v4329_v59 = vpop.f32.mrb[225].mxu1  ;;  %v4393_v52 = vpop.f32.mrb[225].mxu0 }
 0x2bb   : > { %v2840_v51 = vpop.f32.mrb[226].mxu1  ;;  %v3158_v35 = vpop.f32.mrb[226].mxu0 }
 0x2bc   : > { %v3229_v24 = vadd.f32 %v5792_v44, %v3197_v1  ;;  %v3198_v33 = vadd.f32 %v3158_v35, %v2872_v40  ;;  %v4394_v25 = vpop.f32.mrb[227].mxu0  ;;  %v4330_v23 = vpop.f32.mrb[227].mxu1 }
 0x2be   : > { %v3254_v60 = vmax.f32 %v3229_v24, 0.0  ;;  %v3230_v2 = vadd.f32 %v5792_v44, %v3198_v33 }
 0x2bf   : > { %v3362_v8 = vld [vmem:[#allocation2 + $0x87] ss:$2 sm:$0x3f]  ;;  %v3364_v5 = vld [vmem:[#allocation2 + $0x88] ss:$2 sm:$0x3f] }
 0x2c0   : > { %v3365_v21 = vmax.f32 %v3362_v8, %v3364_v5  ;;  %3279 = vst [vmem:[#allocation2 + $0xa0] sm:$0xff] %v3254_v60  ;;  %v3255_v16 = vmax.f32 %v3230_v2, 0.0 }
 0x2c1   : > { %v2845_v63 = vpop.f32.mrb[228].mxu1  ;;  %v3163_v15 = vpop.f32.mrb[228].mxu0 }
 0x2c2   : > { %v3366_v9 = vmax.f32 %v3360_v43, %v3365_v21  ;;  %3280 = vst [vmem:[#allocation2 + $0xa8] sm:$0xff] %v3255_v16  ;;  %v3199_v14 = vadd.f32 %v3163_v15, %v2873_v13  ;;  %v4397_v10 = vpop.f32.mrb[229].mxu0  ;;  %v4333_v45 = vpop.f32.mrb[229].mxu1 }
 0x2c3   : > { %v3166_v19 = vpop.f32.mrb[230].mxu0  ;;  %v2848_v31 = vpop.f32.mrb[230].mxu1 }
 0x2c4   : > { %v3367_v54 = vpack.c.bf16 %v3366_v9, %v3366_v9  ;;  %v3231_v42 = vadd.f32 %v5792_v44, %v3199_v14  ;;  %v4398_v39 = vpop.f32.mrb[231].mxu0  ;;  %v4334_v53 = vpop.f32.mrb[231].mxu1 }
 0x2c6   : > { %3368 = vst [vmem:[%s5811_s13 + $0xc] sm:$0x7] %v3367_v54  ;;  %v3256_v58 = vmax.f32 %v3231_v42, 0.0 }
 0x2c7   : > { %v3370_v29 = vld [vmem:[#allocation2 + $0x96] ss:$2 sm:$0x3f]  ;;  %v3372_v57 = vld [vmem:[#allocation2 + $0x97] ss:$2 sm:$0x3f] }
 0x2c8   : > { %3281 = vst [vmem:[#allocation2 + $0xb0] sm:$0xff] %v3256_v58  ;;  %v3373_v22 = vmax.f32 %v3370_v29, %v3372_v57 }
 0x2c9   : > { %v3171_v37 = vpop.f32.mrb[232].mxu0  ;;  %v3375_v4 = vld [vmem:[#allocation2 + $0xa5] ss:$2 sm:$0x3f] }
 0x2ca   : > { %v4401_v36 = vpop.f32.mrb[233].mxu0 }
 0x2cb   : > { %v3174_v18 = vpop.f32.mrb[234].mxu0 }
 0x2cc   : > { %v4402_v34 = vpop.f32.mrb[235].mxu0 }
 0x2cf   : > { %v3377_v27 = vld [vmem:[#allocation2 + $0xa6] ss:$2 sm:$0x3f] }
 0x2d0   : > { %v3378_v6 = vmax.f32 %v3375_v4, %v3377_v27 }
 0x2d2   : > { %v3379_v32 = vmax.f32 %v3373_v22, %v3378_v6 }
 0x2d4   : > { %v3601_v26 = vpack.c.bf16 %v3379_v32, %v3379_v32 }
 0x2d6   : > { %v3384_v44 = vrot.slane %v3601_v26, 5 }
 0x2d8   : > { %v3385_v20 = vrot.slane %v3384_v44, 4  ;;  %3388 = vst [vmem:[%s5811_s13 + $0xc] sm:$0x8] %v3384_v44 }
 0x2da   : > { %3389 = vst [vmem:[%s5811_s13 + $0x10] sm:$0x3] %v3385_v20 }
 0x2db PF: > { %s13_s12 = sadd.s32 1, %s4576_s12  }
 0x2dc   : > { %p10_p4 = scmp.ge.s32.totalorder %s13_s12, 4  }
 0x2de   :  { %12 = sbr.rel (!%p10_p4) target bundleno = 1 (0x1), region = 85 }

// kernel: embedding_net_forward.3
= control target key start
LH: loop header
LB: loop body
LE: loop exit
PB: predicated region body
PF: predicated region fallthrough
CT: control target
= control target key end

     0   :  { %s15262_s12 = smov 0   ;;  %s17883_s0 = inlined_call_operand.vmem [shape: bf16[2,1024,3], index: 0, kind: input, shape index: {}]   ;;  %s17884_s1 = inlined_call_operand.vmem [shape: bf16[27,128], index: 1, kind: input, shape index: {}]   ;;  %s17885_s2 = inlined_call_operand.vmem [shape: f32[1,128], index: 2, kind: input, shape index: {}]   ;;  %s17886_s3 = inlined_call_operand.vmem [shape: bf16[2,225,128], index: 3, kind: output, shape index: {}]  }
   0x1 LB: > { %s11406_s13 = sadd.s32 4294967295, %s15239_s12   ;;  %p11410_p0 = scmp.ge.s32.totalorder %s15239_s12, 1  ;;  %s15239_s12 = sphi %s15262_s12, %s13_s12  }
   0x2   : > { %p137_p1 = scmp.lt.s32.totalorder %s15239_s12, 3 }
   0x4   : > { %p138_p2 = pnand %p11410_p0, %p137_p1 }
   0x6   : > { %141 = sbr.rel (%p138_p2) target bundleno = 1346 (0x542), region = 32 }
   0xd   : > { %v14830_v0 = vld [vmem:[%s17884_s1] ss:$0 sps:$4 sm:$0x66]   ;;  %vm1267_vm0 = vcmask 1040384   ;;  %p161_p3 = scmp.lt.s32.totalorder %s11406_s13, 1  ;;  %vm1268_vm1 = vcmask 1041408  }
   0xe   : > { %v1079_v1 = vshrl.u32 %v14830_v0, 16  ;;  %v1082_v2 = vshll.u32 %v14830_v0, 16  ;;  %v15241_v3 = vmov 65535   ;;  %v14831_v8 = vld [vmem:[%s17884_s1 + $0x4] ss:$0 sps:$4 sm:$0xcc]  }
   0xf   : > { %v1269_v4 = vsel %vm1267_vm0, 4294967295, %v15241_v3  ;;  %s18072_s13 = smov (!%p161_p3, %s11406_s13), 1  ;;  %vm595_vm2 = vsmask.f32 7424  ;;  %v292_v10 = vld [vmem:[%s17884_s1] sm:$0x3] }
  0x10   : > { %v1081_v5 = vrot.slane %v1079_v1, 1  ;;  %v1084_v6 = vrot.slane %v1082_v2, 2  ;;  %v15277_v7 = vsel %vm1268_vm1, %v1269_v4, 0  ;;  %s12180_s18 = sshll.u32 %s18072_s13, 9  ;;  %v5050_v11 = vrot.slane %v14831_v8, 2  ;;  %s14820_s11 = smul.u32 116, %s18072_s13 }
  0x11   : > { %s15289_s23 = scalar_lea.vmem %s17883_s0, %s12180_s18  ;;  %vm1086_vm3 = vcmask 23552   ;;  %v14836_v12 = vld [vmem:[%s17884_s1 + $0x4] sm:$0x18]   ;;  %v1912_v16 = vand.u32 %v15277_v7, %v292_v10  ;;  %vm2433_vm4 = vcmask 1046528   ;;  %vm10652_vm5 = vsmask.f32 3328 }
  0x12   : > { %v1085_v9 = vor.u32 %v1084_v6, %v1081_v5  ;;  %v172_v14 = vld [vmem:[%s15289_s23] sm:$0xf]  ;;  %v173_v15 = vld [vmem:[%s15289_s23 + $0x4] sm:$0xf]  ;;  %v15299_v17 = vand.u32 %v5050_v11, %v15277_v7  ;;  %v14833_v19 = vld [vmem:[%s15289_s23 + $0x8] sm:$0xff]   ;;  %v5998_v21 = vshrl.u32 %v14836_v12, 16  ;;  %s17514_s15 = scalar_lea.vmem %s17886_s3, %s14820_s11 }
  0x13   : > { %v15301_v18 = vcombine.low %v172_v14, %v173_v15  ;;  %v3375_v20 = vld [vmem:[%s15289_s23 + $0x10] sm:$0xf]  ;;  %v3376_v22 = vld [vmem:[%s15289_s23 + $0x14] sm:$0xf]  ;;  %v604_v25 = vshll.u32 %v14833_v19, 16  ;;  %v608_v26 = vshrl.u32 %v14833_v19, 16 }
  0x14   : > { %v1272_v13 = vand.u32 %v15277_v7, %v1085_v9  ;;  %13248 = vmatprep.subr.bf16.mxu0 %v15299_v17  ;;  %v14835_v27 = vld [vmem:[%s15289_s23 + $0x18] sm:$0xff]   ;;  %v14837_v28 = vld [vmem:[%s15289_s23 + $0x10] sm:$0xff]   ;;  %v15312_v29 = vcombine.low %v3375_v20, %v3376_v22  ;;  %v6000_v30 = vrot.slane %v5998_v21, 3  ;;  %v6001_v31 = vshll.u32 %v14836_v12, 16  ;;  %v14838_v43 = vld [vmem:[%s15289_s23 + $0x20] sm:$0xff]  }
  0x15   : > { %v597_v23 = vshrl.u32 %v15301_v18, 16  ;;  %v599_v24 = vshll.u32 %v15301_v18, 16  ;;  %13249 = vmatpush3.bf16.msra.mxu0 %v15299_v17  ;;  %v606_v33 = vrot.slane %v604_v25, 1  ;;  %v4633_v34 = vshll.u32 %v14835_v27, 16  ;;  %v14839_v47 = vld [vmem:[%s15289_s23 + $0x18] sm:$0xff]   ;;  %v14840_v52 = vld [vmem:[%s15289_s23 + $0x28] sm:$0xff]  }
  0x16   : > { %12760 = vmatprep.subr.bf16.mxu1 %v1272_v13  ;;  %17937 = vst [vmem:[#allocation3_spill] sm:$0xff] %v15312_v29  ;;  %v4637_v35 = vshrl.u32 %v14835_v27, 16  ;;  %v4627_v36 = vshrl.u32 %v15312_v29, 16  ;;  %v4629_v37 = vshll.u32 %v15312_v29, 16  ;;  %v6003_v38 = vrot.slane %v6001_v31, 4  ;;  %v14841_v54 = vld [vmem:[%s15289_s23 + $0x20] sm:$0xff]  }
  0x17   : > { %12761 = vmatpush3.bf16.msra.mxu1 %v1272_v13  ;;  %v601_v32 = vrot.slane %v599_v24, 1  ;;  %v612_v39 = vshll.u32 %v14837_v28, 16  ;;  %v610_v41 = vor.u32 %v608_v26, %v606_v33  ;;  %v4635_v42 = vrot.slane %v4633_v34, 1  ;;  %v14842_v1 = vld [vmem:[%s15289_s23 + $0x30] sm:$0xff]   ;;  %v14843_v3 = vld [vmem:[%s15289_s23 + $0x28] sm:$0xff]   ;;  %v14844_v19 = vld [vmem:[%s15289_s23 + $0x38] sm:$0xff]  }
  0x18   : > { %12882 = vmatprep.subr.bf16.mxu1 %v1912_v16  ;;  %v4631_v44 = vrot.slane %v4629_v37, 1  ;;  %v6004_v45 = vor.u32 %v6003_v38, %v6000_v30  ;;  %v616_v48 = vshrl.u32 %v14837_v28, 16  ;;  %v4640_v51 = vshll.u32 %v14838_v43, 16  ;;  %v14845_v24 = vld [vmem:[%s15289_s23 + $0x30] sm:$0xff]   ;;  %v14846_v28 = vld [vmem:[%s15289_s23 + $0x40] sm:$0xff]   ;;  %v14847_v34 = vld [vmem:[%s15289_s23 + $0x38] sm:$0xff]  }
  0x19   : > { %v602_v40 = vor.u32 %v601_v32, %v597_v23  ;;  %v614_v46 = vrot.slane %v612_v39, 1  ;;  %v4639_v50 = vor.u32 %v4637_v35, %v4635_v42  ;;  %v4644_v53 = vshrl.u32 %v14838_v43, 16  ;;  %v14848_v39 = vld [vmem:[%s15289_s23 + $0x48] sm:$0xff]   ;;  %v16087_v29 = vld [vmem:[%s15289_s23 + $0x58] sm:$0xff]  }
  0x1a   : > { %v4632_v55 = vor.u32 %v4631_v44, %v4627_v36  ;;  %v6186_v56 = vand.u32 %v6004_v45, %v15277_v7  ;;  %v4642_v59 = vrot.slane %v4640_v51, 1  ;;  %v620_v60 = vshll.u32 %v14839_v47, 16  ;;  %v14849_v44 = vld [vmem:[%s15289_s23 + $0x40] sm:$0xff]   ;;  %17946 = vst [vmem:[#allocation12_spill] sm:$0xff] %v16087_v29 }
  0x1b   : > { %v607_v49 = vsel %vm595_vm2, %v602_v40, %v606_v33  ;;  %v615_v57 = vsel %vm595_vm2, %v610_v41, %v614_v46  ;;  %v618_v58 = vor.u32 %v616_v48, %v614_v46  ;;  %v4647_v61 = vshll.u32 %v14840_v52, 16 }
  0x1c   : > { %12762 = vmatprep.mubr.msk.bf16.mxu1 %vm1086_vm3, %v607_v49  ;;  %v624_v62 = vshrl.u32 %v14839_v47, 16  ;;  %v4636_v63 = vsel %vm595_vm2, %v4632_v55, %v4635_v42  ;;  %13370 = vmatprep.subr.bf16.mxu0 %v6186_v56  ;;  %v628_v0 = vshll.u32 %v14841_v54, 16  ;;  %v4651_v2 = vshrl.u32 %v14840_v52, 16  ;;  %v14850_v52 = vld [vmem:[%s15289_s23 + $0x50] sm:$0xff]  }
  0x1d   : > { %12763 = vmatmul.mubr.msk.bf16.vlgmr.msra.gmra.mrb[0].mxu1 %vm1086_vm3, %v615_v57  ;;  %13250 = vmatprep.mubr.msk.bf16.mxu0 %vm1086_vm3, %v4636_v63  ;;  %v4643_v4 = vsel %vm595_vm2, %v4639_v50, %v4642_v59  ;;  %v622_v5 = vrot.slane %v620_v60, 1  ;;  %v4646_v6 = vor.u32 %v4644_v53, %v4642_v59  ;;  %v4649_v8 = vrot.slane %v4647_v61, 1  ;;  %v14851_v53 = vld [vmem:[%s15289_s23 + $0x48] sm:$0xff]   ;;  %v14852_v61 = vld [vmem:[%s15289_s23 + $0x58] sm:$0xff]  }
  0x1e   : > { %12883 = vmatpush3.bf16.msra.mxu1 %v1912_v16  ;;  %13251 = vmatmul.mubr.msk.bf16.vlgmr.msra.gmra.mrb[0].mxu0 %vm1086_vm3, %v4643_v4  ;;  %v630_v9 = vrot.slane %v628_v0, 1  ;;  %v4654_v10 = vshll.u32 %v14842_v1, 16  ;;  %v632_v11 = vshrl.u32 %v14841_v54, 16  ;;  %v636_v12 = vshll.u32 %v14843_v3, 16 }
  0x1f   : > { %13371 = vmatpush3.bf16.msra.mxu0 %v6186_v56  ;;  %v623_v13 = vsel %vm595_vm2, %v618_v58, %v622_v5  ;;  %v4650_v14 = vsel %vm595_vm2, %v4646_v6, %v4649_v8  ;;  %v626_v15 = vor.u32 %v624_v62, %v622_v5  ;;  %v4653_v16 = vor.u32 %v4651_v2, %v4649_v8  ;;  %v14853_v2 = vld [vmem:[%s15289_s23 + $0x50] sm:$0xff]  }
  0x20   : > { %12766 = vmatprep.mubr.msk.bf16.mxu1 %vm1086_vm3, %v623_v13  ;;  %13254 = vmatprep.mubr.msk.bf16.mxu0 %vm1086_vm3, %v4650_v14  ;;  %v4656_v20 = vrot.slane %v4654_v10, 1  ;;  %v634_v21 = vor.u32 %v632_v11, %v630_v9  ;;  %v638_v22 = vrot.slane %v636_v12, 1  ;;  %v4658_v23 = vshrl.u32 %v14842_v1, 16  ;;  %v14855_v10 = vld [vmem:[%s15289_s23 + $0x58] sm:$0xff]   ;;  %v14854_v12 = vld [vmem:[%s15289_s23 + $0x60] sm:$0xff]  }
  0x21   : > { %v631_v25 = vsel %vm595_vm2, %v626_v15, %v630_v9  ;;  %v4661_v26 = vshll.u32 %v14844_v19, 16  ;;  %v640_v27 = vshrl.u32 %v14843_v3, 16  ;;  %v4665_v30 = vshrl.u32 %v14844_v19, 16 }
  0x22   : > { %v639_v31 = vsel %vm595_vm2, %v634_v21, %v638_v22  ;;  %v4660_v32 = vor.u32 %v4658_v23, %v4656_v20  ;;  %v644_v33 = vshll.u32 %v14845_v24, 16  ;;  %v4657_v35 = vsel %vm595_vm2, %v4653_v16, %v4656_v20  ;;  %v14856_v21 = vld [vmem:[%s15289_s23 + $0x68] sm:$0xff]  }
  0x23   : > { %v4663_v36 = vrot.slane %v4661_v26, 1  ;;  %v4668_v37 = vshll.u32 %v14846_v28, 16  ;;  %v648_v38 = vshrl.u32 %v14845_v24, 16  ;;  %v642_v40 = vor.u32 %v640_v27, %v638_v22 }
  0x24   : > { %v646_v41 = vrot.slane %v644_v33, 1  ;;  %v652_v42 = vshll.u32 %v14847_v34, 16  ;;  %v4672_v43 = vshrl.u32 %v14846_v28, 16  ;;  %v4675_v46 = vshll.u32 %v14848_v39, 16 }
  0x25   : > { %12767 = vmatmul.mubr.msk.bf16.gmra.mrb[4].mxu1 %vm1086_vm3, %v631_v25  ;;  %v4664_v45 = vsel %vm595_vm2, %v4660_v32, %v4663_v36  ;;  %v4670_v47 = vrot.slane %v4668_v37, 1  ;;  %v4667_v50 = vor.u32 %v4665_v30, %v4663_v36  ;;  %v660_v51 = vshll.u32 %v14849_v44, 16  ;;  %v14857_v30 = vld [vmem:[%s15289_s23 + $0x60] sm:$0xff]   ;;  %v14859_v37 = vld [vmem:[%s15289_s23 + $0x68] sm:$0xff]  }
  0x26   : > { %12770 = vmatprep.mubr.msk.bf16.mxu1 %vm1086_vm3, %v639_v31  ;;  %13255 = vmatmul.mubr.msk.bf16.gmra.mrb[4].mxu0 %vm1086_vm3, %v4657_v35  ;;  %v650_v48 = vor.u32 %v648_v38, %v646_v41  ;;  %v654_v49 = vrot.slane %v652_v42, 1  ;;  %v647_v54 = vsel %vm595_vm2, %v642_v40, %v646_v41  ;;  %v4677_v56 = vrot.slane %v4675_v46, 1  ;;  %v14860_v46 = vld [vmem:[%s15289_s23 + $0x78] sm:$0xff]  }
  0x27   : > { %13258 = vmatprep.mubr.msk.bf16.mxu0 %vm1086_vm3, %v4664_v45  ;;  %v4674_v55 = vor.u32 %v4672_v43, %v4670_v47  ;;  %v656_v57 = vshrl.u32 %v14847_v34, 16  ;;  %v664_v59 = vshrl.u32 %v14849_v44, 16  ;;  %v668_v60 = vshll.u32 %v14851_v53, 16 }
  0x28   : > { %v655_v58 = vsel %vm595_vm2, %v650_v48, %v654_v49  ;;  %v4679_v62 = vshrl.u32 %v14848_v39, 16  ;;  %v4682_v63 = vshll.u32 %v14850_v52, 16  ;;  %v4671_v0 = vsel %vm595_vm2, %v4667_v50, %v4670_v47  ;;  %v14858_v39 = vld [vmem:[%s15289_s23 + $0x70] sm:$0xff]  }
  0x29   : > { %v662_v1 = vrot.slane %v660_v51, 1  ;;  %v4678_v3 = vsel %vm595_vm2, %v4674_v55, %v4677_v56  ;;  %v658_v4 = vor.u32 %v656_v57, %v654_v49  ;;  %v4686_v5 = vshrl.u32 %v14850_v52, 16 }
  0x2a   : > { %v4689_v6 = vshll.u32 %v14852_v61, 16  ;;  %v670_v9 = vrot.slane %v668_v60, 1  ;;  %v4684_v11 = vrot.slane %v4682_v63, 1  ;;  %v4681_v13 = vor.u32 %v4679_v62, %v4677_v56  ;;  %v14862_v63 = vld [vmem:[%s15289_s23 + $0x80] sm:$0xff]  }
  0x2b   : > { %v666_v8 = vor.u32 %v664_v59, %v662_v1  ;;  %v672_v14 = vshrl.u32 %v14851_v53, 16  ;;  %v676_v15 = vshll.u32 %v14853_v2, 16  ;;  %v663_v16 = vsel %vm595_vm2, %v658_v4, %v662_v1 }
  0x2c   : > { %v4688_v19 = vor.u32 %v4686_v5, %v4684_v11  ;;  %v4691_v20 = vrot.slane %v4689_v6, 1  ;;  %v680_v23 = vshrl.u32 %v14853_v2, 16  ;;  %v684_v24 = vshll.u32 %v14855_v10, 16  ;;  %v14864_v6 = vld [vmem:[%s15289_s23 + $0x88] sm:$0xff]  }
  0x2d   : > { %12771 = vmatmul.mubr.msk.bf16.gmra.mrb[8].mxu1 %vm1086_vm3, %v647_v54  ;;  %v671_v22 = vsel %vm595_vm2, %v666_v8, %v670_v9  ;;  %v4693_v25 = vshrl.u32 %v14852_v61, 16  ;;  %v4696_v26 = vshll.u32 %v14854_v12, 16  ;;  %v4685_v27 = vsel %vm595_vm2, %v4681_v13, %v4684_v11  ;;  %v14861_v54 = vld [vmem:[%s15289_s23 + $0x70] sm:$0xff]   ;;  %v14863_v61 = vld [vmem:[%s15289_s23 + $0x78] sm:$0xff]  }
  0x2e   : > { %12774 = vmatprep.mubr.msk.bf16.mxu1 %vm1086_vm3, %v655_v58  ;;  %13259 = vmatmul.mubr.msk.bf16.gmra.mrb[8].mxu0 %vm1086_vm3, %v4671_v0  ;;  %v678_v28 = vrot.slane %v676_v15, 1  ;;  %v4692_v31 = vsel %vm595_vm2, %v4688_v19, %v4691_v20  ;;  %v674_v32 = vor.u32 %v672_v14, %v670_v9  ;;  %v4700_v33 = vshrl.u32 %v14854_v12, 16  ;;  %v14865_v15 = vld [vmem:[%s15289_s23 + $0x80] sm:$0xff]  }
  0x2f   : > { %13262 = vmatprep.mubr.msk.bf16.mxu0 %vm1086_vm3, %v4678_v3  ;;  %v4703_v34 = vshll.u32 %v14856_v21, 16  ;;  %v686_v36 = vrot.slane %v684_v24, 1  ;;  %v4698_v38 = vrot.slane %v4696_v26, 1  ;;  %v4695_v40 = vor.u32 %v4693_v25, %v4691_v20  ;;  %v14867_v24 = vld [vmem:[%s15289_s23 + $0x88] sm:$0xff]   ;;  %v14866_v26 = vld [vmem:[%s15289_s23 + $0x90] sm:$0xff]  }
  0x30   : > { %v682_v35 = vor.u32 %v680_v23, %v678_v28  ;;  %v688_v41 = vshrl.u32 %v14855_v10, 16  ;;  %v692_v42 = vshll.u32 %v14857_v30, 16  ;;  %v679_v43 = vsel %vm595_vm2, %v674_v32, %v678_v28 }
  0x31   : > { %v4702_v44 = vor.u32 %v4700_v33, %v4698_v38  ;;  %v4705_v45 = vrot.slane %v4703_v34, 1  ;;  %v696_v48 = vshrl.u32 %v14857_v30, 16  ;;  %v700_v49 = vshll.u32 %v14859_v37, 16  ;;  %v14868_v34 = vld [vmem:[%s15289_s23 + $0x98] sm:$0xff]  }
  0x32   : > { %v687_v47 = vsel %vm595_vm2, %v682_v35, %v686_v36  ;;  %v4710_v50 = vshll.u32 %v14858_v39, 16  ;;  %v4699_v51 = vsel %vm595_vm2, %v4695_v40, %v4698_v38  ;;  %v694_v52 = vrot.slane %v692_v42, 1  ;;  %v14869_v42 = vld [vmem:[%s15289_s23 + $0x90] sm:$0xff]  }
  0x33   : > { %v4707_v53 = vshrl.u32 %v14856_v21, 16  ;;  %v4706_v55 = vsel %vm595_vm2, %v4702_v44, %v4705_v45  ;;  %v690_v56 = vor.u32 %v688_v41, %v686_v36  ;;  %v4714_v57 = vshrl.u32 %v14858_v39, 16 }
  0x34   : > { %v4717_v58 = vshll.u32 %v14860_v46, 16  ;;  %v698_v59 = vor.u32 %v696_v48, %v694_v52  ;;  %v702_v60 = vrot.slane %v700_v49, 1  ;;  %v4712_v62 = vrot.slane %v4710_v50, 1  ;;  %v14871_v49 = vld [vmem:[%s15289_s23 + $0x98] sm:$0xff]  }
  0x35   : > { %12775 = vmatmul.mubr.msk.bf16.gmra.mrb[12].mxu1 %vm1086_vm3, %v663_v16  ;;  %v4709_v0 = vor.u32 %v4707_v53, %v4705_v45  ;;  %v704_v1 = vshrl.u32 %v14859_v37, 16  ;;  %v708_v2 = vshll.u32 %v14861_v54, 16  ;;  %v695_v3 = vsel %vm595_vm2, %v690_v56, %v694_v52 }
  0x36   : > { %12778 = vmatprep.mubr.msk.bf16.mxu1 %vm1086_vm3, %v671_v22  ;;  %13263 = vmatmul.mubr.msk.bf16.gmra.mrb[12].mxu0 %vm1086_vm3, %v4685_v27  ;;  %v4716_v4 = vor.u32 %v4714_v57, %v4712_v62  ;;  %v4719_v5 = vrot.slane %v4717_v58, 1  ;;  %v703_v8 = vsel %vm595_vm2, %v698_v59, %v702_v60  ;;  %v712_v9 = vshrl.u32 %v14861_v54, 16  ;;  %v14872_v58 = vld [vmem:[%s15289_s23 + $0xa8] sm:$0xff]  }
  0x37   : > { %13266 = vmatprep.mubr.msk.bf16.mxu0 %vm1086_vm3, %v4692_v31  ;;  %v716_v10 = vshll.u32 %v14863_v61, 16  ;;  %v4724_v11 = vshll.u32 %v14862_v63, 16  ;;  %v4713_v12 = vsel %vm595_vm2, %v4709_v0, %v4712_v62  ;;  %v710_v13 = vrot.slane %v708_v2, 1  ;;  %v14873_v2 = vld [vmem:[%s15289_s23 + $0xa0] sm:$0xff]  }
  0x38   : > { %v4721_v14 = vshrl.u32 %v14860_v46, 16  ;;  %v4720_v16 = vsel %vm595_vm2, %v4716_v4, %v4719_v5  ;;  %v706_v19 = vor.u32 %v704_v1, %v702_v60  ;;  %v4728_v20 = vshrl.u32 %v14862_v63, 16 }
  0x39   : > { %v4731_v21 = vshll.u32 %v14864_v6, 16  ;;  %v714_v22 = vor.u32 %v712_v9, %v710_v13  ;;  %v718_v23 = vrot.slane %v716_v10, 1  ;;  %v4726_v25 = vrot.slane %v4724_v11, 1  ;;  %v14875_v10 = vld [vmem:[%s15289_s23 + $0xa8] sm:$0xff]  }
  0x3a   : > { %v4723_v27 = vor.u32 %v4721_v14, %v4719_v5  ;;  %v724_v28 = vshll.u32 %v14865_v15, 16  ;;  %v711_v30 = vsel %vm595_vm2, %v706_v19, %v710_v13  ;;  %v720_v33 = vshrl.u32 %v14863_v61, 16 }
  0x3b   : > { %v4730_v31 = vor.u32 %v4728_v20, %v4726_v25  ;;  %v4733_v32 = vrot.slane %v4731_v21, 1  ;;  %v719_v35 = vsel %vm595_vm2, %v714_v22, %v718_v23  ;;  %v728_v36 = vshrl.u32 %v14865_v15, 16  ;;  %v14876_v21 = vld [vmem:[%s15289_s23 + $0xb8] sm:$0xff]  }
  0x3c   : > { %v732_v37 = vshll.u32 %v14867_v24, 16  ;;  %v4738_v38 = vshll.u32 %v14866_v26, 16  ;;  %v4727_v39 = vsel %vm595_vm2, %v4723_v27, %v4726_v25  ;;  %v726_v40 = vrot.slane %v724_v28, 1 }
  0x3d   : > { %12779 = vmatmul.mubr.msk.bf16.gmra.mrb[16].mxu1 %vm1086_vm3, %v679_v43  ;;  %v4735_v41 = vshrl.u32 %v14864_v6, 16  ;;  %v4734_v43 = vsel %vm595_vm2, %v4730_v31, %v4733_v32  ;;  %v722_v44 = vor.u32 %v720_v33, %v718_v23  ;;  %v4742_v45 = vshrl.u32 %v14866_v26, 16 }
  0x3e   : > { %12782 = vmatprep.mubr.msk.bf16.mxu1 %vm1086_vm3, %v687_v47  ;;  %13267 = vmatmul.mubr.msk.bf16.gmra.mrb[16].mxu0 %vm1086_vm3, %v4699_v51  ;;  %v4745_v46 = vshll.u32 %v14868_v34, 16  ;;  %v730_v47 = vor.u32 %v728_v36, %v726_v40  ;;  %v734_v48 = vrot.slane %v732_v37, 1  ;;  %v4740_v50 = vrot.slane %v4738_v38, 1  ;;  %v14870_v51 = vld [vmem:[%s15289_s23 + $0xa0] sm:$0xff]   ;;  %v14879_v37 = vld [vmem:[%s15289_s23 + $0xb8] sm:$0xff]  }
  0x3f   : > { %13270 = vmatprep.mubr.msk.bf16.mxu0 %vm1086_vm3, %v4706_v55  ;;  %v4737_v52 = vor.u32 %v4735_v41, %v4733_v32  ;;  %v740_v53 = vshll.u32 %v14869_v42, 16  ;;  %v727_v54 = vsel %vm595_vm2, %v722_v44, %v726_v40  ;;  %v736_v57 = vshrl.u32 %v14867_v24, 16 }
  0x40   : > { %v4744_v55 = vor.u32 %v4742_v45, %v4740_v50  ;;  %v4747_v56 = vrot.slane %v4745_v46, 1  ;;  %v735_v59 = vsel %vm595_vm2, %v730_v47, %v734_v48  ;;  %v744_v60 = vshrl.u32 %v14869_v42, 16  ;;  %v14880_v46 = vld [vmem:[%s15289_s23 + $0xc8] sm:$0xff]  }
  0x41   : > { %v748_v61 = vshll.u32 %v14871_v49, 16  ;;  %v4749_v62 = vshrl.u32 %v14868_v34, 16  ;;  %v4752_v63 = vshll.u32 %v14870_v51, 16  ;;  %v4741_v0 = vsel %vm595_vm2, %v4737_v52, %v4740_v50 }
  0x42   : > { %v742_v1 = vrot.slane %v740_v53, 1  ;;  %v738_v4 = vor.u32 %v736_v57, %v734_v48  ;;  %v4756_v5 = vshrl.u32 %v14870_v51, 16  ;;  %v4759_v6 = vshll.u32 %v14872_v58, 16 }
  0x43   : > { %v750_v9 = vrot.slane %v748_v61, 1  ;;  %v4754_v11 = vrot.slane %v4752_v63, 1  ;;  %v4751_v13 = vor.u32 %v4749_v62, %v4747_v56  ;;  %v756_v14 = vshll.u32 %v14873_v2, 16  ;;  %v14883_v62 = vld [vmem:[%s15289_s23 + $0xc8] sm:$0xff]  }
  0x44   : > { %v743_v15 = vsel %vm595_vm2, %v738_v4, %v742_v1  ;;  %v4761_v19 = vrot.slane %v4759_v6, 1  ;;  %v752_v20 = vshrl.u32 %v14871_v49, 16  ;;  %v760_v23 = vshrl.u32 %v14873_v2, 16 }
  0x45   : > { %12783 = vmatmul.mubr.msk.bf16.gmra.mrb[20].mxu1 %vm1086_vm3, %v695_v3  ;;  %v4748_v3 = vsel %vm595_vm2, %v4744_v55, %v4747_v56  ;;  %v764_v24 = vshll.u32 %v14875_v10, 16  ;;  %v4763_v25 = vshrl.u32 %v14872_v58, 16  ;;  %v4755_v27 = vsel %vm595_vm2, %v4751_v13, %v4754_v11 }
  0x46   : > { %12786 = vmatprep.mubr.msk.bf16.mxu1 %vm1086_vm3, %v703_v8  ;;  %13271 = vmatmul.mubr.msk.bf16.gmra.mrb[20].mxu0 %vm1086_vm3, %v4713_v12  ;;  %v746_v8 = vor.u32 %v744_v60, %v742_v1  ;;  %v14874_v12 = vld [vmem:[%s15289_s23 + $0xb0] sm:$0xff]   ;;  %v758_v28 = vrot.slane %v756_v14, 1  ;;  %v754_v32 = vor.u32 %v752_v20, %v750_v9  ;;  %v4773_v34 = vshll.u32 %v14876_v21, 16 }
  0x47   : > { %13274 = vmatprep.mubr.msk.bf16.mxu0 %vm1086_vm3, %v4720_v16  ;;  %v4758_v16 = vor.u32 %v4756_v5, %v4754_v11  ;;  %v4766_v26 = vshll.u32 %v14874_v12, 16  ;;  %v4770_v33 = vshrl.u32 %v14874_v12, 16  ;;  %v766_v36 = vrot.slane %v764_v24, 1  ;;  %v14885_v20 = vld [vmem:[%s15289_s23 + $0xd0] sm:$0xff]  }
  0x48   : > { %v751_v22 = vsel %vm595_vm2, %v746_v8, %v750_v9  ;;  %v4765_v40 = vor.u32 %v4763_v25, %v4761_v19  ;;  %v768_v41 = vshrl.u32 %v14875_v10, 16  ;;  %v4775_v45 = vrot.slane %v4773_v34, 1  ;;  %v14884_v9 = vld [vmem:[%s15289_s23 + $0xd8] sm:$0xff]  }
  0x49   : > { %v4762_v31 = vsel %vm595_vm2, %v4758_v16, %v4761_v19  ;;  %v4768_v38 = vrot.slane %v4766_v26, 1  ;;  %v780_v49 = vshll.u32 %v14879_v37, 16  ;;  %v4777_v53 = vshrl.u32 %v14876_v21, 16 }
  0x4a   : > { %v770_v56 = vor.u32 %v768_v41, %v766_v36  ;;  %v4787_v58 = vshll.u32 %v14880_v46, 16  ;;  %v784_v2 = vshrl.u32 %v14879_v37, 16  ;;  %v796_v12 = vshll.u32 %v14883_v62, 16  ;;  %v14888_v37 = vld [vmem:[%s15289_s23 + $0xe8] sm:$0xff]  }
  0x4b   : > { %v4772_v44 = vor.u32 %v4770_v33, %v4768_v38  ;;  %v4769_v51 = vsel %vm595_vm2, %v4765_v40, %v4768_v38  ;;  %v782_v61 = vrot.slane %v780_v49, 1  ;;  %v4779_v1 = vor.u32 %v4777_v53, %v4775_v45 }
  0x4c   : > { %v4789_v8 = vrot.slane %v4787_v58, 1  ;;  %v4791_v19 = vshrl.u32 %v14880_v46, 16  ;;  %v4801_v24 = vshll.u32 %v14884_v9, 16  ;;  %v798_v26 = vrot.slane %v796_v12, 1 }
  0x4d   : > { %12787 = vmatmul.mubr.msk.bf16.gmra.mrb[24].mxu1 %vm1086_vm3, %v711_v30  ;;  %v14877_v30 = vld [vmem:[%s15289_s23 + $0xb0] sm:$0xff]   ;;  %v4776_v55 = vsel %vm595_vm2, %v4772_v44, %v4775_v45  ;;  %v804_v33 = vshll.u32 %v14885_v20, 16  ;;  %v4805_v44 = vshrl.u32 %v14884_v9, 16  ;;  %v14889_v45 = vld [vmem:[%s15289_s23 + $0xe0] sm:$0xff]   ;;  %v4815_v49 = vshll.u32 %v14888_v37, 16 }
  0x4e   : > { %12790 = vmatprep.mubr.msk.bf16.mxu1 %vm1086_vm3, %v719_v35  ;;  %13275 = vmatmul.mubr.msk.bf16.gmra.mrb[24].mxu0 %vm1086_vm3, %v4727_v39  ;;  %v762_v35 = vor.u32 %v760_v23, %v758_v28  ;;  %v14878_v39 = vld [vmem:[%s15289_s23 + $0xc0] sm:$0xff]   ;;  %v772_v42 = vshll.u32 %v14877_v30, 16  ;;  %v776_v48 = vshrl.u32 %v14877_v30, 16  ;;  %vm17933_vm6 = vcmask 1043456  }
  0x4f   : > { %13278 = vmatprep.mubr.msk.bf16.mxu0 %vm1086_vm3, %v4734_v43  ;;  %v759_v43 = vsel %vm595_vm2, %v754_v32, %v758_v28  ;;  %v4780_v50 = vshll.u32 %v14878_v39, 16  ;;  %v4784_v57 = vshrl.u32 %v14878_v39, 16  ;;  %v14886_v30 = vld [vmem:[%s15289_s23 + $0xe0] sm:$0xff]   ;;  %v800_v32 = vshrl.u32 %v14883_v62, 16  ;;  %vm17520_vm7 = vmand %vm17933_vm6, %vm10652_vm5 }
  0x50   : > { %v767_v47 = vsel %vm595_vm2, %v762_v35, %v766_v36  ;;  %v774_v52 = vrot.slane %v772_v42, 1  ;;  %v4803_v36 = vrot.slane %v4801_v24, 1  ;;  %v808_v39 = vshrl.u32 %v14885_v20, 16  ;;  %v14894_v20 = vld [vmem:[%s15289_s23 + $0x100] sm:$0xff]  }
  0x51   : > { %v4782_v63 = vrot.slane %v4780_v50, 1  ;;  %v4808_v41 = vshll.u32 %v14886_v30, 16  ;;  %vm10709_vm8 = vcmask 1043459   ;;  %vm10710_vm9 = vsmask.f32 7950 }
  0x52   : > { %v778_v60 = vor.u32 %v776_v48, %v774_v52  ;;  %v775_v5 = vsel %vm595_vm2, %v770_v56, %v774_v52  ;;  %v4812_v48 = vshrl.u32 %v14886_v30, 16  ;;  %v14891_v52 = vld [vmem:[%s15289_s23 + $0xe8] sm:$0xff]   ;;  %vm17554_vm10 = vmand %vm10709_vm8, %vm10710_vm9  ;;  %vm10685_vm11 = vsmask.f32 7440 }
  0x53   : > { %v4786_v6 = vor.u32 %v4784_v57, %v4782_v63  ;;  %v4810_v53 = vrot.slane %v4808_v41, 1  ;;  %v820_v57 = vshll.u32 %v14889_v45, 16  ;;  %v832_v24 = vshrl.u32 %v14891_v52, 16  ;;  %v14899_v41 = vld [vmem:[%s15289_s23 + $0x108] sm:$0xff]   ;;  %vm17565_vm12 = vmor %vm10652_vm5, %vm10685_vm11 }
  0x54   : > { %v783_v10 = vsel %vm595_vm2, %v778_v60, %v782_v61  ;;  %v4817_v60 = vrot.slane %v4815_v49, 1  ;;  %vm10745_vm13 = vcmask 1042432   ;;  %vm10758_vm14 = vsmask.f32 2304 }
  0x55   : > { %12791 = vmatmul.mubr.msk.bf16.gmra.mrb[28].mxu1 %vm1086_vm3, %v727_v54  ;;  %v14881_v54 = vld [vmem:[%s15289_s23 + $0xc0] sm:$0xff]   ;;  %v4790_v21 = vsel %vm595_vm2, %v4786_v6, %v4789_v8  ;;  %vm10746_vm15 = vcmask 1046532   ;;  %vm10816_vm5 = vsmask.f32 7946  ;;  %vm10791_vm8 = vsmask.f32 6416 }
  0x56   : > { %12794 = vmatprep.mubr.msk.bf16.mxu1 %vm1086_vm3, %v735_v59  ;;  %13279 = vmatmul.mubr.msk.bf16.gmra.mrb[28].mxu0 %vm1086_vm3, %v4741_v0  ;;  %v14897_v59 = vld [vmem:[%s17884_s1 + $0x8] ss:$0 sps:$4 sm:$0x66]   ;;  %v14882_v0 = vld [vmem:[%s15289_s23 + $0xd0] sm:$0xff]   ;;  %v792_v11 = vshrl.u32 %v14881_v54, 16  ;;  %vm17636_vm11 = vmor %vm10758_vm14, %vm10791_vm8 }
  0x57   : > { %13282 = vmatprep.mubr.msk.bf16.mxu0 %vm1086_vm3, %v4748_v3  ;;  %v788_v3 = vshll.u32 %v14881_v54, 16  ;;  %v7245_v4 = vrot.slane %v14897_v59, 1  ;;  %v4794_v14 = vshll.u32 %v14882_v0, 16  ;;  %v4798_v23 = vshrl.u32 %v14882_v0, 16  ;;  %v14890_v54 = vld [vmem:[%s15289_s23 + $0xf0] sm:$0xff]  }
  0x58   : > { %v4814_v59 = vor.u32 %v4812_v48, %v4810_v53  ;;  %v828_v0 = vshll.u32 %v14891_v52, 16  ;;  %v4826_v9 = vshrl.u32 %v14890_v54, 16  ;;  %v860_v52 = vshll.u32 %v14899_v41, 16 }
  0x59   : > { %v15454_v13 = vand.u32 %v7245_v4, %v15277_v7  ;;  %v790_v16 = vrot.slane %v788_v3, 1  ;;  %v4796_v28 = vrot.slane %v4794_v14, 1  ;;  %v822_v4 = vrot.slane %v820_v57, 1  ;;  %v14895_v14 = vld [vmem:[%s15289_s23 + $0xf8] sm:$0xff]  }
  0x5a   : > { %v4818_v6 = vsel %vm595_vm2, %v4814_v59, %v4817_v60  ;;  %v830_v12 = vrot.slane %v828_v0, 1  ;;  %v848_v49 = vshrl.u32 %v14895_v14, 16  ;;  %vm10897_vm8 = vsmask.f32 5392 }
  0x5b   : > { %13492 = vmatprep.subr.bf16.mxu0 %v15454_v13  ;;  %v794_v25 = vor.u32 %v792_v11, %v790_v16  ;;  %v4800_v35 = vor.u32 %v4798_v23, %v4796_v28 }
  0x5d   : > { %12795 = vmatmul.mubr.msk.bf16.gmra.mrb[32].mxu1 %vm1086_vm3, %v743_v15  ;;  %v4783_v15 = vsel %vm595_vm2, %v4779_v1, %v4782_v63  ;;  %v799_v38 = vsel %vm595_vm2, %v794_v25, %v798_v26  ;;  %v4804_v46 = vsel %vm595_vm2, %v4800_v35, %v4803_v36  ;;  %v824_v63 = vshrl.u32 %v14889_v45, 16 }
  0x5e   : > { %12798 = vmatprep.mubr.msk.bf16.mxu1 %vm1086_vm3, %v751_v22  ;;  %13283 = vmatmul.mubr.msk.bf16.gmra.mrb[32].mxu0 %vm1086_vm3, %v4755_v27  ;;  %v786_v22 = vor.u32 %v784_v2, %v782_v61  ;;  %v14887_v27 = vld [vmem:[%s15289_s23 + $0xd8] sm:$0xff]   ;;  %v4819_v1 = vshrl.u32 %v14888_v37, 16  ;;  %v4822_v2 = vshll.u32 %v14890_v54, 16  ;;  %v15023_v37 = vld [vmem:[%s15289_s23 + $0x14] sm:$0xf] }
  0x5f   : > { %13286 = vmatprep.mubr.msk.bf16.mxu0 %vm1086_vm3, %v4762_v31  ;;  %v4793_v31 = vor.u32 %v4791_v19, %v4789_v8  ;;  %v812_v40 = vshll.u32 %v14887_v27, 16  ;;  %v816_v56 = vshrl.u32 %v14887_v27, 16  ;;  %v14892_v61 = vld [vmem:[%s15289_s23 + $0xf8] sm:$0xff]   ;;  %v826_v11 = vor.u32 %v824_v63, %v822_v4  ;;  %v15026_v63 = vld [vmem:[%s15289_s23 + $0x28] sm:$0xff]  }
  0x60   : > { %v791_v34 = vsel %vm595_vm2, %v786_v22, %v790_v16  ;;  %v4821_v16 = vor.u32 %v4819_v1, %v4817_v60  ;;  %v844_v27 = vshll.u32 %v14895_v14, 16  ;;  %v862_v60 = vrot.slane %v860_v52, 1 }
  0x61   : > { %v4797_v42 = vsel %vm595_vm2, %v4793_v31, %v4796_v28  ;;  %v831_v25 = vsel %vm595_vm2, %v826_v11, %v830_v12  ;;  %v5867_v28 = vld [vmem:[%s15289_s23 + $0x10] sm:$0xe]  ;;  %v5878_v0 = vrot.slane %v15026_v63, 1 }
  0x65   : > { %12799 = vmatmul.mubr.msk.bf16.gmra.mrb[36].mxu1 %vm1086_vm3, %v759_v43  ;;  %v806_v43 = vrot.slane %v804_v33, 1  ;;  %v4836_v33 = vshll.u32 %v14894_v20, 16  ;;  %v15027_v20 = vld [vmem:[%s15289_s23 + $0x30] sm:$0xff]  }
  0x66   : > { %12802 = vmatprep.mubr.msk.bf16.mxu1 %vm1086_vm3, %v767_v47  ;;  %13287 = vmatmul.mubr.msk.bf16.gmra.mrb[36].mxu0 %vm1086_vm3, %v4769_v51  ;;  %v802_v47 = vor.u32 %v800_v32, %v798_v26  ;;  %v814_v51 = vrot.slane %v812_v40, 1  ;;  %v4833_v32 = vshrl.u32 %v14892_v61, 16  ;;  %v846_v40 = vrot.slane %v844_v27, 1 }
  0x67   : > { %13290 = vmatprep.mubr.msk.bf16.mxu0 %vm1086_vm3, %v4776_v55  ;;  %v810_v50 = vor.u32 %v808_v39, %v806_v43  ;;  %v4807_v55 = vor.u32 %v4805_v44, %v4803_v36  ;;  %v834_v36 = vor.u32 %v832_v24, %v830_v12  ;;  %v15028_v24 = vld [vmem:[%s15289_s23 + $0x38] sm:$0xff]  }
  0x68   : > { %v807_v58 = vsel %vm595_vm2, %v802_v47, %v806_v43  ;;  %v818_v8 = vor.u32 %v816_v56, %v814_v51  ;;  %v15502_v43 = vrot.slane %v4836_v33, 1  ;;  %v15024_v47 = vld [vmem:[%s15289_s23 + $0x18] sm:$0xff]   ;;  %v850_v57 = vor.u32 %v848_v49, %v846_v40 }
  0x69   : > { %v815_v62 = vsel %vm595_vm2, %v810_v50, %v814_v51  ;;  %v4811_v3 = vsel %vm595_vm2, %v4807_v55, %v4810_v53  ;;  %v5874_v48 = vrot.slane %v15024_v47, 1  ;;  %v14900_v55 = vld [vmem:[%s15289_s23 + $0x110] sm:$0xff]   ;;  %v14905_v33 = vld [vmem:[%s15289_s23 + $0x138] sm:$0xff]   ;;  %v15030_v47 = vld [vmem:[%s15289_s23 + $0x48] sm:$0xff]  }
  0x6a   : > { %17938 = vst [vmem:[#allocation4_spill] sm:$0xff] %v15502_v43  ;;  %v868_v1 = vshll.u32 %v14900_v55, 16 }
  0x6d   : > { %12803 = vmatmul.mubr.msk.bf16.gmra.mrb[40].mxu1 %vm1086_vm3, %v775_v5  ;;  %v14893_v5 = vld [vmem:[%s15289_s23 + $0xf0] sm:$0xff]  }
  0x6e   : > { %12806 = vmatprep.mubr.msk.bf16.mxu1 %vm1086_vm3, %v783_v10  ;;  %13291 = vmatmul.mubr.msk.bf16.gmra.mrb[40].mxu0 %vm1086_vm3, %v4783_v15  ;;  %v4829_v10 = vshll.u32 %v14892_v61, 16  ;;  %v4824_v15 = vrot.slane %v4822_v2, 1  ;;  %v836_v19 = vshll.u32 %v14893_v5, 16  ;;  %v840_v26 = vshrl.u32 %v14893_v5, 16  ;;  %v15025_v61 = vld [vmem:[%s15289_s23 + $0x20] sm:$0xff]  }
  0x6f   : > { %13294 = vmatprep.mubr.msk.bf16.mxu0 %vm1086_vm3, %v4790_v21  ;;  %v823_v21 = vsel %vm595_vm2, %v818_v8, %v822_v4 }
  0x70   : > { %v4828_v22 = vor.u32 %v4826_v9, %v4824_v15  ;;  %v4831_v23 = vrot.slane %v4829_v10, 1  ;;  %v4825_v30 = vsel %vm595_vm2, %v4821_v16, %v4824_v15  ;;  %v838_v31 = vrot.slane %v836_v19, 1  ;;  %v14902_v10 = vld [vmem:[%s15289_s23 + $0x120] sm:$0xff]   ;;  %v14903_v15 = vld [vmem:[%s15289_s23 + $0x128] sm:$0xff]  }
  0x71   : > { %v870_v9 = vrot.slane %v868_v1, 1  ;;  %v14926_v19 = vld [vmem:[%s17884_s1] sm:$0x18]   ;;  %v896_v49 = vshrl.u32 %v14903_v15, 16  ;;  %v15032_v1 = vld [vmem:[%s15289_s23 + $0x58] sm:$0xff]  }
  0x72   : > { %v4832_v35 = vsel %vm595_vm2, %v4828_v22, %v4831_v23  ;;  %v842_v39 = vor.u32 %v840_v26, %v838_v31  ;;  %v839_v45 = vsel %vm595_vm2, %v834_v36, %v838_v31  ;;  %v884_v22 = vshll.u32 %v14902_v10, 16  ;;  %v14904_v31 = vld [vmem:[%s15289_s23 + $0x130] sm:$0xff]  }
  0x74   : > { %v847_v50 = vsel %vm595_vm2, %v842_v39, %v846_v40  ;;  %v900_v40 = vshll.u32 %v14904_v31, 16 }
  0x75   : > { %12807 = vmatmul.mubr.msk.bf16.gmra.mrb[44].mxu1 %vm1086_vm3, %v791_v34  ;;  %v14898_v34 = vld [vmem:[%s15289_s23 + $0x100] sm:$0xff]  }
  0x76   : > { %12810 = vmatprep.mubr.msk.bf16.mxu1 %vm1086_vm3, %v799_v38  ;;  %13295 = vmatmul.mubr.msk.bf16.gmra.mrb[44].mxu0 %vm1086_vm3, %v4797_v42  ;;  %v11841_v38 = vcombine.low %v5867_v28, %v15023_v37  ;;  %v4835_v42 = vor.u32 %v4833_v32, %v4831_v23  ;;  %v852_v44 = vshll.u32 %v14898_v34, 16  ;;  %v856_v51 = vshrl.u32 %v14898_v34, 16 }
  0x77   : > { %13298 = vmatprep.mubr.msk.bf16.mxu0 %vm1086_vm3, %v4804_v46  ;;  %v888_v28 = vshrl.u32 %v14902_v10, 16  ;;  %v2558_v32 = vrot.slane %v14926_v19, 3  ;;  %v886_v34 = vrot.slane %v884_v22, 1  ;;  %v902_v52 = vrot.slane %v900_v40, 1  ;;  %v15034_v22 = vld [vmem:[%s15289_s23 + $0x68] sm:$0xff]  }
  0x78   : > { %v5873_v46 = vrot.slane %v11841_v38, 1  ;;  %v4839_v53 = vsel %vm595_vm2, %v4835_v42, %v15502_v43  ;;  %v854_v54 = vrot.slane %v852_v44, 1  ;;  %v15029_v42 = vld [vmem:[%s15289_s23 + $0x40] sm:$0xff]  }
  0x79   : > { %v890_v38 = vor.u32 %v888_v28, %v886_v34  ;;  %v5884_v44 = vrot.slane %v15029_v42, 1  ;;  %v16078_v43 = vld [vmem:[%s15289_s23 + $0x120] sm:$0xff]  }
  0x7a   : > { %v5875_v56 = vsel %vm2433_vm4, %v5873_v46, %v5874_v48  ;;  %v858_v59 = vor.u32 %v856_v51, %v854_v54  ;;  %v855_v2 = vsel %vm595_vm2, %v850_v57, %v854_v54  ;;  %17945 = vst [vmem:[#allocation11_spill] sm:$0xff] %v16078_v43 }
  0x7c   : > { %v863_v5 = vsel %vm595_vm2, %v858_v59, %v862_v60 }
  0x7d   : > { %12811 = vmatmul.mubr.msk.bf16.gmra.mrb[48].mxu1 %vm1086_vm3, %v807_v58  ;;  %v14901_v58 = vld [vmem:[%s15289_s23 + $0x118] sm:$0xff]  }
  0x7e   : > { %12814 = vmatprep.mubr.msk.bf16.mxu1 %vm1086_vm3, %v815_v62  ;;  %13299 = vmatmul.mubr.msk.bf16.gmra.mrb[48].mxu0 %vm1086_vm3, %v4811_v3  ;;  %v5876_v62 = vrot.slane %v15025_v61, 1  ;;  %v864_v3 = vshrl.u32 %v14899_v41, 16  ;;  %v876_v4 = vshll.u32 %v14901_v58, 16  ;;  %v880_v26 = vshrl.u32 %v14901_v58, 16  ;;  %v14906_v41 = vld [vmem:[%s15289_s23 + $0x140] sm:$0xff]   ;;  %v15031_v61 = vld [vmem:[%s15289_s23 + $0x50] sm:$0xff]  }
  0x7f   : > { %13302 = vmatprep.mubr.msk.bf16.mxu0 %vm1086_vm3, %v4818_v6  ;;  %v872_v6 = vshrl.u32 %v14900_v55, 16 }
  0x80   : > { %v5877_v8 = vsel %vm2433_vm4, %v5874_v48, %v5876_v62  ;;  %v5879_v11 = vsel %vm2433_vm4, %v5876_v62, %v5878_v0  ;;  %v866_v12 = vor.u32 %v864_v3, %v862_v60  ;;  %v878_v14 = vrot.slane %v876_v4, 1  ;;  %v14908_v60 = vld [vmem:[%s15289_s23 + $0x150] sm:$0xff]   ;;  %v14909_v4 = vld [vmem:[%s15289_s23 + $0x158] sm:$0xff]  }
  0x81   : > { %v874_v16 = vor.u32 %v872_v6, %v870_v9  ;;  %v5886_v48 = vrot.slane %v15030_v47, 1  ;;  %v5888_v62 = vrot.slane %v15031_v61, 1  ;;  %v912_v3 = vshrl.u32 %v14905_v33, 16 }
  0x82   : > { %v871_v23 = vsel %vm595_vm2, %v866_v12, %v870_v9  ;;  %v882_v37 = vor.u32 %v880_v26, %v878_v14  ;;  %v15579_v26 = vld [vmem:[%s15289_s23 + $0x168] sm:$0xff]  }
  0x83   : > { %v879_v27 = vsel %vm595_vm2, %v874_v16, %v878_v14  ;;  %v5887_v57 = vsel %vm2433_vm4, %v5884_v44, %v5886_v48  ;;  %v5889_v9 = vsel %vm2433_vm4, %v5886_v48, %v5888_v62  ;;  %v15033_v16 = vld [vmem:[%s15289_s23 + $0x60] sm:$0xff]  }
  0x84   : > { %v887_v46 = vsel %vm595_vm2, %v882_v37, %v886_v34  ;;  %v5892_v19 = vrot.slane %v15033_v16, 1  ;;  %v15037_v48 = vld [vmem:[%s15289_s23 + $0x80] sm:$0xff]   ;;  %v15040_v16 = vld [vmem:[%s15289_s23 + $0x98] sm:$0xff]  }
  0x85   : > { %12815 = vmatmul.mubr.msk.bf16.gmra.mrb[52].mxu1 %vm1086_vm3, %v823_v21  ;;  %v5880_v21 = vrot.slane %v15027_v20, 1  ;;  %v940_v20 = vshll.u32 %v14909_v4, 16 }
  0x86   : > { %12818 = vmatprep.mubr.msk.bf16.mxu1 %vm1086_vm3, %v831_v25  ;;  %13303 = vmatmul.mubr.msk.bf16.gmra.mrb[52].mxu0 %vm1086_vm3, %v4825_v30  ;;  %v5882_v25 = vrot.slane %v15028_v24, 1  ;;  %v892_v30 = vshll.u32 %v14903_v15, 16 }
  0x87   : > { %13306 = vmatprep.mubr.msk.bf16.mxu0 %vm1086_vm3, %v4832_v35  ;;  %v15541_v35 = vand.u32 %v2558_v32, %v15277_v7  ;;  %v15035_v32 = vld [vmem:[%s15289_s23 + $0x70] sm:$0xff]  }
  0x88   : > { %v5883_v36 = vsel %vm2433_vm4, %v5880_v21, %v5882_v25  ;;  %v894_v39 = vrot.slane %v892_v30, 1  ;;  %v5885_v54 = vsel %vm2433_vm4, %v5882_v25, %v5884_v44  ;;  %v15576_v25 = vld [vmem:[%s15289_s23 + $0x160] sm:$0xff]   ;;  %v936_v30 = vshrl.u32 %v14908_v60, 16 }
  0x89   : > { %13004 = vmatprep.subr.bf16.mxu1 %v15541_v35  ;;  %v944_v44 = vshrl.u32 %v14909_v4, 16 }
  0x8a   : > { %v895_v51 = vsel %vm595_vm2, %v890_v38, %v894_v39  ;;  %v898_v58 = vor.u32 %v896_v49, %v894_v39  ;;  %v948_v38 = vshll.u32 %v15576_v25, 16  ;;  %v956_v39 = vshll.u32 %v15579_v26, 16 }
  0x8b   : > { %v5900_v49 = vrot.slane %v15037_v48, 1 }
  0x8d   : > { %12819 = vmatmul.mubr.msk.bf16.gmra.mrb[56].mxu1 %vm1086_vm3, %v839_v45  ;;  %v908_v45 = vshll.u32 %v14905_v33, 16  ;;  %v5896_v33 = vrot.slane %v15035_v32, 1 }
  0x8e   : > { %12822 = vmatprep.mubr.msk.bf16.mxu1 %vm1086_vm3, %v847_v50  ;;  %13307 = vmatmul.mubr.msk.bf16.gmra.mrb[56].mxu0 %vm1086_vm3, %v4839_v53  ;;  %v14907_v50 = vld [vmem:[%s15289_s23 + $0x148] sm:$0xff]   ;;  %v904_v53 = vshrl.u32 %v14904_v31, 16 }
  0x8f   : > { %13372 = vmatprep.mubr.msk.bf16.mxu0 %vm1086_vm3, %v5875_v56  ;;  %v910_v55 = vrot.slane %v908_v45, 1  ;;  %v916_v56 = vshll.u32 %v14906_v41, 16  ;;  %v924_v63 = vshll.u32 %v14907_v50, 16  ;;  %v928_v24 = vshrl.u32 %v14907_v50, 16  ;;  %v15594_v45 = vld [vmem:[%s15289_s23 + $0x170] sm:$0xff]  }
  0x90   : > { %v906_v59 = vor.u32 %v904_v53, %v902_v52  ;;  %v952_v50 = vshrl.u32 %v15576_v25, 16  ;;  %v958_v53 = vrot.slane %v956_v39, 1  ;;  %v968_v4 = vshrl.u32 %v15594_v45, 16  ;;  %v15042_v39 = vld [vmem:[%s15289_s23 + $0xa8] sm:$0xff]  }
  0x91   : > { %v918_v6 = vrot.slane %v916_v56, 1  ;;  %v926_v10 = vrot.slane %v924_v63, 1  ;;  %v914_v14 = vor.u32 %v912_v3, %v910_v55  ;;  %v15614_v63 = vld [vmem:[%s15289_s23 + $0x180] sm:$0xff]  }
  0x95   : > { %12823 = vmatmul.mubr.msk.bf16.gmra.mrb[60].mxu1 %vm1086_vm3, %v855_v2  ;;  %v5890_v2 = vrot.slane %v15032_v1, 1 }
  0x96   : > { %12826 = vmatprep.mubr.msk.bf16.mxu1 %vm1086_vm3, %v863_v5  ;;  %13373 = vmatmul.mubr.msk.bf16.vlgmr.msra.gmra.mrb[0].mxu0 %vm1086_vm3, %v5877_v8  ;;  %v911_v5 = vsel %vm595_vm2, %v906_v59, %v910_v55  ;;  %v920_v8 = vshrl.u32 %v14906_v41, 16  ;;  %v15036_v41 = vld [vmem:[%s15289_s23 + $0x78] sm:$0xff]  }
  0x97   : > { %13493 = vmatpush3.bf16.msra.mxu0 %v15454_v13  ;;  %13376 = vmatprep.mubr.msk.bf16.mxu0 %vm1086_vm3, %v5879_v11  ;;  %v5881_v13 = vsel %vm2433_vm4, %v5878_v0, %v5880_v21  ;;  %v903_v0 = vsel %vm595_vm2, %v898_v58, %v902_v52  ;;  %v932_v11 = vshll.u32 %v14908_v60, 16  ;;  %v5891_v12 = vsel %vm2433_vm4, %v5888_v62, %v5890_v2  ;;  %v15038_v60 = vld [vmem:[%s15289_s23 + $0x88] sm:$0xff]  }
  0x98   : > { %v922_v15 = vor.u32 %v920_v8, %v918_v6  ;;  %v919_v21 = vsel %vm595_vm2, %v914_v14, %v918_v6  ;;  %v5893_v31 = vsel %vm2433_vm4, %v5890_v2, %v5892_v19  ;;  %v5898_v42 = vrot.slane %v15036_v41, 1  ;;  %v15039_v2 = vld [vmem:[%s15289_s23 + $0x90] sm:$0xff]  }
  0x99   : > { %v934_v28 = vrot.slane %v932_v11, 1  ;;  %v950_v52 = vrot.slane %v948_v38, 1  ;;  %v5902_v61 = vrot.slane %v15038_v60, 1  ;;  %v960_v62 = vshrl.u32 %v15579_v26, 16 }
  0x9a   : > { %v5904_v3 = vrot.slane %v15039_v2, 1 }
  0x9b   : > { %v938_v37 = vor.u32 %v936_v30, %v934_v28  ;;  %v954_v56 = vor.u32 %v952_v50, %v950_v52 }
  0x9c   : > { %v5905_v30 = vsel %vm2433_vm4, %v5902_v61, %v5904_v3 }
  0x9d   : > { %12827 = vmatmul.mubr.msk.bf16.gmra.mrb[64].mxu1 %vm1086_vm3, %v871_v23  ;;  %v5894_v23 = vrot.slane %v15034_v22, 1  ;;  %v959_v1 = vsel %vm595_vm2, %v954_v56, %v958_v53  ;;  %v15637_v22 = vld [vmem:[%s15289_s23 + $0x198] sm:$0xff]  }
  0x9e   : > { %12830 = vmatprep.mubr.msk.bf16.mxu1 %vm1086_vm3, %v879_v27  ;;  %13377 = vmatmul.mubr.msk.bf16.gmra.mrb[4].mxu0 %vm1086_vm3, %v5881_v13  ;;  %v927_v27 = vsel %vm595_vm2, %v922_v15, %v926_v10  ;;  %v942_v13 = vrot.slane %v940_v20, 1 }
  0x9f   : > { %13380 = vmatprep.mubr.msk.bf16.mxu0 %vm1086_vm3, %v5883_v36  ;;  %v5895_v34 = vsel %vm2433_vm4, %v5892_v19, %v5894_v23  ;;  %v930_v36 = vor.u32 %v928_v24, %v926_v10  ;;  %v962_v10 = vor.u32 %v960_v62, %v958_v53  ;;  %v5906_v19 = vrot.slane %v15040_v16, 1  ;;  %v15041_v24 = vld [vmem:[%s15289_s23 + $0xa0] sm:$0xff]  }
  0xa0   : > { %v943_v47 = vsel %vm595_vm2, %v938_v37, %v942_v13  ;;  %v946_v55 = vor.u32 %v944_v44, %v942_v13  ;;  %v1004_v37 = vshll.u32 %v15637_v22, 16 }
  0xa1   : > { %v935_v40 = vsel %vm595_vm2, %v930_v36, %v934_v28  ;;  %v984_v28 = vshrl.u32 %v15614_v63, 16 }
  0xa2   : > { %v951_v59 = vsel %vm595_vm2, %v946_v55, %v950_v52  ;;  %v1006_v50 = vrot.slane %v1004_v37, 1  ;;  %v15043_v55 = vld [vmem:[%s15289_s23 + $0xb0] sm:$0xff]   ;;  %v15703_v37 = vld [vmem:[%s15289_s23 + $0x1c8] sm:$0xff]  }
  0xa3   : > { %v5912_v56 = vrot.slane %v15043_v55, 1 }
  0xa5   : > { %12831 = vmatmul.mubr.msk.bf16.gmra.mrb[68].mxu1 %vm1086_vm3, %v887_v46  ;;  %v15597_v46 = vld [vmem:[%s15289_s23 + $0x178] sm:$0xff]  }
  0xa6   : > { %12834 = vmatprep.mubr.msk.bf16.mxu1 %vm1086_vm3, %v895_v51  ;;  %13381 = vmatmul.mubr.msk.bf16.gmra.mrb[8].mxu0 %vm1086_vm3, %v5885_v54  ;;  %v5897_v51 = vsel %vm2433_vm4, %v5894_v23, %v5896_v33  ;;  %v5899_v54 = vsel %vm2433_vm4, %v5896_v33, %v5898_v42  ;;  %v972_v58 = vshll.u32 %v15597_v46, 16  ;;  %v976_v20 = vshrl.u32 %v15597_v46, 16 }
  0xa7   : > { %13384 = vmatprep.mubr.msk.bf16.mxu0 %vm1086_vm3, %v5887_v57  ;;  %v964_v57 = vshll.u32 %v15594_v45, 16  ;;  %v5907_v33 = vsel %vm2433_vm4, %v5904_v3, %v5906_v19 }
  0xa8   : > { %v974_v8 = vrot.slane %v972_v58, 1 }
  0xa9   : > { %v966_v6 = vrot.slane %v964_v57, 1 }
  0xaa   : > { %v978_v13 = vor.u32 %v976_v20, %v974_v8 }
  0xab   : > { %v970_v11 = vor.u32 %v968_v4, %v966_v6  ;;  %v967_v15 = vsel %vm595_vm2, %v962_v10, %v966_v6 }
  0xad   : > { %12835 = vmatmul.mubr.msk.bf16.gmra.mrb[72].mxu1 %vm1086_vm3, %v903_v0  ;;  %v15617_v0 = vld [vmem:[%s15289_s23 + $0x188] sm:$0xff]   ;;  %v975_v23 = vsel %vm595_vm2, %v970_v11, %v974_v8  ;;  %v15683_v11 = vld [vmem:[%s15289_s23 + $0x1b8] sm:$0xff]  }
  0xae   : > { %12838 = vmatprep.mubr.msk.bf16.mxu1 %vm1086_vm3, %v911_v5  ;;  %13385 = vmatmul.mubr.msk.bf16.gmra.mrb[12].mxu0 %vm1086_vm3, %v5889_v9  ;;  %v5901_v5 = vsel %vm2433_vm4, %v5898_v42, %v5900_v49  ;;  %v5903_v9 = vsel %vm2433_vm4, %v5900_v49, %v5902_v61  ;;  %v988_v14 = vshll.u32 %v15617_v0, 16  ;;  %v992_v41 = vshrl.u32 %v15617_v0, 16 }
  0xaf   : > { %13388 = vmatprep.mubr.msk.bf16.mxu0 %vm1086_vm3, %v5891_v12  ;;  %v980_v12 = vshll.u32 %v15614_v63, 16  ;;  %v1008_v61 = vshrl.u32 %v15637_v22, 16 }
  0xb0   : > { %v990_v32 = vrot.slane %v988_v14, 1 }
  0xb1   : > { %v1010_v8 = vor.u32 %v1008_v61, %v1006_v50 }
  0xb2   : > { %v994_v53 = vor.u32 %v992_v41, %v990_v32 }
  0xb5   : > { %12839 = vmatmul.mubr.msk.bf16.gmra.mrb[76].mxu1 %vm1086_vm3, %v919_v21  ;;  %v15634_v21 = vld [vmem:[%s15289_s23 + $0x190] sm:$0xff]  }
  0xb6   : > { %12842 = vmatprep.mubr.msk.bf16.mxu1 %vm1086_vm3, %v927_v27  ;;  %13389 = vmatmul.mubr.msk.bf16.gmra.mrb[16].mxu0 %vm1086_vm3, %v5893_v31  ;;  %v5908_v27 = vrot.slane %v15041_v24, 1  ;;  %v982_v31 = vrot.slane %v980_v12, 1  ;;  %v996_v36 = vshll.u32 %v15634_v21, 16  ;;  %v1000_v44 = vshrl.u32 %v15634_v21, 16  ;;  %v15045_v12 = vld [vmem:[%s15289_s23 + $0xc0] sm:$0xff]  }
  0xb7   : > { %13392 = vmatprep.mubr.msk.bf16.mxu0 %vm1086_vm3, %v5895_v34  ;;  %v5916_v14 = vrot.slane %v15045_v12, 1 }
  0xb8   : > { %v986_v34 = vor.u32 %v984_v28, %v982_v31  ;;  %v983_v38 = vsel %vm595_vm2, %v978_v13, %v982_v31  ;;  %v5909_v48 = vsel %vm2433_vm4, %v5906_v19, %v5908_v27  ;;  %v998_v49 = vrot.slane %v996_v36, 1  ;;  %v15046_v19 = vld [vmem:[%s15289_s23 + $0xc8] sm:$0xff]  }
  0xb9   : > { %v5918_v20 = vrot.slane %v15046_v19, 1  ;;  %v1036_v28 = vshll.u32 %v15683_v11, 16 }
  0xba   : > { %v991_v42 = vsel %vm595_vm2, %v986_v34, %v990_v32  ;;  %v999_v58 = vsel %vm595_vm2, %v994_v53, %v998_v49  ;;  %v15698_v32 = vld [vmem:[%s15289_s23 + $0x1c0] sm:$0xff]   ;;  %v15716_v53 = vld [vmem:[%s15289_s23 + $0x1d8] sm:$0xf] }
  0xbb   : > { %v1038_v36 = vrot.slane %v1036_v28, 1 }
  0xbd   : > { %12843 = vmatmul.mubr.msk.bf16.gmra.mrb[80].mxu1 %vm1086_vm3, %v935_v40  ;;  %v5910_v40 = vrot.slane %v15042_v39, 1 }
  0xbe   : > { %12846 = vmatprep.mubr.msk.bf16.mxu1 %vm1086_vm3, %v943_v47  ;;  %13393 = vmatmul.mubr.msk.bf16.gmra.mrb[20].mxu0 %vm1086_vm3, %v5897_v51  ;;  %v15656_v47 = vld [vmem:[%s15289_s23 + $0x1a0] sm:$0xff]   ;;  %v15661_v51 = vld [vmem:[%s15289_s23 + $0x1a8] sm:$0xff]  }
  0xbf   : > { %13396 = vmatprep.mubr.msk.bf16.mxu0 %vm1086_vm3, %v5899_v54  ;;  %v5911_v52 = vsel %vm2433_vm4, %v5908_v27, %v5910_v40  ;;  %v1002_v54 = vor.u32 %v1000_v44, %v998_v49  ;;  %v1012_v57 = vshll.u32 %v15656_v47, 16  ;;  %v1020_v2 = vshll.u32 %v15661_v51, 16 }
  0xc0   : > { %v5913_v3 = vsel %vm2433_vm4, %v5910_v40, %v5912_v56  ;;  %v1044_v40 = vshll.u32 %v15698_v32, 16 }
  0xc1   : > { %v1007_v62 = vsel %vm595_vm2, %v1002_v54, %v1006_v50  ;;  %v1014_v4 = vrot.slane %v1012_v57, 1  ;;  %v1022_v10 = vrot.slane %v1020_v2, 1  ;;  %v1048_v50 = vshrl.u32 %v15698_v32, 16  ;;  %v293_v54 = vld [vmem:[%s15289_s23 + $0x1dc] sm:$0xf]  ;;  %v15722_v57 = vld [vmem:[%s15289_s23 + $0x1d0] sm:$0xff]  }
  0xc2   : > { %v1064_v12 = vshrl.u32 %v15722_v57, 16 }
  0xc3   : > { %v1015_v16 = vsel %vm595_vm2, %v1010_v8, %v1014_v4 }
  0xc5   : > { %12847 = vmatmul.mubr.msk.bf16.gmra.mrb[84].mxu1 %vm1086_vm3, %v951_v59  ;;  %v15044_v59 = vld [vmem:[%s15289_s23 + $0xb8] sm:$0xff]  }
  0xc6   : > { %12850 = vmatprep.mubr.msk.bf16.mxu1 %vm1086_vm3, %v959_v1  ;;  %13397 = vmatmul.mubr.msk.bf16.gmra.mrb[24].mxu0 %vm1086_vm3, %v5901_v5  ;;  %v5914_v60 = vrot.slane %v15044_v59, 1  ;;  %v1016_v1 = vshrl.u32 %v15656_v47, 16  ;;  %v15678_v5 = vld [vmem:[%s15289_s23 + $0x1b0] sm:$0xff]  }
  0xc7   : > { %13400 = vmatprep.mubr.msk.bf16.mxu0 %vm1086_vm3, %v5903_v9  ;;  %v1032_v27 = vshrl.u32 %v15678_v5, 16 }
  0xc8   : > { %v5915_v6 = vsel %vm2433_vm4, %v5912_v56, %v5914_v60  ;;  %v1018_v9 = vor.u32 %v1016_v1, %v1014_v4  ;;  %v1046_v56 = vrot.slane %v1044_v40, 1  ;;  %v15049_v1 = vld [vmem:[%s15289_s23 + $0xe0] sm:$0xff]  }
  0xc9   : > { %v5924_v2 = vrot.slane %v15049_v1, 1 }
  0xca   : > { %v1023_v24 = vsel %vm595_vm2, %v1018_v9, %v1022_v10  ;;  %v1056_v9 = vshrl.u32 %v15703_v37, 16 }
  0xcd   : > { %12851 = vmatmul.mubr.msk.bf16.gmra.mrb[88].mxu1 %vm1086_vm3, %v967_v15  ;;  %v1028_v15 = vshll.u32 %v15678_v5, 16 }
  0xce   : > { %12854 = vmatprep.mubr.msk.bf16.mxu1 %vm1086_vm3, %v975_v23  ;;  %13401 = vmatmul.mubr.msk.bf16.gmra.mrb[28].mxu0 %vm1086_vm3, %v5905_v30  ;;  %v1024_v23 = vshrl.u32 %v15661_v51, 16  ;;  %v5917_v30 = vsel %vm2433_vm4, %v5914_v60, %v5916_v14  ;;  %v1050_v60 = vor.u32 %v1048_v50, %v1046_v56 }
  0xcf   : > { %13404 = vmatprep.mubr.msk.bf16.mxu0 %vm1086_vm3, %v5907_v33  ;;  %v1030_v31 = vrot.slane %v1028_v15, 1  ;;  %v5919_v33 = vsel %vm2433_vm4, %v5916_v14, %v5918_v20 }
  0xd0   : > { %v1026_v13 = vor.u32 %v1024_v23, %v1022_v10 }
  0xd1   : > { %v1034_v34 = vor.u32 %v1032_v27, %v1030_v31  ;;  %v15051_v27 = vld [vmem:[%s15289_s23 + $0xf0] sm:$0xff]  }
  0xd2   : > { %v1031_v41 = vsel %vm595_vm2, %v1026_v13, %v1030_v31  ;;  %v5928_v28 = vrot.slane %v15051_v27, 1  ;;  %v15052_v31 = vld [vmem:[%s15289_s23 + $0xf8] sm:$0xff]   ;;  %v15808_v27 = vld [vmem:[%s15289_s23 + $0x28] sm:$0xff]  }
  0xd3   : > { %v1039_v49 = vsel %vm595_vm2, %v1034_v34, %v1038_v36 }
  0xd5   : > { %12855 = vmatmul.mubr.msk.bf16.gmra.mrb[92].mxu1 %vm1086_vm3, %v983_v38  ;;  %v15047_v38 = vld [vmem:[%s15289_s23 + $0xd0] sm:$0xff]  }
  0xd6   : > { %12858 = vmatprep.mubr.msk.bf16.mxu1 %vm1086_vm3, %v991_v42  ;;  %13405 = vmatmul.mubr.msk.bf16.gmra.mrb[32].mxu0 %vm1086_vm3, %v5909_v48  ;;  %v5920_v39 = vrot.slane %v15047_v38, 1  ;;  %v15048_v42 = vld [vmem:[%s15289_s23 + $0xd8] sm:$0xff]   ;;  %v1040_v48 = vshrl.u32 %v15683_v11, 16 }
  0xd7   : > { %13408 = vmatprep.mubr.msk.bf16.mxu0 %vm1086_vm3, %v5911_v52  ;;  %v5922_v44 = vrot.slane %v15048_v42, 1  ;;  %v1052_v52 = vshll.u32 %v15703_v37, 16 }
  0xd8   : > { %v5921_v55 = vsel %vm2433_vm4, %v5918_v20, %v5920_v39  ;;  %v1042_v59 = vor.u32 %v1040_v48, %v1038_v36 }
  0xd9   : > { %v1054_v61 = vrot.slane %v1052_v52, 1  ;;  %v5925_v15 = vsel %vm2433_vm4, %v5922_v44, %v5924_v2 }
  0xda   : > { %v1047_v4 = vsel %vm595_vm2, %v1042_v59, %v1046_v56  ;;  %v14929_v59 = vld [vmem:[%s15289_s23 + $0x118] sm:$0xff]  }
  0xdb   : > { %v1055_v10 = vsel %vm595_vm2, %v1050_v60, %v1054_v61  ;;  %v1058_v20 = vor.u32 %v1056_v9, %v1054_v61  ;;  %v14931_v9 = vld [vmem:[%s15289_s23 + $0x128] sm:$0xff]  }
  0xdd   : > { %12859 = vmatmul.mubr.msk.bf16.gmra.mrb[96].mxu1 %vm1086_vm3, %v999_v58  ;;  %v5923_v58 = vsel %vm2433_vm4, %v5920_v39, %v5922_v44  ;;  %v14927_v39 = vld [vmem:[%s15289_s23 + $0x108] sm:$0xff]  }
  0xde   : > { %12862 = vmatprep.mubr.msk.bf16.mxu1 %vm1086_vm3, %v1007_v62  ;;  %13409 = vmatmul.mubr.msk.bf16.gmra.mrb[36].mxu0 %vm1086_vm3, %v5913_v3  ;;  %v15727_v62 = vcombine.low %v15716_v53, %v293_v54  ;;  %v1060_v3 = vshll.u32 %v15722_v57, 16  ;;  %v14957_v44 = vld [vmem:[%s17884_s1 + $0x8] ss:$0 sps:$4 sm:$0xcc]   ;;  %v5934_v48 = vrot.slane %v14927_v39, 1  ;;  %v14928_v54 = vld [vmem:[%s15289_s23 + $0x110] sm:$0xff]  }
  0xdf   : > { %13412 = vmatprep.mubr.msk.bf16.mxu0 %vm1086_vm3, %v5915_v6  ;;  %v15050_v6 = vld [vmem:[%s15289_s23 + $0xe8] sm:$0xff]   ;;  %v8494_v50 = vshll.u32 %v14957_v44, 16  ;;  %v5936_v61 = vrot.slane %v14928_v54, 1  ;;  %v14938_v54 = vld [vmem:[%s15289_s23 + $0x160] sm:$0xff]  }
  0xe0   : > { %17939 = vst [vmem:[#allocation5_spill] sm:$0xff] %v15727_v62  ;;  %v5926_v8 = vrot.slane %v15050_v6, 1  ;;  %v1068_v14 = vshll.u32 %v15727_v62, 16  ;;  %v1072_v36 = vshrl.u32 %v15727_v62, 16  ;;  %v15783_v6 = vld [vmem:[%s15289_s23 + $0x10] sm:$0xff]   ;;  %v16090_v62 = vld [vmem:[%s15289_s23 + $0x128] sm:$0xff]  }
  0xe1   : > { %v8496_v56 = vrot.slane %v8494_v50, 3  ;;  %v15840_v50 = vld [vmem:[%s15289_s23 + $0x48] sm:$0xff]   ;;  %17947 = vst [vmem:[#allocation13_spill] sm:$0xff] %v16090_v62 }
  0xe2   : > { %v5927_v19 = vsel %vm2433_vm4, %v5924_v2, %v5926_v8  ;;  %v5929_v34 = vsel %vm2433_vm4, %v5926_v8, %v5928_v28  ;;  %v5938_v2 = vrot.slane %v14929_v59, 1  ;;  %v5956_v59 = vrot.slane %v14938_v54, 1  ;;  %v15911_v54 = vld [vmem:[%s15289_s23 + $0x90] sm:$0xff]  }
  0xe4   : > { %v5939_v8 = vsel %vm2433_vm4, %v5936_v61, %v5938_v2 }
  0xe5   : > { %12863 = vmatmul.mubr.msk.bf16.gmra.mrb[100].mxu1 %vm1086_vm3, %v1015_v16  ;;  %v1062_v16 = vrot.slane %v1060_v3, 1  ;;  %v15775_v3 = vld [vmem:[%s15289_s23 + $0x8] sm:$0xff]  }
  0xe6   : > { %12866 = vmatprep.mubr.msk.bf16.mxu1 %vm1086_vm3, %v1023_v24  ;;  %13413 = vmatmul.mubr.msk.bf16.gmra.mrb[40].mxu0 %vm1086_vm3, %v5917_v30  ;;  %v1070_v24 = vrot.slane %v1068_v14, 1  ;;  %v15792_v14 = vld [vmem:[%s15289_s23 + $0x18] sm:$0xff]  }
  0xe7   : > { %13416 = vmatprep.mubr.msk.bf16.mxu0 %vm1086_vm3, %v5919_v33  ;;  %v1066_v23 = vor.u32 %v1064_v12, %v1062_v16  ;;  %v1063_v30 = vsel %vm595_vm2, %v1058_v20, %v1062_v16  ;;  %v5930_v33 = vrot.slane %v15052_v31, 1  ;;  %v5942_v12 = vrot.slane %v14931_v9, 1  ;;  %v15799_v16 = vld [vmem:[%s15289_s23 + $0x20] sm:$0xff]   ;;  %v14933_v20 = vld [vmem:[%s15289_s23 + $0x138] sm:$0xff]   ;;  %v15815_v31 = vld [vmem:[%s15289_s23 + $0x30] sm:$0xff]  }
  0xe8   : > { %v1074_v40 = vor.u32 %v1072_v36, %v1070_v24  ;;  %v14941_v9 = vld [vmem:[%s15289_s23 + $0x178] sm:$0xff]  }
  0xe9   : > { %v1071_v13 = vsel %vm595_vm2, %v1066_v23, %v1070_v24  ;;  %v5931_v38 = vsel %vm2433_vm4, %v5928_v28, %v5930_v33  ;;  %v5946_v24 = vrot.slane %v14933_v20, 1  ;;  %v15879_v20 = vld [vmem:[%s15289_s23 + $0x70] sm:$0xff]  }
  0xed   : > { %12867 = vmatmul.mubr.msk.bf16.gmra.mrb[104].mxu1 %vm1086_vm3, %v1031_v41  ;;  %v15053_v41 = vld [vmem:[%s15289_s23 + $0x100] sm:$0xff]  }
  0xee   : > { %12870 = vmatprep.mubr.msk.bf16.mxu1 %vm1086_vm3, %v1039_v49  ;;  %13417 = vmatmul.mubr.msk.bf16.gmra.mrb[44].mxu0 %vm1086_vm3, %v5921_v55  ;;  %v5932_v42 = vrot.slane %v15053_v41, 1  ;;  %v8491_v49 = vshrl.u32 %v14957_v44, 16  ;;  %v15831_v41 = vld [vmem:[%s15289_s23 + $0x40] sm:$0xff]   ;;  %v14937_v44 = vld [vmem:[%s15289_s23 + $0x158] sm:$0xff]  }
  0xef   : > { %13420 = vmatprep.mubr.msk.bf16.mxu0 %vm1086_vm3, %v5923_v58 }
  0xf0   : > { %v5933_v52 = vsel %vm2433_vm4, %v5930_v33, %v5932_v42  ;;  %v8493_v55 = vrot.slane %v8491_v49, 2  ;;  %v5935_v58 = vsel %vm2433_vm4, %v5932_v42, %v5934_v48  ;;  %v5954_v49 = vrot.slane %v14937_v44, 1 }
  0xf2   : > { %v8497_v60 = vor.u32 %v8496_v56, %v8493_v55  ;;  %v15847_v55 = vld [vmem:[%s15289_s23 + $0x50] sm:$0xff]  }
  0xf4   : > { %v15771_v1 = vand.u32 %v8497_v60, %v15277_v7 }
  0xf5   : > { %12871 = vmatmul.mubr.msk.bf16.gmra.mrb[108].mxu1 %vm1086_vm3, %v1047_v4  ;;  %v14930_v4 = vld [vmem:[%s15289_s23 + $0x120] sm:$0xff]  }
  0xf6   : > { %12874 = vmatprep.mubr.msk.bf16.mxu1 %vm1086_vm3, %v1055_v10  ;;  %13421 = vmatmul.mubr.msk.bf16.gmra.mrb[48].mxu0 %vm1086_vm3, %v5925_v15  ;;  %v5940_v10 = vrot.slane %v14930_v4, 1  ;;  %v14932_v15 = vld [vmem:[%s15289_s23 + $0x130] sm:$0xff]   ;;  %v15863_v4 = vld [vmem:[%s15289_s23 + $0x60] sm:$0xff]  }
  0xf7   : > { %13424 = vmatprep.mubr.msk.bf16.mxu0 %vm1086_vm3, %v5927_v19  ;;  %13614 = vmatprep.subr.bf16.mxu0 %v15771_v1  ;;  %v5944_v23 = vrot.slane %v14932_v15, 1 }
  0xf8   : > { %v5943_v19 = vsel %vm2433_vm4, %v5940_v10, %v5942_v12 }
  0xf9   : > { %v5945_v28 = vsel %vm2433_vm4, %v5942_v12, %v5944_v23  ;;  %v5947_v33 = vsel %vm2433_vm4, %v5944_v23, %v5946_v24  ;;  %v5962_v12 = vrot.slane %v14941_v9, 1  ;;  %v15927_v9 = vld [vmem:[%s15289_s23 + $0xa0] sm:$0xff]  }
  0xfd   : > { %12875 = vmatmul.mubr.msk.bf16.gmra.mrb[112].mxu1 %vm1086_vm3, %v1063_v30  ;;  %v14934_v30 = vld [vmem:[%s15289_s23 + $0x140] sm:$0xff]  }
  0xfe   : > { %12878 = vmatprep.mubr.msk.bf16.mxu1 %vm1086_vm3, %v1071_v13  ;;  %13425 = vmatmul.mubr.msk.bf16.gmra.mrb[52].mxu0 %vm1086_vm3, %v5929_v34  ;;  %v14935_v13 = vld [vmem:[%s15289_s23 + $0x148] sm:$0xff]   ;;  %v5948_v34 = vrot.slane %v14934_v30, 1 }
  0xff   : > { %13428 = vmatprep.mubr.msk.bf16.mxu0 %vm1086_vm3, %v5931_v38  ;;  %v5950_v36 = vrot.slane %v14935_v13, 1  ;;  %v15824_v38 = vld [vmem:[%s15289_s23 + $0x38] sm:$0xff]  }
 0x100   : > { %v5949_v39 = vsel %vm2433_vm4, %v5946_v24, %v5948_v34  ;;  %v14943_v24 = vld [vmem:[%s15289_s23 + $0x188] sm:$0xff]  }
 0x101   : > { %v5951_v42 = vsel %vm2433_vm4, %v5948_v34, %v5950_v36  ;;  %v5966_v30 = vrot.slane %v14943_v24, 1  ;;  %v14944_v34 = vld [vmem:[%s15289_s23 + $0x190] sm:$0xff]  }
 0x105   : > { %12879 = vmatmul.mubr.msk.bf16.gmra.mrb[116].mxu1 %vm1086_vm3, %v1074_v40  ;;  %v14936_v40 = vld [vmem:[%s15289_s23 + $0x150] sm:$0xff]  }
 0x106   : > { %12884 = vmatprep.mubr.msk.bf16.mxu1 %vm1086_vm3, %v15301_v18  ;;  %13429 = vmatmul.mubr.msk.bf16.gmra.mrb[56].mxu0 %vm1086_vm3, %v5933_v52  ;;  %v5937_v18 = vsel %vm2433_vm4, %v5934_v48, %v5936_v61  ;;  %v5952_v48 = vrot.slane %v14936_v40, 1  ;;  %v15856_v61 = vld [vmem:[%s15289_s23 + $0x58] sm:$0xff]  }
 0x107   : > { %13432 = vmatprep.mubr.msk.bf16.mxu0 %vm1086_vm3, %v5935_v58  ;;  %v14939_v58 = vld [vmem:[%s15289_s23 + $0x168] sm:$0xff]   ;;  %v14945_v40 = vld [vmem:[%s15289_s23 + $0x198] sm:$0xff]  }
 0x108   : > { %v5953_v52 = vsel %vm2433_vm4, %v5950_v36, %v5952_v48  ;;  %v5955_v56 = vsel %vm2433_vm4, %v5952_v48, %v5954_v49  ;;  %v5958_v60 = vrot.slane %v14939_v58, 1  ;;  %v15895_v36 = vld [vmem:[%s15289_s23 + $0x80] sm:$0xff]   ;;  %v5970_v44 = vrot.slane %v14945_v40, 1  ;;  %v15904_v48 = vld [vmem:[%s15289_s23 + $0x88] sm:$0xff]  }
 0x109   : > { %v14947_v58 = vld [vmem:[%s15289_s23 + $0x1a8] sm:$0xff]  }
 0x10d   : > { %12885 = vmatmul.mubr.msk.bf16.vlgmr.msra.gmra.mrb[0].mxu1 %vm1086_vm3, %v15775_v3 }
 0x10e   : > { %13005 = vmatpush3.bf16.msra.mxu1 %v15541_v35  ;;  %12888 = vmatprep.mubr.msk.bf16.mxu1 %vm1086_vm3, %v15783_v6  ;;  %v5941_v35 = vsel %vm2433_vm4, %v5938_v2, %v5940_v10  ;;  %v5957_v2 = vsel %vm2433_vm4, %v5954_v49, %v5956_v59 }
 0x10f   : > { %13433 = vmatmul.mubr.msk.bf16.gmra.mrb[60].mxu0 %vm1086_vm3, %v5937_v18  ;;  %v14940_v18 = vld [vmem:[%s15289_s23 + $0x170] sm:$0xff]  }
 0x110   : > { %13436 = vmatprep.mubr.msk.bf16.mxu0 %vm1086_vm3, %v5939_v8  ;;  %v5959_v8 = vsel %vm2433_vm4, %v5956_v59, %v5958_v60  ;;  %v5960_v10 = vrot.slane %v14940_v18, 1 }
 0x112   : > { %v5961_v15 = vsel %vm2433_vm4, %v5958_v60, %v5960_v10  ;;  %v5963_v23 = vsel %vm2433_vm4, %v5960_v10, %v5962_v12  ;;  %v5974_v60 = vrot.slane %v14947_v58, 1  ;;  %v14953_v58 = vld [vmem:[%s15289_s23 + $0x1d8] sm:$0xff]  }
 0x115   : > { %12889 = vmatmul.mubr.msk.bf16.gmra.mrb[4].mxu1 %vm1086_vm3, %v15792_v14 }
 0x116   : > { %12892 = vmatprep.mubr.msk.bf16.mxu1 %vm1086_vm3, %v15799_v16 }
 0x117   : > { %13437 = vmatmul.mubr.msk.bf16.gmra.mrb[64].mxu0 %vm1086_vm3, %v5941_v35  ;;  %v15872_v35 = vld [vmem:[%s15289_s23 + $0x68] sm:$0xff]  }
 0x118   : > { %13440 = vmatprep.mubr.msk.bf16.mxu0 %vm1086_vm3, %v5943_v19  ;;  %v14942_v19 = vld [vmem:[%s15289_s23 + $0x180] sm:$0xff]  }
 0x11d   : > { %12893 = vmatmul.mubr.msk.bf16.gmra.mrb[8].mxu1 %vm1086_vm3, %v15808_v27 }
 0x11e   : > { %12896 = vmatprep.mubr.msk.bf16.mxu1 %vm1086_vm3, %v15815_v31 }
 0x11f   : > { %13441 = vmatmul.mubr.msk.bf16.gmra.mrb[68].mxu0 %vm1086_vm3, %v5945_v28  ;;  %v5964_v28 = vrot.slane %v14942_v19, 1 }
 0x120   : > { %13444 = vmatprep.mubr.msk.bf16.mxu0 %vm1086_vm3, %v5947_v33  ;;  %v15888_v33 = vld [vmem:[%s15289_s23 + $0x78] sm:$0xff]  }
 0x121   : > { %v5965_v13 = vsel %vm2433_vm4, %v5962_v12, %v5964_v28  ;;  %v14949_v12 = vld [vmem:[%s15289_s23 + $0x1b8] sm:$0xff]  }
 0x122   : > { %v5978_v19 = vrot.slane %v14949_v12, 1 }
 0x125   : > { %12897 = vmatmul.mubr.msk.bf16.gmra.mrb[12].mxu1 %vm1086_vm3, %v15824_v38 }
 0x126   : > { %12900 = vmatprep.mubr.msk.bf16.mxu1 %vm1086_vm3, %v15831_v41 }
 0x127   : > { %13445 = vmatmul.mubr.msk.bf16.gmra.mrb[72].mxu0 %vm1086_vm3, %v5949_v39  ;;  %v5967_v39 = vsel %vm2433_vm4, %v5964_v28, %v5966_v30  ;;  %v14950_v28 = vld [vmem:[%s15289_s23 + $0x1c0] sm:$0xff]  }
 0x128   : > { %13448 = vmatprep.mubr.msk.bf16.mxu0 %vm1086_vm3, %v5951_v42  ;;  %v5968_v42 = vrot.slane %v14944_v34, 1  ;;  %v14951_v34 = vld [vmem:[%s15289_s23 + $0x1c8] sm:$0xff]  }
 0x129   : > { %v5982_v40 = vrot.slane %v14951_v34, 1 }
 0x12a   : > { %v5969_v49 = vsel %vm2433_vm4, %v5966_v30, %v5968_v42  ;;  %v15943_v30 = vld [vmem:[%s15289_s23 + $0xb0] sm:$0xff]  }
 0x12d   : > { %12901 = vmatmul.mubr.msk.bf16.gmra.mrb[16].mxu1 %vm1086_vm3, %v15840_v50 }
 0x12e   : > { %12904 = vmatprep.mubr.msk.bf16.mxu1 %vm1086_vm3, %v15847_v55 }
 0x12f   : > { %13449 = vmatmul.mubr.msk.bf16.gmra.mrb[76].mxu0 %vm1086_vm3, %v5953_v52  ;;  %v14946_v52 = vld [vmem:[%s15289_s23 + $0x1a0] sm:$0xff]  }
 0x130   : > { %13452 = vmatprep.mubr.msk.bf16.mxu0 %vm1086_vm3, %v5955_v56  ;;  %v5971_v56 = vsel %vm2433_vm4, %v5968_v42, %v5970_v44  ;;  %v5972_v59 = vrot.slane %v14946_v52, 1  ;;  %v15952_v42 = vld [vmem:[%s15289_s23 + $0xb8] sm:$0xff]   ;;  %v15959_v52 = vld [vmem:[%s15289_s23 + $0xc0] sm:$0xff]  }
 0x132   : > { %v5973_v18 = vsel %vm2433_vm4, %v5970_v44, %v5972_v59  ;;  %v5975_v10 = vsel %vm2433_vm4, %v5972_v59, %v5974_v60 }
 0x135   : > { %12905 = vmatmul.mubr.msk.bf16.gmra.mrb[20].mxu1 %vm1086_vm3, %v15856_v61 }
 0x136   : > { %12908 = vmatprep.mubr.msk.bf16.mxu1 %vm1086_vm3, %v15863_v4 }
 0x137   : > { %13453 = vmatmul.mubr.msk.bf16.gmra.mrb[80].mxu0 %vm1086_vm3, %v5957_v2  ;;  %v15920_v2 = vld [vmem:[%s15289_s23 + $0x98] sm:$0xff]  }
 0x138   : > { %13456 = vmatprep.mubr.msk.bf16.mxu0 %vm1086_vm3, %v5959_v8  ;;  %v14948_v8 = vld [vmem:[%s15289_s23 + $0x1b0] sm:$0xff]  }
 0x13d   : > { %12909 = vmatmul.mubr.msk.bf16.gmra.mrb[24].mxu1 %vm1086_vm3, %v15872_v35 }
 0x13e   : > { %12912 = vmatprep.mubr.msk.bf16.mxu1 %vm1086_vm3, %v15879_v20 }
 0x13f   : > { %13457 = vmatmul.mubr.msk.bf16.gmra.mrb[84].mxu0 %vm1086_vm3, %v5961_v15  ;;  %v5976_v15 = vrot.slane %v14948_v8, 1  ;;  %v4622_v8 = vld [vmem:[%s15289_s23 + $0x1ec] sm:$0xf] }
 0x140   : > { %13460 = vmatprep.mubr.msk.bf16.mxu0 %vm1086_vm3, %v5963_v23  ;;  %v15936_v23 = vld [vmem:[%s15289_s23 + $0xa8] sm:$0xff]  }
 0x141   : > { %v5977_v24 = vsel %vm2433_vm4, %v5974_v60, %v5976_v15  ;;  %v5986_v60 = vrot.slane %v14953_v58, 1  ;;  %v6821_v58 = vld [vmem:[%s15289_s23 + $0x20] sm:$0xf] }
 0x145   : > { %12913 = vmatmul.mubr.msk.bf16.gmra.mrb[28].mxu1 %vm1086_vm3, %v15888_v33 }
 0x146   : > { %12916 = vmatprep.mubr.msk.bf16.mxu1 %vm1086_vm3, %v15895_v36 }
 0x147   : > { %13461 = vmatmul.mubr.msk.bf16.gmra.mrb[88].mxu0 %vm1086_vm3, %v5965_v13  ;;  %v5979_v13 = vsel %vm2433_vm4, %v5976_v15, %v5978_v19  ;;  %v14954_v15 = vld [vmem:[%s15289_s23 + $0x1e0] sm:$0xff]  }
 0x148   : > { %13464 = vmatprep.mubr.msk.bf16.mxu0 %vm1086_vm3, %v5967_v39  ;;  %v5980_v39 = vrot.slane %v14950_v28, 1 }
 0x14a   : > { %v5981_v44 = vsel %vm2433_vm4, %v5978_v19, %v5980_v39  ;;  %v15977_v19 = vld [vmem:[%s15289_s23 + $0xd0] sm:$0xff]  }
 0x14d   : > { %12917 = vmatmul.mubr.msk.bf16.gmra.mrb[32].mxu1 %vm1086_vm3, %v15904_v48 }
 0x14e   : > { %12920 = vmatprep.mubr.msk.bf16.mxu1 %vm1086_vm3, %v15911_v54 }
 0x14f   : > { %13465 = vmatmul.mubr.msk.bf16.gmra.mrb[92].mxu0 %vm1086_vm3, %v5969_v49  ;;  %v14952_v49 = vld [vmem:[%s15289_s23 + $0x1d0] sm:$0xff]  }
 0x150   : > { %13468 = vmatprep.mubr.msk.bf16.mxu0 %vm1086_vm3, %v5971_v56  ;;  %v5983_v56 = vsel %vm2433_vm4, %v5980_v39, %v5982_v40  ;;  %v5984_v59 = vrot.slane %v14952_v49, 1  ;;  %v15988_v39 = vld [vmem:[%s15289_s23 + $0xd8] sm:$0xff]  }
 0x152   : > { %v5985_v12 = vsel %vm2433_vm4, %v5982_v40, %v5984_v59 }
 0x155   : > { %12921 = vmatmul.mubr.msk.bf16.gmra.mrb[36].mxu1 %vm1086_vm3, %v15920_v2 }
 0x156   : > { %12924 = vmatprep.mubr.msk.bf16.mxu1 %vm1086_vm3, %v15927_v9 }
 0x157   : > { %13469 = vmatmul.mubr.msk.bf16.gmra.mrb[96].mxu0 %vm1086_vm3, %v5973_v18  ;;  %v3493_v18 = vld [vmem:[%s15289_s23 + $0x1e8] sm:$0xf] }
 0x158   : > { %13472 = vmatprep.mubr.msk.bf16.mxu0 %vm1086_vm3, %v5975_v10  ;;  %v15970_v10 = vld [vmem:[%s15289_s23 + $0xc8] sm:$0xff]   ;;  %v15982_v28 = vcombine.low %v3493_v18, %v4622_v8 }
 0x15a   : > { %17940 = vst [vmem:[#allocation6_spill] sm:$0xff] %v15982_v28  ;;  %v5990_v34 = vrot.slane %v15982_v28, 1  ;;  %v16075_v28 = vld [vmem:[%s15289_s23 + $0x50] sm:$0xff]  }
 0x15b   : > { %17944 = vst [vmem:[#allocation10_spill] sm:$0xff] %v16075_v28 }
 0x15d   : > { %12925 = vmatmul.mubr.msk.bf16.gmra.mrb[40].mxu1 %vm1086_vm3, %v15936_v23 }
 0x15e   : > { %12928 = vmatprep.mubr.msk.bf16.mxu1 %vm1086_vm3, %v15943_v30 }
 0x15f   : > { %13473 = vmatmul.mubr.msk.bf16.gmra.mrb[100].mxu0 %vm1086_vm3, %v5977_v24  ;;  %v5987_v24 = vsel %vm2433_vm4, %v5984_v59, %v5986_v60  ;;  %v6822_v59 = vld [vmem:[%s15289_s23 + $0x24] sm:$0xf] }
 0x160   : > { %13476 = vmatprep.mubr.msk.bf16.mxu0 %vm1086_vm3, %v5979_v13  ;;  %v5988_v13 = vrot.slane %v14954_v15, 1  ;;  %v16011_v15 = vcombine.low %v6821_v58, %v6822_v59  ;;  %v16037_v58 = vld [vmem:[%s15289_s23 + $0x100] sm:$0xff]   ;;  %v16047_v59 = vld [vmem:[%s15289_s23 + $0x38] sm:$0xff]  }
 0x162   : > { %v5989_v40 = vsel %vm2433_vm4, %v5986_v60, %v5988_v13  ;;  %v5991_v49 = vsel %vm2433_vm4, %v5988_v13, %v5990_v34 }
 0x165   : > { %12929 = vmatmul.mubr.msk.bf16.gmra.mrb[44].mxu1 %vm1086_vm3, %v15952_v42 }
 0x166   : > { %12932 = vmatprep.mubr.msk.bf16.mxu1 %vm1086_vm3, %v15959_v52 }
 0x167   : > { %13477 = vmatmul.mubr.msk.bf16.gmra.mrb[104].mxu0 %vm1086_vm3, %v5981_v44  ;;  %v15994_v44 = vld [vmem:[%s15289_s23 + $0xe0] sm:$0xff]  }
 0x168   : > { %13480 = vmatprep.mubr.msk.bf16.mxu0 %vm1086_vm3, %v5983_v56  ;;  %v14989_v56 = vld [vmem:[%s17884_s1 + $0x4] ss:$0 sps:$4 sm:$0x33]  }
 0x169   : > { %v3800_v60 = vshrl.u32 %v14989_v56, 16  ;;  %v3802_v18 = vshll.u32 %v14989_v56, 16  ;;  %v16029_v56 = vld [vmem:[%s15289_s23 + $0xf8] sm:$0xff]  }
 0x16b   : > { %v3804_v8 = vrot.slane %v3802_v18, 1  ;;  %v16055_v18 = vld [vmem:[%s15289_s23 + $0x40] sm:$0xff]  }
 0x16d   : > { %12933 = vmatmul.mubr.msk.bf16.gmra.mrb[48].mxu1 %vm1086_vm3, %v15970_v10  ;;  %v3805_v13 = vor.u32 %v3804_v8, %v3800_v60  ;;  %v16050_v60 = vld [vmem:[%s15289_s23 + $0x108] sm:$0xff]   ;;  %v16058_v8 = vld [vmem:[%s15289_s23 + $0x110] sm:$0xff]  }
 0x16e   : > { %12936 = vmatprep.mubr.msk.bf16.mxu1 %vm1086_vm3, %v15977_v19  ;;  %17941 = vst [vmem:[#allocation7_spill] sm:$0xff] %v16058_v8 }
 0x16f   : > { %13481 = vmatmul.mubr.msk.bf16.gmra.mrb[108].mxu0 %vm1086_vm3, %v5985_v12  ;;  %v16007_v12 = vld [vmem:[%s15289_s23 + $0xe8] sm:$0xff]  }
 0x170   : > { %13484 = vmatprep.mubr.msk.bf16.mxu0 %vm1086_vm3, %v5987_v24  ;;  %v16014_v24 = vld [vmem:[%s15289_s23 + $0xf0] sm:$0xff]  }
 0x175   : > { %12937 = vmatmul.mubr.msk.bf16.gmra.mrb[52].mxu1 %vm1086_vm3, %v15988_v39 }
 0x176   : > { %12940 = vmatprep.mubr.msk.bf16.mxu1 %vm1086_vm3, %v15994_v44 }
 0x177   : > { %13485 = vmatmul.mubr.msk.bf16.gmra.mrb[112].mxu0 %vm1086_vm3, %v5989_v40  ;;  %v16020_v40 = vand.u32 %v3805_v13, %v15277_v7  ;;  %v16070_v13 = vld [vmem:[%s15289_s23 + $0x118] sm:$0xff]  }
 0x178   : > { %13488 = vmatprep.mubr.msk.bf16.mxu0 %vm1086_vm3, %v5991_v49  ;;  %v16026_v49 = vld [vmem:[%s15289_s23 + $0x28] sm:$0xff]   ;;  %17943 = vst [vmem:[#allocation9_spill] sm:$0xff] %v16070_v13 }
 0x179   : > { %13126 = vmatprep.subr.bf16.mxu1 %v16020_v40 }
 0x17d   : > { %12941 = vmatmul.mubr.msk.bf16.gmra.mrb[56].mxu1 %vm1086_vm3, %v16007_v12 }
 0x17e   : > { %12944 = vmatprep.mubr.msk.bf16.mxu1 %vm1086_vm3, %v16014_v24 }
 0x17f   : > { %13489 = vmatmul.mubr.msk.bf16.gmra.mrb[116].mxu0 %vm1086_vm3, %v5990_v34  ;;  %v16034_v34 = vld [vmem:[%s15289_s23 + $0x30] sm:$0xff]  }
 0x180   : > { %13494 = vmatprep.mubr.msk.bf16.mxu0 %vm1086_vm3, %v16011_v15 }
 0x185   : > { %12945 = vmatmul.mubr.msk.bf16.gmra.mrb[60].mxu1 %vm1086_vm3, %v16029_v56 }
 0x186   : > { %12948 = vmatprep.mubr.msk.bf16.mxu1 %vm1086_vm3, %v16037_v58 }
 0x187   : > { %13495 = vmatmul.mubr.msk.bf16.vlgmr.msra.gmra.mrb[0].mxu0 %vm1086_vm3, %v16026_v49 }
 0x188   : > { %13615 = vmatpush3.bf16.msra.mxu0 %v15771_v1  ;;  %13498 = vmatprep.mubr.msk.bf16.mxu0 %vm1086_vm3, %v16034_v34  ;;  %v16067_v1 = vld [vmem:[%s15289_s23 + $0x48] sm:$0xff]  }
 0x189   : > { %17942 = vst [vmem:[#allocation8_spill] sm:$0xff] %v16067_v1 }
 0x18d   : > { %12949 = vmatmul.mubr.msk.bf16.gmra.mrb[64].mxu1 %vm1086_vm3, %v16050_v60 }
 0x18e   : > { %12952 = vmatprep.mubr.msk.bf16.mxu1 %vm1086_vm3, %v16058_v8  ;;  %v16098_v8 = vld [vmem:[%s15289_s23 + $0x130] sm:$0xff]  }
 0x18f   : > { %13499 = vmatmul.mubr.msk.bf16.gmra.mrb[4].mxu0 %vm1086_vm3, %v16047_v59  ;;  %17949 = vst [vmem:[#allocation15_spill] sm:$0xff] %v16098_v8 }
 0x190   : > { %13502 = vmatprep.mubr.msk.bf16.mxu0 %vm1086_vm3, %v16055_v18 }
 0x195   : > { %12953 = vmatmul.mubr.msk.bf16.gmra.mrb[68].mxu1 %vm1086_vm3, %v16070_v13  ;;  %v16095_v13 = vld [vmem:[%s15289_s23 + $0x60] sm:$0xff]  }
 0x196   : > { %12956 = vmatprep.mubr.msk.bf16.mxu1 %vm1086_vm3, %v16078_v43  ;;  %17948 = vst [vmem:[#allocation14_spill] sm:$0xff] %v16095_v13  ;;  %v16107_v43 = vld [vmem:[%s15289_s23 + $0x68] sm:$0xff]  }
 0x197   : > { %13503 = vmatmul.mubr.msk.bf16.gmra.mrb[8].mxu0 %vm1086_vm3, %v16067_v1  ;;  %v16118_v1 = vld [vmem:[%s15289_s23 + $0x140] sm:$0xff]  }
 0x198   : > { %13506 = vmatprep.mubr.msk.bf16.mxu0 %vm1086_vm3, %v16075_v28  ;;  %v16110_v28 = vld [vmem:[%s15289_s23 + $0x138] sm:$0xff]   ;;  %17952 = vst [vmem:[#allocation18_spill] sm:$0xff] %v16118_v1 }
 0x199   : > { %17950 = vst [vmem:[#allocation16_spill] sm:$0xff] %v16110_v28 }
 0x19d   : > { %12957 = vmatmul.mubr.msk.bf16.gmra.mrb[72].mxu1 %vm1086_vm3, %v16090_v62  ;;  %v16115_v62 = vld [vmem:[%s15289_s23 + $0x70] sm:$0xff]  }
 0x19e   : > { %12960 = vmatprep.mubr.msk.bf16.mxu1 %vm1086_vm3, %v16098_v8  ;;  %17951 = vst [vmem:[#allocation17_spill] sm:$0xff] %v16115_v62  ;;  %v16127_v8 = vld [vmem:[%s15289_s23 + $0x78] sm:$0xff]  }
 0x19f   : > { %13507 = vmatmul.mubr.msk.bf16.gmra.mrb[12].mxu0 %vm1086_vm3, %v16087_v29  ;;  %v16138_v29 = vld [vmem:[%s15289_s23 + $0x150] sm:$0xff]  }
 0x1a0   : > { %13510 = vmatprep.mubr.msk.bf16.mxu0 %vm1086_vm3, %v16095_v13  ;;  %v16130_v13 = vld [vmem:[%s15289_s23 + $0x148] sm:$0xff]   ;;  %17955 = vst [vmem:[#allocation21_spill] sm:$0xff] %v16138_v29 }
 0x1a1   : > { %17953 = vst [vmem:[#allocation19_spill] sm:$0xff] %v16130_v13 }
 0x1a5   : > { %12961 = vmatmul.mubr.msk.bf16.gmra.mrb[76].mxu1 %vm1086_vm3, %v16110_v28  ;;  %v16135_v28 = vld [vmem:[%s15289_s23 + $0x80] sm:$0xff]  }
 0x1a6   : > { %12964 = vmatprep.mubr.msk.bf16.mxu1 %vm1086_vm3, %v16118_v1  ;;  %17954 = vst [vmem:[#allocation20_spill] sm:$0xff] %v16135_v28  ;;  %v16147_v1 = vld [vmem:[%s15289_s23 + $0x88] sm:$0xff]  }
 0x1a7   : > { %13511 = vmatmul.mubr.msk.bf16.gmra.mrb[16].mxu0 %vm1086_vm3, %v16107_v43 }
 0x1a8   : > { %13514 = vmatprep.mubr.msk.bf16.mxu0 %vm1086_vm3, %v16115_v62  ;;  %v16150_v62 = vld [vmem:[%s15289_s23 + $0x158] sm:$0xff]  }
 0x1ad   : > { %12965 = vmatmul.mubr.msk.bf16.gmra.mrb[80].mxu1 %vm1086_vm3, %v16130_v13  ;;  %v16155_v13 = vld [vmem:[%s15289_s23 + $0x90] sm:$0xff]  }
 0x1ae   : > { %12968 = vmatprep.mubr.msk.bf16.mxu1 %vm1086_vm3, %v16138_v29  ;;  %17956 = vst [vmem:[#allocation22_spill] sm:$0xff] %v16155_v13  ;;  %v16164_v29 = vld [vmem:[%s15289_s23 + $0x98] sm:$0xff]  }
 0x1af   : > { %13515 = vmatmul.mubr.msk.bf16.gmra.mrb[20].mxu0 %vm1086_vm3, %v16127_v8 }
 0x1b0   : > { %13518 = vmatprep.mubr.msk.bf16.mxu0 %vm1086_vm3, %v16135_v28  ;;  %v16169_v28 = vld [vmem:[%s15289_s23 + $0xa0] sm:$0xff]  }
 0x1b5   : > { %12969 = vmatmul.mubr.msk.bf16.gmra.mrb[84].mxu1 %vm1086_vm3, %v16150_v62 }
 0x1b6   : > { %12972 = vmatprep.mubr.msk.bf16.mxu1 %vm1086_vm3, %v15576_v25  ;;  %v16178_v25 = vld [vmem:[%s15289_s23 + $0xa8] sm:$0xff]  }
 0x1b7   : > { %13519 = vmatmul.mubr.msk.bf16.gmra.mrb[24].mxu0 %vm1086_vm3, %v16147_v1 }
 0x1b8   : > { %13522 = vmatprep.mubr.msk.bf16.mxu0 %vm1086_vm3, %v16155_v13  ;;  %v16183_v13 = vld [vmem:[%s15289_s23 + $0xb0] sm:$0xff]  }
 0x1bd   : > { %12973 = vmatmul.mubr.msk.bf16.gmra.mrb[88].mxu1 %vm1086_vm3, %v15579_v26  ;;  %v16192_v26 = vld [vmem:[%s15289_s23 + $0xb8] sm:$0xff]  }
 0x1be   : > { %12976 = vmatprep.mubr.msk.bf16.mxu1 %vm1086_vm3, %v15594_v45  ;;  %v16197_v45 = vld [vmem:[%s15289_s23 + $0xc0] sm:$0xff]  }
 0x1bf   : > { %13523 = vmatmul.mubr.msk.bf16.gmra.mrb[28].mxu0 %vm1086_vm3, %v16164_v29 }
 0x1c0   : > { %13526 = vmatprep.mubr.msk.bf16.mxu0 %vm1086_vm3, %v16169_v28 }
 0x1c5   : > { %12977 = vmatmul.mubr.msk.bf16.gmra.mrb[92].mxu1 %vm1086_vm3, %v15597_v46  ;;  %v16206_v46 = vld [vmem:[%s15289_s23 + $0xc8] sm:$0xff]  }
 0x1c6   : > { %12980 = vmatprep.mubr.msk.bf16.mxu1 %vm1086_vm3, %v15614_v63  ;;  %v16211_v63 = vld [vmem:[%s15289_s23 + $0xd0] sm:$0xff]  }
 0x1c7   : > { %13527 = vmatmul.mubr.msk.bf16.gmra.mrb[32].mxu0 %vm1086_vm3, %v16178_v25  ;;  %17957 = vst [vmem:[#allocation23_spill] sm:$0xff] %v16211_v63 }
 0x1c8   : > { %13530 = vmatprep.mubr.msk.bf16.mxu0 %vm1086_vm3, %v16183_v13 }
 0x1cd   : > { %12981 = vmatmul.mubr.msk.bf16.gmra.mrb[96].mxu1 %vm1086_vm3, %v15617_v0  ;;  %v16220_v0 = vld [vmem:[%s15289_s23 + $0xd8] sm:$0xff]  }
 0x1ce   : > { %12984 = vmatprep.mubr.msk.bf16.mxu1 %vm1086_vm3, %v15634_v21  ;;  %17958 = vst [vmem:[#allocation24_spill] sm:$0xff] %v16220_v0  ;;  %v16225_v21 = vld [vmem:[%s15289_s23 + $0xe0] sm:$0xff]  }
 0x1cf   : > { %13531 = vmatmul.mubr.msk.bf16.gmra.mrb[36].mxu0 %vm1086_vm3, %v16192_v26  ;;  %17959 = vst [vmem:[#allocation25_spill] sm:$0xff] %v16225_v21 }
 0x1d0   : > { %13534 = vmatprep.mubr.msk.bf16.mxu0 %vm1086_vm3, %v16197_v45 }
 0x1d5   : > { %12985 = vmatmul.mubr.msk.bf16.gmra.mrb[100].mxu1 %vm1086_vm3, %v15637_v22  ;;  %v16234_v22 = vld [vmem:[%s15289_s23 + $0xe8] sm:$0xff]  }
 0x1d6   : > { %12988 = vmatprep.mubr.msk.bf16.mxu1 %vm1086_vm3, %v15656_v47  ;;  %17960 = vst [vmem:[#allocation26_spill] sm:$0xff] %v16234_v22  ;;  %v16239_v47 = vld [vmem:[%s15289_s23 + $0xf0] sm:$0xff]  }
 0x1d7   : > { %13535 = vmatmul.mubr.msk.bf16.gmra.mrb[40].mxu0 %vm1086_vm3, %v16206_v46 }
 0x1d8   : > { %13538 = vmatprep.mubr.msk.bf16.mxu0 %vm1086_vm3, %v16211_v63  ;;  %v2435_v63 = vrot.slane %v15775_v3, 1  ;;  %v16274_v3 = vld [vmem:[%s15289_s23 + $0x108] sm:$0xff]  }
 0x1dd   : > { %12989 = vmatmul.mubr.msk.bf16.gmra.mrb[104].mxu1 %vm1086_vm3, %v15661_v51  ;;  %v2427_v51 = vld [vmem:[%s15289_s23] sm:$0xe] }
 0x1de   : > { %12992 = vmatprep.mubr.msk.bf16.mxu1 %vm1086_vm3, %v15678_v5  ;;  %v15097_v5 = vld [vmem:[%s15289_s23 + $0x4] sm:$0xf] }
 0x1df   : > { %13539 = vmatmul.mubr.msk.bf16.gmra.mrb[44].mxu0 %vm1086_vm3, %v16220_v0  ;;  %v16250_v0 = vld [vmem:[%s15289_s23 + $0xf8] sm:$0xff]  }
 0x1e0   : > { %13542 = vmatprep.mubr.msk.bf16.mxu0 %vm1086_vm3, %v16225_v21  ;;  %v11596_v21 = vcombine.low %v2427_v51, %v15097_v5  ;;  %v16279_v5 = vld [vmem:[%s15289_s23 + $0x110] sm:$0xff]  }
 0x1e5   : > { %12993 = vmatmul.mubr.msk.bf16.gmra.mrb[108].mxu1 %vm1086_vm3, %v15683_v11  ;;  %v16255_v11 = vld [vmem:[%s15289_s23 + $0x100] sm:$0xff]  }
 0x1e6   : > { %12996 = vmatprep.mubr.msk.bf16.mxu1 %vm1086_vm3, %v15698_v32  ;;  %v291_v32 = vld [vmem:[%s15289_s23 + $0x1dc] sm:$0x7] }
 0x1e7   : > { %13543 = vmatmul.mubr.msk.bf16.gmra.mrb[48].mxu0 %vm1086_vm3, %v16234_v22  ;;  %v2434_v22 = vrot.slane %v11596_v21, 1  ;;  %v11535_v51 = vcombine.low %v15716_v53, %v291_v32  ;;  %v2437_v53 = vrot.slane %v15783_v6, 1  ;;  %v2439_v32 = vrot.slane %v15792_v14, 1 }
 0x1e8   : > { %13546 = vmatprep.mubr.msk.bf16.mxu0 %vm1086_vm3, %v16239_v47  ;;  %v2441_v6 = vrot.slane %v15799_v16, 1  ;;  %v2443_v14 = vrot.slane %v15808_v27, 1  ;;  %v16313_v16 = vld [vmem:[%s15289_s23 + $0x130] sm:$0xff]   ;;  %v2445_v27 = vrot.slane %v15815_v31, 1  ;;  %v2449_v31 = vrot.slane %v15831_v41, 1 }
 0x1e9   : > { %v2436_v21 = vsel %vm2433_vm4, %v2434_v22, %v2435_v63  ;;  %v2440_v22 = vsel %vm2433_vm4, %v2437_v53, %v2439_v32  ;;  %v2453_v41 = vrot.slane %v15847_v55, 1  ;;  %v2457_v55 = vrot.slane %v15863_v4, 1 }
 0x1ea   : > { %v2461_v4 = vrot.slane %v15879_v20, 1  ;;  %v2465_v20 = vrot.slane %v15895_v36, 1  ;;  %v2469_v36 = vrot.slane %v15911_v54, 1  ;;  %v2473_v54 = vrot.slane %v15927_v9, 1 }
 0x1eb   : > { %v2477_v9 = vrot.slane %v15943_v30, 1  ;;  %v2481_v30 = vrot.slane %v15959_v52, 1  ;;  %v2485_v52 = vrot.slane %v15977_v19, 1  ;;  %v2489_v19 = vrot.slane %v15994_v44, 1  ;;  %v16506_v44 = vld [vmem:[%s15289_s23 + $0x1f0] sm:$0xff]  }
 0x1ec   : > { %17965 = vst [vmem:[#allocation31_spill] sm:$0xff] %v16506_v44 }
 0x1ed   : > { %12997 = vmatmul.mubr.msk.bf16.gmra.mrb[112].mxu1 %vm1086_vm3, %v15703_v37  ;;  %v9315_v37 = vld [vmem:[%s17884_s1 + $0xc] sm:$0x3] }
 0x1ee   : > { %13000 = vmatprep.mubr.msk.bf16.mxu1 %vm1086_vm3, %v15722_v57  ;;  %v16270_v57 = vand.u32 %v9315_v37, %v15277_v7  ;;  %v2438_v7 = vsel %vm2433_vm4, %v2435_v63, %v2437_v53  ;;  %v16295_v37 = vld [vmem:[%s15289_s23 + $0x120] sm:$0xff]   ;;  %v2442_v63 = vsel %vm2433_vm4, %v2439_v32, %v2441_v6  ;;  %v2447_v53 = vrot.slane %v15824_v38, 1 }
 0x1ef   : > { %13547 = vmatmul.mubr.msk.bf16.gmra.mrb[52].mxu0 %vm1086_vm3, %v16250_v0  ;;  %v2446_v32 = vsel %vm2433_vm4, %v2443_v14, %v2445_v27  ;;  %v2451_v38 = vrot.slane %v15840_v50, 1  ;;  %v2455_v50 = vrot.slane %v15856_v61, 1  ;;  %v2459_v61 = vrot.slane %v15872_v35, 1 }
 0x1f0   : > { %13550 = vmatprep.mubr.msk.bf16.mxu0 %vm1086_vm3, %v16255_v11  ;;  %13736 = vmatprep.subr.bf16.mxu0 %v16270_v57  ;;  %v2463_v35 = vrot.slane %v15888_v33, 1  ;;  %v2467_v33 = vrot.slane %v15904_v48, 1  ;;  %v2471_v48 = vrot.slane %v15920_v2, 1  ;;  %v2475_v2 = vrot.slane %v15936_v23, 1 }
 0x1f1   : > { %v2479_v23 = vrot.slane %v15952_v42, 1  ;;  %v2483_v42 = vrot.slane %v15970_v10, 1  ;;  %v2487_v10 = vrot.slane %v15988_v39, 1  ;;  %v2491_v39 = vrot.slane %v16007_v12, 1 }
 0x1f2   : > { %v2493_v12 = vrot.slane %v16014_v24, 1 }
 0x1f5   : > { %13001 = vmatmul.mubr.msk.bf16.gmra.mrb[116].mxu1 %vm1086_vm3, %v11535_v51  ;;  %v16291_v51 = vld [vmem:[%s15289_s23 + $0x118] sm:$0xff]  }
 0x1f6   : > { %13006 = vmatprep.mubr.msk.bf16.mxu1 %vm1086_vm3, %v2436_v21  ;;  %v16309_v21 = vld [vmem:[%s15289_s23 + $0x128] sm:$0xff]  }
 0x1f7   : > { %13551 = vmatmul.mubr.msk.bf16.gmra.mrb[56].mxu0 %vm1086_vm3, %v16274_v3 }
 0x1f8   : > { %13554 = vmatprep.mubr.msk.bf16.mxu0 %vm1086_vm3, %v16279_v5 }
 0x1fd   : > { %13007 = vmatmul.mubr.msk.bf16.vlgmr.msra.gmra.mrb[0].mxu1 %vm1086_vm3, %v2438_v7  ;;  %v2448_v7 = vsel %vm2433_vm4, %v2445_v27, %v2447_v53  ;;  %v16345_v27 = vld [vmem:[%s15289_s23 + $0x150] sm:$0xff]  }
 0x1fe   : > { %13127 = vmatpush3.bf16.msra.mxu1 %v16020_v40  ;;  %13010 = vmatprep.mubr.msk.bf16.mxu1 %vm1086_vm3, %v2440_v22  ;;  %v2444_v40 = vsel %vm2433_vm4, %v2441_v6, %v2443_v14  ;;  %v16325_v22 = vld [vmem:[%s15289_s23 + $0x138] sm:$0xff]   ;;  %v16329_v6 = vld [vmem:[%s15289_s23 + $0x140] sm:$0xff]   ;;  %v2450_v14 = vsel %vm2433_vm4, %v2447_v53, %v2449_v31  ;;  %v2454_v53 = vsel %vm2433_vm4, %v2451_v38, %v2453_v41 }
 0x1ff   : > { %13858 = vmatprep.subr.bf16.mxu1 %v15299_v17  ;;  %13555 = vmatmul.mubr.msk.bf16.gmra.mrb[60].mxu0 %vm1086_vm3, %v16291_v51 }
 0x200   : > { %13558 = vmatprep.mubr.msk.bf16.mxu0 %vm1086_vm3, %v16295_v37 }
 0x205   : > { %13011 = vmatmul.mubr.msk.bf16.gmra.mrb[4].mxu1 %vm1086_vm3, %v2442_v63  ;;  %v2452_v63 = vsel %vm2433_vm4, %v2449_v31, %v2451_v38  ;;  %v16361_v31 = vld [vmem:[%s15289_s23 + $0x160] sm:$0xff]   ;;  %v2458_v38 = vsel %vm2433_vm4, %v2455_v50, %v2457_v55 }
 0x206   : > { %13014 = vmatprep.mubr.msk.bf16.mxu1 %vm1086_vm3, %v2444_v40  ;;  %v16341_v40 = vld [vmem:[%s15289_s23 + $0x148] sm:$0xff]  }
 0x207   : > { %13559 = vmatmul.mubr.msk.bf16.gmra.mrb[64].mxu0 %vm1086_vm3, %v16309_v21 }
 0x208   : > { %13562 = vmatprep.mubr.msk.bf16.mxu0 %vm1086_vm3, %v16313_v16 }
 0x20d   : > { %13015 = vmatmul.mubr.msk.bf16.gmra.mrb[8].mxu1 %vm1086_vm3, %v2446_v32  ;;  %v2456_v32 = vsel %vm2433_vm4, %v2453_v41, %v2455_v50  ;;  %v16377_v41 = vld [vmem:[%s15289_s23 + $0x170] sm:$0xff]   ;;  %v2462_v50 = vsel %vm2433_vm4, %v2459_v61, %v2461_v4 }
 0x20e   : > { %13018 = vmatprep.mubr.msk.bf16.mxu1 %vm1086_vm3, %v2448_v7  ;;  %v16357_v7 = vld [vmem:[%s15289_s23 + $0x158] sm:$0xff]  }
 0x20f   : > { %13563 = vmatmul.mubr.msk.bf16.gmra.mrb[68].mxu0 %vm1086_vm3, %v16325_v22 }
 0x210   : > { %13566 = vmatprep.mubr.msk.bf16.mxu0 %vm1086_vm3, %v16329_v6 }
 0x215   : > { %13019 = vmatmul.mubr.msk.bf16.gmra.mrb[12].mxu1 %vm1086_vm3, %v2450_v14  ;;  %v2460_v14 = vsel %vm2433_vm4, %v2457_v55, %v2459_v61  ;;  %v16393_v55 = vld [vmem:[%s15289_s23 + $0x180] sm:$0xff]   ;;  %v2466_v61 = vsel %vm2433_vm4, %v2463_v35, %v2465_v20 }
 0x216   : > { %13022 = vmatprep.mubr.msk.bf16.mxu1 %vm1086_vm3, %v2452_v63  ;;  %v16373_v63 = vld [vmem:[%s15289_s23 + $0x168] sm:$0xff]  }
 0x217   : > { %13567 = vmatmul.mubr.msk.bf16.gmra.mrb[72].mxu0 %vm1086_vm3, %v16341_v40 }
 0x218   : > { %13570 = vmatprep.mubr.msk.bf16.mxu0 %vm1086_vm3, %v16345_v27 }
 0x21d   : > { %13023 = vmatmul.mubr.msk.bf16.gmra.mrb[16].mxu1 %vm1086_vm3, %v2454_v53  ;;  %v2464_v53 = vsel %vm2433_vm4, %v2461_v4, %v2463_v35  ;;  %v16409_v4 = vld [vmem:[%s15289_s23 + $0x190] sm:$0xff]   ;;  %v2470_v35 = vsel %vm2433_vm4, %v2467_v33, %v2469_v36 }
 0x21e   : > { %13026 = vmatprep.mubr.msk.bf16.mxu1 %vm1086_vm3, %v2456_v32  ;;  %v16389_v32 = vld [vmem:[%s15289_s23 + $0x178] sm:$0xff]  }
 0x21f   : > { %13571 = vmatmul.mubr.msk.bf16.gmra.mrb[76].mxu0 %vm1086_vm3, %v16357_v7 }
 0x220   : > { %13574 = vmatprep.mubr.msk.bf16.mxu0 %vm1086_vm3, %v16361_v31 }
 0x225   : > { %13027 = vmatmul.mubr.msk.bf16.gmra.mrb[20].mxu1 %vm1086_vm3, %v2458_v38  ;;  %v2468_v38 = vsel %vm2433_vm4, %v2465_v20, %v2467_v33  ;;  %v16425_v20 = vld [vmem:[%s15289_s23 + $0x1a0] sm:$0xff]   ;;  %v2474_v33 = vsel %vm2433_vm4, %v2471_v48, %v2473_v54 }
 0x226   : > { %13030 = vmatprep.mubr.msk.bf16.mxu1 %vm1086_vm3, %v2460_v14  ;;  %v16405_v14 = vld [vmem:[%s15289_s23 + $0x188] sm:$0xff]  }
 0x227   : > { %13575 = vmatmul.mubr.msk.bf16.gmra.mrb[80].mxu0 %vm1086_vm3, %v16373_v63 }
 0x228   : > { %13578 = vmatprep.mubr.msk.bf16.mxu0 %vm1086_vm3, %v16377_v41 }
 0x22d   : > { %13031 = vmatmul.mubr.msk.bf16.gmra.mrb[24].mxu1 %vm1086_vm3, %v2462_v50  ;;  %v2472_v50 = vsel %vm2433_vm4, %v2469_v36, %v2471_v48  ;;  %v16441_v36 = vld [vmem:[%s15289_s23 + $0x1b0] sm:$0xff]   ;;  %v2478_v48 = vsel %vm2433_vm4, %v2475_v2, %v2477_v9 }
 0x22e   : > { %13034 = vmatprep.mubr.msk.bf16.mxu1 %vm1086_vm3, %v2464_v53  ;;  %v16421_v53 = vld [vmem:[%s15289_s23 + $0x198] sm:$0xff]  }
 0x22f   : > { %13579 = vmatmul.mubr.msk.bf16.gmra.mrb[84].mxu0 %vm1086_vm3, %v16389_v32 }
 0x230   : > { %13582 = vmatprep.mubr.msk.bf16.mxu0 %vm1086_vm3, %v16393_v55 }
 0x235   : > { %13035 = vmatmul.mubr.msk.bf16.gmra.mrb[28].mxu1 %vm1086_vm3, %v2466_v61  ;;  %v2476_v61 = vsel %vm2433_vm4, %v2473_v54, %v2475_v2  ;;  %v16457_v54 = vld [vmem:[%s15289_s23 + $0x1c0] sm:$0xff]   ;;  %v2482_v2 = vsel %vm2433_vm4, %v2479_v23, %v2481_v30 }
 0x236   : > { %13038 = vmatprep.mubr.msk.bf16.mxu1 %vm1086_vm3, %v2468_v38  ;;  %v16437_v38 = vld [vmem:[%s15289_s23 + $0x1a8] sm:$0xff]  }
 0x237   : > { %13583 = vmatmul.mubr.msk.bf16.gmra.mrb[88].mxu0 %vm1086_vm3, %v16405_v14 }
 0x238   : > { %13586 = vmatprep.mubr.msk.bf16.mxu0 %vm1086_vm3, %v16409_v4 }
 0x23d   : > { %13039 = vmatmul.mubr.msk.bf16.gmra.mrb[32].mxu1 %vm1086_vm3, %v2470_v35  ;;  %v2480_v35 = vsel %vm2433_vm4, %v2477_v9, %v2479_v23  ;;  %v16473_v9 = vld [vmem:[%s15289_s23 + $0x1d0] sm:$0xff]   ;;  %v2486_v23 = vsel %vm2433_vm4, %v2483_v42, %v2485_v52 }
 0x23e   : > { %13042 = vmatprep.mubr.msk.bf16.mxu1 %vm1086_vm3, %v2472_v50  ;;  %v16453_v50 = vld [vmem:[%s15289_s23 + $0x1b8] sm:$0xff]   ;;  %17961 = vst [vmem:[#allocation27_spill] sm:$0xff] %v16473_v9 }
 0x23f   : > { %13587 = vmatmul.mubr.msk.bf16.gmra.mrb[92].mxu0 %vm1086_vm3, %v16421_v53 }
 0x240   : > { %13590 = vmatprep.mubr.msk.bf16.mxu0 %vm1086_vm3, %v16425_v20 }
 0x245   : > { %13043 = vmatmul.mubr.msk.bf16.gmra.mrb[36].mxu1 %vm1086_vm3, %v2474_v33  ;;  %v2484_v33 = vsel %vm2433_vm4, %v2481_v30, %v2483_v42  ;;  %v16489_v30 = vld [vmem:[%s15289_s23 + $0x1e0] sm:$0xff]   ;;  %v2490_v42 = vsel %vm2433_vm4, %v2487_v10, %v2489_v19 }
 0x246   : > { %13046 = vmatprep.mubr.msk.bf16.mxu1 %vm1086_vm3, %v2476_v61  ;;  %v16469_v61 = vld [vmem:[%s15289_s23 + $0x1c8] sm:$0xff]   ;;  %17963 = vst [vmem:[#allocation29_spill] sm:$0xff] %v16489_v30 }
 0x247   : > { %13591 = vmatmul.mubr.msk.bf16.gmra.mrb[96].mxu0 %vm1086_vm3, %v16437_v38 }
 0x248   : > { %13594 = vmatprep.mubr.msk.bf16.mxu0 %vm1086_vm3, %v16441_v36 }
 0x24d   : > { %13047 = vmatmul.mubr.msk.bf16.gmra.mrb[40].mxu1 %vm1086_vm3, %v2478_v48  ;;  %v2488_v48 = vsel %vm2433_vm4, %v2485_v52, %v2487_v10  ;;  %v16502_v52 = vld [vmem:[%s15289_s23 + $0x1e8] sm:$0xff]   ;;  %v2495_v10 = vrot.slane %v16029_v56, 1  ;;  %v8077_v56 = vshrl.u32 %v16026_v49, 16 }
 0x24e   : > { %13050 = vmatprep.mubr.msk.bf16.mxu1 %vm1086_vm3, %v2480_v35  ;;  %v16485_v35 = vld [vmem:[%s15289_s23 + $0x1d8] sm:$0xff]   ;;  %17964 = vst [vmem:[#allocation30_spill] sm:$0xff] %v16502_v52 }
 0x24f   : > { %13595 = vmatmul.mubr.msk.bf16.gmra.mrb[100].mxu0 %vm1086_vm3, %v16453_v50  ;;  %17962 = vst [vmem:[#allocation28_spill] sm:$0xff] %v16485_v35 }
 0x250   : > { %13598 = vmatprep.mubr.msk.bf16.mxu0 %vm1086_vm3, %v16457_v54 }
 0x255   : > { %13051 = vmatmul.mubr.msk.bf16.gmra.mrb[44].mxu1 %vm1086_vm3, %v2482_v2  ;;  %v8069_v2 = vshll.u32 %v16011_v15, 16 }
 0x256   : > { %13054 = vmatprep.mubr.msk.bf16.mxu1 %vm1086_vm3, %v2484_v33  ;;  %v2492_v33 = vsel %vm2433_vm4, %v2489_v19, %v2491_v39  ;;  %v16518_v19 = vld [vmem:[%s15289_s23 + $0x1f8] sm:$0xf] }
 0x257   : > { %13599 = vmatmul.mubr.msk.bf16.gmra.mrb[104].mxu0 %vm1086_vm3, %v16469_v61 }
 0x258   : > { %13602 = vmatprep.mubr.msk.bf16.mxu0 %vm1086_vm3, %v16473_v9  ;;  %v8080_v9 = vshll.u32 %v16034_v34, 16 }
 0x25d   : > { %13055 = vmatmul.mubr.msk.bf16.gmra.mrb[48].mxu1 %vm1086_vm3, %v2486_v23  ;;  %v8067_v23 = vshrl.u32 %v16011_v15, 16  ;;  %v2496_v15 = vsel %vm2433_vm4, %v2493_v12, %v2495_v10 }
 0x25e   : > { %13058 = vmatprep.mubr.msk.bf16.mxu1 %vm1086_vm3, %v2488_v48  ;;  %v8071_v48 = vrot.slane %v8069_v2, 1 }
 0x25f   : > { %13603 = vmatmul.mubr.msk.bf16.gmra.mrb[108].mxu0 %vm1086_vm3, %v16485_v35 }
 0x260   : > { %13606 = vmatprep.mubr.msk.bf16.mxu0 %vm1086_vm3, %v16489_v30  ;;  %v8073_v30 = vshll.u32 %v16026_v49, 16  ;;  %v8072_v35 = vor.u32 %v8071_v48, %v8067_v23  ;;  %v8082_v23 = vrot.slane %v8080_v9, 1 }
 0x262   : > { %v8075_v24 = vrot.slane %v8073_v30, 1  ;;  %v8087_v30 = vshll.u32 %v16047_v59, 16 }
 0x264   : > { %v8079_v48 = vor.u32 %v8077_v56, %v8075_v24  ;;  %v17968_v56 = vld [vmem:[#allocation9_spill] sm:$0xff] }
 0x265   : > { %13059 = vmatmul.mubr.msk.bf16.gmra.mrb[52].mxu1 %vm1086_vm3, %v2490_v42  ;;  %v6940_v42 = vld [vmem:[%s15289_s23 + $0x1fc] sm:$0x7] }
 0x266   : > { %13062 = vmatprep.mubr.msk.bf16.mxu1 %vm1086_vm3, %v2492_v33  ;;  %v2494_v33 = vsel %vm2433_vm4, %v2491_v39, %v2493_v12  ;;  %v11962_v2 = vcombine.low %v16518_v19, %v6940_v42  ;;  %v8084_v39 = vshrl.u32 %v16034_v34, 16  ;;  %v2499_v12 = vrot.slane %v16050_v60, 1 }
 0x267   : > { %13607 = vmatmul.mubr.msk.bf16.gmra.mrb[112].mxu0 %vm1086_vm3, %v16502_v52  ;;  %v2497_v52 = vrot.slane %v16037_v58, 1  ;;  %v8094_v58 = vshll.u32 %v16055_v18, 16  ;;  %v8083_v34 = vsel %vm595_vm2, %v8079_v48, %v8082_v23  ;;  %v8091_v60 = vshrl.u32 %v16047_v59, 16 }
 0x268   : > { %13610 = vmatprep.mubr.msk.bf16.mxu0 %vm1086_vm3, %v16506_v44  ;;  %v8076_v44 = vsel %vm595_vm2, %v8072_v35, %v8075_v24  ;;  %v8086_v42 = vor.u32 %v8084_v39, %v8082_v23  ;;  %v17966_v24 = vld [vmem:[#allocation7_spill] sm:$0xff] }
 0x269   : > { %v2498_v49 = vsel %vm2433_vm4, %v2495_v10, %v2497_v52  ;;  %v2500_v35 = vsel %vm2433_vm4, %v2497_v52, %v2499_v12  ;;  %v8098_v10 = vshrl.u32 %v16055_v18, 16  ;;  %v2503_v52 = vrot.slane %v17968_v56, 1 }
 0x26a   : > { %v8096_v39 = vrot.slane %v8094_v58, 1  ;;  %v17970_v58 = vld [vmem:[#allocation11_spill] sm:$0xff] }
 0x26c   : > { %v8100_v23 = vor.u32 %v8098_v10, %v8096_v39 }
 0x26d   : > { %13063 = vmatmul.mubr.msk.bf16.gmra.mrb[56].mxu1 %vm1086_vm3, %v2494_v33  ;;  %v8089_v33 = vrot.slane %v8087_v30, 1 }
 0x26e   : > { %13066 = vmatprep.mubr.msk.bf16.mxu1 %vm1086_vm3, %v2496_v15  ;;  %v17967_v15 = vld [vmem:[#allocation8_spill] sm:$0xff] }
 0x26f   : > { %13611 = vmatmul.mubr.msk.bf16.gmra.mrb[116].mxu0 %vm1086_vm3, %v11962_v2  ;;  %v8090_v9 = vsel %vm595_vm2, %v8086_v42, %v8089_v33  ;;  %v8101_v2 = vshll.u32 %v17967_v15, 16  ;;  %v8093_v59 = vor.u32 %v8091_v60, %v8089_v33  ;;  %v17969_v42 = vld [vmem:[#allocation10_spill] sm:$0xff]  ;;  %v2505_v33 = vrot.slane %v17970_v58, 1  ;;  %v17971_v60 = vld [vmem:[#allocation12_spill] sm:$0xff] }
 0x270   : > { %13616 = vmatprep.mubr.msk.bf16.mxu0 %vm1086_vm3, %v8076_v44  ;;  %v2501_v44 = vrot.slane %v17966_v24, 1  ;;  %v8108_v18 = vshll.u32 %v17969_v42, 16  ;;  %v17972_v24 = vld [vmem:[#allocation13_spill] sm:$0xff] }
 0x271   : > { %v8103_v48 = vrot.slane %v8101_v2, 1 }
 0x272   : > { %v2502_v30 = vsel %vm2433_vm4, %v2499_v12, %v2501_v44  ;;  %v8112_v12 = vshrl.u32 %v17969_v42, 16  ;;  %v8110_v10 = vrot.slane %v8108_v18, 1  ;;  %v8119_v42 = vshrl.u32 %v17971_v60, 16 }
 0x274   : > { %v8114_v56 = vor.u32 %v8112_v12, %v8110_v10 }
 0x275   : > { %13067 = vmatmul.mubr.msk.bf16.gmra.mrb[60].mxu1 %vm1086_vm3, %v2498_v49  ;;  %v2504_v49 = vsel %vm2433_vm4, %v2501_v44, %v2503_v52  ;;  %v2507_v44 = vrot.slane %v17972_v24, 1 }
 0x276   : > { %13070 = vmatprep.mubr.msk.bf16.mxu1 %vm1086_vm3, %v2500_v35  ;;  %v8097_v35 = vsel %vm595_vm2, %v8093_v59, %v8096_v39 }
 0x277   : > { %13617 = vmatmul.mubr.msk.bf16.vlgmr.msra.gmra.mrb[0].mxu0 %vm1086_vm3, %v8083_v34  ;;  %v8105_v34 = vshrl.u32 %v17967_v15, 16  ;;  %v2506_v15 = vsel %vm2433_vm4, %v2503_v52, %v2505_v33  ;;  %v2508_v59 = vsel %vm2433_vm4, %v2505_v33, %v2507_v44 }
 0x278   : > { %13737 = vmatpush3.bf16.msra.mxu0 %v16270_v57  ;;  %13620 = vmatprep.mubr.msk.bf16.mxu0 %vm1086_vm3, %v8090_v9  ;;  %v8104_v57 = vsel %vm595_vm2, %v8100_v23, %v8103_v48  ;;  %v8115_v9 = vshll.u32 %v17971_v60, 16 }
 0x279   : > { %v8107_v2 = vor.u32 %v8105_v34, %v8103_v48  ;;  %v8129_v34 = vshll.u32 %v16107_v43, 16 }
 0x27a   : > { %v8117_v39 = vrot.slane %v8115_v9, 1 }
 0x27b   : > { %v8131_v24 = vrot.slane %v8129_v34, 1 }
 0x27c   : > { %v8118_v18 = vsel %vm595_vm2, %v8114_v56, %v8117_v39  ;;  %v8121_v12 = vor.u32 %v8119_v42, %v8117_v39  ;;  %v17978_v42 = vld [vmem:[#allocation19_spill] sm:$0xff] }
 0x27d   : > { %13071 = vmatmul.mubr.msk.bf16.gmra.mrb[64].mxu1 %vm1086_vm3, %v2502_v30  ;;  %v17973_v30 = vld [vmem:[#allocation14_spill] sm:$0xff] }
 0x27e   : > { %13074 = vmatprep.mubr.msk.bf16.mxu1 %vm1086_vm3, %v2504_v49  ;;  %v8122_v23 = vshll.u32 %v17973_v30, 16  ;;  %v8111_v49 = vsel %vm595_vm2, %v8107_v2, %v8110_v10  ;;  %v8126_v52 = vshrl.u32 %v17973_v30, 16  ;;  %v17976_v2 = vld [vmem:[#allocation17_spill] sm:$0xff] }
 0x27f   : > { %13621 = vmatmul.mubr.msk.bf16.gmra.mrb[4].mxu0 %vm1086_vm3, %v8097_v35  ;;  %v17974_v35 = vld [vmem:[#allocation15_spill] sm:$0xff] }
 0x280   : > { %13624 = vmatprep.mubr.msk.bf16.mxu0 %vm1086_vm3, %v8104_v57  ;;  %v2509_v48 = vrot.slane %v17974_v35, 1  ;;  %v17975_v57 = vld [vmem:[#allocation16_spill] sm:$0xff]  ;;  %v8124_v33 = vrot.slane %v8122_v23, 1  ;;  %v17977_v23 = vld [vmem:[#allocation18_spill] sm:$0xff] }
 0x281   : > { %v2511_v58 = vrot.slane %v17975_v57, 1  ;;  %v2513_v39 = vrot.slane %v17977_v23, 1 }
 0x282   : > { %v2510_v60 = vsel %vm2433_vm4, %v2507_v44, %v2509_v48  ;;  %v8128_v9 = vor.u32 %v8126_v52, %v8124_v33  ;;  %v8125_v56 = vsel %vm595_vm2, %v8121_v12, %v8124_v33  ;;  %v8140_v44 = vshrl.u32 %v17976_v2, 16  ;;  %v17979_v33 = vld [vmem:[#allocation20_spill] sm:$0xff] }
 0x283   : > { %v2512_v10 = vsel %vm2433_vm4, %v2509_v48, %v2511_v58  ;;  %v8150_v12 = vshll.u32 %v17979_v33, 16 }
 0x284   : > { %v8132_v30 = vsel %vm595_vm2, %v8128_v9, %v8131_v24  ;;  %v8147_v9 = vshrl.u32 %v16127_v8, 16 }
 0x285   : > { %13075 = vmatmul.mubr.msk.bf16.gmra.mrb[68].mxu1 %vm1086_vm3, %v2506_v15  ;;  %v8136_v15 = vshll.u32 %v17976_v2, 16  ;;  %v17980_v2 = vld [vmem:[#allocation21_spill] sm:$0xff] }
 0x286   : > { %13078 = vmatprep.mubr.msk.bf16.mxu1 %vm1086_vm3, %v2508_v59  ;;  %v8133_v59 = vshrl.u32 %v16107_v43, 16  ;;  %v2514_v43 = vsel %vm2433_vm4, %v2511_v58, %v2513_v39  ;;  %v8154_v58 = vshrl.u32 %v17979_v33, 16 }
 0x287   : > { %13625 = vmatmul.mubr.msk.bf16.gmra.mrb[8].mxu0 %vm1086_vm3, %v8111_v49  ;;  %v8143_v49 = vshll.u32 %v16127_v8, 16  ;;  %v8138_v35 = vrot.slane %v8136_v15, 1  ;;  %v8157_v15 = vshll.u32 %v16147_v1, 16 }
 0x288   : > { %13628 = vmatprep.mubr.msk.bf16.mxu0 %vm1086_vm3, %v8118_v18  ;;  %v2515_v18 = vrot.slane %v17978_v42, 1  ;;  %v8135_v48 = vor.u32 %v8133_v59, %v8131_v24  ;;  %v2517_v24 = vrot.slane %v17980_v2, 1  ;;  %v8152_v59 = vrot.slane %v8150_v12, 1 }
 0x289   : > { %v8142_v52 = vor.u32 %v8140_v44, %v8138_v35  ;;  %v8145_v34 = vrot.slane %v8143_v49, 1  ;;  %v17981_v49 = vld [vmem:[#allocation22_spill] sm:$0xff] }
 0x28a   : > { %v2516_v57 = vsel %vm2433_vm4, %v2513_v39, %v2515_v18  ;;  %v8156_v23 = vor.u32 %v8154_v58, %v8152_v59  ;;  %v8159_v39 = vrot.slane %v8157_v15, 1  ;;  %v8164_v42 = vshll.u32 %v17981_v49, 16 }
 0x28b   : > { %v8149_v8 = vor.u32 %v8147_v9, %v8145_v34  ;;  %v8175_v15 = vshrl.u32 %v16164_v29, 16 }
 0x28c   : > { %v8166_v12 = vrot.slane %v8164_v42, 1 }
 0x28d   : > { %13079 = vmatmul.mubr.msk.bf16.gmra.mrb[72].mxu1 %vm1086_vm3, %v2510_v60  ;;  %v8139_v60 = vsel %vm595_vm2, %v8135_v48, %v8138_v35  ;;  %v8153_v35 = vsel %vm595_vm2, %v8149_v8, %v8152_v59  ;;  %v8160_v48 = vsel %vm595_vm2, %v8156_v23, %v8159_v39  ;;  %v15100_v8 = vld [vmem:[%s15289_s23 + $0x170] sm:$0xff]   ;;  %v8185_v23 = vshll.u32 %v16178_v25, 16 }
 0x28e   : > { %13082 = vmatprep.mubr.msk.bf16.mxu1 %vm1086_vm3, %v2512_v10  ;;  %v8146_v10 = vsel %vm595_vm2, %v8142_v52, %v8145_v34  ;;  %v8171_v34 = vshll.u32 %v16164_v29, 16 }
 0x28f   : > { %13629 = vmatmul.mubr.msk.bf16.gmra.mrb[12].mxu0 %vm1086_vm3, %v8125_v56  ;;  %v2519_v56 = vrot.slane %v16150_v62, 1  ;;  %v8161_v62 = vshrl.u32 %v16147_v1, 16 }
 0x290   : > { %13632 = vmatprep.mubr.msk.bf16.mxu0 %vm1086_vm3, %v8132_v30  ;;  %v2518_v30 = vsel %vm2433_vm4, %v2515_v18, %v2517_v24  ;;  %v8168_v18 = vshrl.u32 %v17981_v49, 16 }
 0x291   : > { %v2520_v44 = vsel %vm2433_vm4, %v2517_v24, %v2519_v56  ;;  %v8163_v1 = vor.u32 %v8161_v62, %v8159_v39  ;;  %v8178_v24 = vshll.u32 %v16169_v28, 16  ;;  %v15101_v39 = vld [vmem:[%s15289_s23 + $0x178] sm:$0xff]   ;;  %v8187_v62 = vrot.slane %v8185_v23, 1 }
 0x292   : > { %v8170_v9 = vor.u32 %v8168_v18, %v8166_v12  ;;  %v8210_v23 = vshrl.u32 %v16197_v45, 16 }
 0x293   : > { %v8167_v58 = vsel %vm595_vm2, %v8163_v1, %v8166_v12  ;;  %v8180_v49 = vrot.slane %v8178_v24, 1  ;;  %v8199_v12 = vshll.u32 %v16192_v26, 16  ;;  %v15103_v1 = vld [vmem:[%s15289_s23 + $0x188] sm:$0xff]  }
 0x295   : > { %13083 = vmatmul.mubr.msk.bf16.gmra.mrb[76].mxu1 %vm1086_vm3, %v2514_v43  ;;  %v15098_v43 = vld [vmem:[%s15289_s23 + $0x160] sm:$0xff]   ;;  %v8201_v24 = vrot.slane %v8199_v12, 1  ;;  %v17983_v12 = vld [vmem:[#allocation24_spill] sm:$0xff] }
 0x296   : > { %13086 = vmatprep.mubr.msk.bf16.mxu1 %vm1086_vm3, %v2516_v57  ;;  %v2521_v52 = vrot.slane %v15098_v43, 1  ;;  %v15099_v57 = vld [vmem:[%s15289_s23 + $0x168] sm:$0xff]  }
 0x297   : > { %13633 = vmatmul.mubr.msk.bf16.gmra.mrb[16].mxu0 %vm1086_vm3, %v8139_v60  ;;  %v2523_v33 = vrot.slane %v15099_v57, 1 }
 0x298   : > { %13636 = vmatprep.mubr.msk.bf16.mxu0 %vm1086_vm3, %v8146_v10  ;;  %v2522_v60 = vsel %vm2433_vm4, %v2519_v56, %v2521_v52  ;;  %v8173_v10 = vrot.slane %v8171_v34, 1  ;;  %v8182_v56 = vshrl.u32 %v16169_v28, 16  ;;  %v8192_v28 = vshll.u32 %v16183_v13, 16  ;;  %v15102_v34 = vld [vmem:[%s15289_s23 + $0x180] sm:$0xff]  }
 0x299   : > { %v2524_v2 = vsel %vm2433_vm4, %v2521_v52, %v2523_v33  ;;  %v8189_v52 = vshrl.u32 %v16178_v25, 16  ;;  %v2529_v57 = vrot.slane %v15102_v34, 1  ;;  %v15106_v34 = vld [vmem:[%s15289_s23 + $0x1a0] sm:$0xff]  }
 0x29a   : > { %v8174_v59 = vsel %vm595_vm2, %v8170_v9, %v8173_v10  ;;  %v8177_v29 = vor.u32 %v8175_v15, %v8173_v10  ;;  %v8194_v9 = vrot.slane %v8192_v28, 1  ;;  %v17982_v28 = vld [vmem:[#allocation23_spill] sm:$0xff] }
 0x29b   : > { %v8191_v25 = vor.u32 %v8189_v52, %v8187_v62  ;;  %v8217_v52 = vshrl.u32 %v16206_v46, 16 }
 0x29c   : > { %v8181_v43 = vsel %vm595_vm2, %v8177_v29, %v8180_v49 }
 0x29d   : > { %13087 = vmatmul.mubr.msk.bf16.gmra.mrb[80].mxu1 %vm1086_vm3, %v2518_v30  ;;  %v2525_v30 = vrot.slane %v15100_v8, 1  ;;  %v8195_v15 = vsel %vm595_vm2, %v8191_v25, %v8194_v9 }
 0x29e   : > { %13090 = vmatprep.mubr.msk.bf16.mxu1 %vm1086_vm3, %v2520_v44  ;;  %v2527_v44 = vrot.slane %v15101_v39, 1  ;;  %v8213_v39 = vshll.u32 %v16206_v46, 16 }
 0x29f   : > { %13637 = vmatmul.mubr.msk.bf16.gmra.mrb[20].mxu0 %vm1086_vm3, %v8153_v35  ;;  %v2526_v42 = vsel %vm2433_vm4, %v2523_v33, %v2525_v30  ;;  %v8184_v35 = vor.u32 %v8182_v56, %v8180_v49  ;;  %v8196_v33 = vshrl.u32 %v16183_v13, 16  ;;  %v8206_v13 = vshll.u32 %v16197_v45, 16 }
 0x2a0   : > { %13640 = vmatprep.mubr.msk.bf16.mxu0 %vm1086_vm3, %v8160_v48  ;;  %v2528_v48 = vsel %vm2433_vm4, %v2525_v30, %v2527_v44  ;;  %v2530_v10 = vsel %vm2433_vm4, %v2527_v44, %v2529_v57  ;;  %v15104_v30 = vld [vmem:[%s15289_s23 + $0x190] sm:$0xff]   ;;  %v15105_v44 = vld [vmem:[%s15289_s23 + $0x198] sm:$0xff]   ;;  %v8220_v45 = vshll.u32 %v17982_v28, 16 }
 0x2a1   : > { %v8188_v18 = vsel %vm595_vm2, %v8184_v35, %v8187_v62  ;;  %v2533_v56 = vrot.slane %v15104_v30, 1  ;;  %v2535_v49 = vrot.slane %v15105_v44, 1  ;;  %v8208_v29 = vrot.slane %v8206_v13, 1  ;;  %v17984_v13 = vld [vmem:[#allocation25_spill] sm:$0xff]  ;;  %v17985_v44 = vld [vmem:[#allocation26_spill] sm:$0xff] }
 0x2a2   : > { %v8215_v62 = vrot.slane %v8213_v39, 1  ;;  %v8222_v25 = vrot.slane %v8220_v45, 1  ;;  %v8238_v39 = vshrl.u32 %v17984_v13, 16 }
 0x2a3   : > { %v8212_v35 = vor.u32 %v8210_v23, %v8208_v29 }
 0x2a4   : > { %v8219_v46 = vor.u32 %v8217_v52, %v8215_v62 }
 0x2a5   : > { %13091 = vmatmul.mubr.msk.bf16.gmra.mrb[84].mxu1 %vm1086_vm3, %v2522_v60  ;;  %v2531_v60 = vrot.slane %v15103_v1, 1  ;;  %v8227_v1 = vshll.u32 %v17983_v12, 16 }
 0x2a6   : > { %13094 = vmatprep.mubr.msk.bf16.mxu1 %vm1086_vm3, %v2524_v2  ;;  %v8198_v2 = vor.u32 %v8196_v33, %v8194_v9  ;;  %v8224_v33 = vshrl.u32 %v17982_v28, 16 }
 0x2a7   : > { %13641 = vmatmul.mubr.msk.bf16.gmra.mrb[24].mxu0 %vm1086_vm3, %v8167_v58  ;;  %v2532_v58 = vsel %vm2433_vm4, %v2529_v57, %v2531_v60  ;;  %v2537_v57 = vrot.slane %v15106_v34, 1 }
 0x2a8   : > { %13644 = vmatprep.mubr.msk.bf16.mxu0 %vm1086_vm3, %v8174_v59  ;;  %v8203_v59 = vshrl.u32 %v16192_v26, 16  ;;  %v8202_v8 = vsel %vm595_vm2, %v8198_v2, %v8201_v24  ;;  %v8226_v2 = vor.u32 %v8224_v33, %v8222_v25 }
 0x2aa   : > { %v8205_v26 = vor.u32 %v8203_v59, %v8201_v24  ;;  %v8229_v24 = vrot.slane %v8227_v1, 1  ;;  %v8223_v59 = vsel %vm595_vm2, %v8219_v46, %v8222_v25  ;;  %v8255_v1 = vshll.u32 %v16250_v0, 16 }
 0x2ac   : > { %v8230_v30 = vsel %vm595_vm2, %v8226_v2, %v8229_v24 }
 0x2ad   : > { %13095 = vmatmul.mubr.msk.bf16.gmra.mrb[88].mxu1 %vm1086_vm3, %v2526_v42  ;;  %v2534_v42 = vsel %vm2433_vm4, %v2531_v60, %v2533_v56  ;;  %v15107_v60 = vld [vmem:[%s15289_s23 + $0x1a8] sm:$0xff]  }
 0x2ae   : > { %13098 = vmatprep.mubr.msk.bf16.mxu1 %vm1086_vm3, %v2528_v48  ;;  %v2536_v48 = vsel %vm2433_vm4, %v2533_v56, %v2535_v49  ;;  %v2539_v9 = vrot.slane %v15107_v60, 1  ;;  %v15108_v56 = vld [vmem:[%s15289_s23 + $0x1b0] sm:$0xff]   ;;  %v15111_v60 = vld [vmem:[%s15289_s23 + $0x1c8] sm:$0xff]  }
 0x2af   : > { %13645 = vmatmul.mubr.msk.bf16.gmra.mrb[28].mxu0 %vm1086_vm3, %v8181_v43  ;;  %v8209_v43 = vsel %vm595_vm2, %v8205_v26, %v8208_v29  ;;  %v2541_v23 = vrot.slane %v15108_v56, 1  ;;  %v15109_v29 = vld [vmem:[%s15289_s23 + $0x1b8] sm:$0xff]   ;;  %v8266_v56 = vshrl.u32 %v16255_v11, 16 }
 0x2b0   : > { %13648 = vmatprep.mubr.msk.bf16.mxu0 %vm1086_vm3, %v8188_v18  ;;  %v8216_v18 = vsel %vm595_vm2, %v8212_v35, %v8215_v62  ;;  %v2543_v26 = vrot.slane %v15109_v29, 1 }
 0x2b1   : > { %v2542_v62 = vsel %vm2433_vm4, %v2539_v9, %v2541_v23 }
 0x2b2   : > { %v2544_v45 = vsel %vm2433_vm4, %v2541_v23, %v2543_v26  ;;  %v8269_v23 = vshll.u32 %v16274_v3, 16 }
 0x2b5   : > { %13099 = vmatmul.mubr.msk.bf16.gmra.mrb[92].mxu1 %vm1086_vm3, %v2530_v10  ;;  %v2538_v10 = vsel %vm2433_vm4, %v2535_v49, %v2537_v57  ;;  %v8241_v49 = vshll.u32 %v17985_v44, 16 }
 0x2b6   : > { %13102 = vmatprep.mubr.msk.bf16.mxu1 %vm1086_vm3, %v2532_v58  ;;  %v2540_v58 = vsel %vm2433_vm4, %v2537_v57, %v2539_v9  ;;  %v15110_v57 = vld [vmem:[%s15289_s23 + $0x1c0] sm:$0xff]   ;;  %v2547_v9 = vrot.slane %v15111_v60, 1  ;;  %v8294_v60 = vshrl.u32 %v16295_v37, 16 }
 0x2b7   : > { %13649 = vmatmul.mubr.msk.bf16.gmra.mrb[32].mxu0 %vm1086_vm3, %v8195_v15  ;;  %v8234_v15 = vshll.u32 %v17984_v13, 16  ;;  %v8243_v28 = vrot.slane %v8241_v49, 1  ;;  %v2545_v33 = vrot.slane %v15110_v57, 1  ;;  %v8262_v13 = vshll.u32 %v16255_v11, 16 }
 0x2b8   : > { %13652 = vmatprep.mubr.msk.bf16.mxu0 %vm1086_vm3, %v8202_v8  ;;  %v8231_v8 = vshrl.u32 %v17983_v12, 16  ;;  %v8252_v12 = vshrl.u32 %v16239_v47, 16 }
 0x2b9   : > { %v8264_v49 = vrot.slane %v8262_v13, 1  ;;  %v15114_v13 = vld [vmem:[%s15289_s23 + $0x20] sm:$0xff]  }
 0x2ba   : > { %v8233_v35 = vor.u32 %v8231_v8, %v8229_v24  ;;  %v8257_v24 = vrot.slane %v8255_v1, 1  ;;  %v15112_v8 = vld [vmem:[%s15289_s23 + $0x1d0] sm:$0xff]  }
 0x2bd   : > { %13103 = vmatmul.mubr.msk.bf16.gmra.mrb[96].mxu1 %vm1086_vm3, %v2534_v42  ;;  %v8236_v42 = vrot.slane %v8234_v15, 1  ;;  %v8259_v15 = vshrl.u32 %v16250_v0, 16 }
 0x2be   : > { %13106 = vmatprep.mubr.msk.bf16.mxu1 %vm1086_vm3, %v2536_v48 }
 0x2bf   : > { %13653 = vmatmul.mubr.msk.bf16.gmra.mrb[36].mxu0 %vm1086_vm3, %v8209_v43  ;;  %v8240_v48 = vor.u32 %v8238_v39, %v8236_v42  ;;  %v8248_v43 = vshll.u32 %v16239_v47, 16  ;;  %v8237_v52 = vsel %vm595_vm2, %v8233_v35, %v8236_v42  ;;  %v17986_v39 = vld [vmem:[#allocation5_spill] sm:$0xff]  ;;  %v8261_v29 = vor.u32 %v8259_v15, %v8257_v24 }
 0x2c0   : > { %13656 = vmatprep.mubr.msk.bf16.mxu0 %vm1086_vm3, %v8216_v18  ;;  %v8245_v18 = vshrl.u32 %v17985_v44, 16  ;;  %v2551_v44 = vrot.slane %v17986_v39, 1  ;;  %v8271_v42 = vrot.slane %v8269_v23, 1  ;;  %v8308_v15 = vshrl.u32 %v16313_v16, 16  ;;  %v15115_v23 = vld [vmem:[%s15289_s23 + $0x28] sm:$0xff]  }
 0x2c1   : > { %v8244_v34 = vsel %vm595_vm2, %v8240_v48, %v8243_v28  ;;  %v8250_v25 = vrot.slane %v8248_v43, 1  ;;  %v8265_v11 = vsel %vm595_vm2, %v8261_v29, %v8264_v49  ;;  %v8273_v48 = vshrl.u32 %v16274_v3, 16 }
 0x2c2   : > { %v8247_v46 = vor.u32 %v8245_v18, %v8243_v28  ;;  %v8283_v43 = vshll.u32 %v16291_v51, 16  ;;  %v8322_v29 = vshrl.u32 %v16329_v6, 16 }
 0x2c3   : > { %v8254_v2 = vor.u32 %v8252_v12, %v8250_v25  ;;  %v8275_v18 = vor.u32 %v8273_v48, %v8271_v42  ;;  %v8287_v12 = vshrl.u32 %v16291_v51, 16  ;;  %v8304_v51 = vshll.u32 %v16313_v16, 16 }
 0x2c4   : > { %v8251_v47 = vsel %vm595_vm2, %v8247_v46, %v8250_v25  ;;  %v8285_v57 = vrot.slane %v8283_v43, 1  ;;  %v8315_v16 = vshrl.u32 %v16325_v22, 16  ;;  %v8336_v43 = vshrl.u32 %v16345_v27, 16 }
 0x2c5   : > { %13107 = vmatmul.mubr.msk.bf16.gmra.mrb[100].mxu1 %vm1086_vm3, %v2538_v10  ;;  %v2546_v10 = vsel %vm2433_vm4, %v2543_v26, %v2545_v33  ;;  %v8268_v26 = vor.u32 %v8266_v56, %v8264_v49 }
 0x2c6   : > { %13110 = vmatprep.mubr.msk.bf16.mxu1 %vm1086_vm3, %v2540_v58  ;;  %v2548_v58 = vsel %vm2433_vm4, %v2545_v33, %v2547_v9  ;;  %v8290_v33 = vshll.u32 %v16295_v37, 16  ;;  %v8289_v46 = vor.u32 %v8287_v12, %v8285_v57  ;;  %v8301_v37 = vshrl.u32 %v16309_v21, 16 }
 0x2c7   : > { %13657 = vmatmul.mubr.msk.bf16.gmra.mrb[40].mxu0 %vm1086_vm3, %v8223_v59  ;;  %v8258_v59 = vsel %vm595_vm2, %v8254_v2, %v8257_v24  ;;  %v8272_v28 = vsel %vm595_vm2, %v8268_v26, %v8271_v42  ;;  %v15113_v24 = vld [vmem:[%s15289_s23 + $0x18] sm:$0xff]  }
 0x2c8   : > { %13660 = vmatprep.mubr.msk.bf16.mxu0 %vm1086_vm3, %v8230_v30  ;;  %v2549_v30 = vrot.slane %v15112_v8, 1  ;;  %v8292_v25 = vrot.slane %v8290_v33, 1  ;;  %v8306_v8 = vrot.slane %v8304_v51, 1  ;;  %v15121_v51 = vld [vmem:[%s15289_s23 + $0x58] sm:$0xff]  }
 0x2ca   : > { %v2550_v0 = vsel %vm2433_vm4, %v2547_v9, %v2549_v30  ;;  %v2552_v35 = vsel %vm2433_vm4, %v2549_v30, %v2551_v44  ;;  %v8297_v9 = vshll.u32 %v16309_v21, 16  ;;  %v8310_v56 = vor.u32 %v8308_v15, %v8306_v8 }
 0x2cc   : > { %v8299_v2 = vrot.slane %v8297_v9, 1  ;;  %v8353_v9 = vshll.u32 %v16373_v63, 16 }
 0x2cd   : > { %13111 = vmatmul.mubr.msk.bf16.gmra.mrb[104].mxu1 %vm1086_vm3, %v2542_v62  ;;  %v8276_v62 = vshll.u32 %v16279_v5, 16 }
 0x2ce   : > { %13114 = vmatprep.mubr.msk.bf16.mxu1 %vm1086_vm3, %v2544_v45  ;;  %v8280_v45 = vshrl.u32 %v16279_v5, 16  ;;  %v17987_v5 = vld [vmem:[#allocation3_spill] sm:$0xff]  ;;  %v8303_v30 = vor.u32 %v8301_v37, %v8299_v2 }
 0x2cf   : > { %13661 = vmatmul.mubr.msk.bf16.gmra.mrb[44].mxu0 %vm1086_vm3, %v8237_v52  ;;  %v8278_v52 = vrot.slane %v8276_v62, 1 }
 0x2d0   : > { %13664 = vmatprep.mubr.msk.bf16.mxu0 %vm1086_vm3, %v8244_v34  ;;  %v8307_v39 = vsel %vm595_vm2, %v8303_v30, %v8306_v8 }
 0x2d1   : > { %v8282_v34 = vor.u32 %v8280_v45, %v8278_v52  ;;  %v8279_v3 = vsel %vm595_vm2, %v8275_v18, %v8278_v52  ;;  %v8339_v52 = vshll.u32 %v16357_v7, 16 }
 0x2d3   : > { %v8286_v1 = vsel %vm595_vm2, %v8282_v34, %v8285_v57  ;;  %v8341_v33 = vrot.slane %v8339_v52, 1 }
 0x2d5   : > { %13115 = vmatmul.mubr.msk.bf16.gmra.mrb[108].mxu1 %vm1086_vm3, %v2546_v10  ;;  %v8296_v10 = vor.u32 %v8294_v60, %v8292_v25  ;;  %v8350_v60 = vshrl.u32 %v16361_v31, 16 }
 0x2d6   : > { %13118 = vmatprep.mubr.msk.bf16.mxu1 %vm1086_vm3, %v2548_v58  ;;  %v8293_v58 = vsel %vm595_vm2, %v8289_v46, %v8292_v25 }
 0x2d7   : > { %13665 = vmatmul.mubr.msk.bf16.gmra.mrb[48].mxu0 %vm1086_vm3, %v8251_v47  ;;  %v8300_v47 = vsel %vm595_vm2, %v8296_v10, %v8299_v2  ;;  %v8355_v2 = vrot.slane %v8353_v9, 1 }
 0x2d8   : > { %13668 = vmatprep.mubr.msk.bf16.mxu0 %vm1086_vm3, %v8258_v59  ;;  %v8311_v59 = vshll.u32 %v16325_v22, 16  ;;  %v8332_v22 = vshll.u32 %v16345_v27, 16  ;;  %v8343_v27 = vshrl.u32 %v16357_v7, 16  ;;  %v8360_v7 = vshll.u32 %v16377_v41, 16 }
 0x2da   : > { %v8313_v21 = vrot.slane %v8311_v59, 1  ;;  %v8334_v18 = vrot.slane %v8332_v22, 1  ;;  %v8345_v46 = vor.u32 %v8343_v27, %v8341_v33  ;;  %v8362_v15 = vrot.slane %v8360_v7, 1 }
 0x2db   : > { %v8392_v22 = vshrl.u32 %v16409_v4, 16 }
 0x2dc   : > { %v8314_v49 = vsel %vm595_vm2, %v8310_v56, %v8313_v21  ;;  %v8317_v42 = vor.u32 %v8315_v16, %v8313_v21  ;;  %v8338_v57 = vor.u32 %v8336_v43, %v8334_v18  ;;  %v15123_v56 = vld [vmem:[%s15289_s23 + $0x68] sm:$0xff]   ;;  %v8381_v16 = vshll.u32 %v16405_v14, 16 }
 0x2dd   : > { %13119 = vmatmul.mubr.msk.bf16.gmra.mrb[112].mxu1 %vm1086_vm3, %v2550_v0  ;;  %v8325_v0 = vshll.u32 %v16341_v40, 16  ;;  %v15127_v43 = vld [vmem:[%s15289_s23 + $0x88] sm:$0xff]  }
 0x2de   : > { %13122 = vmatprep.mubr.msk.bf16.mxu1 %vm1086_vm3, %v2552_v35 }
 0x2df   : > { %13669 = vmatmul.mubr.msk.bf16.gmra.mrb[52].mxu0 %vm1086_vm3, %v8265_v11  ;;  %v8327_v62 = vrot.slane %v8325_v0, 1  ;;  %v15117_v11 = vld [vmem:[%s15289_s23 + $0x38] sm:$0xff]   ;;  %v8383_v0 = vrot.slane %v8381_v16, 1 }
 0x2e0   : > { %13672 = vmatprep.mubr.msk.bf16.mxu0 %vm1086_vm3, %v8272_v28  ;;  %v15118_v28 = vld [vmem:[%s15289_s23 + $0x40] sm:$0xff]  }
 0x2e5   : > { %13123 = vmatmul.mubr.msk.bf16.gmra.mrb[116].mxu1 %vm1086_vm3, %v2551_v44  ;;  %v15116_v44 = vld [vmem:[%s15289_s23 + $0x30] sm:$0xff]  }
 0x2e6   : > { %13128 = vmatprep.mubr.msk.bf16.mxu1 %vm1086_vm3, %v17987_v5  ;;  %v15120_v5 = vld [vmem:[%s15289_s23 + $0x50] sm:$0xff]  }
 0x2e7   : > { %13673 = vmatmul.mubr.msk.bf16.gmra.mrb[56].mxu0 %vm1086_vm3, %v8279_v3  ;;  %v15119_v3 = vld [vmem:[%s15289_s23 + $0x48] sm:$0xff]  }
 0x2e8   : > { %13676 = vmatprep.mubr.msk.bf16.mxu0 %vm1086_vm3, %v8286_v1  ;;  %v8342_v1 = vsel %vm595_vm2, %v8338_v57, %v8341_v33  ;;  %v8406_v57 = vshrl.u32 %v16425_v20, 16  ;;  %v8409_v33 = vshll.u32 %v16437_v38, 16 }
 0x2ea   : > { %v8411_v27 = vrot.slane %v8409_v33, 1 }
 0x2ed   : > { %13129 = vmatmul.mubr.msk.bf16.vlgmr.msra.gmra.mrb[0].mxu1 %vm1086_vm3, %v15113_v24 }
 0x2ee   : > { %13859 = vmatpush3.bf16.msra.mxu1 %v15299_v17  ;;  %13132 = vmatprep.mubr.msk.bf16.mxu1 %vm1086_vm3, %v15114_v13  ;;  %v8318_v17 = vshll.u32 %v16329_v6, 16  ;;  %v8329_v6 = vshrl.u32 %v16341_v40, 16  ;;  %v8346_v40 = vshll.u32 %v16361_v31, 16  ;;  %v8357_v31 = vshrl.u32 %v16373_v63, 16 }
 0x2ef   : > { %13677 = vmatmul.mubr.msk.bf16.gmra.mrb[60].mxu0 %vm1086_vm3, %v8293_v58  ;;  %v15122_v58 = vld [vmem:[%s15289_s23 + $0x60] sm:$0xff]   ;;  %v8364_v13 = vshrl.u32 %v16377_v41, 16  ;;  %v8374_v63 = vshll.u32 %v16393_v55, 16  ;;  %v8371_v41 = vshrl.u32 %v16389_v32, 16 }
 0x2f0   : > { %13680 = vmatprep.mubr.msk.bf16.mxu0 %vm1086_vm3, %v8300_v47  ;;  %v8320_v26 = vrot.slane %v8318_v17, 1  ;;  %v8331_v34 = vor.u32 %v8329_v6, %v8327_v62  ;;  %v8348_v25 = vrot.slane %v8346_v40, 1  ;;  %v8367_v47 = vshll.u32 %v16389_v32, 16  ;;  %v15124_v17 = vld [vmem:[%s15289_s23 + $0x70] sm:$0xff]  }
 0x2f1   : > { %v8359_v59 = vor.u32 %v8357_v31, %v8355_v2  ;;  %v8366_v8 = vor.u32 %v8364_v13, %v8362_v15  ;;  %v8388_v32 = vshll.u32 %v16409_v4, 16  ;;  %v8399_v4 = vshrl.u32 %v16421_v53, 16 }
 0x2f2   : > { %v8324_v35 = vor.u32 %v8322_v29, %v8320_v26  ;;  %v8321_v48 = vsel %vm595_vm2, %v8317_v42, %v8320_v26  ;;  %v8335_v12 = vsel %vm595_vm2, %v8331_v34, %v8334_v18  ;;  %v8352_v10 = vor.u32 %v8350_v60, %v8348_v25  ;;  %v15125_v26 = vld [vmem:[%s15289_s23 + $0x78] sm:$0xff]   ;;  %v15128_v18 = vld [vmem:[%s15289_s23 + $0x90] sm:$0xff]   ;;  %v15130_v60 = vld [vmem:[%s15289_s23 + $0xa0] sm:$0xff]  }
 0x2f3   : > { %v8349_v24 = vsel %vm595_vm2, %v8345_v46, %v8348_v25  ;;  %v8369_v30 = vrot.slane %v8367_v47, 1  ;;  %v8363_v21 = vsel %vm595_vm2, %v8359_v59, %v8362_v15  ;;  %v8420_v25 = vshrl.u32 %v16441_v36, 16 }
 0x2f4   : > { %v8328_v45 = vsel %vm595_vm2, %v8324_v35, %v8327_v62  ;;  %v8356_v37 = vsel %vm595_vm2, %v8352_v10, %v8355_v2  ;;  %v15126_v35 = vld [vmem:[%s15289_s23 + $0x80] sm:$0xff]   ;;  %v8423_v46 = vshll.u32 %v16453_v50, 16  ;;  %v8434_v13 = vshrl.u32 %v16457_v54, 16 }
 0x2f5   : > { %13133 = vmatmul.mubr.msk.bf16.gmra.mrb[4].mxu1 %vm1086_vm3, %v15115_v23  ;;  %v8370_v23 = vsel %vm595_vm2, %v8366_v8, %v8369_v30  ;;  %v8437_v47 = vshll.u32 %v16469_v61, 16 }
 0x2f6   : > { %13136 = vmatprep.mubr.msk.bf16.mxu1 %vm1086_vm3, %v15116_v44  ;;  %v8376_v44 = vrot.slane %v8374_v63, 1  ;;  %v17988_v63 = vld [vmem:[#allocation27_spill] sm:$0xff] }
 0x2f7   : > { %13681 = vmatmul.mubr.msk.bf16.gmra.mrb[64].mxu0 %vm1086_vm3, %v8307_v39  ;;  %v8378_v39 = vshrl.u32 %v16393_v55, 16  ;;  %v8385_v55 = vshrl.u32 %v16405_v14, 16  ;;  %v8402_v14 = vshll.u32 %v16425_v20, 16  ;;  %v8413_v20 = vshrl.u32 %v16437_v38, 16 }
 0x2f8   : > { %13684 = vmatprep.mubr.msk.bf16.mxu0 %vm1086_vm3, %v8314_v49  ;;  %v8373_v49 = vor.u32 %v8371_v41, %v8369_v30  ;;  %v8430_v38 = vshll.u32 %v16457_v54, 16  ;;  %v8439_v30 = vrot.slane %v8437_v47, 1  ;;  %v8441_v54 = vshrl.u32 %v16469_v61, 16  ;;  %v15134_v41 = vld [vmem:[%s15289_s23 + $0xc0] sm:$0xff]   ;;  %v17990_v61 = vld [vmem:[#allocation29_spill] sm:$0xff] }
 0x2f9   : > { %v8380_v29 = vor.u32 %v8378_v39, %v8376_v44  ;;  %v8387_v6 = vor.u32 %v8385_v55, %v8383_v0  ;;  %v8404_v40 = vrot.slane %v8402_v14, 1  ;;  %v8415_v2 = vor.u32 %v8413_v20, %v8411_v27  ;;  %v17989_v39 = vld [vmem:[#allocation28_spill] sm:$0xff]  ;;  %v9314_v20 = vld [vmem:[%s15289_s23 + $0x20] sm:$0xe] }
 0x2fa   : > { %v8377_v42 = vsel %vm595_vm2, %v8373_v49, %v8376_v44  ;;  %v8432_v15 = vrot.slane %v8430_v38, 1  ;;  %v8451_v16 = vshll.u32 %v17989_v39, 16  ;;  %v8443_v49 = vor.u32 %v8441_v54, %v8439_v30  ;;  %v15142_v38 = vld [vmem:[%s15289_s23 + $0x28] sm:$0xff]  }
 0x2fb   : > { %v8384_v62 = vsel %vm595_vm2, %v8380_v29, %v8383_v0  ;;  %v8455_v55 = vshrl.u32 %v17989_v39, 16  ;;  %v15150_v54 = vld [vmem:[%s15289_s23 + $0x48] sm:$0xff]   ;;  %v16949_v39 = vld [vmem:[%s15289_s23 + $0x120] sm:$0xff]  }
 0x2fc   : > { %v8436_v8 = vor.u32 %v8434_v13, %v8432_v15  ;;  %v8453_v0 = vrot.slane %v8451_v16, 1  ;;  %v15145_v13 = vld [vmem:[%s15289_s23 + $0x30] sm:$0xff]  }
 0x2fd   : > { %13137 = vmatmul.mubr.msk.bf16.gmra.mrb[8].mxu1 %vm1086_vm3, %v15117_v11  ;;  %v8395_v11 = vshll.u32 %v16421_v53, 16  ;;  %v8416_v53 = vshll.u32 %v16441_v36, 16  ;;  %v8427_v36 = vshrl.u32 %v16453_v50, 16  ;;  %v8444_v50 = vshll.u32 %v17988_v63, 16 }
 0x2fe   : > { %13140 = vmatprep.mubr.msk.bf16.mxu1 %vm1086_vm3, %v15118_v28  ;;  %v9322_v47 = vrot.slane %v15145_v13, 1  ;;  %v17045_v13 = vld [vmem:[%s15289_s23 + $0x180] sm:$0xff]  }
 0x2ff   : > { %13685 = vmatmul.mubr.msk.bf16.gmra.mrb[68].mxu0 %vm1086_vm3, %v8321_v48  ;;  %v8390_v48 = vrot.slane %v8388_v32, 1  ;;  %v8418_v10 = vrot.slane %v8416_v53, 1  ;;  %v8446_v44 = vrot.slane %v8444_v50, 1  ;;  %v8458_v32 = vshll.u32 %v17990_v61, 16 }
 0x300   : > { %13688 = vmatprep.mubr.msk.bf16.mxu0 %vm1086_vm3, %v8328_v45  ;;  %v8397_v45 = vrot.slane %v8395_v11, 1  ;;  %v17991_v11 = vld [vmem:[#allocation30_spill] sm:$0xff] }
 0x301   : > { %v8394_v28 = vor.u32 %v8392_v22, %v8390_v48  ;;  %v8391_v52 = vsel %vm595_vm2, %v8387_v6, %v8390_v48  ;;  %v8422_v7 = vor.u32 %v8420_v25, %v8418_v10  ;;  %v8419_v31 = vsel %vm595_vm2, %v8415_v2, %v8418_v10  ;;  %v8062_v6 = vld [vmem:[%s15289_s23 + $0x1fc] sm:$0xf]  ;;  %v15140_v25 = vld [vmem:[%s15289_s23 + $0xf0] sm:$0xff]   ;;  %v15141_v10 = vld [vmem:[%s15289_s23 + $0x24] sm:$0xf] }
 0x302   : > { %v8462_v22 = vshrl.u32 %v17990_v61, 16  ;;  %v8465_v48 = vshll.u32 %v17991_v11, 16  ;;  %v16888_v14 = vcombine.low %v16518_v19, %v8062_v6  ;;  %v8469_v33 = vshrl.u32 %v17991_v11, 16  ;;  %v16959_v61 = vld [vmem:[%s15289_s23 + $0x128] sm:$0xff]   ;;  %v16975_v11 = vld [vmem:[%s15289_s23 + $0x138] sm:$0xff]   ;;  %v16981_v6 = vld [vmem:[%s15289_s23 + $0x140] sm:$0xff]  }
 0x303   : > { %v8398_v34 = vsel %vm595_vm2, %v8394_v28, %v8397_v45  ;;  %v8460_v28 = vrot.slane %v8458_v32, 1  ;;  %v12086_v2 = vcombine.low %v9314_v20, %v15141_v10  ;;  %v15169_v20 = vld [vmem:[%s15289_s23 + $0x90] sm:$0xff]  }
 0x305   : > { %13141 = vmatmul.mubr.msk.bf16.gmra.mrb[12].mxu1 %vm1086_vm3, %v15119_v3  ;;  %v8401_v3 = vor.u32 %v8399_v4, %v8397_v45  ;;  %v8457_v45 = vor.u32 %v8455_v55, %v8453_v0  ;;  %v17992_v4 = vld [vmem:[#allocation31_spill] sm:$0xff] }
 0x306   : > { %13144 = vmatprep.mubr.msk.bf16.mxu1 %vm1086_vm3, %v15120_v5  ;;  %v15129_v5 = vld [vmem:[%s15289_s23 + $0x98] sm:$0xff]   ;;  %v15157_v55 = vld [vmem:[%s15289_s23 + $0x60] sm:$0xff]  }
 0x307   : > { %13689 = vmatmul.mubr.msk.bf16.gmra.mrb[72].mxu0 %vm1086_vm3, %v8335_v12  ;;  %v8408_v12 = vor.u32 %v8406_v57, %v8404_v40  ;;  %v8461_v57 = vsel %vm595_vm2, %v8457_v45, %v8460_v28  ;;  %v15161_v45 = vld [vmem:[%s15289_s23 + $0x70] sm:$0xff]  }
 0x308   : > { %13692 = vmatprep.mubr.msk.bf16.mxu0 %vm1086_vm3, %v8342_v1  ;;  %v8405_v1 = vsel %vm595_vm2, %v8401_v3, %v8404_v40  ;;  %v15138_v40 = vld [vmem:[%s15289_s23 + $0xe0] sm:$0xff]   ;;  %v8476_v3 = vshrl.u32 %v17992_v4, 16 }
 0x309   : > { %v8412_v9 = vsel %vm595_vm2, %v8408_v12, %v8411_v27  ;;  %v8480_v12 = vshll.u32 %v16888_v14, 16 }
 0x30d   : > { %13145 = vmatmul.mubr.msk.bf16.gmra.mrb[16].mxu1 %vm1086_vm3, %v15121_v51  ;;  %v8425_v51 = vrot.slane %v8423_v46, 1 }
 0x30e   : > { %13148 = vmatprep.mubr.msk.bf16.mxu1 %vm1086_vm3, %v15122_v58  ;;  %v15132_v58 = vld [vmem:[%s15289_s23 + $0xb0] sm:$0xff]  }
 0x30f   : > { %13693 = vmatmul.mubr.msk.bf16.gmra.mrb[76].mxu0 %vm1086_vm3, %v8349_v24  ;;  %v15131_v24 = vld [vmem:[%s15289_s23 + $0xa8] sm:$0xff]   ;;  %v8429_v59 = vor.u32 %v8427_v36, %v8425_v51  ;;  %v15143_v36 = vld [vmem:[%s15289_s23 + $0xf8] sm:$0xff]  }
 0x310   : > { %13696 = vmatprep.mubr.msk.bf16.mxu0 %vm1086_vm3, %v8356_v37  ;;  %v8426_v37 = vsel %vm595_vm2, %v8422_v7, %v8425_v51  ;;  %v8484_v7 = vshrl.u32 %v16888_v14, 16  ;;  %v9319_v51 = vrot.slane %v12086_v2, 1  ;;  %v17029_v2 = vld [vmem:[%s15289_s23 + $0x170] sm:$0xff]  }
 0x315   : > { %13149 = vmatmul.mubr.msk.bf16.gmra.mrb[20].mxu1 %vm1086_vm3, %v15123_v56  ;;  %v15133_v56 = vld [vmem:[%s15289_s23 + $0xb8] sm:$0xff]  }
 0x316   : > { %13152 = vmatprep.mubr.msk.bf16.mxu1 %vm1086_vm3, %v15124_v17  ;;  %v8440_v17 = vsel %vm595_vm2, %v8436_v8, %v8439_v30  ;;  %v16927_v8 = vld [vmem:[%s15289_s23 + $0x108] sm:$0xff]  }
 0x317   : > { %13697 = vmatmul.mubr.msk.bf16.gmra.mrb[80].mxu0 %vm1086_vm3, %v8363_v21  ;;  %v8433_v21 = vsel %vm595_vm2, %v8429_v59, %v8432_v15  ;;  %v15146_v15 = vld [vmem:[%s15289_s23 + $0x38] sm:$0xff]  }
 0x318   : > { %13700 = vmatprep.mubr.msk.bf16.mxu0 %vm1086_vm3, %v8370_v23  ;;  %v8448_v23 = vshrl.u32 %v17988_v63, 16  ;;  %v9324_v59 = vrot.slane %v15146_v15, 1  ;;  %v16933_v63 = vld [vmem:[%s15289_s23 + $0x110] sm:$0xff]  }
 0x319   : > { %v15177_v15 = vld [vmem:[%s15289_s23 + $0xb0] sm:$0xff]  }
 0x31a   : > { %v8450_v29 = vor.u32 %v8448_v23, %v8446_v44  ;;  %v9325_v50 = vsel %vm2433_vm4, %v9322_v47, %v9324_v59 }
 0x31d   : > { %13153 = vmatmul.mubr.msk.bf16.gmra.mrb[24].mxu1 %vm1086_vm3, %v15125_v26  ;;  %v15135_v26 = vld [vmem:[%s15289_s23 + $0xc8] sm:$0xff]  }
 0x31e   : > { %13156 = vmatprep.mubr.msk.bf16.mxu1 %vm1086_vm3, %v15126_v35  ;;  %v15136_v35 = vld [vmem:[%s15289_s23 + $0xd0] sm:$0xff]  }
 0x31f   : > { %13701 = vmatmul.mubr.msk.bf16.gmra.mrb[84].mxu0 %vm1086_vm3, %v8377_v42  ;;  %v8447_v42 = vsel %vm595_vm2, %v8443_v49, %v8446_v44  ;;  %v15153_v44 = vld [vmem:[%s15289_s23 + $0x50] sm:$0xff]  }
 0x320   : > { %13704 = vmatprep.mubr.msk.bf16.mxu0 %vm1086_vm3, %v8384_v62  ;;  %v8454_v62 = vsel %vm595_vm2, %v8450_v29, %v8453_v0  ;;  %v9330_v49 = vrot.slane %v15153_v44, 1  ;;  %v15154_v29 = vld [vmem:[%s15289_s23 + $0x58] sm:$0xff]   ;;  %v15182_v44 = vld [vmem:[%s15289_s23 + $0xc8] sm:$0xff]  }
 0x321   : > { %v9332_v0 = vrot.slane %v15154_v29, 1  ;;  %v17071_v29 = vld [vmem:[%s15289_s23 + $0x198] sm:$0xff]  }
 0x325   : > { %13157 = vmatmul.mubr.msk.bf16.gmra.mrb[28].mxu1 %vm1086_vm3, %v15127_v43  ;;  %v8464_v43 = vor.u32 %v8462_v22, %v8460_v28 }
 0x326   : > { %13160 = vmatprep.mubr.msk.bf16.mxu1 %vm1086_vm3, %v15128_v18  ;;  %v8472_v18 = vshll.u32 %v17992_v4, 16 }
 0x327   : > { %13705 = vmatmul.mubr.msk.bf16.gmra.mrb[88].mxu0 %vm1086_vm3, %v8391_v52  ;;  %v8467_v52 = vrot.slane %v8465_v48, 1 }
 0x328   : > { %13708 = vmatprep.mubr.msk.bf16.mxu0 %vm1086_vm3, %v8398_v34  ;;  %v15137_v34 = vld [vmem:[%s15289_s23 + $0xd8] sm:$0xff]   ;;  %v8474_v27 = vrot.slane %v8472_v18, 1  ;;  %v16991_v18 = vld [vmem:[%s15289_s23 + $0x148] sm:$0xff]  }
 0x329   : > { %v8468_v19 = vsel %vm595_vm2, %v8464_v43, %v8467_v52  ;;  %v8471_v53 = vor.u32 %v8469_v33, %v8467_v52  ;;  %v9338_v43 = vrot.slane %v15161_v45, 1  ;;  %v15162_v52 = vld [vmem:[%s15289_s23 + $0x78] sm:$0xff]   ;;  %v17093_v45 = vld [vmem:[%s15289_s23 + $0x1b0] sm:$0xff]  }
 0x32a   : > { %v9340_v4 = vrot.slane %v15162_v52, 1  ;;  %v15189_v52 = vld [vmem:[%s15289_s23 + $0xe0] sm:$0xff]  }
 0x32c   : > { %v9341_v33 = vsel %vm2433_vm4, %v9338_v43, %v9340_v4 }
 0x32d   : > { %13161 = vmatmul.mubr.msk.bf16.gmra.mrb[32].mxu1 %vm1086_vm3, %v15129_v5  ;;  %v8478_v5 = vor.u32 %v8476_v3, %v8474_v27  ;;  %v15166_v3 = vld [vmem:[%s15289_s23 + $0x88] sm:$0xff]  }
 0x32e   : > { %13164 = vmatprep.mubr.msk.bf16.mxu1 %vm1086_vm3, %v15130_v60  ;;  %v15139_v60 = vld [vmem:[%s15289_s23 + $0xe8] sm:$0xff]  }
 0x32f   : > { %13709 = vmatmul.mubr.msk.bf16.gmra.mrb[92].mxu0 %vm1086_vm3, %v8405_v1  ;;  %v8482_v1 = vrot.slane %v8480_v12, 1  ;;  %v9344_v12 = vrot.slane %v15166_v3, 1  ;;  %v17109_v3 = vld [vmem:[%s15289_s23 + $0x1c0] sm:$0xff]  }
 0x330   : > { %13712 = vmatprep.mubr.msk.bf16.mxu0 %vm1086_vm3, %v8412_v9  ;;  %v8475_v9 = vsel %vm595_vm2, %v8471_v53, %v8474_v27  ;;  %v17007_v27 = vld [vmem:[%s15289_s23 + $0x158] sm:$0xff]  }
 0x331   : > { %v8483_v46 = vsel %vm595_vm2, %v8478_v5, %v8482_v1  ;;  %v17013_v5 = vld [vmem:[%s15289_s23 + $0x160] sm:$0xff]  }
 0x335   : > { %13165 = vmatmul.mubr.msk.bf16.gmra.mrb[36].mxu1 %vm1086_vm3, %v15131_v24  ;;  %v9320_v24 = vrot.slane %v15142_v38, 1 }
 0x336   : > { %13168 = vmatprep.mubr.msk.bf16.mxu1 %vm1086_vm3, %v15132_v58  ;;  %v16917_v58 = vld [vmem:[%s15289_s23 + $0x100] sm:$0xff]  }
 0x337   : > { %13713 = vmatmul.mubr.msk.bf16.gmra.mrb[96].mxu0 %vm1086_vm3, %v8419_v31  ;;  %v8486_v31 = vor.u32 %v8484_v7, %v8482_v1  ;;  %v9323_v30 = vsel %vm2433_vm4, %v9320_v24, %v9322_v47 }
 0x338   : > { %13716 = vmatprep.mubr.msk.bf16.mxu0 %vm1086_vm3, %v8426_v37  ;;  %v9321_v37 = vsel %vm2433_vm4, %v9319_v51, %v9320_v24  ;;  %v15173_v51 = vld [vmem:[%s15289_s23 + $0xa0] sm:$0xff]   ;;  %v15174_v24 = vld [vmem:[%s15289_s23 + $0xa8] sm:$0xff]  }
 0x339   : > { %v9350_v38 = vrot.slane %v15173_v51, 1  ;;  %v17127_v51 = vld [vmem:[%s15289_s23 + $0x1c8] sm:$0xff]  }
 0x33d   : > { %13169 = vmatmul.mubr.msk.bf16.gmra.mrb[40].mxu1 %vm1086_vm3, %v15133_v56  ;;  %v15149_v56 = vld [vmem:[%s15289_s23 + $0x40] sm:$0xff]  }
 0x33e   : > { %13172 = vmatprep.mubr.msk.bf16.mxu1 %vm1086_vm3, %v15134_v41  ;;  %v9328_v41 = vrot.slane %v15150_v54, 1  ;;  %v17061_v54 = vld [vmem:[%s15289_s23 + $0x190] sm:$0xff]  }
 0x33f   : > { %13717 = vmatmul.mubr.msk.bf16.gmra.mrb[100].mxu0 %vm1086_vm3, %v8433_v21  ;;  %v9326_v21 = vrot.slane %v15149_v56, 1  ;;  %v17055_v56 = vld [vmem:[%s15289_s23 + $0x188] sm:$0xff]  }
 0x340   : > { %13720 = vmatprep.mubr.msk.bf16.mxu0 %vm1086_vm3, %v8440_v17  ;;  %v16943_v17 = vld [vmem:[%s15289_s23 + $0x118] sm:$0xff]   ;;  %v9331_v32 = vsel %vm2433_vm4, %v9328_v41, %v9330_v49 }
 0x341   : > { %v9327_v23 = vsel %vm2433_vm4, %v9324_v59, %v9326_v21  ;;  %v9329_v16 = vsel %vm2433_vm4, %v9326_v21, %v9328_v41  ;;  %v9354_v59 = vrot.slane %v15177_v15, 1  ;;  %v15197_v15 = vld [vmem:[%s15289_s23 + $0x100] sm:$0xff]  }
 0x345   : > { %13173 = vmatmul.mubr.msk.bf16.gmra.mrb[44].mxu1 %vm1086_vm3, %v15135_v26  ;;  %v16965_v26 = vld [vmem:[%s15289_s23 + $0x130] sm:$0xff]  }
 0x346   : > { %13176 = vmatprep.mubr.msk.bf16.mxu1 %vm1086_vm3, %v15136_v35  ;;  %v9334_v35 = vrot.slane %v15157_v55, 1  ;;  %v15185_v55 = vld [vmem:[%s15289_s23 + $0xd0] sm:$0xff]  }
 0x347   : > { %13721 = vmatmul.mubr.msk.bf16.gmra.mrb[104].mxu0 %vm1086_vm3, %v8447_v42  ;;  %v9333_v42 = vsel %vm2433_vm4, %v9330_v49, %v9332_v0  ;;  %v9360_v49 = vrot.slane %v15182_v44, 1  ;;  %v17153_v44 = vld [vmem:[%s15289_s23 + $0x1d8] sm:$0xff]  }
 0x348   : > { %13724 = vmatprep.mubr.msk.bf16.mxu0 %vm1086_vm3, %v8454_v62  ;;  %v15158_v62 = vld [vmem:[%s15289_s23 + $0x68] sm:$0xff]   ;;  %v9335_v48 = vsel %vm2433_vm4, %v9332_v0, %v9334_v35 }
 0x349   : > { %v9336_v22 = vrot.slane %v15158_v62, 1  ;;  %v15186_v62 = vld [vmem:[%s15289_s23 + $0xd8] sm:$0xff]  }
 0x34b   : > { %v9337_v28 = vsel %vm2433_vm4, %v9334_v35, %v9336_v22  ;;  %v9362_v35 = vrot.slane %v15185_v55, 1  ;;  %v3494_v55 = vld [vmem:[%s15289_s23 + $0x1ec] sm:$0x7] }
 0x34d   : > { %13177 = vmatmul.mubr.msk.bf16.gmra.mrb[48].mxu1 %vm1086_vm3, %v15137_v34  ;;  %v9339_v34 = vsel %vm2433_vm4, %v9336_v22, %v9338_v43  ;;  %v9364_v22 = vrot.slane %v15186_v62, 1 }
 0x34e   : > { %13180 = vmatprep.mubr.msk.bf16.mxu1 %vm1086_vm3, %v15138_v40  ;;  %v15165_v40 = vld [vmem:[%s15289_s23 + $0x80] sm:$0xff]  }
 0x34f   : > { %13725 = vmatmul.mubr.msk.bf16.gmra.mrb[108].mxu0 %vm1086_vm3, %v8461_v57  ;;  %v16997_v57 = vld [vmem:[%s15289_s23 + $0x150] sm:$0xff]   ;;  %v9365_v43 = vsel %vm2433_vm4, %v9362_v35, %v9364_v22 }
 0x350   : > { %13728 = vmatprep.mubr.msk.bf16.mxu0 %vm1086_vm3, %v8468_v19  ;;  %v9342_v19 = vrot.slane %v15165_v40, 1  ;;  %v17103_v40 = vld [vmem:[%s15289_s23 + $0x1b8] sm:$0xff]  }
 0x352   : > { %v9343_v53 = vsel %vm2433_vm4, %v9340_v4, %v9342_v19  ;;  %v9345_v1 = vsel %vm2433_vm4, %v9342_v19, %v9344_v12  ;;  %v9366_v4 = vrot.slane %v15189_v52, 1 }
 0x354   : > { %v9367_v19 = vsel %vm2433_vm4, %v9364_v22, %v9366_v4 }
 0x355   : > { %13181 = vmatmul.mubr.msk.bf16.gmra.mrb[52].mxu1 %vm1086_vm3, %v15139_v60  ;;  %v9346_v60 = vrot.slane %v15169_v20, 1  ;;  %v15193_v20 = vld [vmem:[%s15289_s23 + $0xf0] sm:$0xff]  }
 0x356   : > { %13184 = vmatprep.mubr.msk.bf16.mxu1 %vm1086_vm3, %v15140_v25 }
 0x357   : > { %13729 = vmatmul.mubr.msk.bf16.gmra.mrb[112].mxu0 %vm1086_vm3, %v8475_v9  ;;  %v15170_v9 = vld [vmem:[%s15289_s23 + $0x98] sm:$0xff]   ;;  %v9347_v10 = vsel %vm2433_vm4, %v9344_v12, %v9346_v60 }
 0x358   : > { %13732 = vmatprep.mubr.msk.bf16.mxu0 %vm1086_vm3, %v8483_v46  ;;  %v9348_v25 = vrot.slane %v15170_v9, 1  ;;  %v17023_v46 = vld [vmem:[%s15289_s23 + $0x168] sm:$0xff]  }
 0x35a   : > { %v9349_v7 = vsel %vm2433_vm4, %v9346_v60, %v9348_v25  ;;  %v9370_v60 = vrot.slane %v15193_v20, 1  ;;  %v15203_v20 = vld [vmem:[%s15289_s23 + $0x118] sm:$0xff]  }
 0x35d   : > { %13185 = vmatmul.mubr.msk.bf16.gmra.mrb[56].mxu1 %vm1086_vm3, %v15143_v36  ;;  %v17039_v36 = vld [vmem:[%s15289_s23 + $0x178] sm:$0xff]  }
 0x35e   : > { %13188 = vmatprep.mubr.msk.bf16.mxu1 %vm1086_vm3, %v16917_v58 }
 0x35f   : > { %13733 = vmatmul.mubr.msk.bf16.gmra.mrb[116].mxu0 %vm1086_vm3, %v8486_v31  ;;  %v9352_v31 = vrot.slane %v15174_v24, 1  ;;  %v17133_v24 = vld [vmem:[%s15289_s23 + $0x1d0] sm:$0xff]  }
 0x360   : > { %13738 = vmatprep.mubr.msk.bf16.mxu0 %vm1086_vm3, %v9321_v37  ;;  %v9351_v37 = vsel %vm2433_vm4, %v9348_v25, %v9350_v38  ;;  %v15194_v25 = vld [vmem:[%s15289_s23 + $0xf8] sm:$0xff]  }
 0x361   : > { %v9353_v47 = vsel %vm2433_vm4, %v9350_v38, %v9352_v31  ;;  %v9355_v21 = vsel %vm2433_vm4, %v9352_v31, %v9354_v59 }
 0x365   : > { %13189 = vmatmul.mubr.msk.bf16.gmra.mrb[60].mxu1 %vm1086_vm3, %v16927_v8 }
 0x366   : > { %13192 = vmatprep.mubr.msk.bf16.mxu1 %vm1086_vm3, %v16933_v63 }
 0x367   : > { %13739 = vmatmul.mubr.msk.bf16.vlgmr.msra.gmra.mrb[0].mxu0 %vm1086_vm3, %v9323_v30  ;;  %v15178_v30 = vld [vmem:[%s15289_s23 + $0xb8] sm:$0xff]  }
 0x368   : > { %13742 = vmatprep.mubr.msk.bf16.mxu0 %vm1086_vm3, %v9325_v50  ;;  %v9356_v50 = vrot.slane %v15178_v30, 1 }
 0x36a   : > { %v9357_v41 = vsel %vm2433_vm4, %v9354_v59, %v9356_v50  ;;  %v9374_v59 = vrot.slane %v15197_v15, 1 }
 0x36d   : > { %13193 = vmatmul.mubr.msk.bf16.gmra.mrb[64].mxu1 %vm1086_vm3, %v16943_v17 }
 0x36e   : > { %13196 = vmatprep.mubr.msk.bf16.mxu1 %vm1086_vm3, %v16949_v39 }
 0x36f   : > { %13743 = vmatmul.mubr.msk.bf16.gmra.mrb[4].mxu0 %vm1086_vm3, %v9327_v23  ;;  %v15181_v23 = vld [vmem:[%s15289_s23 + $0xc0] sm:$0xff]  }
 0x370   : > { %13746 = vmatprep.mubr.msk.bf16.mxu0 %vm1086_vm3, %v9329_v16  ;;  %v9358_v16 = vrot.slane %v15181_v23, 1  ;;  %v4840_v23 = vshrl.u32 %v16917_v58, 16  ;;  %v17993_v58 = vld [vmem:[#allocation4_spill] sm:$0xff] }
 0x372   : > { %v9359_v0 = vsel %vm2433_vm4, %v9356_v50, %v9358_v16  ;;  %v15198_v50 = vld [vmem:[%s15289_s23 + $0x108] sm:$0xff]  }
 0x375   : > { %13197 = vmatmul.mubr.msk.bf16.gmra.mrb[68].mxu1 %vm1086_vm3, %v16959_v61 }
 0x376   : > { %13200 = vmatprep.mubr.msk.bf16.mxu1 %vm1086_vm3, %v16965_v26 }
 0x377   : > { %13747 = vmatmul.mubr.msk.bf16.gmra.mrb[8].mxu0 %vm1086_vm3, %v9331_v32  ;;  %v17077_v32 = vld [vmem:[%s15289_s23 + $0x1a0] sm:$0xff]  }
 0x378   : > { %13750 = vmatprep.mubr.msk.bf16.mxu0 %vm1086_vm3, %v9333_v42  ;;  %v9361_v42 = vsel %vm2433_vm4, %v9358_v16, %v9360_v49  ;;  %v4843_v16 = vshll.u32 %v16927_v8, 16 }
 0x37a   : > { %v4845_v62 = vrot.slane %v4843_v16, 1 }
 0x37d   : > { %13201 = vmatmul.mubr.msk.bf16.gmra.mrb[72].mxu1 %vm1086_vm3, %v16975_v11 }
 0x37e   : > { %13204 = vmatprep.mubr.msk.bf16.mxu1 %vm1086_vm3, %v16981_v6 }
 0x37f   : > { %13751 = vmatmul.mubr.msk.bf16.gmra.mrb[12].mxu0 %vm1086_vm3, %v9335_v48  ;;  %v17087_v48 = vld [vmem:[%s15289_s23 + $0x1a8] sm:$0xff]  }
 0x380   : > { %13754 = vmatprep.mubr.msk.bf16.mxu0 %vm1086_vm3, %v9337_v28  ;;  %v9363_v28 = vsel %vm2433_vm4, %v9360_v49, %v9362_v35  ;;  %v4842_v35 = vor.u32 %v4840_v23, %v17993_v58 }
 0x385   : > { %13205 = vmatmul.mubr.msk.bf16.gmra.mrb[76].mxu1 %vm1086_vm3, %v16991_v18 }
 0x386   : > { %13208 = vmatprep.mubr.msk.bf16.mxu1 %vm1086_vm3, %v16997_v57 }
 0x387   : > { %13755 = vmatmul.mubr.msk.bf16.gmra.mrb[16].mxu0 %vm1086_vm3, %v9339_v34  ;;  %v15190_v34 = vld [vmem:[%s15289_s23 + $0xe8] sm:$0xff]  }
 0x388   : > { %13758 = vmatprep.mubr.msk.bf16.mxu0 %vm1086_vm3, %v9341_v33  ;;  %v9368_v33 = vrot.slane %v15190_v34, 1 }
 0x38a   : > { %v9369_v12 = vsel %vm2433_vm4, %v9366_v4, %v9368_v33  ;;  %v9371_v38 = vsel %vm2433_vm4, %v9368_v33, %v9370_v60  ;;  %v15202_v4 = vld [vmem:[%s15289_s23 + $0x110] sm:$0xff]   ;;  %v4850_v33 = vshll.u32 %v16933_v63, 16 }
 0x38b   : > { %v9378_v34 = vrot.slane %v15202_v4, 1 }
 0x38d   : > { %13209 = vmatmul.mubr.msk.bf16.gmra.mrb[80].mxu1 %vm1086_vm3, %v17007_v27 }
 0x38e   : > { %13212 = vmatprep.mubr.msk.bf16.mxu1 %vm1086_vm3, %v17013_v5 }
 0x38f   : > { %13759 = vmatmul.mubr.msk.bf16.gmra.mrb[20].mxu0 %vm1086_vm3, %v9343_v53 }
 0x390   : > { %13762 = vmatprep.mubr.msk.bf16.mxu0 %vm1086_vm3, %v9345_v1 }
 0x395   : > { %13213 = vmatmul.mubr.msk.bf16.gmra.mrb[84].mxu1 %vm1086_vm3, %v17023_v46 }
 0x396   : > { %13216 = vmatprep.mubr.msk.bf16.mxu1 %vm1086_vm3, %v17029_v2 }
 0x397   : > { %13763 = vmatmul.mubr.msk.bf16.gmra.mrb[24].mxu0 %vm1086_vm3, %v9347_v10  ;;  %v9372_v10 = vrot.slane %v15194_v25, 1 }
 0x398   : > { %13766 = vmatprep.mubr.msk.bf16.mxu0 %vm1086_vm3, %v9349_v7 }
 0x399   : > { %v9373_v31 = vsel %vm2433_vm4, %v9370_v60, %v9372_v10  ;;  %v9375_v49 = vsel %vm2433_vm4, %v9372_v10, %v9374_v59  ;;  %v9380_v60 = vrot.slane %v15203_v20, 1  ;;  %v4846_v10 = vsel %vm595_vm2, %v4842_v35, %v4845_v62 }
 0x39d   : > { %13217 = vmatmul.mubr.msk.bf16.gmra.mrb[88].mxu1 %vm1086_vm3, %v17039_v36 }
 0x39e   : > { %13220 = vmatprep.mubr.msk.bf16.mxu1 %vm1086_vm3, %v17045_v13 }
 0x39f   : > { %13767 = vmatmul.mubr.msk.bf16.gmra.mrb[28].mxu0 %vm1086_vm3, %v9351_v37 }
 0x3a0   : > { %13770 = vmatprep.mubr.msk.bf16.mxu0 %vm1086_vm3, %v9353_v47 }
 0x3a5   : > { %13221 = vmatmul.mubr.msk.bf16.gmra.mrb[92].mxu1 %vm1086_vm3, %v17055_v56 }
 0x3a6   : > { %13224 = vmatprep.mubr.msk.bf16.mxu1 %vm1086_vm3, %v17061_v54 }
 0x3a7   : > { %13771 = vmatmul.mubr.msk.bf16.gmra.mrb[32].mxu0 %vm1086_vm3, %v9355_v21  ;;  %v9376_v21 = vrot.slane %v15198_v50, 1 }
 0x3a8   : > { %13774 = vmatprep.mubr.msk.bf16.mxu0 %vm1086_vm3, %v9357_v41 }
 0x3a9   : > { %v9379_v15 = vsel %vm2433_vm4, %v9376_v21, %v9378_v34 }
 0x3ad   : > { %13225 = vmatmul.mubr.msk.bf16.gmra.mrb[96].mxu1 %vm1086_vm3, %v17071_v29 }
 0x3ae   : > { %13228 = vmatprep.mubr.msk.bf16.mxu1 %vm1086_vm3, %v17077_v32 }
 0x3af   : > { %13775 = vmatmul.mubr.msk.bf16.gmra.mrb[36].mxu0 %vm1086_vm3, %v9359_v0  ;;  %v17159_v0 = vld [vmem:[%s15289_s23 + $0x1e0] sm:$0xff]  }
 0x3b0   : > { %13778 = vmatprep.mubr.msk.bf16.mxu0 %vm1086_vm3, %v9361_v42  ;;  %v9377_v42 = vsel %vm2433_vm4, %v9374_v59, %v9376_v21  ;;  %v4852_v59 = vrot.slane %v4850_v33, 1  ;;  %v4864_v21 = vshll.u32 %v16949_v39, 16  ;;  %v4868_v33 = vshrl.u32 %v16949_v39, 16 }
 0x3b5   : > { %13229 = vmatmul.mubr.msk.bf16.gmra.mrb[100].mxu1 %vm1086_vm3, %v17087_v48 }
 0x3b6   : > { %13232 = vmatprep.mubr.msk.bf16.mxu1 %vm1086_vm3, %v17093_v45 }
 0x3b7   : > { %13779 = vmatmul.mubr.msk.bf16.gmra.mrb[40].mxu0 %vm1086_vm3, %v9363_v28 }
 0x3b8   : > { %13782 = vmatprep.mubr.msk.bf16.mxu0 %vm1086_vm3, %v9365_v43  ;;  %v15201_v43 = vld [vmem:[%s15289_s23 + $0x1e8] sm:$0xf] }
 0x3b9   : > { %v11717_v52 = vcombine.low %v15201_v43, %v3494_v55 }
 0x3bd   : > { %13233 = vmatmul.mubr.msk.bf16.gmra.mrb[104].mxu1 %vm1086_vm3, %v17103_v40 }
 0x3be   : > { %13236 = vmatprep.mubr.msk.bf16.mxu1 %vm1086_vm3, %v17109_v3 }
 0x3bf   : > { %13783 = vmatmul.mubr.msk.bf16.gmra.mrb[44].mxu0 %vm1086_vm3, %v9367_v19 }
 0x3c0   : > { %v17115_v53 = vpop.f32.mrb[0].mxu1  ;;  %13786 = vmatprep.mubr.msk.bf16.mxu0 %vm1086_vm3, %v9369_v12  ;;  %v4847_v12 = vshrl.u32 %v16927_v8, 16  ;;  %v9381_v8 = vsel %vm2433_vm4, %v9378_v34, %v9380_v60 }
 0x3c1   : > { %v17117_v1 = vpop.f32.mrb[1].mxu1 }
 0x3c2   : > { %v17121_v9 = vpop.f32.mrb[2].mxu1  ;;  %v4849_v50 = vor.u32 %v4847_v12, %v4845_v62  ;;  %v15205_v62 = vld [vmem:[%s15289_s23 + $0x128] sm:$0xff]   ;;  %v4871_v12 = vshll.u32 %v16959_v61, 16 }
 0x3c3   : > { %v17124_v7 = vpop.f32.mrb[3].mxu1  ;;  %v9384_v43 = vrot.slane %v15205_v62, 1 }
 0x3c4   : > { %v4853_v35 = vsel %vm595_vm2, %v4849_v50, %v4852_v59  ;;  %v15206_v50 = vld [vmem:[%s15289_s23 + $0x130] sm:$0xff]  }
 0x3c5   : > { %13237 = vmatmul.mubr.msk.bf16.gmra.mrb[108].mxu1 %vm1086_vm3, %v17127_v51 }
 0x3c6   : > { %13240 = vmatprep.mubr.msk.bf16.mxu1 %vm1086_vm3, %v17133_v24 }
 0x3c7   : > { %13787 = vmatmul.mubr.msk.bf16.gmra.mrb[48].mxu0 %vm1086_vm3, %v9371_v38  ;;  %v4854_v38 = vshrl.u32 %v16933_v63, 16 }
 0x3c8   : > { %v17139_v37 = vpop.f32.mrb[4].mxu1  ;;  %13790 = vmatprep.mubr.msk.bf16.mxu0 %vm1086_vm3, %v9373_v31  ;;  %v4857_v31 = vshll.u32 %v16943_v17, 16 }
 0x3c9   : > { %v17141_v47 = vpop.f32.mrb[5].mxu1  ;;  %v4856_v23 = vor.u32 %v4854_v38, %v4852_v59 }
 0x3ca   : > { %v17145_v30 = vpop.f32.mrb[6].mxu1  ;;  %v4859_v16 = vrot.slane %v4857_v31, 1 }
 0x3cb   : > { %v17148_v41 = vpop.f32.mrb[7].mxu1 }
 0x3cc   : > { %v4860_v34 = vsel %vm595_vm2, %v4856_v23, %v4859_v16 }
 0x3cd   : > { %13241 = vmatmul.mubr.msk.bf16.gmra.mrb[112].mxu1 %vm1086_vm3, %v17153_v44 }
 0x3ce   : > { %13244 = vmatprep.mubr.msk.bf16.mxu1 %vm1086_vm3, %v17159_v0 }
 0x3cf   : > { %13791 = vmatmul.mubr.msk.bf16.gmra.mrb[52].mxu0 %vm1086_vm3, %v9375_v49 }
 0x3d0   : > { %v17167_v22 = vpop.f32.mrb[8].mxu1  ;;  %13794 = vmatprep.mubr.msk.bf16.mxu0 %vm1086_vm3, %v9377_v42  ;;  %v15204_v42 = vld [vmem:[%s15289_s23 + $0x120] sm:$0xff]  }
 0x3d1   : > { %v17169_v28 = vpop.f32.mrb[9].mxu1  ;;  %v9382_v55 = vrot.slane %v15204_v42, 1 }
 0x3d2   : > { %v17175_v19 = vpop.f32.mrb[10].mxu1 }
 0x3d3   : > { %v17179_v25 = vpop.f32.mrb[11].mxu1  ;;  %v9383_v20 = vsel %vm2433_vm4, %v9380_v60, %v9382_v55  ;;  %v9385_v38 = vsel %vm2433_vm4, %v9382_v55, %v9384_v43  ;;  %v4878_v60 = vshll.u32 %v16965_v26, 16  ;;  %v15207_v55 = vld [vmem:[%s15289_s23 + $0x138] sm:$0xff]  }
 0x3d5   : > { %13245 = vmatmul.mubr.msk.bf16.gmra.mrb[116].mxu1 %vm1086_vm3, %v11717_v52  ;;  %v4861_v52 = vshrl.u32 %v16943_v17, 16 }
 0x3d6   : > { %13310 = vmatprep.mubr.msk.bf16.mxu1 %vm1086_vm3, %v4846_v10  ;;  %v4866_v10 = vrot.slane %v4864_v21, 1  ;;  %v4875_v21 = vshrl.u32 %v16959_v61, 16 }
 0x3d7   : > { %13795 = vmatmul.mubr.msk.bf16.gmra.mrb[56].mxu0 %vm1086_vm3, %v9379_v15  ;;  %v4863_v17 = vor.u32 %v4861_v52, %v4859_v16  ;;  %v4873_v15 = vrot.slane %v4871_v12, 1  ;;  %v9388_v16 = vrot.slane %v15207_v55, 1  ;;  %v4882_v52 = vshrl.u32 %v16965_v26, 16 }
 0x3d8   : > { %v17189_v49 = vpop.f32.mrb[12].mxu1  ;;  %13798 = vmatprep.mubr.msk.bf16.mxu0 %vm1086_vm3, %v9381_v8  ;;  %v4870_v31 = vor.u32 %v4868_v33, %v4866_v10  ;;  %v9386_v8 = vrot.slane %v15206_v50, 1  ;;  %v4880_v12 = vrot.slane %v4878_v60, 1  ;;  %v4889_v55 = vshrl.u32 %v16975_v11, 16 }
 0x3d9   : > { %v17191_v63 = vpop.f32.mrb[13].mxu1  ;;  %v4867_v42 = vsel %vm595_vm2, %v4863_v17, %v4866_v10  ;;  %v4877_v61 = vor.u32 %v4875_v21, %v4873_v15 }
 0x3da   : > { %v17196_v58 = vpop.f32.mrb[14].mxu1  ;;  %v4874_v62 = vsel %vm595_vm2, %v4870_v31, %v4873_v15  ;;  %v9387_v33 = vsel %vm2433_vm4, %v9384_v43, %v9386_v8  ;;  %v4884_v10 = vor.u32 %v4882_v52, %v4880_v12  ;;  %v15208_v31 = vld [vmem:[%s15289_s23 + $0x140] sm:$0xff]   ;;  %v4892_v43 = vshll.u32 %v16981_v6, 16 }
 0x3db   : > { %v17201_v4 = vpop.f32.mrb[15].mxu1  ;;  %v9390_v50 = vrot.slane %v15208_v31, 1  ;;  %v4896_v52 = vshrl.u32 %v16981_v6, 16 }
 0x3dd   : > { %13311 = vmatmul.mubr.msk.bf16.vlgmr.msra.gmra.mrb[60].mxu1 %vm1086_vm3, %v4853_v35 }
 0x3de   : > { %13314 = vmatprep.mubr.msk.bf16.mxu1 %vm1086_vm3, %v4860_v34  ;;  %v4885_v34 = vshll.u32 %v16975_v11, 16 }
 0x3df   : > { %13799 = vmatmul.mubr.msk.bf16.gmra.mrb[60].mxu0 %vm1086_vm3, %v9383_v20  ;;  %v9389_v20 = vsel %vm2433_vm4, %v9386_v8, %v9388_v16  ;;  %v15209_v8 = vld [vmem:[%s15289_s23 + $0x148] sm:$0xff]  }
 0x3e0   : > { %v17211_v59 = vpop.f32.mrb[16].mxu1  ;;  %13802 = vmatprep.mubr.msk.bf16.mxu0 %vm1086_vm3, %v9385_v38  ;;  %v4887_v38 = vrot.slane %v4885_v34, 1  ;;  %v9392_v15 = vrot.slane %v15209_v8, 1  ;;  %v4899_v34 = vshll.u32 %v16991_v18, 16 }
 0x3e1   : > { %v17213_v39 = vpop.f32.mrb[17].mxu1 }
 0x3e2   : > { %v17218_v23 = vpop.f32.mrb[18].mxu1  ;;  %v4891_v11 = vor.u32 %v4889_v55, %v4887_v38  ;;  %v4901_v31 = vrot.slane %v4899_v34, 1  ;;  %v4903_v55 = vshrl.u32 %v16991_v18, 16 }
 0x3e3   : > { %v17223_v35 = vpop.f32.mrb[19].mxu1 }
 0x3e4   : > { %v4905_v18 = vor.u32 %v4903_v55, %v4901_v31  ;;  %v4917_v55 = vshrl.u32 %v17007_v27, 16 }
 0x3e5   : > { %13315 = vmatmul.mubr.msk.bf16.gmra.mrb[64].mxu1 %vm1086_vm3, %v4867_v42  ;;  %v4881_v42 = vsel %vm595_vm2, %v4877_v61, %v4880_v12  ;;  %v9393_v12 = vsel %vm2433_vm4, %v9390_v50, %v9392_v15 }
 0x3e6   : > { %13318 = vmatprep.mubr.msk.bf16.mxu1 %vm1086_vm3, %v4874_v62  ;;  %v4888_v62 = vsel %vm595_vm2, %v4884_v10, %v4887_v38 }
 0x3e7   : > { %13803 = vmatmul.mubr.msk.bf16.gmra.mrb[64].mxu0 %vm1086_vm3, %v9387_v33  ;;  %v9391_v33 = vsel %vm2433_vm4, %v9388_v16, %v9390_v50  ;;  %v4906_v16 = vshll.u32 %v16997_v57, 16  ;;  %v15211_v50 = vld [vmem:[%s15289_s23 + $0x158] sm:$0xff]  }
 0x3e8   : > { %v17233_v17 = vpop.f32.mrb[20].mxu1  ;;  %13806 = vmatprep.mubr.msk.bf16.mxu0 %vm1086_vm3, %v9389_v20  ;;  %v4894_v20 = vrot.slane %v4892_v43, 1  ;;  %v9396_v38 = vrot.slane %v15211_v50, 1 }
 0x3e9   : > { %v17235_v26 = vpop.f32.mrb[21].mxu1 }
 0x3ea   : > { %v17240_v60 = vpop.f32.mrb[22].mxu1  ;;  %v4898_v61 = vor.u32 %v4896_v52, %v4894_v20 }
 0x3eb   : > { %v17245_v21 = vpop.f32.mrb[23].mxu1 }
 0x3ec   : > { %v4902_v34 = vsel %vm595_vm2, %v4898_v61, %v4901_v31 }
 0x3ed   : > { %13319 = vmatmul.mubr.msk.bf16.gmra.mrb[68].mxu1 %vm1086_vm3, %v4881_v42  ;;  %v15210_v42 = vld [vmem:[%s15289_s23 + $0x150] sm:$0xff]  }
 0x3ee   : > { %13322 = vmatprep.mubr.msk.bf16.mxu1 %vm1086_vm3, %v4888_v62  ;;  %v9394_v8 = vrot.slane %v15210_v42, 1  ;;  %v4895_v62 = vsel %vm595_vm2, %v4891_v11, %v4894_v20 }
 0x3ef   : > { %13807 = vmatmul.mubr.msk.bf16.gmra.mrb[68].mxu0 %vm1086_vm3, %v9391_v33  ;;  %v4910_v33 = vshrl.u32 %v16997_v57, 16 }
 0x3f0   : > { %v17255_v10 = vpop.f32.mrb[24].mxu1  ;;  %13810 = vmatprep.mubr.msk.bf16.mxu0 %vm1086_vm3, %v9393_v12  ;;  %v4913_v12 = vshll.u32 %v17007_v27, 16  ;;  %v9395_v42 = vsel %vm2433_vm4, %v9392_v15, %v9394_v8  ;;  %v9397_v20 = vsel %vm2433_vm4, %v9394_v8, %v9396_v38  ;;  %v4920_v15 = vshll.u32 %v17013_v5, 16  ;;  %v15213_v8 = vld [vmem:[%s15289_s23 + $0x168] sm:$0xff]  }
 0x3f1   : > { %v17257_v6 = vpop.f32.mrb[25].mxu1  ;;  %v9400_v31 = vrot.slane %v15213_v8, 1 }
 0x3f2   : > { %v17262_v43 = vpop.f32.mrb[26].mxu1  ;;  %v4915_v50 = vrot.slane %v4913_v12, 1 }
 0x3f3   : > { %17994 = vst [vmem:[#allocation7_spill] sm:$0xff] %v17262_v43  ;;  %v17267_v52 = vpop.f32.mrb[27].mxu1  ;;  %v4908_v43 = vrot.slane %v4906_v16, 1 }
 0x3f4   : > { %17995 = vst [vmem:[#allocation8_spill] sm:$0xff] %v17267_v52  ;;  %v4919_v27 = vor.u32 %v4917_v55, %v4915_v50  ;;  %v4931_v55 = vshrl.u32 %v17023_v46, 16 }
 0x3f5   : > { %13323 = vmatmul.mubr.msk.bf16.gmra.mrb[72].mxu1 %vm1086_vm3, %v4895_v62  ;;  %v4912_v11 = vor.u32 %v4910_v33, %v4908_v43  ;;  %v15212_v62 = vld [vmem:[%s15289_s23 + $0x160] sm:$0xff]  }
 0x3f6   : > { %13326 = vmatprep.mubr.msk.bf16.mxu1 %vm1086_vm3, %v4902_v34  ;;  %v9398_v52 = vrot.slane %v15212_v62, 1  ;;  %v4909_v34 = vsel %vm595_vm2, %v4905_v18, %v4908_v43 }
 0x3f7   : > { %13811 = vmatmul.mubr.msk.bf16.gmra.mrb[72].mxu0 %vm1086_vm3, %v9395_v42  ;;  %v4916_v12 = vsel %vm595_vm2, %v4912_v11, %v4915_v50  ;;  %v4924_v42 = vshrl.u32 %v17013_v5, 16 }
 0x3f8   : > { %v17277_v61 = vpop.f32.mrb[28].mxu1  ;;  %13814 = vmatprep.mubr.msk.bf16.mxu0 %vm1086_vm3, %v9397_v20  ;;  %v4927_v20 = vshll.u32 %v17023_v46, 16  ;;  %v9399_v62 = vsel %vm2433_vm4, %v9396_v38, %v9398_v52  ;;  %v9401_v43 = vsel %vm2433_vm4, %v9398_v52, %v9400_v31  ;;  %v4934_v38 = vshll.u32 %v17029_v2, 16  ;;  %v15215_v52 = vld [vmem:[%s15289_s23 + $0x178] sm:$0xff]  }
 0x3f9   : > { %v17279_v57 = vpop.f32.mrb[29].mxu1  ;;  %v9404_v50 = vrot.slane %v15215_v52, 1 }
 0x3fa   : > { %v17284_v16 = vpop.f32.mrb[30].mxu1  ;;  %v4929_v8 = vrot.slane %v4927_v20, 1 }
 0x3fb   : > { %17996 = vst [vmem:[#allocation9_spill] sm:$0xff] %v17284_v16  ;;  %v17289_v33 = vpop.f32.mrb[31].mxu1  ;;  %v4922_v16 = vrot.slane %v4920_v15, 1 }
 0x3fc   : > { %17997 = vst [vmem:[#allocation10_spill] sm:$0xff] %v17289_v33  ;;  %v4933_v46 = vor.u32 %v4931_v55, %v4929_v8  ;;  %v4945_v55 = vshrl.u32 %v17039_v36, 16 }
 0x3fd   : > { %13327 = vmatmul.mubr.msk.bf16.gmra.mrb[76].mxu1 %vm1086_vm3, %v4909_v34  ;;  %v4926_v18 = vor.u32 %v4924_v42, %v4922_v16  ;;  %v15214_v34 = vld [vmem:[%s15289_s23 + $0x170] sm:$0xff]  }
 0x3fe   : > { %13330 = vmatprep.mubr.msk.bf16.mxu1 %vm1086_vm3, %v4916_v12  ;;  %v9402_v33 = vrot.slane %v15214_v34, 1  ;;  %v4923_v12 = vsel %vm595_vm2, %v4919_v27, %v4922_v16 }
 0x3ff   : > { %13815 = vmatmul.mubr.msk.bf16.gmra.mrb[76].mxu0 %vm1086_vm3, %v9399_v62  ;;  %v4930_v20 = vsel %vm595_vm2, %v4926_v18, %v4929_v8  ;;  %v4938_v62 = vshrl.u32 %v17029_v2, 16 }
 0x400   : > { %v17299_v11 = vpop.f32.mrb[32].mxu1  ;;  %13818 = vmatprep.mubr.msk.bf16.mxu0 %vm1086_vm3, %v9401_v43  ;;  %v4941_v43 = vshll.u32 %v17039_v36, 16  ;;  %v9403_v34 = vsel %vm2433_vm4, %v9400_v31, %v9402_v33  ;;  %v9405_v16 = vsel %vm2433_vm4, %v9402_v33, %v9404_v50  ;;  %v4948_v31 = vshll.u32 %v17045_v13, 16  ;;  %v15217_v33 = vld [vmem:[%s15289_s23 + $0x188] sm:$0xff]  }
 0x401   : > { %v17301_v5 = vpop.f32.mrb[33].mxu1  ;;  %v9408_v8 = vrot.slane %v15217_v33, 1 }
 0x402   : > { %v17306_v15 = vpop.f32.mrb[34].mxu1  ;;  %v4943_v52 = vrot.slane %v4941_v43, 1 }
 0x403   : > { %17998 = vst [vmem:[#allocation11_spill] sm:$0xff] %v17306_v15  ;;  %v17311_v42 = vpop.f32.mrb[35].mxu1  ;;  %v4936_v15 = vrot.slane %v4934_v38, 1 }
 0x404   : > { %17999 = vst [vmem:[#allocation12_spill] sm:$0xff] %v17311_v42  ;;  %v4947_v36 = vor.u32 %v4945_v55, %v4943_v52  ;;  %v4959_v55 = vshrl.u32 %v17055_v56, 16 }
 0x405   : > { %13331 = vmatmul.mubr.msk.bf16.gmra.mrb[80].mxu1 %vm1086_vm3, %v4923_v12  ;;  %v4940_v27 = vor.u32 %v4938_v62, %v4936_v15  ;;  %v15216_v12 = vld [vmem:[%s15289_s23 + $0x180] sm:$0xff]  }
 0x406   : > { %13334 = vmatprep.mubr.msk.bf16.mxu1 %vm1086_vm3, %v4930_v20  ;;  %v9406_v42 = vrot.slane %v15216_v12, 1  ;;  %v4937_v20 = vsel %vm595_vm2, %v4933_v46, %v4936_v15 }
 0x407   : > { %13819 = vmatmul.mubr.msk.bf16.gmra.mrb[80].mxu0 %vm1086_vm3, %v9403_v34  ;;  %v4944_v43 = vsel %vm595_vm2, %v4940_v27, %v4943_v52  ;;  %v4952_v34 = vshrl.u32 %v17045_v13, 16 }
 0x408   : > { %v17321_v18 = vpop.f32.mrb[36].mxu1  ;;  %13822 = vmatprep.mubr.msk.bf16.mxu0 %vm1086_vm3, %v9405_v16  ;;  %v4955_v16 = vshll.u32 %v17055_v56, 16  ;;  %v9407_v12 = vsel %vm2433_vm4, %v9404_v50, %v9406_v42  ;;  %v9409_v15 = vsel %vm2433_vm4, %v9406_v42, %v9408_v8  ;;  %v4962_v50 = vshll.u32 %v17061_v54, 16  ;;  %v15219_v42 = vld [vmem:[%s15289_s23 + $0x198] sm:$0xff]  }
 0x409   : > { %v17323_v2 = vpop.f32.mrb[37].mxu1  ;;  %v9412_v52 = vrot.slane %v15219_v42, 1 }
 0x40a   : > { %v17328_v38 = vpop.f32.mrb[38].mxu1  ;;  %v4957_v33 = vrot.slane %v4955_v16, 1 }
 0x40b   : > { %18000 = vst [vmem:[#allocation13_spill] sm:$0xff] %v17328_v38  ;;  %v17333_v62 = vpop.f32.mrb[39].mxu1  ;;  %v4950_v38 = vrot.slane %v4948_v31, 1 }
 0x40c   : > { %18001 = vst [vmem:[#allocation14_spill] sm:$0xff] %v17333_v62  ;;  %v4961_v56 = vor.u32 %v4959_v55, %v4957_v33  ;;  %v4973_v55 = vshrl.u32 %v17071_v29, 16 }
 0x40d   : > { %13335 = vmatmul.mubr.msk.bf16.gmra.mrb[84].mxu1 %vm1086_vm3, %v4937_v20  ;;  %v4954_v46 = vor.u32 %v4952_v34, %v4950_v38  ;;  %v15218_v20 = vld [vmem:[%s15289_s23 + $0x190] sm:$0xff]  }
 0x40e   : > { %13338 = vmatprep.mubr.msk.bf16.mxu1 %vm1086_vm3, %v4944_v43  ;;  %v9410_v62 = vrot.slane %v15218_v20, 1  ;;  %v4951_v43 = vsel %vm595_vm2, %v4947_v36, %v4950_v38 }
 0x40f   : > { %13823 = vmatmul.mubr.msk.bf16.gmra.mrb[84].mxu0 %vm1086_vm3, %v9407_v12  ;;  %v4958_v16 = vsel %vm595_vm2, %v4954_v46, %v4957_v33  ;;  %v4966_v12 = vshrl.u32 %v17061_v54, 16 }
 0x410   : > { %v17343_v27 = vpop.f32.mrb[40].mxu1  ;;  %13826 = vmatprep.mubr.msk.bf16.mxu0 %vm1086_vm3, %v9409_v15  ;;  %v4969_v15 = vshll.u32 %v17071_v29, 16  ;;  %v9411_v20 = vsel %vm2433_vm4, %v9408_v8, %v9410_v62  ;;  %v9413_v38 = vsel %vm2433_vm4, %v9410_v62, %v9412_v52  ;;  %v4976_v8 = vshll.u32 %v17077_v32, 16  ;;  %v15221_v62 = vld [vmem:[%s15289_s23 + $0x1a8] sm:$0xff]  }
 0x411   : > { %v17345_v13 = vpop.f32.mrb[41].mxu1  ;;  %v9416_v33 = vrot.slane %v15221_v62, 1 }
 0x412   : > { %v17350_v31 = vpop.f32.mrb[42].mxu1  ;;  %v4971_v42 = vrot.slane %v4969_v15, 1 }
 0x413   : > { %18002 = vst [vmem:[#allocation15_spill] sm:$0xff] %v17350_v31  ;;  %v17355_v34 = vpop.f32.mrb[43].mxu1  ;;  %v4964_v31 = vrot.slane %v4962_v50, 1 }
 0x414   : > { %18003 = vst [vmem:[#allocation16_spill] sm:$0xff] %v17355_v34  ;;  %v4975_v29 = vor.u32 %v4973_v55, %v4971_v42  ;;  %v4987_v55 = vshrl.u32 %v17087_v48, 16 }
 0x415   : > { %13339 = vmatmul.mubr.msk.bf16.gmra.mrb[88].mxu1 %vm1086_vm3, %v4951_v43  ;;  %v4968_v36 = vor.u32 %v4966_v12, %v4964_v31  ;;  %v15220_v43 = vld [vmem:[%s15289_s23 + $0x1a0] sm:$0xff]  }
 0x416   : > { %13342 = vmatprep.mubr.msk.bf16.mxu1 %vm1086_vm3, %v4958_v16  ;;  %v9414_v34 = vrot.slane %v15220_v43, 1  ;;  %v4965_v16 = vsel %vm595_vm2, %v4961_v56, %v4964_v31 }
 0x417   : > { %13827 = vmatmul.mubr.msk.bf16.gmra.mrb[88].mxu0 %vm1086_vm3, %v9411_v20  ;;  %v4972_v15 = vsel %vm595_vm2, %v4968_v36, %v4971_v42  ;;  %v4980_v20 = vshrl.u32 %v17077_v32, 16 }
 0x418   : > { %v17365_v46 = vpop.f32.mrb[44].mxu1  ;;  %13830 = vmatprep.mubr.msk.bf16.mxu0 %vm1086_vm3, %v9413_v38  ;;  %v4983_v38 = vshll.u32 %v17087_v48, 16  ;;  %v9415_v43 = vsel %vm2433_vm4, %v9412_v52, %v9414_v34  ;;  %v9417_v31 = vsel %vm2433_vm4, %v9414_v34, %v9416_v33  ;;  %v4990_v52 = vshll.u32 %v17093_v45, 16  ;;  %v15223_v34 = vld [vmem:[%s15289_s23 + $0x1b8] sm:$0xff]  }
 0x419   : > { %v17367_v54 = vpop.f32.mrb[45].mxu1  ;;  %v9420_v42 = vrot.slane %v15223_v34, 1 }
 0x41a   : > { %v17372_v50 = vpop.f32.mrb[46].mxu1  ;;  %v4985_v62 = vrot.slane %v4983_v38, 1 }
 0x41b   : > { %18004 = vst [vmem:[#allocation17_spill] sm:$0xff] %v17372_v50  ;;  %v17377_v12 = vpop.f32.mrb[47].mxu1  ;;  %v4978_v50 = vrot.slane %v4976_v8, 1 }
 0x41c   : > { %18005 = vst [vmem:[#allocation18_spill] sm:$0xff] %v17377_v12  ;;  %v4989_v48 = vor.u32 %v4987_v55, %v4985_v62  ;;  %v5001_v55 = vshrl.u32 %v17103_v40, 16 }
 0x41d   : > { %13343 = vmatmul.mubr.msk.bf16.gmra.mrb[92].mxu1 %vm1086_vm3, %v4965_v16  ;;  %v4982_v56 = vor.u32 %v4980_v20, %v4978_v50  ;;  %v15222_v16 = vld [vmem:[%s15289_s23 + $0x1b0] sm:$0xff]  }
 0x41e   : > { %13346 = vmatprep.mubr.msk.bf16.mxu1 %vm1086_vm3, %v4972_v15  ;;  %v9418_v12 = vrot.slane %v15222_v16, 1  ;;  %v4979_v15 = vsel %vm595_vm2, %v4975_v29, %v4978_v50 }
 0x41f   : > { %13831 = vmatmul.mubr.msk.bf16.gmra.mrb[92].mxu0 %vm1086_vm3, %v9415_v43  ;;  %v4986_v38 = vsel %vm595_vm2, %v4982_v56, %v4985_v62  ;;  %v4994_v43 = vshrl.u32 %v17093_v45, 16 }
 0x420   : > { %v17387_v36 = vpop.f32.mrb[48].mxu1  ;;  %13834 = vmatprep.mubr.msk.bf16.mxu0 %vm1086_vm3, %v9417_v31  ;;  %v4997_v31 = vshll.u32 %v17103_v40, 16  ;;  %v9419_v16 = vsel %vm2433_vm4, %v9416_v33, %v9418_v12  ;;  %v9421_v50 = vsel %vm2433_vm4, %v9418_v12, %v9420_v42  ;;  %v5004_v33 = vshll.u32 %v17109_v3, 16  ;;  %v15225_v12 = vld [vmem:[%s15289_s23 + $0x1c8] sm:$0xff]  }
 0x421   : > { %v17389_v32 = vpop.f32.mrb[49].mxu1  ;;  %v9424_v62 = vrot.slane %v15225_v12, 1 }
 0x422   : > { %v17394_v8 = vpop.f32.mrb[50].mxu1  ;;  %v4999_v34 = vrot.slane %v4997_v31, 1 }
 0x423   : > { %18006 = vst [vmem:[#allocation19_spill] sm:$0xff] %v17394_v8  ;;  %v17399_v20 = vpop.f32.mrb[51].mxu1  ;;  %v4992_v8 = vrot.slane %v4990_v52, 1 }
 0x424   : > { %18007 = vst [vmem:[#allocation20_spill] sm:$0xff] %v17399_v20  ;;  %v5003_v40 = vor.u32 %v5001_v55, %v4999_v34  ;;  %v5015_v55 = vshrl.u32 %v17127_v51, 16 }
 0x425   : > { %13347 = vmatmul.mubr.msk.bf16.gmra.mrb[96].mxu1 %vm1086_vm3, %v4979_v15  ;;  %v4996_v29 = vor.u32 %v4994_v43, %v4992_v8  ;;  %v15224_v15 = vld [vmem:[%s15289_s23 + $0x1c0] sm:$0xff]  }
 0x426   : > { %13350 = vmatprep.mubr.msk.bf16.mxu1 %vm1086_vm3, %v4986_v38  ;;  %v9422_v20 = vrot.slane %v15224_v15, 1  ;;  %v4993_v38 = vsel %vm595_vm2, %v4989_v48, %v4992_v8 }
 0x427   : > { %13835 = vmatmul.mubr.msk.bf16.gmra.mrb[96].mxu0 %vm1086_vm3, %v9419_v16  ;;  %v5000_v31 = vsel %vm595_vm2, %v4996_v29, %v4999_v34  ;;  %v5008_v16 = vshrl.u32 %v17109_v3, 16 }
 0x428   : > { %v17409_v56 = vpop.f32.mrb[52].mxu1  ;;  %13838 = vmatprep.mubr.msk.bf16.mxu0 %vm1086_vm3, %v9421_v50  ;;  %v5011_v50 = vshll.u32 %v17127_v51, 16  ;;  %v9423_v15 = vsel %vm2433_vm4, %v9420_v42, %v9422_v20  ;;  %v9425_v8 = vsel %vm2433_vm4, %v9422_v20, %v9424_v62  ;;  %v5018_v42 = vshll.u32 %v17133_v24, 16  ;;  %v15227_v20 = vld [vmem:[%s15289_s23 + $0x1d8] sm:$0xff]  }
 0x429   : > { %v17411_v45 = vpop.f32.mrb[53].mxu1  ;;  %v9428_v34 = vrot.slane %v15227_v20, 1 }
 0x42a   : > { %18008 = vst [vmem:[#allocation21_spill] sm:$0xff] %v17411_v45  ;;  %v17416_v52 = vpop.f32.mrb[54].mxu1  ;;  %v5013_v12 = vrot.slane %v5011_v50, 1 }
 0x42b   : > { %18009 = vst [vmem:[#allocation22_spill] sm:$0xff] %v17416_v52  ;;  %v17421_v43 = vpop.f32.mrb[55].mxu1  ;;  %v5006_v52 = vrot.slane %v5004_v33, 1 }
 0x42c   : > { %18010 = vst [vmem:[#allocation23_spill] sm:$0xff] %v17421_v43 }
 0x42d   : > { %13351 = vmatmul.mubr.msk.bf16.gmra.mrb[100].mxu1 %vm1086_vm3, %v4993_v38  ;;  %v5010_v48 = vor.u32 %v5008_v16, %v5006_v52  ;;  %v15226_v38 = vld [vmem:[%s15289_s23 + $0x1d0] sm:$0xff]  }
 0x42e   : > { %13354 = vmatprep.mubr.msk.bf16.mxu1 %vm1086_vm3, %v5000_v31  ;;  %v9426_v43 = vrot.slane %v15226_v38, 1  ;;  %v5007_v31 = vsel %vm595_vm2, %v5003_v40, %v5006_v52  ;;  %v5017_v40 = vor.u32 %v5015_v55, %v5013_v12  ;;  %v5036_v55 = vshrl.u32 %v17159_v0, 16 }
 0x42f   : > { %13839 = vmatmul.mubr.msk.bf16.gmra.mrb[100].mxu0 %vm1086_vm3, %v9423_v15  ;;  %v5014_v50 = vsel %vm595_vm2, %v5010_v48, %v5013_v12  ;;  %v5022_v15 = vshrl.u32 %v17133_v24, 16  ;;  %v15228_v24 = vld [vmem:[%s15289_s23 + $0x1e0] sm:$0xff]  }
 0x430   : > { %v17431_v29 = vpop.f32.mrb[56].mxu1  ;;  %13842 = vmatprep.mubr.msk.bf16.mxu0 %vm1086_vm3, %v9425_v8  ;;  %v5025_v8 = vshll.u32 %v17153_v44, 16  ;;  %v9427_v38 = vsel %vm2433_vm4, %v9424_v62, %v9426_v43  ;;  %v9429_v52 = vsel %vm2433_vm4, %v9426_v43, %v9428_v34  ;;  %v9430_v48 = vrot.slane %v15228_v24, 1  ;;  %v17462_v43 = vld [vmem:[%s17885_s2] ss:$0 sm:$0xff] }
 0x431   : > { %18011 = vst [vmem:[#allocation24_spill] sm:$0xff] %v17431_v29  ;;  %v17433_v3 = vpop.f32.mrb[57].mxu1 }
 0x432   : > { %18012 = vst [vmem:[#allocation25_spill] sm:$0xff] %v17433_v3  ;;  %v17438_v33 = vpop.f32.mrb[58].mxu1  ;;  %v5027_v20 = vrot.slane %v5025_v8, 1  ;;  %v15229_v3 = vld [vmem:[%s15289_s23 + $0x1e8] sm:$0xff]  }
 0x433   : > { %18013 = vst [vmem:[#allocation26_spill] sm:$0xff] %v17438_v33  ;;  %v17443_v16 = vpop.f32.mrb[59].mxu1  ;;  %v5020_v33 = vrot.slane %v5018_v42, 1  ;;  %v9432_v62 = vrot.slane %v15229_v3, 1  ;;  %v5029_v42 = vshrl.u32 %v17153_v44, 16  ;;  %v9431_v44 = vsel %vm2433_vm4, %v9428_v34, %v9430_v48 }
 0x434   : > { %18014 = vst [vmem:[#allocation5_spill] sm:$0xff] %v17443_v16  ;;  %v5032_v16 = vshll.u32 %v17159_v0, 16 }
 0x435   : > { %13355 = vmatmul.mubr.msk.bf16.gmra.mrb[104].mxu1 %vm1086_vm3, %v5007_v31  ;;  %v5024_v51 = vor.u32 %v5022_v15, %v5020_v33  ;;  %v5021_v31 = vsel %vm595_vm2, %v5017_v40, %v5020_v33  ;;  %v18015_v15 = vld [vmem:[#allocation6_spill] sm:$0xff]  ;;  %v9433_v0 = vsel %vm2433_vm4, %v9430_v48, %v9432_v62 }
 0x436   : > { %13358 = vmatprep.mubr.msk.bf16.mxu1 %vm1086_vm3, %v5014_v50  ;;  %v5040_v8 = vshll.u32 %v18015_v15, 16  ;;  %v5034_v40 = vrot.slane %v5032_v16, 1 }
 0x437   : > { %13843 = vmatmul.mubr.msk.bf16.gmra.mrb[104].mxu0 %vm1086_vm3, %v9427_v38  ;;  %v5028_v12 = vsel %vm595_vm2, %v5024_v51, %v5027_v20 }
 0x438   : > { %13846 = vmatprep.mubr.msk.bf16.mxu0 %vm1086_vm3, %v9429_v52 }
 0x43a   : > { %v13740_v50 = vpop.f32.mrb[0].mxu0 }
 0x43b   : > { %v13860_v38 = vadd.f32 %v13740_v50, %v17115_v53  ;;  %v9655_v52 = vpop.f32.mrb[1].mxu0  ;;  %v5031_v53 = vor.u32 %v5029_v42, %v5027_v20 }
 0x43c   : > { %v13861_v33 = vadd.f32 %v9655_v52, %v17117_v1  ;;  %v13741_v3 = vpop.f32.mrb[2].mxu0  ;;  %v5038_v52 = vor.u32 %v5036_v55, %v5034_v40 }
 0x43d   : > { %13359 = vmatmul.mubr.msk.bf16.gmra.mrb[108].mxu1 %vm1086_vm3, %v5021_v31  ;;  %v10263_v24 = vadd.f32 %v13860_v38, %v17462_v43  ;;  %v13862_v51 = vadd.f32 %v13741_v3, %v17121_v9  ;;  %v9658_v29 = vpop.f32.mrb[3].mxu0  ;;  %v5042_v31 = vrot.slane %v5040_v8, 1  ;;  %v5035_v48 = vsel %vm595_vm2, %v5031_v53, %v5034_v40 }
 0x43e   : > { %13362 = vmatprep.mubr.msk.bf16.mxu1 %vm1086_vm3, %v5028_v12  ;;  %v10261_v50 = vadd.f32 %v13861_v33, %v17462_v43  ;;  %v13863_v1 = vadd.f32 %v9658_v29, %v17124_v7  ;;  %v15230_v12 = vld [vmem:[%s15289_s23 + $0x1f0] sm:$0xff]   ;;  %v9436_v7 = vrot.slane %v16888_v14, 1  ;;  %v5044_v40 = vshrl.u32 %v18015_v15, 16 }
 0x43f   : > { %v10383_v45 = vmax.f32 %v10263_v24, 0.0  ;;  %v10264_v34 = vadd.f32 %v13862_v51, %v17462_v43  ;;  %13847 = vmatmul.mubr.msk.bf16.gmra.mrb[108].mxu0 %vm1086_vm3, %v9431_v44  ;;  %v9434_v38 = vrot.slane %v15230_v12, 1  ;;  %v5043_v55 = vsel %vm595_vm2, %v5038_v52, %v5042_v31  ;;  %vm17588_vm2 = vmand %vm10745_vm13, %vm10758_vm14 }
 0x440   : > { %v10381_v16 = vmax.f32 %v10261_v50, 0.0  ;;  %v10262_v9 = vadd.f32 %v13863_v1, %v17462_v43  ;;  %13850 = vmatprep.mubr.msk.bf16.mxu0 %vm1086_vm3, %v9433_v0  ;;  %vm10852_vm14 = vcmask 1045508  }
 0x441   : > { %10503 = vst [vmem:[#allocation2 + $0x10] sm:$0xff] %v10383_v45  ;;  %v10384_v20 = vmax.f32 %v10264_v34, 0.0  ;;  %v9435_v45 = vsel %vm2433_vm4, %v9432_v62, %v9434_v38 }
 0x442   : > { %10501 = vst [vmem:[#allocation2] sm:$0xff] %v10381_v16  ;;  %v10382_v29 = vmax.f32 %v10262_v9, 0.0  ;;  %v13744_v42 = vpop.f32.mrb[4].mxu0 }
 0x443   : > { %10504 = vst [vmem:[#allocation2 + $0x18] sm:$0xff] %v10384_v20  ;;  %v13864_v8 = vadd.f32 %v13744_v42, %v17139_v37  ;;  %v9671_v33 = vpop.f32.mrb[5].mxu0  ;;  %v9437_v37 = vsel %vm2433_vm4, %v9434_v38, %v9436_v7  ;;  %vm10815_vm4 = vcmask 1043458  }
 0x444   : > { %10502 = vst [vmem:[#allocation2 + $0x8] sm:$0xff] %v10382_v29  ;;  %v13865_v3 = vadd.f32 %v9671_v33, %v17141_v47  ;;  %v13745_v44 = vpop.f32.mrb[6].mxu0  ;;  %vm17626_vm9 = vmand %vm10815_vm4, %vm10816_vm5  ;;  %vm10922_vm5 = vsmask.f32 7942 }
 0x445   : > { %13363 = vmatmul.mubr.msk.bf16.gmra.mrb[112].mxu1 %vm1086_vm3, %v5035_v48  ;;  %v10267_v14 = vadd.f32 %v13864_v8, %v17462_v43  ;;  %v13866_v24 = vadd.f32 %v13745_v44, %v17145_v30  ;;  %v9674_v51 = vpop.f32.mrb[7].mxu0  ;;  %v5046_v30 = vor.u32 %v5044_v40, %v5042_v31  ;;  %vm17666_vm4 = vmor %vm1268_vm1, %vm10852_vm14 }
 0x446   : > { %13366 = vmatprep.mubr.msk.bf16.mxu1 %vm1086_vm3, %v5043_v55  ;;  %v10265_v0 = vadd.f32 %v13865_v3, %v17462_v43  ;;  %v13867_v47 = vadd.f32 %v9674_v51, %v17148_v41 }
 0x447   : > { %v10387_v53 = vmax.f32 %v10267_v14, 0.0  ;;  %v10268_v50 = vadd.f32 %v13866_v24, %v17462_v43  ;;  %13851 = vmatmul.mubr.msk.bf16.gmra.mrb[112].mxu0 %vm1086_vm3, %v9435_v45 }
 0x448   : > { %v10385_v62 = vmax.f32 %v10265_v0, 0.0  ;;  %v10266_v15 = vadd.f32 %v13867_v47, %v17462_v43  ;;  %13854 = vmatprep.mubr.msk.bf16.mxu0 %vm1086_vm3, %v9437_v37 }
 0x449   : > { %10507 = vst [vmem:[#allocation2 + $0x30] sm:$0xff] %v10387_v53  ;;  %v10388_v1 = vmax.f32 %v10268_v50, 0.0 }
 0x44a   : > { %10505 = vst [vmem:[#allocation2 + $0x20] sm:$0xff] %v10385_v62  ;;  %v10386_v52 = vmax.f32 %v10266_v15, 0.0  ;;  %v13748_v34 = vpop.f32.mrb[8].mxu0  ;;  %v10623_v48 = vld [vmem:[#allocation2 + $0x10] ss:$2 sm:$0x7f] }
 0x44b   : > { %10508 = vst [vmem:[#allocation2 + $0x38] sm:$0xff] %v10388_v1  ;;  %v13868_v41 = vadd.f32 %v13748_v34, %v17167_v22  ;;  %v9687_v16 = vpop.f32.mrb[9].mxu0  ;;  %v10627_v22 = vld [vmem:[#allocation2 + $0x11] ss:$2 sm:$0x7f] }
 0x44c   : > { %10506 = vst [vmem:[#allocation2 + $0x28] sm:$0xff] %v10386_v52  ;;  %v13869_v9 = vadd.f32 %v9687_v16, %v17169_v28  ;;  %v13749_v12 = vpop.f32.mrb[10].mxu0  ;;  %v10621_v28 = vld [vmem:[#allocation2] ss:$2 sm:$0xff]  ;;  %v10625_v33 = vld [vmem:[#allocation2 + $0x1] ss:$2 sm:$0xff]  ;;  %v10629_v40 = vmax.f32 %v10623_v48, %v10627_v22 }
 0x44d   : > { %13367 = vmatmul.mubr.msk.bf16.gmra.mrb[116].mxu1 %vm1086_vm3, %v5046_v30  ;;  %v10271_v38 = vadd.f32 %v13868_v41, %v17462_v43  ;;  %v13870_v31 = vadd.f32 %v13749_v12, %v17175_v19  ;;  %v9690_v20 = vpop.f32.mrb[11].mxu0  ;;  %v10628_v53 = vmax.f32 %v10621_v28, %v10625_v33  ;;  %v10654_v52 = vld [vmem:[%s17514_s15 + $0x4] sm:$0xf] }
 0x44e   : > { %v10269_v29 = vadd.f32 %v13869_v9, %v17462_v43  ;;  %v13871_v42 = vadd.f32 %v9690_v20, %v17179_v25 }
 0x44f   : > { %13855 = vmatmul.mubr.msk.bf16.gmra.mrb[116].mxu0 %vm1086_vm3, %v9436_v7  ;;  %v10391_v55 = vmax.f32 %v10271_v38, 0.0  ;;  %v10272_v8 = vadd.f32 %v13870_v31, %v17462_v43  ;;  %vm17595_vm3 = vmor %vm10745_vm13, %vm10746_vm15  ;;  %vm10864_vm13 = vsmask.f32 1280 }
 0x450   : > { %v10389_v3 = vmax.f32 %v10269_v29, 0.0  ;;  %v10270_v19 = vadd.f32 %v13871_v42, %v17462_v43  ;;  %vm17658_vm15 = vmand %vm1268_vm1, %vm10864_vm13  ;;  %vm10921_vm1 = vcmask 1043457  }
 0x451   : > { %10511 = vst [vmem:[#allocation2 + $0x50] sm:$0xff] %v10391_v55  ;;  %v10392_v7 = vmax.f32 %v10272_v8, 0.0  ;;  %vm17693_vm14 = vmand %vm10921_vm1, %vm10922_vm5  ;;  %vm10958_vm1 = vcmask 1044484  }
 0x452   : > { %v10633_v44 = vld [vmem:[#allocation2 + $0x30] ss:$2 sm:$0x7f]  ;;  %v10637_v45 = vld [vmem:[#allocation2 + $0x31] ss:$2 sm:$0x7f]  ;;  %vm17702_vm6 = vmor %vm10864_vm13, %vm10897_vm8 }
 0x453   : > { %v10639_v25 = vmax.f32 %v10633_v44, %v10637_v45  ;;  %10509 = vst [vmem:[#allocation2 + $0x40] sm:$0xff] %v10389_v3  ;;  %v10390_v14 = vmax.f32 %v10270_v19, 0.0  ;;  %v13752_v24 = vpop.f32.mrb[12].mxu0  ;;  %v10631_v51 = vld [vmem:[#allocation2 + $0x20] ss:$2 sm:$0xff]  ;;  %10512 = vst [vmem:[#allocation2 + $0x58] sm:$0xff] %v10392_v7 }
 0x454   : > { %v10635_v37 = vld [vmem:[#allocation2 + $0x21] ss:$2 sm:$0xff]  ;;  %v13872_v0 = vadd.f32 %v13752_v24, %v17189_v49  ;;  %v9703_v47 = vpop.f32.mrb[13].mxu0  ;;  %vm10970_vm13 = vsmask.f32 256  ;;  %vm17737_vm8 = vmor %vm1267_vm0, %vm10958_vm1 }
 0x455   : > { %v10641_v50 = vmax.f32 %v10629_v40, %v10639_v25  ;;  %v10638_v62 = vmax.f32 %v10631_v51, %v10635_v37  ;;  %10510 = vst [vmem:[#allocation2 + $0x48] sm:$0xff] %v10390_v14  ;;  %v13873_v15 = vadd.f32 %v9703_v47, %v17191_v63  ;;  %v13753_v30 = vpop.f32.mrb[14].mxu0  ;;  %vm17730_vm5 = vmand %vm1267_vm0, %vm10970_vm13  ;;  %vm11003_vm0 = vsmask.f32 4368 }
 0x456   : > { %v10275_v34 = vadd.f32 %v13872_v0, %v17462_v43  ;;  %v13874_v49 = vadd.f32 %v13753_v30, %v17196_v58  ;;  %v9706_v41 = vpop.f32.mrb[15].mxu0  ;;  %vm11023_vm1 = vsmask.f32 7938 }
 0x457   : > { %v12182_v16 = vpack.c.bf16 %v10641_v50, %v10641_v50  ;;  %v10640_v9 = vmax.f32 %v10628_v53, %v10638_v62  ;;  %v10273_v12 = vadd.f32 %v13873_v15, %v17462_v43  ;;  %v13875_v63 = vadd.f32 %v9706_v41, %v17201_v4 }
 0x458   : > { %v10395_v38 = vmax.f32 %v10275_v34, 0.0  ;;  %v10276_v31 = vadd.f32 %v13874_v49, %v17462_v43 }
 0x459   : > { %v10655_v20 = vsel %vm17520_vm7, %v12182_v16, %v10654_v52  ;;  %v12181_v48 = vpack.c.bf16 %v10640_v9, %v10640_v9  ;;  %v10393_v29 = vmax.f32 %v10273_v12, 0.0  ;;  %v10274_v42 = vadd.f32 %v13875_v63, %v17462_v43 }
 0x45a   : > { %10656 = vst [vmem:[%s17514_s15 + $0x4] sm:$0xf] %v10655_v20  ;;  %10515 = vst [vmem:[#allocation2 + $0x70] sm:$0xff] %v10395_v38  ;;  %v10396_v58 = vmax.f32 %v10276_v31, 0.0  ;;  %v13756_v22 = vpop.f32.mrb[16].mxu0 }
 0x45b   : > { %10650 = vst [vmem:[%s17514_s15] sm:$0xf] %v12181_v48  ;;  %10513 = vst [vmem:[#allocation2 + $0x60] sm:$0xff] %v10393_v29  ;;  %v10394_v55 = vmax.f32 %v10274_v42, 0.0  ;;  %v13876_v8 = vadd.f32 %v13756_v22, %v17211_v59  ;;  %v9719_v4 = vpop.f32.mrb[17].mxu0 }
 0x45c   : > { %10516 = vst [vmem:[#allocation2 + $0x78] sm:$0xff] %v10396_v58  ;;  %v13877_v28 = vadd.f32 %v9719_v4, %v17213_v39  ;;  %v13757_v3 = vpop.f32.mrb[18].mxu0  ;;  %v10660_v59 = vld [vmem:[#allocation2 + $0x50] ss:$2 sm:$0x7f] }
 0x45d   : > { %10514 = vst [vmem:[#allocation2 + $0x68] sm:$0xff] %v10394_v55  ;;  %v10279_v33 = vadd.f32 %v13876_v8, %v17462_v43  ;;  %v13878_v44 = vadd.f32 %v13757_v3, %v17218_v23  ;;  %v9722_v45 = vpop.f32.mrb[19].mxu0  ;;  %v10664_v24 = vld [vmem:[#allocation2 + $0x51] ss:$2 sm:$0x7f] }
 0x45e   : > { %v10277_v19 = vadd.f32 %v13877_v28, %v17462_v43  ;;  %v13879_v25 = vadd.f32 %v9722_v45, %v17223_v35  ;;  %v10658_v51 = vld [vmem:[#allocation2 + $0x40] ss:$2 sm:$0xff]  ;;  %v10662_v37 = vld [vmem:[#allocation2 + $0x41] ss:$2 sm:$0xff]  ;;  %v10666_v62 = vmax.f32 %v10660_v59, %v10664_v24 }
 0x45f   : > { %v10399_v40 = vmax.f32 %v10279_v33, 0.0  ;;  %v10280_v14 = vadd.f32 %v13878_v44, %v17462_v43  ;;  %v10665_v49 = vmax.f32 %v10658_v51, %v10662_v37 }
 0x460   : > { %v10397_v7 = vmax.f32 %v10277_v19, 0.0  ;;  %v10278_v39 = vadd.f32 %v13879_v25, %v17462_v43 }
 0x461   : > { %10519 = vst [vmem:[#allocation2 + $0x90] sm:$0xff] %v10399_v40  ;;  %v10400_v0 = vmax.f32 %v10280_v14, 0.0 }
 0x462   : > { %10517 = vst [vmem:[#allocation2 + $0x80] sm:$0xff] %v10397_v7  ;;  %v13760_v47 = vpop.f32.mrb[20].mxu0  ;;  %v10398_v52 = vmax.f32 %v10278_v39, 0.0  ;;  %v10712_v39 = vld [vmem:[%s17514_s15 + $0x4] sm:$0x8] }
 0x463   : > { %v10670_v53 = vld [vmem:[#allocation2 + $0x70] ss:$2 sm:$0x7f]  ;;  %v10674_v50 = vld [vmem:[#allocation2 + $0x71] ss:$2 sm:$0x7f]  ;;  %v13880_v23 = vadd.f32 %v13760_v47, %v17233_v17 }
 0x464   : > { %v10676_v15 = vmax.f32 %v10670_v53, %v10674_v50  ;;  %v10668_v35 = vld [vmem:[#allocation2 + $0x60] ss:$2 sm:$0xff]  ;;  %v10672_v30 = vld [vmem:[#allocation2 + $0x61] ss:$2 sm:$0xff]  ;;  %10520 = vst [vmem:[#allocation2 + $0x98] sm:$0xff] %v10400_v0  ;;  %v9735_v34 = vpop.f32.mrb[21].mxu0 }
 0x465   : > { %v10675_v41 = vmax.f32 %v10668_v35, %v10672_v30  ;;  %v10283_v16 = vadd.f32 %v13880_v23, %v17462_v43  ;;  %v13881_v9 = vadd.f32 %v9735_v34, %v17235_v26  ;;  %v13761_v12 = vpop.f32.mrb[22].mxu0  ;;  %10518 = vst [vmem:[#allocation2 + $0x88] sm:$0xff] %v10398_v52  ;;  %v18020_v53 = vld [vmem:[#allocation7_spill] sm:$0xff]  ;;  %v18023_v30 = vld [vmem:[#allocation8_spill] sm:$0xff] }
 0x466   : > { %v10678_v63 = vmax.f32 %v10666_v62, %v10676_v15  ;;  %v13882_v38 = vadd.f32 %v13761_v12, %v17240_v60  ;;  %v9738_v31 = vpop.f32.mrb[23].mxu0 }
 0x467   : > { %v10677_v17 = vmax.f32 %v10665_v49, %v10675_v41  ;;  %v10403_v20 = vmax.f32 %v10283_v16, 0.0  ;;  %v10281_v48 = vadd.f32 %v13881_v9, %v17462_v43  ;;  %v13883_v29 = vadd.f32 %v9738_v31, %v17245_v21 }
 0x468   : > { %v12184_v42 = vpack.c.bf16 %v10678_v63, %v10678_v63  ;;  %v10284_v58 = vadd.f32 %v13882_v38, %v17462_v43 }
 0x469   : > { %v12183_v22 = vpack.c.bf16 %v10677_v17, %v10677_v17  ;;  %10523 = vst [vmem:[#allocation2 + $0xb0] sm:$0xff] %v10403_v20  ;;  %v10401_v26 = vmax.f32 %v10281_v48, 0.0  ;;  %v10282_v55 = vadd.f32 %v13883_v29, %v17462_v43 }
 0x46a   : > { %v10697_v8 = vshll.u32 %v12184_v42, 16  ;;  %v10701_v4 = vshrl.u32 %v12184_v42, 16  ;;  %v10404_v60 = vmax.f32 %v10284_v58, 0.0  ;;  %v13764_v28 = vpop.f32.mrb[24].mxu0 }
 0x46b   : > { %v10688_v33 = vshll.u32 %v12183_v22, 16  ;;  %v10691_v3 = vshrl.u32 %v12183_v22, 16  ;;  %10521 = vst [vmem:[#allocation2 + $0xa0] sm:$0xff] %v10401_v26  ;;  %v10402_v19 = vmax.f32 %v10282_v55, 0.0  ;;  %v13884_v21 = vadd.f32 %v13764_v28, %v17255_v10  ;;  %v9751_v25 = vpop.f32.mrb[25].mxu0 }
 0x46c   : > { %v10699_v44 = vrot.slane %v10697_v8, 5  ;;  %v10703_v45 = vrot.slane %v10701_v4, 4  ;;  %10524 = vst [vmem:[#allocation2 + $0xb8] sm:$0xff] %v10404_v60  ;;  %v13885_v10 = vadd.f32 %v9751_v25, %v17257_v6  ;;  %v13765_v51 = vpop.f32.mrb[26].mxu0  ;;  %v10718_v16 = vld [vmem:[#allocation2 + $0x80] ss:$2 sm:$0xff] }
 0x46d   : > { %v10690_v7 = vrot.slane %v10688_v33, 5  ;;  %v10693_v14 = vrot.slane %v10691_v3, 4  ;;  %10522 = vst [vmem:[#allocation2 + $0xa8] sm:$0xff] %v10402_v19  ;;  %v10287_v59 = vadd.f32 %v13884_v21, %v17462_v43  ;;  %v13886_v50 = vadd.f32 %v13765_v51, %v18020_v53  ;;  %v9754_v23 = vpop.f32.mrb[27].mxu0  ;;  %v10722_v9 = vld [vmem:[#allocation2 + $0x81] ss:$2 sm:$0xff] }
 0x46e   : > { %v10704_v24 = vor.u32 %v10703_v45, %v10699_v44  ;;  %v10720_v35 = vld [vmem:[#allocation2 + $0x90] ss:$2 sm:$0x7f]  ;;  %v10285_v6 = vadd.f32 %v13885_v10, %v17462_v43  ;;  %v13887_v52 = vadd.f32 %v9754_v23, %v18023_v30  ;;  %v10724_v49 = vld [vmem:[#allocation2 + $0x91] ss:$2 sm:$0x7f]  ;;  %v10725_v8 = vmax.f32 %v10718_v16, %v10722_v9 }
 0x46f   : > { %v10694_v37 = vor.u32 %v10693_v14, %v10690_v7  ;;  %v10713_v0 = vsel %vm17554_vm10, %v10690_v7, %v10712_v39  ;;  %v10407_v47 = vmax.f32 %v10287_v59, 0.0  ;;  %v10288_v41 = vadd.f32 %v13886_v50, %v17462_v43  ;;  %v18025_v59 = vld [vmem:[#allocation10_spill] sm:$0xff]  ;;  %v10760_v53 = vld [vmem:[%s17514_s15 + $0x14] sm:$0x7] }
 0x470   : > { %v10705_v15 = vrot.slane %v10704_v24, 4  ;;  %10714 = vst [vmem:[%s17514_s15 + $0x4] sm:$0x8] %v10713_v0  ;;  %v10405_v12 = vmax.f32 %v10285_v6, 0.0  ;;  %v10286_v63 = vadd.f32 %v13887_v52, %v17462_v43  ;;  %v10726_v29 = vmax.f32 %v10720_v35, %v10724_v49 }
 0x471   : > { %v10695_v34 = vrot.slane %v10694_v37, 4  ;;  %10527 = vst [vmem:[#allocation2 + $0xd0] sm:$0xff] %v10407_v47  ;;  %v10408_v26 = vmax.f32 %v10288_v41, 0.0 }
 0x472   : > { %10716 = vst [vmem:[%s17514_s15 + $0xc] sm:$0x7] %v10705_v15  ;;  %v13768_v38 = vpop.f32.mrb[28].mxu0  ;;  %10525 = vst [vmem:[#allocation2 + $0xc0] sm:$0xff] %v10405_v12  ;;  %v10406_v55 = vmax.f32 %v10286_v63, 0.0 }
 0x473   : > { %v10700_v31 = vsel %vm17565_vm12, %v10695_v34, %v10699_v44  ;;  %v10730_v17 = vld [vmem:[#allocation2 + $0xb0] ss:$2 sm:$0x7f]  ;;  %v10734_v20 = vld [vmem:[#allocation2 + $0xb1] ss:$2 sm:$0x7f]  ;;  %v13888_v48 = vadd.f32 %v13768_v38, %v17277_v61 }
 0x474   : > { %10715 = vst [vmem:[%s17514_s15 + $0x8] sm:$0xf] %v10700_v31  ;;  %v10736_v42 = vmax.f32 %v10730_v17, %v10734_v20  ;;  %v10728_v58 = vld [vmem:[#allocation2 + $0xa0] ss:$2 sm:$0xff]  ;;  %v10732_v22 = vld [vmem:[#allocation2 + $0xa1] ss:$2 sm:$0xff] }
 0x475   : > { %v10735_v4 = vmax.f32 %v10728_v58, %v10732_v22  ;;  %v10291_v60 = vadd.f32 %v13888_v48, %v17462_v43  ;;  %v9767_v28 = vpop.f32.mrb[29].mxu0  ;;  %10528 = vst [vmem:[#allocation2 + $0xd8] sm:$0xff] %v10408_v26  ;;  %10526 = vst [vmem:[#allocation2 + $0xc8] sm:$0xff] %v10406_v55  ;;  %v18024_v44 = vld [vmem:[#allocation9_spill] sm:$0xff]  ;;  %v18031_v48 = vld [vmem:[#allocation12_spill] sm:$0xff] }
 0x476   : > { %v10738_v33 = vmax.f32 %v10726_v29, %v10736_v42  ;;  %v13889_v3 = vadd.f32 %v9767_v28, %v17279_v57  ;;  %v13769_v19 = vpop.f32.mrb[30].mxu0 }
 0x477   : > { %v10737_v61 = vmax.f32 %v10725_v8, %v10735_v4  ;;  %v10411_v21 = vmax.f32 %v10291_v60, 0.0  ;;  %v13890_v45 = vadd.f32 %v13769_v19, %v18024_v44  ;;  %v9770_v25 = vpop.f32.mrb[31].mxu0 }
 0x478   : > { %v12186_v7 = vpack.c.bf16 %v10738_v33, %v10738_v33  ;;  %v10289_v14 = vadd.f32 %v13889_v3, %v17462_v43  ;;  %v13891_v24 = vadd.f32 %v9770_v25, %v18025_v59 }
 0x479   : > { %v12185_v39 = vpack.c.bf16 %v10737_v61, %v10737_v61  ;;  %10531 = vst [vmem:[#allocation2 + $0xf0] sm:$0xff] %v10411_v21  ;;  %v10292_v10 = vadd.f32 %v13890_v45, %v17462_v43 }
 0x47a   : > { %v10750_v57 = vrot.slane %v12186_v7, 5  ;;  %v10409_v51 = vmax.f32 %v10289_v14, 0.0  ;;  %v10290_v37 = vadd.f32 %v13891_v24, %v17462_v43  ;;  %v13772_v0 = vpop.f32.mrb[32].mxu0 }
 0x47b   : > { %v10748_v50 = vrot.slane %v12185_v39, 5  ;;  %v10412_v23 = vmax.f32 %v10292_v10, 0.0  ;;  %v13892_v15 = vadd.f32 %v13772_v0, %v17299_v11  ;;  %v9783_v35 = vpop.f32.mrb[33].mxu0  ;;  %v18030_v11 = vld [vmem:[#allocation11_spill] sm:$0xff]  ;;  %v18032_v10 = vld [vmem:[#allocation13_spill] sm:$0xff]  ;;  %v18033_v0 = vld [vmem:[#allocation14_spill] sm:$0xff] }
 0x47c   : > { %v10752_v6 = vrot.slane %v10750_v57, 4  ;;  %10529 = vst [vmem:[#allocation2 + $0xe0] sm:$0xff] %v10409_v51  ;;  %v10410_v52 = vmax.f32 %v10290_v37, 0.0  ;;  %v13893_v34 = vadd.f32 %v9783_v35, %v17301_v5  ;;  %v13773_v49 = vpop.f32.mrb[34].mxu0  ;;  %v10764_v8 = vld [vmem:[#allocation2 + $0xc0] ss:$2 sm:$0xff] }
 0x47d   : > { %v10749_v41 = vrot.slane %v10748_v50, 4  ;;  %10756 = vst [vmem:[%s17514_s15 + $0xc] sm:$0x8] %v10748_v50  ;;  %10532 = vst [vmem:[#allocation2 + $0xf8] sm:$0xff] %v10412_v23  ;;  %v10295_v16 = vadd.f32 %v13892_v15, %v17462_v43  ;;  %v13894_v9 = vadd.f32 %v13773_v49, %v18030_v11  ;;  %v9786_v38 = vpop.f32.mrb[35].mxu0 }
 0x47e   : > { %v10761_v12 = vsel %vm17588_vm2, %v10752_v6, %v10760_v53  ;;  %10530 = vst [vmem:[#allocation2 + $0xe8] sm:$0xff] %v10410_v52  ;;  %v10293_v63 = vadd.f32 %v13893_v34, %v17462_v43  ;;  %v13895_v29 = vadd.f32 %v9786_v38, %v18031_v48  ;;  %v10766_v42 = vld [vmem:[#allocation2 + $0xd0] ss:$2 sm:$0x7f]  ;;  %v10768_v4 = vld [vmem:[#allocation2 + $0xc1] ss:$2 sm:$0xff] }
 0x47f   : > { %10762 = vst [vmem:[%s17514_s15 + $0x14] sm:$0x7] %v10761_v12  ;;  %v10751_v31 = vsel %vm17595_vm3, %v10749_v41, %v10750_v57  ;;  %v10415_v5 = vmax.f32 %v10295_v16, 0.0  ;;  %v10296_v20 = vadd.f32 %v13894_v9, %v17462_v43  ;;  %v10770_v58 = vld [vmem:[#allocation2 + $0xd1] ss:$2 sm:$0x7f]  ;;  %v10771_v59 = vmax.f32 %v10764_v8, %v10768_v4 }
 0x480   : > { %10757 = vst [vmem:[%s17514_s15 + $0x10] sm:$0xf] %v10751_v31  ;;  %v10413_v17 = vmax.f32 %v10293_v63, 0.0  ;;  %v10294_v26 = vadd.f32 %v13895_v29, %v17462_v43  ;;  %v10772_v61 = vmax.f32 %v10766_v42, %v10770_v58  ;;  %v18034_v42 = vld [vmem:[#allocation15_spill] sm:$0xff] }
 0x481   : > { %10535 = vst [vmem:[#allocation2 + $0x110] sm:$0xff] %v10415_v5  ;;  %v10416_v22 = vmax.f32 %v10296_v20, 0.0 }
 0x482   : > { %10533 = vst [vmem:[#allocation2 + $0x100] sm:$0xff] %v10413_v17  ;;  %v13776_v55 = vpop.f32.mrb[36].mxu0  ;;  %v10414_v25 = vmax.f32 %v10294_v26, 0.0 }
 0x483   : > { %v13896_v60 = vadd.f32 %v13776_v55, %v17321_v18  ;;  %v9799_v28 = vpop.f32.mrb[37].mxu0  ;;  %10536 = vst [vmem:[#allocation2 + $0x118] sm:$0xff] %v10416_v22 }
 0x484   : > { %v10776_v33 = vld [vmem:[#allocation2 + $0xf0] ss:$2 sm:$0x7f]  ;;  %v10780_v3 = vld [vmem:[#allocation2 + $0xf1] ss:$2 sm:$0x7f]  ;;  %v13897_v19 = vadd.f32 %v9799_v28, %v17323_v2 }
 0x485   : > { %v10782_v21 = vmax.f32 %v10776_v33, %v10780_v3  ;;  %v10774_v44 = vld [vmem:[#allocation2 + $0xe0] ss:$2 sm:$0xff]  ;;  %v10778_v45 = vld [vmem:[#allocation2 + $0xe1] ss:$2 sm:$0xff]  ;;  %v10299_v7 = vadd.f32 %v13896_v60, %v17462_v43  ;;  %v13777_v14 = vpop.f32.mrb[38].mxu0  ;;  %10534 = vst [vmem:[#allocation2 + $0x108] sm:$0xff] %v10414_v25 }
 0x486   : > { %v10781_v24 = vmax.f32 %v10774_v44, %v10778_v45  ;;  %v10297_v39 = vadd.f32 %v13897_v19, %v17462_v43  ;;  %v13898_v18 = vadd.f32 %v13777_v14, %v18032_v10  ;;  %v9802_v57 = vpop.f32.mrb[39].mxu0  ;;  %v10818_v26 = vld [vmem:[%s17514_s15 + $0x14] sm:$0xc]  ;;  %v18037_v3 = vld [vmem:[#allocation16_spill] sm:$0xff] }
 0x487   : > { %v10784_v51 = vmax.f32 %v10772_v61, %v10782_v21  ;;  %v10419_v37 = vmax.f32 %v10299_v7, 0.0  ;;  %v13899_v2 = vadd.f32 %v9802_v57, %v18033_v0 }
 0x488   : > { %v10783_v53 = vmax.f32 %v10771_v59, %v10781_v24  ;;  %v10417_v50 = vmax.f32 %v10297_v39, 0.0  ;;  %v10300_v23 = vadd.f32 %v13898_v18, %v17462_v43 }
 0x489   : > { %v12188_v15 = vpack.c.bf16 %v10784_v51, %v10784_v51  ;;  %10539 = vst [vmem:[#allocation2 + $0x130] sm:$0xff] %v10419_v37  ;;  %v10298_v35 = vadd.f32 %v13899_v2, %v17462_v43 }
 0x48a   : > { %v12187_v6 = vpack.c.bf16 %v10783_v53, %v10783_v53  ;;  %10537 = vst [vmem:[#allocation2 + $0x120] sm:$0xff] %v10417_v50  ;;  %v10420_v52 = vmax.f32 %v10300_v23, 0.0  ;;  %v13780_v34 = vpop.f32.mrb[40].mxu0  ;;  %v10826_v60 = vld [vmem:[#allocation2 + $0x110] ss:$2 sm:$0x7f] }
 0x48b   : > { %v10803_v49 = vshrl.u32 %v12188_v15, 16  ;;  %v10806_v41 = vshll.u32 %v12188_v15, 16  ;;  %v10418_v16 = vmax.f32 %v10298_v35, 0.0  ;;  %v13900_v11 = vadd.f32 %v13780_v34, %v17343_v27  ;;  %v9815_v63 = vpop.f32.mrb[41].mxu0 }
 0x48c   : > { %v10794_v9 = vshrl.u32 %v12187_v6, 16  ;;  %v10797_v12 = vshll.u32 %v12187_v6, 16  ;;  %10540 = vst [vmem:[#allocation2 + $0x138] sm:$0xff] %v10420_v52  ;;  %v13781_v17 = vpop.f32.mrb[42].mxu0  ;;  %v13901_v29 = vadd.f32 %v9815_v63, %v17345_v13  ;;  %v10824_v44 = vld [vmem:[#allocation2 + $0x100] ss:$2 sm:$0xff] }
 0x48d   : > { %v10805_v38 = vrot.slane %v10803_v49, 5  ;;  %v10808_v31 = vrot.slane %v10806_v41, 6  ;;  %10538 = vst [vmem:[#allocation2 + $0x128] sm:$0xff] %v10418_v16  ;;  %v10303_v5 = vadd.f32 %v13900_v11, %v17462_v43  ;;  %v13902_v27 = vadd.f32 %v13781_v17, %v18034_v42  ;;  %v9818_v8 = vpop.f32.mrb[43].mxu0  ;;  %v10828_v45 = vld [vmem:[#allocation2 + $0x101] ss:$2 sm:$0xff] }
 0x48e   : > { %v10796_v20 = vrot.slane %v10794_v9, 5  ;;  %v10799_v48 = vrot.slane %v10797_v12, 6  ;;  %v10830_v28 = vld [vmem:[#allocation2 + $0x111] ss:$2 sm:$0x7f]  ;;  %v10301_v33 = vadd.f32 %v13901_v29, %v17462_v43  ;;  %v13903_v19 = vadd.f32 %v9818_v8, %v18037_v3 }
 0x48f   : > { %v10809_v58 = vor.u32 %v10808_v31, %v10805_v38  ;;  %v10423_v55 = vmax.f32 %v10303_v5, 0.0  ;;  %v10304_v13 = vadd.f32 %v13902_v27, %v17462_v43  ;;  %v10832_v37 = vmax.f32 %v10826_v60, %v10830_v28  ;;  %v18040_v49 = vld [vmem:[#allocation17_spill] sm:$0xff]  ;;  %v18041_v63 = vld [vmem:[#allocation18_spill] sm:$0xff] }
 0x490   : > { %v10800_v4 = vor.u32 %v10799_v48, %v10796_v20  ;;  %v10421_v14 = vmax.f32 %v10301_v33, 0.0  ;;  %v10302_v18 = vadd.f32 %v13903_v19, %v17462_v43  ;;  %v10831_v0 = vmax.f32 %v10824_v44, %v10828_v45 }
 0x491   : > { %v10811_v21 = vrot.slane %v10809_v58, 4  ;;  %10543 = vst [vmem:[#allocation2 + $0x150] sm:$0xff] %v10423_v55  ;;  %v10424_v59 = vmax.f32 %v10304_v13, 0.0 }
 0x492   : > { %v10801_v25 = vrot.slane %v10800_v4, 4  ;;  %v10819_v7 = vsel %vm17626_vm9, %v10800_v4, %v10818_v26  ;;  %v13784_v24 = vpop.f32.mrb[44].mxu0  ;;  %10541 = vst [vmem:[#allocation2 + $0x140] sm:$0xff] %v10421_v14  ;;  %v10422_v35 = vmax.f32 %v10302_v18, 0.0 }
 0x493   : > { %10822 = vst [vmem:[%s17514_s15 + $0x1c] sm:$0x3] %v10811_v21  ;;  %10820 = vst [vmem:[%s17514_s15 + $0x14] sm:$0xc] %v10819_v7  ;;  %v13904_v57 = vadd.f32 %v13784_v24, %v17365_v46  ;;  %v9831_v23 = vpop.f32.mrb[45].mxu0  ;;  %v18047_v7 = vld [vmem:[#allocation20_spill] sm:$0xff] }
 0x494   : > { %v10836_v39 = vld [vmem:[#allocation2 + $0x130] ss:$2 sm:$0x7f]  ;;  %v10840_v10 = vld [vmem:[#allocation2 + $0x131] ss:$2 sm:$0x7f]  ;;  %v10810_v51 = vsel %vm17636_vm11, %v10801_v25, %v10809_v58  ;;  %v13905_v52 = vadd.f32 %v9831_v23, %v17367_v54 }
 0x495   : > { %v10842_v2 = vmax.f32 %v10836_v39, %v10840_v10  ;;  %v10834_v53 = vld [vmem:[#allocation2 + $0x120] ss:$2 sm:$0xff]  ;;  %v10838_v50 = vld [vmem:[#allocation2 + $0x121] ss:$2 sm:$0xff]  ;;  %10544 = vst [vmem:[#allocation2 + $0x158] sm:$0xff] %v10424_v59  ;;  %v10307_v6 = vadd.f32 %v13904_v57, %v17462_v43  ;;  %v13785_v34 = vpop.f32.mrb[46].mxu0 }
 0x496   : > { %10821 = vst [vmem:[%s17514_s15 + $0x18] sm:$0xf] %v10810_v51  ;;  %v10841_v15 = vmax.f32 %v10834_v53, %v10838_v50  ;;  %v13906_v41 = vadd.f32 %v13785_v34, %v18040_v49  ;;  %v9834_v16 = vpop.f32.mrb[47].mxu0  ;;  %10542 = vst [vmem:[#allocation2 + $0x148] sm:$0xff] %v10422_v35  ;;  %v10305_v12 = vadd.f32 %v13905_v52, %v17462_v43  ;;  %v10866_v58 = vld [vmem:[%s17514_s15 + $0x24] sm:$0x3] }
 0x497   : > { %v10844_v46 = vmax.f32 %v10832_v37, %v10842_v2  ;;  %v10427_v9 = vmax.f32 %v10307_v6, 0.0  ;;  %v13907_v38 = vadd.f32 %v9834_v16, %v18041_v63 }
 0x498   : > { %v10843_v11 = vmax.f32 %v10831_v0, %v10841_v15  ;;  %v10308_v5 = vadd.f32 %v13906_v41, %v17462_v43  ;;  %v10425_v54 = vmax.f32 %v10305_v12, 0.0 }
 0x499   : > { %v12190_v31 = vpack.c.bf16 %v10844_v46, %v10844_v46  ;;  %10547 = vst [vmem:[#allocation2 + $0x170] sm:$0xff] %v10427_v9  ;;  %v10306_v20 = vadd.f32 %v13907_v38, %v17462_v43  ;;  %v18049_v38 = vld [vmem:[#allocation22_spill] sm:$0xff] }
 0x49a   : > { %v12189_v17 = vpack.c.bf16 %v10843_v11, %v10843_v11  ;;  %v10428_v29 = vmax.f32 %v10308_v5, 0.0  ;;  %v13788_v42 = vpop.f32.mrb[48].mxu0  ;;  %10545 = vst [vmem:[#allocation2 + $0x160] sm:$0xff] %v10425_v54  ;;  %v18048_v11 = vld [vmem:[#allocation21_spill] sm:$0xff] }
 0x49b   : > { %v10856_v48 = vrot.slane %v12190_v31, 6  ;;  %v10426_v55 = vmax.f32 %v10306_v20, 0.0  ;;  %v13908_v8 = vadd.f32 %v13788_v42, %v17387_v36  ;;  %v9847_v4 = vpop.f32.mrb[49].mxu0  ;;  %v18046_v36 = vld [vmem:[#allocation19_spill] sm:$0xff] }
 0x49c   : > { %v10854_v26 = vrot.slane %v12189_v17, 6  ;;  %10548 = vst [vmem:[#allocation2 + $0x178] sm:$0xff] %v10428_v29  ;;  %v13909_v33 = vadd.f32 %v9847_v4, %v17389_v32  ;;  %v13789_v13 = vpop.f32.mrb[50].mxu0  ;;  %v10872_v39 = vld [vmem:[#allocation2 + $0x150] ss:$2 sm:$0x7f] }
 0x49d   : > { %v10858_v28 = vrot.slane %v10856_v48, 4  ;;  %10546 = vst [vmem:[#allocation2 + $0x168] sm:$0xff] %v10426_v55  ;;  %v10311_v19 = vadd.f32 %v13908_v8, %v17462_v43  ;;  %v13910_v21 = vadd.f32 %v13789_v13, %v18046_v36  ;;  %v9850_v44 = vpop.f32.mrb[51].mxu0  ;;  %v10876_v57 = vld [vmem:[#allocation2 + $0x151] ss:$2 sm:$0x7f] }
 0x49e   : > { %v10855_v3 = vrot.slane %v10854_v26, 4  ;;  %10862 = vst [vmem:[%s17514_s15 + $0x1c] sm:$0xc] %v10854_v26  ;;  %v10309_v25 = vadd.f32 %v13909_v33, %v17462_v43  ;;  %v13911_v14 = vadd.f32 %v9850_v44, %v18047_v7  ;;  %v10870_v37 = vld [vmem:[#allocation2 + $0x140] ss:$2 sm:$0xff]  ;;  %v10878_v35 = vmax.f32 %v10872_v39, %v10876_v57 }
 0x49f   : > { %v10867_v45 = vsel %vm17658_vm15, %v10858_v28, %v10866_v58  ;;  %v10431_v59 = vmax.f32 %v10311_v19, 0.0  ;;  %v10312_v24 = vadd.f32 %v13910_v21, %v17462_v43  ;;  %v10874_v0 = vld [vmem:[#allocation2 + $0x141] ss:$2 sm:$0xff] }
 0x4a0   : > { %10868 = vst [vmem:[%s17514_s15 + $0x24] sm:$0x3] %v10867_v45  ;;  %v10857_v32 = vsel %vm17666_vm4, %v10855_v3, %v10856_v48  ;;  %v10429_v10 = vmax.f32 %v10309_v25, 0.0  ;;  %v10310_v18 = vadd.f32 %v13911_v14, %v17462_v43  ;;  %v10877_v49 = vmax.f32 %v10870_v37, %v10874_v0  ;;  %v18050_v20 = vld [vmem:[#allocation23_spill] sm:$0xff]  ;;  %v18053_v14 = vld [vmem:[#allocation24_spill] sm:$0xff] }
 0x4a1   : > { %10863 = vst [vmem:[%s17514_s15 + $0x20] sm:$0xf] %v10857_v32  ;;  %10551 = vst [vmem:[#allocation2 + $0x190] sm:$0xff] %v10431_v59  ;;  %v10432_v51 = vmax.f32 %v10312_v24, 0.0  ;;  %v18055_v37 = vmov 0 }
 0x4a2   : > { %10549 = vst [vmem:[#allocation2 + $0x180] sm:$0xff] %v10429_v10  ;;  %v10430_v2 = vmax.f32 %v10310_v18, 0.0  ;;  %v13792_v53 = vpop.f32.mrb[52].mxu0  ;;  %v18054_v10 = vld [vmem:[#allocation25_spill] sm:$0xff]  ;;  %v18056_v37 = vsel %vm17702_vm6, 4294967295, %v18055_v37 }
 0x4a3   : > { %v10882_v50 = vld [vmem:[#allocation2 + $0x170] ss:$2 sm:$0x7f]  ;;  %v10886_v23 = vld [vmem:[#allocation2 + $0x171] ss:$2 sm:$0x7f]  ;;  %v13912_v15 = vadd.f32 %v13792_v53, %v17409_v56 }
 0x4a4   : > { %10552 = vst [vmem:[#allocation2 + $0x198] sm:$0xff] %v10432_v51  ;;  %v10888_v6 = vmax.f32 %v10882_v50, %v10886_v23  ;;  %v10880_v52 = vld [vmem:[#allocation2 + $0x160] ss:$2 sm:$0xff]  ;;  %v10884_v34 = vld [vmem:[#allocation2 + $0x161] ss:$2 sm:$0xff]  ;;  %10550 = vst [vmem:[#allocation2 + $0x188] sm:$0xff] %v10430_v2 }
 0x4a5   : > { %v9863_v46 = vpop.f32.mrb[53].mxu0  ;;  %v10887_v41 = vmax.f32 %v10880_v52, %v10884_v34  ;;  %v10315_v16 = vadd.f32 %v13912_v15, %v17462_v43  ;;  %v17709_v53 = vld [vmem:[%s17885_s2] ss:$0 sm:$0xff]  ;;  %v18057_v23 = vld [vmem:[#allocation26_spill] sm:$0xff] }
 0x4a6   : > { %v13913_v9 = vadd.f32 %v9863_v46, %v18048_v11  ;;  %v13793_v12 = vpop.f32.mrb[54].mxu0  ;;  %v10890_v63 = vmax.f32 %v10878_v35, %v10888_v6 }
 0x4a7   : > { %v13914_v31 = vadd.f32 %v13793_v12, %v18049_v38  ;;  %v9866_v5 = vpop.f32.mrb[55].mxu0  ;;  %v10889_v17 = vmax.f32 %v10877_v49, %v10887_v41  ;;  %v10435_v54 = vmax.f32 %v10315_v16, 0.0  ;;  %v10924_v7 = vld [vmem:[%s17514_s15 + $0x24] sm:$0xe]  ;;  %v18058_v41 = vld [vmem:[#allocation5_spill] sm:$0xff] }
 0x4a8   : > { %v10313_v56 = vadd.f32 %v13913_v9, %v17462_v43  ;;  %v13915_v48 = vadd.f32 %v9866_v5, %v18050_v20  ;;  %v12192_v29 = vpack.c.bf16 %v10890_v63, %v10890_v63 }
 0x4a9   : > { %v10316_v42 = vadd.f32 %v13914_v31, %v17462_v43  ;;  %v12191_v58 = vpack.c.bf16 %v10889_v17, %v10889_v17  ;;  %10555 = vst [vmem:[#allocation2 + $0x1b0] sm:$0xff] %v10435_v54 }
 0x4aa   : > { %v10433_v26 = vmax.f32 %v10313_v56, 0.0  ;;  %v10314_v55 = vadd.f32 %v13915_v48, %v17462_v43  ;;  %v10909_v8 = vshrl.u32 %v12192_v29, 16  ;;  %v10912_v4 = vshll.u32 %v12192_v29, 16  ;;  %v13796_v45 = vpop.f32.mrb[56].mxu0 }
 0x4ab   : > { %v10436_v28 = vmax.f32 %v10316_v42, 0.0  ;;  %v10900_v33 = vshrl.u32 %v12191_v58, 16  ;;  %v10903_v13 = vshll.u32 %v12191_v58, 16  ;;  %v13916_v32 = vadd.f32 %v13796_v45, %v18053_v14  ;;  %v9879_v59 = vpop.f32.mrb[57].mxu0  ;;  %v10930_v46 = vld [vmem:[#allocation2 + $0x180] ss:$2 sm:$0xff] }
 0x4ac   : > { %10553 = vst [vmem:[#allocation2 + $0x1a0] sm:$0xff] %v10433_v26  ;;  %v10434_v3 = vmax.f32 %v10314_v55, 0.0  ;;  %v10911_v19 = vrot.slane %v10909_v8, 6  ;;  %v10914_v36 = vrot.slane %v10912_v4, 7  ;;  %v13917_v18 = vadd.f32 %v9879_v59, %v18054_v10  ;;  %v13797_v57 = vpop.f32.mrb[58].mxu0 }
 0x4ad   : > { %10556 = vst [vmem:[#allocation2 + $0x1b8] sm:$0xff] %v10436_v28  ;;  %v10902_v21 = vrot.slane %v10900_v33, 6  ;;  %v10905_v44 = vrot.slane %v10903_v13, 7  ;;  %v10932_v39 = vld [vmem:[#allocation2 + $0x190] ss:$2 sm:$0x7f]  ;;  %v10319_v50 = vadd.f32 %v17709_v53, %v13916_v32  ;;  %v13918_v15 = vadd.f32 %v13797_v57, %v18057_v23 }
 0x4ae   : > { %10554 = vst [vmem:[#allocation2 + $0x1a8] sm:$0xff] %v10434_v3  ;;  %v10915_v25 = vor.u32 %v10914_v36, %v10911_v19  ;;  %v10936_v2 = vld [vmem:[#allocation2 + $0x191] ss:$2 sm:$0x7f]  ;;  %v9882_v35 = vpop.f32.mrb[59].mxu0  ;;  %v10317_v49 = vadd.f32 %v17709_v53, %v13917_v18  ;;  %v18059_v23 = vmov 0 }
 0x4af   : > { %v10906_v24 = vor.u32 %v10905_v44, %v10902_v21  ;;  %v13919_v16 = vadd.f32 %v9882_v35, %v18058_v41  ;;  %v10934_v9 = vld [vmem:[#allocation2 + $0x181] ss:$2 sm:$0xff]  ;;  %v10439_v12 = vmax.f32 %v10319_v50, 0.0  ;;  %v10320_v63 = vadd.f32 %v17709_v53, %v13918_v15  ;;  %v10972_v15 = vld [vmem:[%s17514_s15 + $0x34] sm:$0x1] }
 0x4b0   : > { %v13312_v51 = vpop.f32.mrb[60].mxu1  ;;  %v10917_v0 = vrot.slane %v10915_v25, 4  ;;  %v10938_v48 = vmax.f32 %v10932_v39, %v10936_v2  ;;  %v10437_v26 = vmax.f32 %v10317_v49, 0.0  ;;  %v10937_v8 = vmax.f32 %v10930_v46, %v10934_v9 }
 0x4b1   : > { %v5508_v6 = vpop.f32.mrb[61].mxu1  ;;  %v10907_v52 = vrot.slane %v10906_v24, 4  ;;  %v10925_v34 = vsel %vm17693_vm14, %v10906_v24, %v10924_v7  ;;  %v10318_v56 = vadd.f32 %v17709_v53, %v13919_v16  ;;  %10559 = vst [vmem:[#allocation2 + $0x1d0] sm:$0xff] %v10439_v12  ;;  %v10440_v55 = vmax.f32 %v10320_v63, 0.0 }
 0x4b2   : > { %v13313_v11 = vpop.f32.mrb[62].mxu1  ;;  %10928 = vst [vmem:[%s17514_s15 + $0x2c] sm:$0x1] %v10917_v0  ;;  %10926 = vst [vmem:[%s17514_s15 + $0x24] sm:$0xe] %v10925_v34  ;;  %v13800_v38 = vpop.f32.mrb[60].mxu0 }
 0x4b3   : > { %v5511_v31 = vpop.f32.mrb[63].mxu1  ;;  %v10916_v5 = vsel %vm17702_vm6, %v10907_v52, %v10915_v25  ;;  %v13920_v20 = vadd.f32 %v13800_v38, %v13312_v51  ;;  %v10438_v28 = vmax.f32 %v10318_v56, 0.0  ;;  %v9895_v13 = vpop.f32.mrb[61].mxu0  ;;  %10557 = vst [vmem:[#allocation2 + $0x1c0] sm:$0xff] %v10437_v26  ;;  %10560 = vst [vmem:[#allocation2 + $0x1d8] sm:$0xff] %v10440_v55  ;;  %v18060_v23 = vsel %vm17730_vm5, 4294967295, %v18059_v23 }
 0x4b4   : > { %v10942_v17 = vld [vmem:[#allocation2 + $0x1b0] ss:$2 sm:$0x7f]  ;;  %v10946_v54 = vld [vmem:[#allocation2 + $0x1b1] ss:$2 sm:$0x7f]  ;;  %v13921_v19 = vadd.f32 %v9895_v13, %v5508_v6 }
 0x4b5   : > { %10927 = vst [vmem:[%s17514_s15 + $0x28] sm:$0xf] %v10916_v5  ;;  %v10948_v29 = vmax.f32 %v10942_v17, %v10946_v54  ;;  %v10940_v42 = vld [vmem:[#allocation2 + $0x1a0] ss:$2 sm:$0xff]  ;;  %v10944_v58 = vld [vmem:[#allocation2 + $0x1a1] ss:$2 sm:$0xff]  ;;  %v10323_v33 = vadd.f32 %v17709_v53, %v13920_v20 }
 0x4b6   : > { %v10947_v4 = vmax.f32 %v10940_v42, %v10944_v58  ;;  %v13801_v36 = vpop.f32.mrb[62].mxu0  ;;  %10558 = vst [vmem:[#allocation2 + $0x1c8] sm:$0xff] %v10438_v28  ;;  %v10321_v32 = vadd.f32 %v17709_v53, %v13921_v19  ;;  %v18061_v46 = vmov 0 }
 0x4b7   : > { %v10950_v3 = vmax.f32 %v10938_v48, %v10948_v29  ;;  %v10443_v44 = vmax.f32 %v10323_v33, 0.0  ;;  %v13922_v45 = vadd.f32 %v13801_v36, %v13313_v11  ;;  %v9898_v25 = vpop.f32.mrb[63].mxu0  ;;  %v18062_v46 = vsel %vm17737_vm8, 4294967295, %v18061_v46 }
 0x4b8   : > { %v10949_v21 = vmax.f32 %v10937_v8, %v10947_v4  ;;  %v13316_v7 = vpop.f32.mrb[64].mxu1  ;;  %v13923_v59 = vadd.f32 %v9898_v25, %v5511_v31  ;;  %v10441_v51 = vmax.f32 %v10321_v32, 0.0 }
 0x4b9   : > { %v12194_v14 = vpack.c.bf16 %v10950_v3, %v10950_v3  ;;  %v5524_v24 = vpop.f32.mrb[65].mxu1  ;;  %10563 = vst [vmem:[#allocation2 + $0x1f0] sm:$0xff] %v10443_v44  ;;  %v10324_v10 = vadd.f32 %v17709_v53, %v13922_v45 }
 0x4ba   : > { %v12193_v39 = vpack.c.bf16 %v10949_v21, %v10949_v21  ;;  %v13317_v18 = vpop.f32.mrb[66].mxu1  ;;  %v10322_v0 = vadd.f32 %v17709_v53, %v13923_v59  ;;  %v13804_v2 = vpop.f32.mrb[64].mxu0  ;;  %10561 = vst [vmem:[#allocation2 + $0x1e0] sm:$0xff] %v10441_v51  ;;  %v10978_v26 = vld [vmem:[#allocation2 + $0x1d0] ss:$2 sm:$0x7f] }
 0x4bb   : > { %v10962_v57 = vrot.slane %v12194_v14, 7  ;;  %v5527_v50 = vpop.f32.mrb[67].mxu1  ;;  %v10444_v6 = vmax.f32 %v10324_v10, 0.0  ;;  %v13924_v52 = vadd.f32 %v13804_v2, %v13316_v7  ;;  %v9911_v34 = vpop.f32.mrb[65].mxu0 }
 0x4bc   : > { %v10960_v35 = vrot.slane %v12193_v39, 7  ;;  %v10442_v41 = vmax.f32 %v10322_v0, 0.0  ;;  %v13925_v16 = vadd.f32 %v9911_v34, %v5524_v24  ;;  %v13805_v11 = vpop.f32.mrb[66].mxu0  ;;  %v10982_v4 = vld [vmem:[#allocation2 + $0x1d1] ss:$2 sm:$0x7f] }
 0x4bd   : > { %v10964_v49 = vrot.slane %v10962_v57, 4  ;;  %10564 = vst [vmem:[#allocation2 + $0x1f8] sm:$0xff] %v10444_v6  ;;  %v10327_v12 = vadd.f32 %v17709_v53, %v13924_v52  ;;  %v13926_v63 = vadd.f32 %v13805_v11, %v13317_v18  ;;  %v9914_v38 = vpop.f32.mrb[67].mxu0  ;;  %v10976_v3 = vld [vmem:[#allocation2 + $0x1c0] ss:$2 sm:$0xff]  ;;  %v10984_v7 = vmax.f32 %v10978_v26, %v10982_v4 }
 0x4be   : > { %v10961_v9 = vrot.slane %v10960_v35, 4  ;;  %10968 = vst [vmem:[%s17514_s15 + $0x2c] sm:$0xe] %v10960_v35  ;;  %10562 = vst [vmem:[#allocation2 + $0x1e8] sm:$0xff] %v10442_v41  ;;  %v10325_v5 = vadd.f32 %v17709_v53, %v13925_v16  ;;  %v13927_v17 = vadd.f32 %v9914_v38, %v5527_v50  ;;  %v10980_v19 = vld [vmem:[#allocation2 + $0x1c1] ss:$2 sm:$0xff] }
 0x4bf   : > { %v10973_v31 = vsel %vm17730_vm5, %v10964_v49, %v10972_v15  ;;  %v10447_v56 = vmax.f32 %v10327_v12, 0.0  ;;  %v10328_v20 = vadd.f32 %v17709_v53, %v13926_v63  ;;  %v10983_v10 = vmax.f32 %v10976_v3, %v10980_v19 }
 0x4c0   : > { %10974 = vst [vmem:[%s17514_s15 + $0x34] sm:$0x1] %v10973_v31  ;;  %v10963_v54 = vsel %vm17737_vm8, %v10961_v9, %v10962_v57  ;;  %v13320_v48 = vpop.f32.mrb[68].mxu1  ;;  %v10445_v29 = vmax.f32 %v10325_v5, 0.0  ;;  %v10326_v42 = vadd.f32 %v17709_v53, %v13927_v17  ;;  %vm17757_vm8 = vmor %vm10970_vm13, %vm11003_vm0  ;;  %vm18065_vm5 = vcmask 1043456  }
 0x4c1   : > { %10969 = vst [vmem:[%s17514_s15 + $0x30] sm:$0xf] %v10963_v54  ;;  %v5540_v58 = vpop.f32.mrb[69].mxu1  ;;  %10567 = vst [vmem:[#allocation2 + $0x210] sm:$0xff] %v10447_v56  ;;  %v10448_v55 = vmax.f32 %v10328_v20, 0.0 }
 0x4c2   : > { %v13321_v8 = vpop.f32.mrb[70].mxu1  ;;  %10565 = vst [vmem:[#allocation2 + $0x200] sm:$0xff] %v10445_v29  ;;  %v10446_v28 = vmax.f32 %v10326_v42, 0.0  ;;  %v13808_v33 = vpop.f32.mrb[68].mxu0  ;;  %vm17763_vm6 = vmand %vm18065_vm5, %vm11023_vm1 }
 0x4c3   : > { %v5543_v13 = vpop.f32.mrb[71].mxu1  ;;  %10568 = vst [vmem:[#allocation2 + $0x218] sm:$0xff] %v10448_v55  ;;  %v13928_v36 = vadd.f32 %v13808_v33, %v13320_v48  ;;  %v9927_v21 = vpop.f32.mrb[69].mxu0 }
 0x4c4   : > { %v10988_v44 = vld [vmem:[#allocation2 + $0x1f0] ss:$2 sm:$0x7f]  ;;  %v10992_v45 = vld [vmem:[#allocation2 + $0x1f1] ss:$2 sm:$0x7f]  ;;  %v13929_v25 = vadd.f32 %v9927_v21, %v5540_v58 }
 0x4c5   : > { %10566 = vst [vmem:[#allocation2 + $0x208] sm:$0xff] %v10446_v28  ;;  %v10994_v14 = vmax.f32 %v10988_v44, %v10992_v45  ;;  %v10986_v32 = vld [vmem:[#allocation2 + $0x1e0] ss:$2 sm:$0xff]  ;;  %v10990_v59 = vld [vmem:[#allocation2 + $0x1e1] ss:$2 sm:$0xff]  ;;  %v10331_v24 = vadd.f32 %v17709_v53, %v13928_v36  ;;  %v13809_v39 = vpop.f32.mrb[70].mxu0 }
 0x4c6   : > { %v10993_v18 = vmax.f32 %v10986_v32, %v10990_v59  ;;  %v10329_v57 = vadd.f32 %v17709_v53, %v13929_v25  ;;  %v13930_v51 = vadd.f32 %v13809_v39, %v13321_v8  ;;  %v9930_v0 = vpop.f32.mrb[71].mxu0  ;;  %v11060_v8 = vld [vmem:[%s17514_s15 + $0x40] sm:$0xf] }
 0x4c7   : > { %v10996_v2 = vmax.f32 %v10984_v7, %v10994_v14  ;;  %v10451_v50 = vmax.f32 %v10331_v24, 0.0  ;;  %v13931_v15 = vadd.f32 %v9930_v0, %v5543_v13  ;;  %v11025_v21 = vld [vmem:[%s17514_s15 + $0x34] sm:$0xf] }
 0x4c8   : > { %v13324_v35 = vpop.f32.mrb[72].mxu1  ;;  %v10995_v6 = vmax.f32 %v10983_v10, %v10993_v18  ;;  %v10449_v52 = vmax.f32 %v10329_v57, 0.0  ;;  %v10332_v34 = vadd.f32 %v17709_v53, %v13930_v51 }
 0x4c9   : > { %v5556_v49 = vpop.f32.mrb[73].mxu1  ;;  %v12196_v41 = vpack.c.bf16 %v10996_v2, %v10996_v2  ;;  %10571 = vst [vmem:[#allocation2 + $0x230] sm:$0xff] %v10451_v50  ;;  %v10330_v16 = vadd.f32 %v17709_v53, %v13931_v15 }
 0x4ca   : > { %v13325_v11 = vpop.f32.mrb[74].mxu1  ;;  %v12195_v9 = vpack.c.bf16 %v10995_v6, %v10995_v6  ;;  %10569 = vst [vmem:[#allocation2 + $0x220] sm:$0xff] %v10449_v52  ;;  %v10452_v38 = vmax.f32 %v10332_v34, 0.0  ;;  %v13812_v31 = vpop.f32.mrb[72].mxu0 }
 0x4cb   : > { %v11014_v12 = vshrl.u32 %v12196_v41, 16  ;;  %v5559_v5 = vpop.f32.mrb[75].mxu1  ;;  %v11017_v54 = vshll.u32 %v12196_v41, 16  ;;  %v10450_v56 = vmax.f32 %v10330_v16, 0.0  ;;  %v13932_v20 = vadd.f32 %v13812_v31, %v13324_v35  ;;  %v9943_v48 = vpop.f32.mrb[73].mxu0 }
 0x4cc   : > { %v11006_v63 = vshrl.u32 %v12195_v9, 16  ;;  %v11009_v58 = vshll.u32 %v12195_v9, 16  ;;  %10572 = vst [vmem:[#allocation2 + $0x238] sm:$0xff] %v10452_v38  ;;  %v13933_v26 = vadd.f32 %v9943_v48, %v5556_v49  ;;  %v13813_v55 = vpop.f32.mrb[74].mxu0  ;;  %v11030_v2 = vld [vmem:[#allocation2 + $0x200] ss:$2 sm:$0xff] }
 0x4cd   : > { %v11016_v17 = vrot.slane %v11014_v12, 7  ;;  %10570 = vst [vmem:[#allocation2 + $0x228] sm:$0xff] %v10450_v56  ;;  %v10335_v28 = vadd.f32 %v17709_v53, %v13932_v20  ;;  %v13934_v33 = vadd.f32 %v13813_v55, %v13325_v11  ;;  %v9946_v13 = vpop.f32.mrb[75].mxu0  ;;  %v11032_v7 = vld [vmem:[#allocation2 + $0x210] ss:$2 sm:$0x7f] }
 0x4ce   : > { %v11008_v42 = vrot.slane %v11006_v63, 7  ;;  %v10333_v44 = vadd.f32 %v17709_v53, %v13933_v26  ;;  %v13935_v45 = vadd.f32 %v9946_v13, %v5559_v5  ;;  %v11036_v10 = vld [vmem:[#allocation2 + $0x211] ss:$2 sm:$0x7f]  ;;  %v11034_v50 = vld [vmem:[#allocation2 + $0x201] ss:$2 sm:$0xff] }
 0x4cf   : > { %v11019_v4 = vor.u32 %v11017_v54, %v11016_v17  ;;  %v10455_v14 = vmax.f32 %v10335_v28, 0.0  ;;  %v10336_v32 = vadd.f32 %v17709_v53, %v13934_v33  ;;  %v11038_v12 = vmax.f32 %v11032_v7, %v11036_v10 }
 0x4d0   : > { %v13328_v3 = vpop.f32.mrb[76].mxu1  ;;  %v11011_v19 = vor.u32 %v11009_v58, %v11008_v42  ;;  %v11012_v36 = vrot.slane %v11008_v42, 4  ;;  %v10453_v18 = vmax.f32 %v10333_v44, 0.0  ;;  %v10334_v57 = vadd.f32 %v17709_v53, %v13935_v45 }
 0x4d1   : > { %v5572_v25 = vpop.f32.mrb[77].mxu1  ;;  %10575 = vst [vmem:[#allocation2 + $0x250] sm:$0xff] %v10455_v14  ;;  %v10456_v15 = vmax.f32 %v10336_v32, 0.0  ;;  %v11037_v63 = vmax.f32 %v11030_v2, %v11034_v50 }
 0x4d2   : > { %v13329_v59 = vpop.f32.mrb[78].mxu1  ;;  %v11020_v24 = vsel %vm17757_vm8, %v11012_v36, %v11019_v4  ;;  %v11026_v39 = vsel %vm17763_vm6, %v11011_v19, %v11025_v21  ;;  %v13816_v51 = vpop.f32.mrb[76].mxu0  ;;  %10573 = vst [vmem:[#allocation2 + $0x240] sm:$0xff] %v10453_v18  ;;  %v10454_v52 = vmax.f32 %v10334_v57, 0.0  ;;  %vm18068_vm6 = vnez %v18056_v37  ;;  %v11348_v37 = vld [vmem:[%s17514_s15 + $0x70] sm:$0x1] }
 0x4d3   : > { %v5575_v0 = vpop.f32.mrb[79].mxu1  ;;  %11027 = vst [vmem:[%s17514_s15 + $0x34] sm:$0xf] %v11026_v39  ;;  %11028 = vst [vmem:[%s17514_s15 + $0x38] sm:$0xf] %v11020_v24  ;;  %v13936_v35 = vadd.f32 %v13816_v51, %v13328_v3  ;;  %v9959_v6 = vpop.f32.mrb[77].mxu0 }
 0x4d4   : > { %v13937_v34 = vadd.f32 %v9959_v6, %v5572_v25  ;;  %v13817_v49 = vpop.f32.mrb[78].mxu0  ;;  %v11042_v41 = vld [vmem:[#allocation2 + $0x230] ss:$2 sm:$0x7f]  ;;  %10576 = vst [vmem:[#allocation2 + $0x258] sm:$0xff] %v10456_v15  ;;  %10574 = vst [vmem:[#allocation2 + $0x248] sm:$0xff] %v10454_v52 }
 0x4d5   : > { %v11046_v16 = vld [vmem:[#allocation2 + $0x231] ss:$2 sm:$0x7f]  ;;  %v10339_v11 = vadd.f32 %v17709_v53, %v13936_v35  ;;  %v13938_v9 = vadd.f32 %v13817_v49, %v13329_v59  ;;  %v11040_v31 = vld [vmem:[#allocation2 + $0x220] ss:$2 sm:$0xff]  ;;  %v9962_v54 = vpop.f32.mrb[79].mxu0 }
 0x4d6   : > { %v11048_v38 = vmax.f32 %v11042_v41, %v11046_v16  ;;  %v11044_v5 = vld [vmem:[#allocation2 + $0x221] ss:$2 sm:$0xff]  ;;  %v10337_v17 = vadd.f32 %v17709_v53, %v13937_v34  ;;  %v13939_v29 = vadd.f32 %v9962_v54, %v5575_v0 }
 0x4d7   : > { %v11047_v56 = vmax.f32 %v11040_v31, %v11044_v5  ;;  %v10459_v20 = vmax.f32 %v10339_v11, 0.0  ;;  %v10340_v48 = vadd.f32 %v17709_v53, %v13938_v9 }
 0x4d8   : > { %v13332_v42 = vpop.f32.mrb[80].mxu1  ;;  %v11050_v58 = vmax.f32 %v11038_v12, %v11048_v38  ;;  %v10457_v26 = vmax.f32 %v10337_v17, 0.0  ;;  %v10338_v33 = vadd.f32 %v17709_v53, %v13939_v29 }
 0x4d9   : > { %v5588_v55 = vpop.f32.mrb[81].mxu1  ;;  %v11049_v4 = vmax.f32 %v11037_v63, %v11047_v56  ;;  %10579 = vst [vmem:[#allocation2 + $0x270] sm:$0xff] %v10459_v20  ;;  %v10460_v28 = vmax.f32 %v10340_v48, 0.0 }
 0x4da   : > { %v13333_v13 = vpop.f32.mrb[82].mxu1  ;;  %v12198_v3 = vpack.c.bf16 %v11050_v58, %v11050_v58  ;;  %10577 = vst [vmem:[#allocation2 + $0x260] sm:$0xff] %v10457_v26  ;;  %v13820_v19 = vpop.f32.mrb[80].mxu0  ;;  %v10458_v44 = vmax.f32 %v10338_v33, 0.0 }
 0x4db   : > { %v5591_v36 = vpop.f32.mrb[83].mxu1  ;;  %v12197_v21 = vpack.c.bf16 %v11049_v4, %v11049_v4  ;;  %10580 = vst [vmem:[#allocation2 + $0x278] sm:$0xff] %v10460_v28  ;;  %v13940_v45 = vadd.f32 %v13820_v19, %v13332_v42  ;;  %v9975_v25 = vpop.f32.mrb[81].mxu0  ;;  %v11066_v18 = vld [vmem:[#allocation2 + $0x250] ss:$2 sm:$0x7f] }
 0x4dc   : > { %v11061_v7 = vsel %vm17520_vm7, %v12198_v3, %v11060_v8  ;;  %v13941_v14 = vadd.f32 %v9975_v25, %v5588_v55  ;;  %10578 = vst [vmem:[#allocation2 + $0x268] sm:$0xff] %v10458_v44  ;;  %v13821_v59 = vpop.f32.mrb[82].mxu0  ;;  %v11070_v2 = vld [vmem:[#allocation2 + $0x251] ss:$2 sm:$0x7f]  ;;  %vm18069_vm7 = vnez %v18060_v23 }
 0x4dd   : > { %11062 = vst [vmem:[%s17514_s15 + $0x40] sm:$0xf] %v11061_v7  ;;  %11059 = vst [vmem:[%s17514_s15 + $0x3c] sm:$0xf] %v12197_v21  ;;  %v10343_v32 = vadd.f32 %v17709_v53, %v13940_v45  ;;  %v13942_v39 = vadd.f32 %v13821_v59, %v13333_v13  ;;  %v9978_v10 = vpop.f32.mrb[83].mxu0  ;;  %v11072_v16 = vmax.f32 %v11066_v18, %v11070_v2 }
 0x4de   : > { %v10341_v24 = vadd.f32 %v17709_v53, %v13941_v14  ;;  %v13943_v51 = vadd.f32 %v9978_v10, %v5591_v36  ;;  %v11064_v35 = vld [vmem:[#allocation2 + $0x240] ss:$2 sm:$0xff]  ;;  %v11068_v6 = vld [vmem:[#allocation2 + $0x241] ss:$2 sm:$0xff] }
 0x4df   : > { %v10463_v57 = vmax.f32 %v10343_v32, 0.0  ;;  %v10344_v1 = vadd.f32 %v17709_v53, %v13942_v39  ;;  %v11071_v54 = vmax.f32 %v11064_v35, %v11068_v6 }
 0x4e0   : > { %v13336_v0 = vpop.f32.mrb[84].mxu1  ;;  %v10461_v50 = vmax.f32 %v10341_v24, 0.0  ;;  %v10342_v52 = vadd.f32 %v17709_v53, %v13943_v51 }
 0x4e1   : > { %v5604_v15 = vpop.f32.mrb[85].mxu1  ;;  %10583 = vst [vmem:[#allocation2 + $0x290] sm:$0xff] %v10463_v57  ;;  %v10464_v9 = vmax.f32 %v10344_v1, 0.0 }
 0x4e2   : > { %v13337_v34 = vpop.f32.mrb[86].mxu1  ;;  %v11076_v49 = vld [vmem:[#allocation2 + $0x270] ss:$2 sm:$0x7f]  ;;  %10581 = vst [vmem:[#allocation2 + $0x280] sm:$0xff] %v10461_v50  ;;  %v10462_v12 = vmax.f32 %v10342_v52, 0.0 }
 0x4e3   : > { %v11080_v41 = vld [vmem:[#allocation2 + $0x271] ss:$2 sm:$0x7f]  ;;  %v13824_v63 = vpop.f32.mrb[84].mxu0  ;;  %v5607_v38 = vpop.f32.mrb[87].mxu1  ;;  %10584 = vst [vmem:[#allocation2 + $0x298] sm:$0xff] %v10464_v9 }
 0x4e4   : > { %v11082_v11 = vmax.f32 %v11076_v49, %v11080_v41  ;;  %v11074_v31 = vld [vmem:[#allocation2 + $0x260] ss:$2 sm:$0xff]  ;;  %v11078_v5 = vld [vmem:[#allocation2 + $0x261] ss:$2 sm:$0xff]  ;;  %v13944_v17 = vadd.f32 %v13824_v63, %v13336_v0  ;;  %10582 = vst [vmem:[#allocation2 + $0x288] sm:$0xff] %v10462_v12  ;;  %v9991_v48 = vpop.f32.mrb[85].mxu0 }
 0x4e5   : > { %v11081_v20 = vmax.f32 %v11074_v31, %v11078_v5  ;;  %v13945_v42 = vadd.f32 %v9991_v48, %v5604_v15  ;;  %v13825_v58 = vpop.f32.mrb[86].mxu0  ;;  %v11113_v15 = vld [vmem:[%s17514_s15 + $0x40] sm:$0x8] }
 0x4e6   : > { %v11084_v56 = vmax.f32 %v11072_v16, %v11082_v11  ;;  %v10347_v29 = vadd.f32 %v17709_v53, %v13944_v17  ;;  %v13946_v8 = vadd.f32 %v13825_v58, %v13337_v34  ;;  %v9994_v4 = vpop.f32.mrb[87].mxu0 }
 0x4e7   : > { %v11083_v55 = vmax.f32 %v11071_v54, %v11081_v20  ;;  %v10345_v13 = vadd.f32 %v17709_v53, %v13945_v42  ;;  %v13947_v3 = vadd.f32 %v9994_v4, %v5607_v38 }
 0x4e8   : > { %v12200_v26 = vpack.c.bf16 %v11084_v56, %v11084_v56  ;;  %v13340_v28 = vpop.f32.mrb[88].mxu1  ;;  %v10467_v33 = vmax.f32 %v10347_v29, 0.0  ;;  %v10348_v7 = vadd.f32 %v17709_v53, %v13946_v8 }
 0x4e9   : > { %v5620_v19 = vpop.f32.mrb[89].mxu1  ;;  %v12199_v44 = vpack.c.bf16 %v11083_v55, %v11083_v55  ;;  %v10465_v25 = vmax.f32 %v10345_v13, 0.0  ;;  %v10346_v14 = vadd.f32 %v17709_v53, %v13947_v3 }
 0x4ea   : > { %v11101_v36 = vshll.u32 %v12200_v26, 16  ;;  %v11105_v21 = vshrl.u32 %v12200_v26, 16  ;;  %v13341_v45 = vpop.f32.mrb[90].mxu1  ;;  %10587 = vst [vmem:[#allocation2 + $0x2b0] sm:$0xff] %v10467_v33  ;;  %v13828_v32 = vpop.f32.mrb[88].mxu0  ;;  %v10468_v35 = vmax.f32 %v10348_v7, 0.0 }
 0x4eb   : > { %v5623_v59 = vpop.f32.mrb[91].mxu1  ;;  %v11092_v10 = vshll.u32 %v12199_v44, 16  ;;  %v11095_v18 = vshrl.u32 %v12199_v44, 16  ;;  %v10007_v57 = vpop.f32.mrb[89].mxu0  ;;  %10585 = vst [vmem:[#allocation2 + $0x2a0] sm:$0xff] %v10465_v25  ;;  %v13948_v51 = vadd.f32 %v13828_v32, %v13340_v28  ;;  %v10466_v6 = vmax.f32 %v10346_v14, 0.0 }
 0x4ec   : > { %v11103_v24 = vrot.slane %v11101_v36, 5  ;;  %v11107_v39 = vrot.slane %v11105_v21, 4  ;;  %v13949_v0 = vadd.f32 %v10007_v57, %v5620_v19  ;;  %v13829_v34 = vpop.f32.mrb[90].mxu0  ;;  %10588 = vst [vmem:[#allocation2 + $0x2b8] sm:$0xff] %v10468_v35  ;;  %v11119_v21 = vld [vmem:[#allocation2 + $0x280] ss:$2 sm:$0xff] }
 0x4ed   : > { %v11094_v50 = vrot.slane %v11092_v10, 5  ;;  %v11097_v1 = vrot.slane %v11095_v18, 4  ;;  %v10351_v52 = vadd.f32 %v17709_v53, %v13948_v51  ;;  %v10010_v9 = vpop.f32.mrb[91].mxu0  ;;  %10586 = vst [vmem:[#allocation2 + $0x2a8] sm:$0xff] %v10466_v6  ;;  %v13950_v38 = vadd.f32 %v13829_v34, %v13341_v45  ;;  %v11123_v44 = vld [vmem:[#allocation2 + $0x281] ss:$2 sm:$0xff] }
 0x4ee   : > { %v11108_v2 = vor.u32 %v11107_v39, %v11103_v24  ;;  %v10349_v11 = vadd.f32 %v17709_v53, %v13949_v0  ;;  %v13951_v31 = vadd.f32 %v10010_v9, %v5623_v59  ;;  %v11121_v58 = vld [vmem:[#allocation2 + $0x290] ss:$2 sm:$0x7f]  ;;  %v11125_v8 = vld [vmem:[#allocation2 + $0x291] ss:$2 sm:$0x7f]  ;;  %v11126_v51 = vmax.f32 %v11119_v21, %v11123_v44 }
 0x4ef   : > { %v11098_v41 = vor.u32 %v11097_v1, %v11094_v50  ;;  %v11114_v16 = vsel %vm17554_vm10, %v11094_v50, %v11113_v15  ;;  %v10471_v63 = vmax.f32 %v10351_v52, 0.0  ;;  %v10352_v40 = vadd.f32 %v17709_v53, %v13950_v38 }
 0x4f0   : > { %v11109_v49 = vrot.slane %v11108_v2, 4  ;;  %v13344_v12 = vpop.f32.mrb[92].mxu1  ;;  %11115 = vst [vmem:[%s17514_s15 + $0x40] sm:$0x8] %v11114_v16  ;;  %v10469_v54 = vmax.f32 %v10349_v11, 0.0  ;;  %v10350_v20 = vadd.f32 %v17709_v53, %v13951_v31  ;;  %v11127_v25 = vmax.f32 %v11121_v58, %v11125_v8 }
 0x4f1   : > { %v5636_v5 = vpop.f32.mrb[93].mxu1  ;;  %v11099_v17 = vrot.slane %v11098_v41, 4  ;;  %10591 = vst [vmem:[#allocation2 + $0x2d0] sm:$0xff] %v10471_v63  ;;  %v10472_v4 = vmax.f32 %v10352_v40, 0.0  ;;  %v11156_v63 = vld [vmem:[%s17514_s15 + $0x50] sm:$0x7]  ;;  %vm18070_vm10 = vnez %v18062_v46 }
 0x4f2   : > { %11117 = vst [vmem:[%s17514_s15 + $0x48] sm:$0x7] %v11109_v49  ;;  %v13345_v56 = vpop.f32.mrb[94].mxu1  ;;  %v13832_v48 = vpop.f32.mrb[92].mxu0  ;;  %10589 = vst [vmem:[#allocation2 + $0x2c0] sm:$0xff] %v10469_v54  ;;  %v10470_v28 = vmax.f32 %v10350_v20, 0.0 }
 0x4f3   : > { %v5639_v29 = vpop.f32.mrb[95].mxu1  ;;  %v11104_v42 = vsel %vm17565_vm12, %v11099_v17, %v11103_v24  ;;  %v13952_v26 = vadd.f32 %v13832_v48, %v13344_v12  ;;  %v10023_v55 = vpop.f32.mrb[93].mxu0  ;;  %10592 = vst [vmem:[#allocation2 + $0x2d8] sm:$0xff] %v10472_v4  ;;  %v11131_v7 = vld [vmem:[#allocation2 + $0x2b0] ss:$2 sm:$0x7f] }
 0x4f4   : > { %11116 = vst [vmem:[%s17514_s15 + $0x44] sm:$0xf] %v11104_v42  ;;  %v13953_v33 = vadd.f32 %v10023_v55, %v5636_v5  ;;  %v13833_v13 = vpop.f32.mrb[94].mxu0  ;;  %10590 = vst [vmem:[#allocation2 + $0x2c8] sm:$0xff] %v10470_v28  ;;  %v11129_v24 = vld [vmem:[#allocation2 + $0x2a0] ss:$2 sm:$0xff] }
 0x4f5   : > { %v10355_v3 = vadd.f32 %v17709_v53, %v13952_v26  ;;  %v13954_v19 = vadd.f32 %v13833_v13, %v13345_v56  ;;  %v10026_v36 = vpop.f32.mrb[95].mxu0  ;;  %v11135_v14 = vld [vmem:[#allocation2 + $0x2b1] ss:$2 sm:$0x7f]  ;;  %v11133_v39 = vld [vmem:[#allocation2 + $0x2a1] ss:$2 sm:$0xff] }
 0x4f6   : > { %v10353_v62 = vadd.f32 %v17709_v53, %v13953_v33  ;;  %v13955_v45 = vadd.f32 %v10026_v36, %v5639_v29  ;;  %v11137_v59 = vmax.f32 %v11131_v7, %v11135_v14  ;;  %v11136_v0 = vmax.f32 %v11129_v24, %v11133_v39 }
 0x4f7   : > { %v10356_v32 = vadd.f32 %v17709_v53, %v13954_v19  ;;  %v10475_v10 = vmax.f32 %v10355_v3, 0.0 }
 0x4f8   : > { %v10473_v18 = vmax.f32 %v10353_v62, 0.0  ;;  %v10354_v57 = vadd.f32 %v17709_v53, %v13955_v45  ;;  %v13348_v50 = vpop.f32.mrb[96].mxu1  ;;  %v11139_v1 = vmax.f32 %v11127_v25, %v11137_v59  ;;  %v11138_v52 = vmax.f32 %v11126_v51, %v11136_v0 }
 0x4f9   : > { %v10476_v2 = vmax.f32 %v10356_v32, 0.0  ;;  %10595 = vst [vmem:[#allocation2 + $0x2f0] sm:$0xff] %v10475_v10  ;;  %v5652_v6 = vpop.f32.mrb[97].mxu1 }
 0x4fa   : > { %10593 = vst [vmem:[#allocation2 + $0x2e0] sm:$0xff] %v10473_v18  ;;  %v10474_v15 = vmax.f32 %v10354_v57, 0.0  ;;  %v13836_v35 = vpop.f32.mrb[96].mxu0  ;;  %v13349_v41 = vpop.f32.mrb[98].mxu1  ;;  %v12202_v16 = vpack.c.bf16 %v11139_v1, %v11139_v1  ;;  %v12201_v38 = vpack.c.bf16 %v11138_v52, %v11138_v52 }
 0x4fb   : > { %10596 = vst [vmem:[#allocation2 + $0x2f8] sm:$0xff] %v10476_v2  ;;  %v13956_v34 = vadd.f32 %v13836_v35, %v13348_v50  ;;  %v10039_v49 = vpop.f32.mrb[97].mxu0  ;;  %v5655_v12 = vpop.f32.mrb[99].mxu1  ;;  %v11162_v54 = vld [vmem:[#allocation2 + $0x2d0] ss:$2 sm:$0x7f] }
 0x4fc   : > { %10594 = vst [vmem:[#allocation2 + $0x2e8] sm:$0xff] %v10474_v15  ;;  %v13957_v11 = vadd.f32 %v10039_v49, %v5652_v6  ;;  %v13837_v9 = vpop.f32.mrb[98].mxu0  ;;  %v11148_v17 = vrot.slane %v12202_v16, 5  ;;  %v11146_v20 = vrot.slane %v12201_v38, 5  ;;  %v11160_v55 = vld [vmem:[#allocation2 + $0x2c0] ss:$2 sm:$0xff] }
 0x4fd   : > { %v10359_v31 = vadd.f32 %v17709_v53, %v13956_v34  ;;  %v13958_v5 = vadd.f32 %v13837_v9, %v13349_v41  ;;  %v10042_v40 = vpop.f32.mrb[99].mxu0  ;;  %v11166_v48 = vld [vmem:[#allocation2 + $0x2d1] ss:$2 sm:$0x7f]  ;;  %v11164_v13 = vld [vmem:[#allocation2 + $0x2c1] ss:$2 sm:$0xff] }
 0x4fe   : > { %v10357_v56 = vadd.f32 %v17709_v53, %v13957_v11  ;;  %v11150_v26 = vrot.slane %v11148_v17, 4  ;;  %v13959_v4 = vadd.f32 %v10042_v40, %v5655_v12  ;;  %v11147_v33 = vrot.slane %v11146_v20, 4  ;;  %11154 = vst [vmem:[%s17514_s15 + $0x48] sm:$0x8] %v11146_v20 }
 0x4ff   : > { %v10479_v29 = vmax.f32 %v10359_v31, 0.0  ;;  %v10360_v42 = vadd.f32 %v17709_v53, %v13958_v5  ;;  %v11168_v25 = vmax.f32 %v11162_v54, %v11166_v48  ;;  %v11167_v39 = vmax.f32 %v11160_v55, %v11164_v13 }
 0x500   : > { %v13352_v58 = vpop.f32.mrb[100].mxu1  ;;  %v10477_v8 = vmax.f32 %v10357_v56, 0.0  ;;  %v11157_v36 = vsel %vm17588_vm2, %v11150_v26, %v11156_v63  ;;  %v10358_v62 = vadd.f32 %v17709_v53, %v13959_v4  ;;  %v11149_v45 = vsel %vm17595_vm3, %v11147_v33, %v11148_v17 }
 0x501   : > { %v5668_v28 = vpop.f32.mrb[101].mxu1  ;;  %10599 = vst [vmem:[#allocation2 + $0x310] sm:$0xff] %v10479_v29  ;;  %v10480_v3 = vmax.f32 %v10360_v42, 0.0  ;;  %11158 = vst [vmem:[%s17514_s15 + $0x50] sm:$0x7] %v11157_v36 }
 0x502   : > { %v13353_v19 = vpop.f32.mrb[102].mxu1  ;;  %v11172_v21 = vld [vmem:[#allocation2 + $0x2f0] ss:$2 sm:$0x7f]  ;;  %10597 = vst [vmem:[#allocation2 + $0x300] sm:$0xff] %v10477_v8  ;;  %v13840_v59 = vpop.f32.mrb[100].mxu0 }
 0x503   : > { %v11176_v44 = vld [vmem:[#allocation2 + $0x2f1] ss:$2 sm:$0x7f]  ;;  %v11170_v14 = vld [vmem:[#allocation2 + $0x2e0] ss:$2 sm:$0xff]  ;;  %10600 = vst [vmem:[#allocation2 + $0x318] sm:$0xff] %v10480_v3  ;;  %v13960_v18 = vadd.f32 %v13840_v59, %v13352_v58 }
 0x504   : > { %v11178_v7 = vmax.f32 %v11172_v21, %v11176_v44  ;;  %v11174_v32 = vld [vmem:[#allocation2 + $0x2e1] ss:$2 sm:$0xff]  ;;  %v5671_v24 = vpop.f32.mrb[103].mxu1  ;;  %11155 = vst [vmem:[%s17514_s15 + $0x4c] sm:$0xf] %v11149_v45  ;;  %v10478_v10 = vmax.f32 %v10358_v62, 0.0 }
 0x505   : > { %v11177_v47 = vmax.f32 %v11170_v14, %v11174_v32  ;;  %v10055_v57 = vpop.f32.mrb[101].mxu0  ;;  %v10363_v30 = vadd.f32 %v17709_v53, %v13960_v18 }
 0x506   : > { %v11180_v51 = vmax.f32 %v11168_v25, %v11178_v7  ;;  %v13961_v0 = vadd.f32 %v10055_v57, %v5668_v28  ;;  %v13841_v2 = vpop.f32.mrb[102].mxu0  ;;  %10598 = vst [vmem:[#allocation2 + $0x308] sm:$0xff] %v10478_v10 }
 0x507   : > { %v11179_v50 = vmax.f32 %v11167_v39, %v11177_v47  ;;  %v13962_v1 = vadd.f32 %v13841_v2, %v13353_v19  ;;  %v10058_v15 = vpop.f32.mrb[103].mxu0  ;;  %v10483_v41 = vmax.f32 %v10363_v30, 0.0 }
 0x508   : > { %v12204_v35 = vpack.c.bf16 %v11180_v51, %v11180_v51  ;;  %v10361_v6 = vadd.f32 %v17709_v53, %v13961_v0  ;;  %v13963_v52 = vadd.f32 %v10058_v15, %v5671_v24  ;;  %v13356_v34 = vpop.f32.mrb[104].mxu1  ;;  %v11209_v3 = vld [vmem:[%s17514_s15 + $0x50] sm:$0xc] }
 0x509   : > { %v12203_v49 = vpack.c.bf16 %v11179_v50, %v11179_v50  ;;  %v10364_v16 = vadd.f32 %v17709_v53, %v13962_v1  ;;  %v5684_v11 = vpop.f32.mrb[105].mxu1  ;;  %10603 = vst [vmem:[#allocation2 + $0x330] sm:$0xff] %v10483_v41 }
 0x50a   : > { %v11197_v9 = vshrl.u32 %v12204_v35, 16  ;;  %v11200_v12 = vshll.u32 %v12204_v35, 16  ;;  %v10481_v63 = vmax.f32 %v10361_v6, 0.0  ;;  %v10362_v38 = vadd.f32 %v17709_v53, %v13963_v52  ;;  %v13357_v31 = vpop.f32.mrb[106].mxu1  ;;  %v13844_v56 = vpop.f32.mrb[104].mxu0 }
 0x50b   : > { %v11188_v5 = vshrl.u32 %v12203_v49, 16  ;;  %v11191_v17 = vshll.u32 %v12203_v49, 16  ;;  %v10484_v54 = vmax.f32 %v10364_v16, 0.0  ;;  %v13964_v29 = vadd.f32 %v13844_v56, %v13356_v34  ;;  %v10071_v26 = vpop.f32.mrb[105].mxu0  ;;  %v5687_v33 = vpop.f32.mrb[107].mxu1 }
 0x50c   : > { %v11199_v40 = vrot.slane %v11197_v9, 5  ;;  %v11202_v20 = vrot.slane %v11200_v12, 6  ;;  %10601 = vst [vmem:[#allocation2 + $0x320] sm:$0xff] %v10481_v63  ;;  %v10482_v48 = vmax.f32 %v10362_v38, 0.0  ;;  %v13965_v4 = vadd.f32 %v10071_v26, %v5684_v11  ;;  %v13845_v28 = vpop.f32.mrb[106].mxu0 }
 0x50d   : > { %v11190_v42 = vrot.slane %v11188_v5, 5  ;;  %v11193_v58 = vrot.slane %v11191_v17, 6  ;;  %10604 = vst [vmem:[#allocation2 + $0x338] sm:$0xff] %v10484_v54  ;;  %v10367_v8 = vadd.f32 %v17709_v53, %v13964_v29  ;;  %v13966_v19 = vadd.f32 %v13845_v28, %v13357_v31  ;;  %v10074_v36 = vpop.f32.mrb[107].mxu0  ;;  %v11215_v47 = vld [vmem:[#allocation2 + $0x300] ss:$2 sm:$0xff] }
 0x50e   : > { %v11203_v55 = vor.u32 %v11202_v20, %v11199_v40  ;;  %10602 = vst [vmem:[#allocation2 + $0x328] sm:$0xff] %v10482_v48  ;;  %v11217_v44 = vld [vmem:[#allocation2 + $0x310] ss:$2 sm:$0x7f]  ;;  %v10365_v45 = vadd.f32 %v17709_v53, %v13965_v4  ;;  %v13967_v25 = vadd.f32 %v10074_v36, %v5687_v33  ;;  %v11219_v0 = vld [vmem:[#allocation2 + $0x301] ss:$2 sm:$0xff] }
 0x50f   : > { %v11194_v13 = vor.u32 %v11193_v58, %v11190_v42  ;;  %v10487_v62 = vmax.f32 %v10367_v8, 0.0  ;;  %v11221_v59 = vld [vmem:[#allocation2 + $0x311] ss:$2 sm:$0x7f]  ;;  %v10368_v24 = vadd.f32 %v17709_v53, %v13966_v19  ;;  %v11222_v16 = vmax.f32 %v11215_v47, %v11219_v0  ;;  %v17844_v48 = vld [vmem:[%s17885_s2] ss:$0 sm:$0xff] }
 0x510   : > { %v11205_v21 = vrot.slane %v11203_v55, 4  ;;  %v13360_v7 = vpop.f32.mrb[108].mxu1  ;;  %v10485_v10 = vmax.f32 %v10365_v45, 0.0  ;;  %v10366_v18 = vadd.f32 %v17709_v53, %v13967_v25  ;;  %v11223_v35 = vmax.f32 %v11217_v44, %v11221_v59 }
 0x511   : > { %v11195_v14 = vrot.slane %v11194_v13, 4  ;;  %v11210_v32 = vsel %vm17626_vm9, %v11194_v13, %v11209_v3  ;;  %v5700_v39 = vpop.f32.mrb[109].mxu1  ;;  %10607 = vst [vmem:[#allocation2 + $0x350] sm:$0xff] %v10487_v62  ;;  %v10488_v2 = vmax.f32 %v10368_v24, 0.0  ;;  %v11252_v13 = vld [vmem:[%s17514_s15 + $0x60] sm:$0x3] }
 0x512   : > { %11213 = vst [vmem:[%s17514_s15 + $0x58] sm:$0x3] %v11205_v21  ;;  %11211 = vst [vmem:[%s17514_s15 + $0x50] sm:$0xc] %v11210_v32  ;;  %v13361_v57 = vpop.f32.mrb[110].mxu1  ;;  %v13848_v22 = vpop.f32.mrb[108].mxu0 }
 0x513   : > { %v11204_v51 = vsel %vm17636_vm11, %v11195_v14, %v11203_v55  ;;  %v5703_v50 = vpop.f32.mrb[111].mxu1  ;;  %10605 = vst [vmem:[#allocation2 + $0x340] sm:$0xff] %v10485_v10  ;;  %v13968_v15 = vadd.f32 %v13848_v22, %v13360_v7  ;;  %10608 = vst [vmem:[#allocation2 + $0x358] sm:$0xff] %v10488_v2  ;;  %v10486_v49 = vmax.f32 %v10366_v18, 0.0  ;;  %v10087_v41 = vpop.f32.mrb[109].mxu0 }
 0x514   : > { %11212 = vst [vmem:[%s17514_s15 + $0x54] sm:$0xf] %v11204_v51  ;;  %v11227_v30 = vld [vmem:[#allocation2 + $0x330] ss:$2 sm:$0x7f]  ;;  %v13969_v9 = vadd.f32 %v10087_v41, %v5700_v39  ;;  %v13849_v12 = vpop.f32.mrb[110].mxu0 }
 0x515   : > { %v11231_v1 = vld [vmem:[#allocation2 + $0x331] ss:$2 sm:$0x7f]  ;;  %v11225_v52 = vld [vmem:[#allocation2 + $0x320] ss:$2 sm:$0xff]  ;;  %v10371_v61 = vadd.f32 %v17709_v53, %v13968_v15  ;;  %10606 = vst [vmem:[#allocation2 + $0x348] sm:$0xff] %v10486_v49  ;;  %v13970_v38 = vadd.f32 %v13849_v12, %v13361_v57 }
 0x516   : > { %v11233_v6 = vmax.f32 %v11227_v30, %v11231_v1  ;;  %v11229_v34 = vld [vmem:[#allocation2 + $0x321] ss:$2 sm:$0xff]  ;;  %v10090_v31 = vpop.f32.mrb[111].mxu0  ;;  %v10369_v54 = vadd.f32 %v17709_v53, %v13969_v9 }
 0x517   : > { %v11232_v11 = vmax.f32 %v11225_v52, %v11229_v34  ;;  %v10491_v17 = vmax.f32 %v10371_v61, 0.0  ;;  %v13971_v56 = vadd.f32 %v10090_v31, %v5703_v50  ;;  %v10372_v29 = vadd.f32 %v17844_v48, %v13970_v38 }
 0x518   : > { %v11235_v63 = vmax.f32 %v11223_v35, %v11233_v6  ;;  %v13364_v40 = vpop.f32.mrb[112].mxu1  ;;  %v10489_v26 = vmax.f32 %v10369_v54, 0.0 }
 0x519   : > { %v11234_v5 = vmax.f32 %v11222_v16, %v11232_v11  ;;  %v5716_v42 = vpop.f32.mrb[113].mxu1  ;;  %10611 = vst [vmem:[#allocation2 + $0x370] sm:$0xff] %v10491_v17  ;;  %v10370_v55 = vadd.f32 %v17844_v48, %v13971_v56  ;;  %v10492_v4 = vmax.f32 %v10372_v29, 0.0 }
 0x51a   : > { %v12206_v20 = vpack.c.bf16 %v11235_v63, %v11235_v63  ;;  %v13365_v8 = vpop.f32.mrb[114].mxu1  ;;  %v13852_v28 = vpop.f32.mrb[112].mxu0  ;;  %10609 = vst [vmem:[#allocation2 + $0x360] sm:$0xff] %v10489_v26  ;;  %v11258_v10 = vld [vmem:[#allocation2 + $0x350] ss:$2 sm:$0x7f] }
 0x51b   : > { %v12205_v58 = vpack.c.bf16 %v11234_v5, %v11234_v5  ;;  %v5719_v33 = vpop.f32.mrb[115].mxu1  ;;  %v10490_v19 = vmax.f32 %v10370_v55, 0.0  ;;  %v13972_v36 = vadd.f32 %v13852_v28, %v13364_v40  ;;  %v10103_v21 = vpop.f32.mrb[113].mxu0  ;;  %10612 = vst [vmem:[#allocation2 + $0x378] sm:$0xff] %v10492_v4 }
 0x51c   : > { %v11244_v53 = vrot.slane %v12206_v20, 6  ;;  %v13973_v62 = vadd.f32 %v10103_v21, %v5716_v42  ;;  %v13853_v45 = vpop.f32.mrb[114].mxu0  ;;  %v11262_v0 = vld [vmem:[#allocation2 + $0x351] ss:$2 sm:$0x7f] }
 0x51d   : > { %v11242_v3 = vrot.slane %v12205_v58, 6  ;;  %10610 = vst [vmem:[#allocation2 + $0x368] sm:$0xff] %v10490_v19  ;;  %v10375_v7 = vadd.f32 %v17844_v48, %v13972_v36  ;;  %v13974_v14 = vadd.f32 %v13853_v45, %v13365_v8  ;;  %v10106_v32 = vpop.f32.mrb[115].mxu0  ;;  %v11256_v27 = vld [vmem:[#allocation2 + $0x340] ss:$2 sm:$0xff]  ;;  %v11264_v41 = vmax.f32 %v11258_v10, %v11262_v0 }
 0x51e   : > { %v11246_v44 = vrot.slane %v11244_v53, 4  ;;  %v10373_v24 = vadd.f32 %v17844_v48, %v13973_v62  ;;  %v13975_v39 = vadd.f32 %v10106_v32, %v5719_v33  ;;  %v11260_v15 = vld [vmem:[#allocation2 + $0x341] ss:$2 sm:$0xff] }
 0x51f   : > { %v11243_v25 = vrot.slane %v11242_v3, 4  ;;  %11250 = vst [vmem:[%s17514_s15 + $0x58] sm:$0xc] %v11242_v3  ;;  %v10495_v18 = vmax.f32 %v10375_v7, 0.0  ;;  %v10376_v57 = vadd.f32 %v17844_v48, %v13974_v14  ;;  %v11263_v12 = vmax.f32 %v11256_v27, %v11260_v15 }
 0x520   : > { %v11253_v59 = vsel %vm17658_vm15, %v11246_v44, %v11252_v13  ;;  %v13368_v51 = vpop.f32.mrb[116].mxu1  ;;  %v10493_v2 = vmax.f32 %v10373_v24, 0.0  ;;  %v10374_v22 = vadd.f32 %v17844_v48, %v13975_v39 }
 0x521   : > { %11254 = vst [vmem:[%s17514_s15 + $0x60] sm:$0x3] %v11253_v59  ;;  %v11245_v47 = vsel %vm17666_vm4, %v11243_v25, %v11244_v53  ;;  %v5732_v50 = vpop.f32.mrb[117].mxu1  ;;  %10615 = vst [vmem:[#allocation2 + $0x390] sm:$0xff] %v10495_v18  ;;  %v10496_v30 = vmax.f32 %v10376_v57, 0.0 }
 0x522   : > { %11251 = vst [vmem:[%s17514_s15 + $0x5c] sm:$0xf] %v11245_v47  ;;  %v13369_v1 = vpop.f32.mrb[118].mxu1  ;;  %10613 = vst [vmem:[#allocation2 + $0x380] sm:$0xff] %v10493_v2  ;;  %v10494_v35 = vmax.f32 %v10374_v22, 0.0  ;;  %v13856_v60 = vpop.f32.mrb[116].mxu0 }
 0x523   : > { %v5735_v6 = vpop.f32.mrb[119].mxu1  ;;  %v11268_v52 = vld [vmem:[#allocation2 + $0x370] ss:$2 sm:$0x7f]  ;;  %10616 = vst [vmem:[#allocation2 + $0x398] sm:$0xff] %v10496_v30  ;;  %v13976_v49 = vadd.f32 %v13856_v60, %v13368_v51  ;;  %v10119_v9 = vpop.f32.mrb[117].mxu0 }
 0x524   : > { %v11272_v34 = vld [vmem:[#allocation2 + $0x371] ss:$2 sm:$0x7f]  ;;  %v11266_v11 = vld [vmem:[#allocation2 + $0x360] ss:$2 sm:$0xff]  ;;  %10614 = vst [vmem:[#allocation2 + $0x388] sm:$0xff] %v10494_v35  ;;  %v13977_v31 = vadd.f32 %v10119_v9, %v5732_v50 }
 0x525   : > { %v11274_v16 = vmax.f32 %v11268_v52, %v11272_v34  ;;  %v11270_v61 = vld [vmem:[#allocation2 + $0x361] ss:$2 sm:$0xff]  ;;  %v10379_v38 = vadd.f32 %v17844_v48, %v13976_v49  ;;  %v13857_v5 = vpop.f32.mrb[118].mxu0 }
 0x526   : > { %v11273_v63 = vmax.f32 %v11266_v11, %v11270_v61  ;;  %v13978_v54 = vadd.f32 %v13857_v5, %v13369_v1  ;;  %v10122_v56 = vpop.f32.mrb[119].mxu0  ;;  %v10377_v29 = vadd.f32 %v17844_v48, %v13977_v31 }
 0x527   : > { %v11276_v17 = vmax.f32 %v11264_v41, %v11274_v16  ;;  %v10499_v20 = vmax.f32 %v10379_v38, 0.0  ;;  %v13979_v42 = vadd.f32 %v10122_v56, %v5735_v6 }
 0x528   : > { %v11275_v40 = vmax.f32 %v11263_v12, %v11273_v63  ;;  %v10380_v26 = vadd.f32 %v17844_v48, %v13978_v54  ;;  %v10497_v8 = vmax.f32 %v10377_v29, 0.0  ;;  %v11305_v7 = vld [vmem:[%s17514_s15 + $0x60] sm:$0xe] }
 0x529   : > { %v12208_v58 = vpack.c.bf16 %v11276_v17, %v11276_v17  ;;  %10619 = vst [vmem:[#allocation2 + $0x3b0] sm:$0xff] %v10499_v20  ;;  %v10378_v53 = vadd.f32 %v17844_v48, %v13979_v42 }
 0x52a   : > { %v12207_v55 = vpack.c.bf16 %v11275_v40, %v11275_v40  ;;  %v10500_v33 = vmax.f32 %v10380_v26, 0.0  ;;  %10617 = vst [vmem:[#allocation2 + $0x3a0] sm:$0xff] %v10497_v8  ;;  %v11313_v14 = vld [vmem:[#allocation2 + $0x390] ss:$2 sm:$0x7f] }
 0x52b   : > { %v11293_v4 = vshrl.u32 %v12208_v58, 16  ;;  %v11296_v28 = vshll.u32 %v12208_v58, 16  ;;  %v10498_v19 = vmax.f32 %v10378_v53, 0.0  ;;  %v11317_v24 = vld [vmem:[#allocation2 + $0x391] ss:$2 sm:$0x7f] }
 0x52c   : > { %v11284_v13 = vshrl.u32 %v12207_v55, 16  ;;  %v11287_v3 = vshll.u32 %v12207_v55, 16  ;;  %10620 = vst [vmem:[#allocation2 + $0x3b8] sm:$0x3f] %v10500_v33  ;;  %v11311_v39 = vld [vmem:[#allocation2 + $0x380] ss:$2 sm:$0xff]  ;;  %v11319_v51 = vmax.f32 %v11313_v14, %v11317_v24 }
 0x52d   : > { %v11295_v36 = vrot.slane %v11293_v4, 6  ;;  %v11298_v21 = vrot.slane %v11296_v28, 7  ;;  %10618 = vst [vmem:[#allocation2 + $0x3a8] sm:$0xff] %v10498_v19  ;;  %v11315_v47 = vld [vmem:[#allocation2 + $0x381] ss:$2 sm:$0xff] }
 0x52e   : > { %v11286_v44 = vrot.slane %v11284_v13, 6  ;;  %v11289_v62 = vrot.slane %v11287_v3, 7  ;;  %v11318_v43 = vmax.f32 %v11311_v39, %v11315_v47 }
 0x52f   : > { %v11299_v45 = vor.u32 %v11298_v21, %v11295_v36 }
 0x530   : > { %v11290_v25 = vor.u32 %v11289_v62, %v11286_v44 }
 0x531   : > { %v11301_v48 = vrot.slane %v11299_v45, 4 }
 0x532   : > { %v11291_v32 = vrot.slane %v11290_v25, 4  ;;  %v11306_v59 = vsel %vm17693_vm14, %v11290_v25, %v11305_v7 }
 0x533   : > { %11309 = vst [vmem:[%s17514_s15 + $0x68] sm:$0x1] %v11301_v48  ;;  %11307 = vst [vmem:[%s17514_s15 + $0x60] sm:$0xe] %v11306_v59 }
 0x534   : > { %v11300_v10 = vsel %vm18068_vm6, %v11291_v32, %v11299_v45  ;;  %v11323_v18 = vld [vmem:[#allocation2 + $0x3b0] ss:$2 sm:$0x7f]  ;;  %v11327_v57 = vld [vmem:[#allocation2 + $0x3b1] ss:$2 sm:$0x7f] }
 0x535   : > { %11308 = vst [vmem:[%s17514_s15 + $0x64] sm:$0xf] %v11300_v10  ;;  %v11329_v0 = vmax.f32 %v11323_v18, %v11327_v57  ;;  %v11321_v2 = vld [vmem:[#allocation2 + $0x3a0] ss:$2 sm:$0xff]  ;;  %v11325_v22 = vld [vmem:[#allocation2 + $0x3a1] ss:$2 sm:$0xff] }
 0x536   : > { %v11328_v50 = vmax.f32 %v11321_v2, %v11325_v22 }
 0x537   : > { %v11331_v27 = vmax.f32 %v11319_v51, %v11329_v0 }
 0x538   : > { %v11330_v30 = vmax.f32 %v11318_v43, %v11328_v50 }
 0x539   : > { %v12210_v1 = vpack.c.bf16 %v11331_v27, %v11331_v27 }
 0x53a   : > { %v12209_v15 = vpack.c.bf16 %v11330_v30, %v11330_v30 }
 0x53b   : > { %v11340_v35 = vrot.slane %v12210_v1, 7 }
 0x53c   : > { %v11338_v60 = vrot.slane %v12209_v15, 7 }
 0x53d   : > { %v11342_v6 = vrot.slane %v11340_v35, 4 }
 0x53e   : > { %v11339_v52 = vrot.slane %v11338_v60, 4  ;;  %11346 = vst [vmem:[%s17514_s15 + $0x68] sm:$0xe] %v11338_v60 }
 0x53f   : > { %v11349_v34 = vsel %vm18069_vm7, %v11342_v6, %v11348_v37 }
 0x540   : > { %11350 = vst [vmem:[%s17514_s15 + $0x70] sm:$0x1] %v11349_v34  ;;  %v11341_v49 = vsel %vm18070_vm10, %v11339_v52, %v11340_v35 }
 0x541   : > { %11347 = vst [vmem:[%s17514_s15 + $0x6c] sm:$0xf] %v11341_v49 }
 0x542 PF: > { %s13_s12 = sadd.s32 1, %s15239_s12  }
 0x543   : > { %p10_p4 = scmp.ge.s32.totalorder %s13_s12, 4  }
 0x545   :  { %12 = sbr.rel (!%p10_p4) target bundleno = 1 (0x1), region = 181 }

</bundles_post_ra>
